<compile_context>
chip_gen: v5e
topology: v5e:2x2
jax: 0.10.0
libtpu: 0.0.40
codegen_flags: <defaults>
</compile_context>

<pallas_src>
import jax
import jax.numpy as jnp
from jax.experimental import pallas as pl
from jax.experimental.pallas import tpu as pltpu

INPUT_DIM = 640
HIDDEN = 1024
OUTPUT_DIM = 640
MAX_TILE_B = 512        # rows per batch tile for the large-B path
SINGLE_TILE_MAX_B = 64  # <= this: single-tile latency path with manual w2/w3 DMA overlap


def _round_up(x, m):
    return ((x + m - 1) // m) * m


# ----------------------------------------------------------------------------------
# Multi-tile kernel: weights/biases stay VMEM-resident via constant index_maps.
# ----------------------------------------------------------------------------------
def _mlp_tiled_kernel(x_ref, w1_ref, b1_ref, w2_ref, b2_ref, w3_ref, b3_ref, o_ref):
    x = x_ref[...].astype(jnp.bfloat16)
    # Layers 1/2: bias-add + tanh in bf16 (bf16 EUP on v6e/v7x; result feeds the next
    # MXU matmul directly, so no extra astype pass). Matmuls accumulate in f32.
    h = jnp.tanh(
        (jnp.dot(x, w1_ref[...], preferred_element_type=jnp.float32) + b1_ref[...]
         ).astype(jnp.bfloat16))
    h = jnp.tanh(
        (jnp.dot(h, w2_ref[...], preferred_element_type=jnp.float32) + b2_ref[...]
         ).astype(jnp.bfloat16))
    # Final layer: keep the output tanh in f32.
    out = jnp.tanh(
        jnp.dot(h, w3_ref[...], preferred_element_type=jnp.float32) + b3_ref[...])
    o_ref[...] = out.astype(o_ref.dtype)


# ----------------------------------------------------------------------------------
# Single-tile kernel: w2/w3 are raw HBM refs; their DMA overlaps layer-1 compute.
# ----------------------------------------------------------------------------------
def _mlp_single_tile_kernel(x_ref, w1_ref, b1_ref, w2_hbm, b2_ref, w3_hbm, b3_ref,
                            o_ref, w2_buf, w3_buf, sem):
    # Kick off w2/w3 HBM->VMEM copies; they run while layer 1 computes.
    w2_cp = pltpu.make_async_copy(w2_hbm, w2_buf, sem.at[0])
    w3_cp = pltpu.make_async_copy(w3_hbm, w3_buf, sem.at[1])
    w2_cp.start()
    w3_cp.start()

    x = x_ref[...].astype(jnp.bfloat16)
    h = jnp.tanh(
        (jnp.dot(x, w1_ref[...], preferred_element_type=jnp.float32) + b1_ref[...]
         ).astype(jnp.bfloat16))

    w2_cp.wait()
    h = jnp.tanh(
        (jnp.dot(h, w2_buf[...], preferred_element_type=jnp.float32) + b2_ref[...]
         ).astype(jnp.bfloat16))

    w3_cp.wait()
    out = jnp.tanh(
        jnp.dot(h, w3_buf[...], preferred_element_type=jnp.float32) + b3_ref[...])
    o_ref[...] = out.astype(o_ref.dtype)


@jax.jit
def mlp_manager_forward(x, w1, b1, w2, b2, w3, b3):
    """Fused 640->1024->1024->640 MLP with tanh after each Linear.

    Weights are expected already cast to bf16 (done once at init, never per call);
    biases, activations, and the output stay f32.
    """
    B = x.shape[0]

    if B <= SINGLE_TILE_MAX_B:
        # ---- single-tile latency path: overlap w2/w3 weight DMA with layer-1 compute.
        return pl.pallas_call(
            _mlp_single_tile_kernel,
            out_shape=jax.ShapeDtypeStruct((B, OUTPUT_DIM), x.dtype),
            grid=(1,),
            in_specs=[
                pl.BlockSpec((B, INPUT_DIM), lambda i: (0, 0)),
                pl.BlockSpec((INPUT_DIM, HIDDEN), lambda i: (0, 0)),
                pl.BlockSpec((1, HIDDEN), lambda i: (0, 0)),
                pl.BlockSpec(memory_space=pl.ANY),            # w2: manual DMA
                pl.BlockSpec((1, HIDDEN), lambda i: (0, 0)),
                pl.BlockSpec(memory_space=pl.ANY),            # w3: manual DMA
                pl.BlockSpec((1, OUTPUT_DIM), lambda i: (0, 0)),
            ],
            out_specs=pl.BlockSpec((B, OUTPUT_DIM), lambda i: (0, 0)),
            scratch_shapes=[
                pltpu.VMEM((HIDDEN, HIDDEN), w2.dtype),       # w2 staging buffer
                pltpu.VMEM((HIDDEN, OUTPUT_DIM), w3.dtype),   # w3 staging buffer
                pltpu.SemaphoreType.DMA((2,)),
            ],
            compiler_params=pltpu.CompilerParams(
                dimension_semantics=("arbitrary",),
                vmem_limit_bytes=48 << 20,
            ),
        )(x, w1, b1, w2, b2, w3, b3)

    # ---- multi-tile path: guarantee >= 2 tiles so the batch axis can shard across
    # v7x's 2 TensorCores; last block may be partial (OOB output rows are masked and
    # each output row depends only on its own input row, so no pad/slice is needed).
    tb = min(MAX_TILE_B, _round_up(pl.cdiv(B, 2), 8))
    nb = pl.cdiv(B, tb)

    # Weights/biases: constant index_map -> blocks stay VMEM-resident across batch tiles.
    # TODO(synk): try pipeline_mode=pl.Buffered(1) on these constant specs to drop their
    # unused second VMEM buffer (not needed at the current ~20 MiB VMEM footprint).
    const = lambda shape: pl.BlockSpec(shape, lambda i: (0, 0))

    return pl.pallas_call(
        _mlp_tiled_kernel,
        out_shape=jax.ShapeDtypeStruct((B, OUTPUT_DIM), x.dtype),
        grid=(nb,),
        in_specs=[
            pl.BlockSpec((tb, INPUT_DIM), lambda i: (i, 0)),
            const((INPUT_DIM, HIDDEN)),
            const((1, HIDDEN)),
            const((HIDDEN, HIDDEN)),
            const((1, HIDDEN)),
            const((HIDDEN, OUTPUT_DIM)),
            const((1, OUTPUT_DIM)),
        ],
        out_specs=pl.BlockSpec((tb, OUTPUT_DIM), lambda i: (i, 0)),
        compiler_params=pltpu.CompilerParams(
            dimension_semantics=("parallel",),  # shard batch tiles across TCs (v7x)
            vmem_limit_bytes=48 << 20,          # < 64 MiB physical VMEM on v7x
        ),
    )(x, w1, b1, w2, b2, w3, b3)


def init_linear(key, fan_in, fan_out, dtype=jnp.float32):
    """PyTorch nn.Linear default init: U(-1/sqrt(fan_in), 1/sqrt(fan_in)).

    Weight is returned in (in, out) layout (transposed vs torch's (out, in))."""
    kw, kb = jax.random.split(key)
    bound = 1.0 / float(fan_in) ** 0.5
    w = jax.random.uniform(kw, (fan_in, fan_out), dtype, minval=-bound, maxval=bound)
    b = jax.random.uniform(kb, (1, fan_out), dtype, minval=-bound, maxval=bound)
    return w, b


def reference_forward(x, w1, b1, w2, b2, w3, b3):
    h = jnp.tanh(x @ w1 + b1)
    h = jnp.tanh(h @ w2 + b2)
    return jnp.tanh(h @ w3 + b3)


if __name__ == "__main__":
    key = jax.random.PRNGKey(0)
    kx, k1, k2, k3 = jax.random.split(key, 4)

    w1, b1 = init_linear(k1, INPUT_DIM, HIDDEN)
    w2, b2 = init_linear(k2, HIDDEN, HIDDEN)
    w3, b3 = init_linear(k3, HIDDEN, OUTPUT_DIM)

    # Persistent bf16 weight storage: cast ONCE here, OUTSIDE the jitted forward, so
    # every call reads ~4.5 MiB of bf16 weights instead of re-converting 9 MiB of f32.
    w1b = w1.astype(jnp.bfloat16)
    w2b = w2.astype(jnp.bfloat16)
    w3b = w3.astype(jnp.bfloat16)
    # TODO(synk): optional further weight compression for the latency path
    # (fp8-e4m3 on v7x, int8 on v5e/v6e, with per-output-channel scales).

    for B in (8, 100):  # exercises the single-tile latency path and the 2-tile path
        x = jax.random.normal(kx, (B, INPUT_DIM), jnp.float32)
        out = jax.block_until_ready(
            mlp_manager_forward(x, w1b, b1, w2b, b2, w3b, b3))
        ref = reference_forward(x, w1, b1, w2, b2, w3, b3)  # pure-f32 reference
        assert out.shape == (B, OUTPUT_DIM), out.shape
        max_err = float(jnp.max(jnp.abs(out - ref)))
        # tolerance covers bf16 MXU inputs + bf16 intermediate tanh (f32 accumulation kept)
        assert max_err < 4e-2, f"B={B}: mismatch vs reference, max abs err {max_err}"

    print("KERNEL_OK")
</pallas_src>

<mosaic_0001>
module attributes {stable_mosaic.version = 11 : i64} {
  func.func @_mlp_single_tile_kernel(%arg0: i32, %arg1: memref<8x640xf32, #tpu.memory_space<vmem>>, %arg2: memref<640x1024xbf16, #tpu.memory_space<vmem>>, %arg3: memref<1x1024xf32, #tpu.memory_space<vmem>>, %arg4: memref<1024x1024xbf16, #tpu.memory_space<any>>, %arg5: memref<1x1024xf32, #tpu.memory_space<vmem>>, %arg6: memref<1024x640xbf16, #tpu.memory_space<any>>, %arg7: memref<1x640xf32, #tpu.memory_space<vmem>>, %arg8: memref<8x640xf32, #tpu.memory_space<vmem>>, %arg9: memref<1024x1024xbf16, #tpu.memory_space<vmem>>, %arg10: memref<1024x640xbf16, #tpu.memory_space<vmem>>, %arg11: memref<2x!tpu.dma_semaphore, #tpu.memory_space<semaphore_mem>>) attributes {dimension_semantics = [#tpu.dimension_semantics<arbitrary>], iteration_bounds = array<i64: 1>, scalar_prefetch = 0 : i64, scratch_operands = 3 : i64, tpu.core_type = #tpu.core_type<tc>, window_params = [{pipeline_mode = #tpu.pipeline_mode<synchronous>, transform_indices = @transform_0, window_bounds = array<i64: 8, 640>}, {pipeline_mode = #tpu.pipeline_mode<synchronous>, transform_indices = @transform_1, window_bounds = array<i64: 640, 1024>}, {pipeline_mode = #tpu.pipeline_mode<synchronous>, transform_indices = @transform_2, window_bounds = array<i64: 1, 1024>}, {}, {pipeline_mode = #tpu.pipeline_mode<synchronous>, transform_indices = @transform_4, window_bounds = array<i64: 1, 1024>}, {}, {pipeline_mode = #tpu.pipeline_mode<synchronous>, transform_indices = @transform_6, window_bounds = array<i64: 1, 640>}, {pipeline_mode = #tpu.pipeline_mode<synchronous>, transform_indices = @transform_7, window_bounds = array<i64: 8, 640>}]} {
    %c0_i32 = arith.constant 0 : i32
    %0 = tpu.memref_slice %arg11[%c0_i32] : memref<2x!tpu.dma_semaphore, #tpu.memory_space<semaphore_mem>> -> memref<1x!tpu.dma_semaphore, #tpu.memory_space<semaphore_mem>>
    %1 = tpu.memref_squeeze %0 : memref<1x!tpu.dma_semaphore, #tpu.memory_space<semaphore_mem>> -> memref<!tpu.dma_semaphore, #tpu.memory_space<semaphore_mem>>
    tpu.enqueue_dma source(%arg4 : memref<1024x1024xbf16, #tpu.memory_space<any>>) target(%arg9 : memref<1024x1024xbf16, #tpu.memory_space<vmem>>) target_semaphore(%1 : memref<!tpu.dma_semaphore, #tpu.memory_space<semaphore_mem>>)
    %c1_i32 = arith.constant 1 : i32
    %2 = tpu.memref_slice %arg11[%c1_i32] : memref<2x!tpu.dma_semaphore, #tpu.memory_space<semaphore_mem>> -> memref<1x!tpu.dma_semaphore, #tpu.memory_space<semaphore_mem>>
    %3 = tpu.memref_squeeze %2 : memref<1x!tpu.dma_semaphore, #tpu.memory_space<semaphore_mem>> -> memref<!tpu.dma_semaphore, #tpu.memory_space<semaphore_mem>>
    tpu.enqueue_dma source(%arg6 : memref<1024x640xbf16, #tpu.memory_space<any>>) target(%arg10 : memref<1024x640xbf16, #tpu.memory_space<vmem>>) target_semaphore(%3 : memref<!tpu.dma_semaphore, #tpu.memory_space<semaphore_mem>>)
    %c0 = arith.constant 0 : index
    %c0_0 = arith.constant 0 : index
    %4 = vector.load %arg1[%c0, %c0_0] : memref<8x640xf32, #tpu.memory_space<vmem>>, vector<8x640xf32>
    %5 = arith.truncf %4 : vector<8x640xf32> to vector<8x640xbf16>
    %c0_1 = arith.constant 0 : index
    %c0_2 = arith.constant 0 : index
    %6 = vector.load %arg2[%c0_1, %c0_2] : memref<640x1024xbf16, #tpu.memory_space<vmem>>, vector<640x1024xbf16>
    %cst = arith.constant dense<0.000000e+00> : vector<8x1024xf32>
    %7 = tpu.matmul %5, %6, %cst {dimension_numbers = #tpu.dot_dimension_numbers<[1], [0], [0], [1], [0, 0, 1, 1], [], []>} : vector<8x640xbf16>, vector<640x1024xbf16>, vector<8x1024xf32> -> vector<8x1024xf32>
    %c0_3 = arith.constant 0 : index
    %c0_4 = arith.constant 0 : index
    %8 = vector.load %arg3[%c0_3, %c0_4] : memref<1x1024xf32, #tpu.memory_space<vmem>>, vector<1x1024xf32>
    %9 = vector.broadcast %8 : vector<1x1024xf32> to vector<8x1024xf32>
    %10 = arith.addf %7, %9 : vector<8x1024xf32>
    %11 = arith.truncf %10 : vector<8x1024xf32> to vector<8x1024xbf16>
    %12 = math.tanh %11 : vector<8x1024xbf16>
    %c0_i32_5 = arith.constant 0 : i32
    %13 = tpu.memref_slice %arg11[%c0_i32_5] : memref<2x!tpu.dma_semaphore, #tpu.memory_space<semaphore_mem>> -> memref<1x!tpu.dma_semaphore, #tpu.memory_space<semaphore_mem>>
    %14 = tpu.memref_squeeze %13 : memref<1x!tpu.dma_semaphore, #tpu.memory_space<semaphore_mem>> -> memref<!tpu.dma_semaphore, #tpu.memory_space<semaphore_mem>>
    tpu.wait_dma2 semaphore(%14 : memref<!tpu.dma_semaphore, #tpu.memory_space<semaphore_mem>>) src(%arg4 : memref<1024x1024xbf16, #tpu.memory_space<any>>) dst(%arg9 : memref<1024x1024xbf16, #tpu.memory_space<vmem>>)
    %c0_6 = arith.constant 0 : index
    %c0_7 = arith.constant 0 : index
    %15 = vector.load %arg9[%c0_6, %c0_7] : memref<1024x1024xbf16, #tpu.memory_space<vmem>>, vector<1024x1024xbf16>
    %cst_8 = arith.constant dense<0.000000e+00> : vector<8x1024xf32>
    %16 = tpu.matmul %12, %15, %cst_8 {dimension_numbers = #tpu.dot_dimension_numbers<[1], [0], [0], [1], [0, 0, 1, 1], [], []>} : vector<8x1024xbf16>, vector<1024x1024xbf16>, vector<8x1024xf32> -> vector<8x1024xf32>
    %c0_9 = arith.constant 0 : index
    %c0_10 = arith.constant 0 : index
    %17 = vector.load %arg5[%c0_9, %c0_10] : memref<1x1024xf32, #tpu.memory_space<vmem>>, vector<1x1024xf32>
    %18 = vector.broadcast %17 : vector<1x1024xf32> to vector<8x1024xf32>
    %19 = arith.addf %16, %18 : vector<8x1024xf32>
    %20 = arith.truncf %19 : vector<8x1024xf32> to vector<8x1024xbf16>
    %21 = math.tanh %20 : vector<8x1024xbf16>
    %c1_i32_11 = arith.constant 1 : i32
    %22 = tpu.memref_slice %arg11[%c1_i32_11] : memref<2x!tpu.dma_semaphore, #tpu.memory_space<semaphore_mem>> -> memref<1x!tpu.dma_semaphore, #tpu.memory_space<semaphore_mem>>
    %23 = tpu.memref_squeeze %22 : memref<1x!tpu.dma_semaphore, #tpu.memory_space<semaphore_mem>> -> memref<!tpu.dma_semaphore, #tpu.memory_space<semaphore_mem>>
    tpu.wait_dma2 semaphore(%23 : memref<!tpu.dma_semaphore, #tpu.memory_space<semaphore_mem>>) src(%arg6 : memref<1024x640xbf16, #tpu.memory_space<any>>) dst(%arg10 : memref<1024x640xbf16, #tpu.memory_space<vmem>>)
    %c0_12 = arith.constant 0 : index
    %c0_13 = arith.constant 0 : index
    %24 = vector.load %arg10[%c0_12, %c0_13] : memref<1024x640xbf16, #tpu.memory_space<vmem>>, vector<1024x640xbf16>
    %cst_14 = arith.constant dense<0.000000e+00> : vector<8x640xf32>
    %25 = tpu.matmul %21, %24, %cst_14 {dimension_numbers = #tpu.dot_dimension_numbers<[1], [0], [0], [1], [0, 0, 1, 1], [], []>} : vector<8x1024xbf16>, vector<1024x640xbf16>, vector<8x640xf32> -> vector<8x640xf32>
    %c0_15 = arith.constant 0 : index
    %c0_16 = arith.constant 0 : index
    %26 = vector.load %arg7[%c0_15, %c0_16] : memref<1x640xf32, #tpu.memory_space<vmem>>, vector<1x640xf32>
    %27 = vector.broadcast %26 : vector<1x640xf32> to vector<8x640xf32>
    %28 = arith.addf %25, %27 : vector<8x640xf32>
    %29 = math.tanh %28 : vector<8x640xf32>
    %c0_17 = arith.constant 0 : index
    %c0_18 = arith.constant 0 : index
    %30 = vector.load %arg8[%c0_17, %c0_18] : memref<8x640xf32, #tpu.memory_space<vmem>>, vector<8x640xf32>
    tpu.vector_store %arg8[%c0_17, %c0_18], %29 {strides = array<i32>} : memref<8x640xf32, #tpu.memory_space<vmem>>, vector<8x640xf32>,
    return
  }
  func.func @transform_0(%arg0: i32) -> (i32, i32) {
    %c0_i32 = arith.constant 0 : i32
    %c0_i32_0 = arith.constant 0 : i32
    %c0_i32_1 = arith.constant 0 : i32
    return %c0_i32, %c0_i32_0 : i32, i32
  }
  func.func @transform_1(%arg0: i32) -> (i32, i32) {
    %c0_i32 = arith.constant 0 : i32
    %c0_i32_0 = arith.constant 0 : i32
    %c0_i32_1 = arith.constant 0 : i32
    return %c0_i32, %c0_i32_0 : i32, i32
  }
  func.func @transform_2(%arg0: i32) -> (i32, i32) {
    %c0_i32 = arith.constant 0 : i32
    %c0_i32_0 = arith.constant 0 : i32
    %c0_i32_1 = arith.constant 0 : i32
    return %c0_i32, %c0_i32_0 : i32, i32
  }
  func.func @transform_4(%arg0: i32) -> (i32, i32) {
    %c0_i32 = arith.constant 0 : i32
    %c0_i32_0 = arith.constant 0 : i32
    %c0_i32_1 = arith.constant 0 : i32
    return %c0_i32, %c0_i32_0 : i32, i32
  }
  func.func @transform_6(%arg0: i32) -> (i32, i32) {
    %c0_i32 = arith.constant 0 : i32
    %c0_i32_0 = arith.constant 0 : i32
    %c0_i32_1 = arith.constant 0 : i32
    return %c0_i32, %c0_i32_0 : i32, i32
  }
  func.func @transform_7(%arg0: i32) -> (i32, i32) {
    %c0_i32 = arith.constant 0 : i32
    %c0_i32_0 = arith.constant 0 : i32
    %c0_i32_1 = arith.constant 0 : i32
    return %c0_i32, %c0_i32_0 : i32, i32
  }
}

</mosaic_0001>

<bundles_post_ra>
// kernel: mlp_manager_forward.1
= control target key start
LH: loop header
LB: loop body
LE: loop exit
PB: predicated region body
PF: predicated region fallthrough
CT: control target
= control target key end

     0   :  { %12 = vsyncpa [#allocation6], 0  ;;  %s15577_s0 = inlined_call_operand.hbm [shape: f32[8,640], index: 0, kind: input, shape index: {}]   ;;  %s15578_s1 = inlined_call_operand.hbm [shape: bf16[640,1024], index: 1, kind: input, shape index: {}]   ;;  %s15579_s2 = inlined_call_operand.hbm [shape: f32[1,1024], index: 2, kind: input, shape index: {}]   ;;  %s15580_s3 = inlined_call_operand.hbm [shape: bf16[1024,1024], index: 3, kind: input, shape index: {}]   ;;  %s15581_s4 = inlined_call_operand.hbm [shape: f32[1,1024], index: 4, kind: input, shape index: {}]   ;;  %s15582_s5 = inlined_call_operand.hbm [shape: bf16[1024,640], index: 5, kind: input, shape index: {}]   ;;  %s15583_s6 = inlined_call_operand.hbm [shape: f32[1,640], index: 6, kind: input, shape index: {}]   ;;  %s15584_s7 = inlined_call_operand.hbm [shape: f32[8,640], index: 7, kind: output, shape index: {}]  }
   0x1   :  { %13 = vsyncpa [#allocation9], 0 }
   0x2   :  { %14 = vsyncpa [#allocation12], 0  ;;  %s31_s26 = sshll.u32 %s15578_s1, 4  ;;  %s32_s26 = int_to_ptr.hbm [resolvable:$true] %s31_s26 }
   0x3   :  { %15 = vsyncpa [#allocation7], 0  ;;  %s15225_s27 = smov [#allocation8]   ;;  %s56_s8 = sshll.u32 %s15581_s4, 4  ;;  %s57_s8 = int_to_ptr.hbm [resolvable:$true] %s56_s8 }
   0x4   :  { %s33_s28 = sshll.u32 %s15225_s27, 4  ;;  %s15226_s9 = smov 512   ;;  %s34_s28 = int_to_ptr.vmem [resolvable:$true] %s33_s28 }
   0x5   :  { %s15227_s10 = smov 32   ;;  %s15228_s11 = smov [#allocation11]  }
   0x6   :  { %39 = dma.hbm_to_vmem [thread:$0]  %s32_s26, 40960, %s34_s28, [#allocation9], %s15226_s9, %s15226_s9, %s15227_s10  }
   0x7   :  { %s58_s12 = sshll.u32 %s15228_s11, 4  ;;  %s21_s15 = sshll.u32 %s15577_s0, 4  ;;  %s59_s12 = int_to_ptr.vmem [resolvable:$true] %s58_s12  ;;  %s22_s15 = int_to_ptr.hbm [resolvable:$true] %s21_s15 }
   0x8   :  { %61 = dma.hbm_to_vmem [thread:$0]  %s57_s8, 128, %s59_s12, [#allocation12]  }
   0x9   :  { %s45_s17 = sshll.u32 %s15579_s2, 4  ;;  %s15229_s18 = smov [#allocation5]   ;;  %s46_s17 = int_to_ptr.hbm [resolvable:$true] %s45_s17 }
   0xa   :  { %s23_s19 = sshll.u32 %s15229_s18, 4  ;;  %s15230_s4 = smov [#allocation10]   ;;  %s24_s19 = int_to_ptr.vmem [resolvable:$true] %s23_s19 }
   0xb   :  { %26 = dma.hbm_to_vmem [thread:$0]  %s22_s15, 640, %s24_s19, [#allocation6]  }
   0xc   :  { %s47_s20 = sshll.u32 %s15230_s4, 4  ;;  %s67_s23 = sshll.u32 %s15583_s6, 4  ;;  %s48_s20 = int_to_ptr.vmem [resolvable:$true] %s47_s20  ;;  %s68_s23 = int_to_ptr.hbm [resolvable:$true] %s67_s23 }
   0xd   :  { %50 = dma.hbm_to_vmem [thread:$0]  %s46_s17, 128, %s48_s20, [#allocation9]  }
   0xe   :  { %s15231_s0 = smov [#allocation13]  }
   0xf   :  { %s69_s24 = sshll.u32 %s15231_s0, 4  ;;  %s70_s24 = int_to_ptr.vmem [resolvable:$true] %s69_s24 }
  0x10   :  { %72 = dma.hbm_to_vmem [thread:$0]  %s68_s23, 80, %s70_s24, [#allocation12]  }
  0x11   :  { %15213 = dma.done.wait [#allocation6], 640  }
  0x12   :  { %15214 = vsyncadd [#allocation6], 4294966656 }
  0x13   :  { %15215 = dma.done.wait [#allocation9], 41088  }
  0x14   :  { %15216 = vsyncadd [#allocation9], 4294926208 }
  0x15   :  { %15217 = dma.done.wait [#allocation12], 208  }
  0x16   :  { %15218 = vsyncadd [#allocation12], 4294967088  ;;  %v9429_v0 = vld [vmem:[#allocation8 + $0x1c0] sm:$0xf]  ;;  %s100_s25 = sshll.u32 %s15580_s3, 4  ;;  %s15232_s26 = smov [#allocation2]   ;;  %s101_s25 = int_to_ptr.hbm [resolvable:$true] %s100_s25 }
  0x17   :  { %v13873_v1 = vld [vmem:[#allocation8 + $0x1dc] sm:$0xf0]  ;;  %s102_s27 = sshll.u32 %s15232_s26, 4  ;;  %s114_s30 = sshll.u32 %s15582_s5, 4  ;;  %s103_s27 = int_to_ptr.vmem [resolvable:$true] %s102_s27  ;;  %s115_s30 = int_to_ptr.hbm [resolvable:$true] %s114_s30 }
  0x18   :  { %v9685_v2 = vld [vmem:[#allocation8 + $0x3c0] sm:$0xf]  ;;  %v9430_v3 = vor.u32 %v13873_v1, %v9429_v0  ;;  %105 = dma.hbm_to_vmem [thread:$0]  %s101_s25, 65536, %s103_s27, [#allocation4] }
  0x19   :  { %v13937_v4 = vld [vmem:[#allocation8 + $0x3dc] sm:$0xf0]  ;;  %s15233_s8 = smov [#allocation3]  }
  0x1a   :  { %v9941_v5 = vld [vmem:[#allocation8 + $0x5c0] sm:$0xf]  ;;  %v9686_v7 = vor.u32 %v13937_v4, %v9685_v2  ;;  %2068 = vmatpush.bf16.msra.mxu0 %v9430_v3  ;;  %s116_s9 = sshll.u32 %s15233_s8, 4  ;;  %s117_s9 = int_to_ptr.vmem [resolvable:$true] %s116_s9 }
  0x1b   :  { %v14001_v6 = vld [vmem:[#allocation8 + $0x5dc] sm:$0xf0]  ;;  %119 = dma.hbm_to_vmem [thread:$0]  %s115_s30, 40960, %s117_s9, [#allocation4 + $0x1] }
  0x1c   :  { %v9942_v8 = vor.u32 %v14001_v6, %v9941_v5  ;;  %v10197_v9 = vld [vmem:[#allocation8 + $0x7c0] sm:$0xf]  ;;  %2081 = vmatpush.bf16.msra.mxu1 %v9686_v7 }
  0x1d   :  { %v14065_v10 = vld [vmem:[#allocation8 + $0x7dc] sm:$0xf0] }
  0x1e   :  { %v9397_v11 = vld [vmem:[#allocation8 + $0x180] sm:$0xf]  ;;  %v10198_v12 = vor.u32 %v14065_v10, %v10197_v9  ;;  %2094 = vmatpush.bf16.msra.mxu2 %v9942_v8 }
  0x1f   :  { %v13865_v13 = vld [vmem:[#allocation8 + $0x19c] sm:$0xf0] }
  0x20   :  { %v9653_v14 = vld [vmem:[#allocation8 + $0x380] sm:$0xf]  ;;  %v9398_v16 = vor.u32 %v13865_v13, %v9397_v11  ;;  %2107 = vmatpush.bf16.msra.mxu3 %v10198_v12 }
  0x21   :  { %v13929_v15 = vld [vmem:[#allocation8 + $0x39c] sm:$0xf0] }
  0x22   :  { %v9654_v17 = vor.u32 %v13929_v15, %v9653_v14  ;;  %v9909_v18 = vld [vmem:[#allocation8 + $0x580] sm:$0xf]  ;;  %2069 = vmatpush.bf16.msra.mxu0 %v9398_v16 }
  0x23   :  { %v13993_v19 = vld [vmem:[#allocation8 + $0x59c] sm:$0xf0] }
  0x24   :  { %v10165_v20 = vld [vmem:[#allocation8 + $0x780] sm:$0xf]  ;;  %v9910_v21 = vor.u32 %v13993_v19, %v9909_v18  ;;  %2082 = vmatpush.bf16.msra.mxu1 %v9654_v17 }
  0x25   :  { %v14057_v22 = vld [vmem:[#allocation8 + $0x79c] sm:$0xf0] }
  0x26   :  { %v9365_v23 = vld [vmem:[#allocation8 + $0x140] sm:$0xf]  ;;  %v10166_v25 = vor.u32 %v14057_v22, %v10165_v20  ;;  %2095 = vmatpush.bf16.msra.mxu2 %v9910_v21 }
  0x27   :  { %v13857_v24 = vld [vmem:[#allocation8 + $0x15c] sm:$0xf0] }
  0x28   :  { %v9621_v26 = vld [vmem:[#allocation8 + $0x340] sm:$0xf]  ;;  %v9366_v29 = vor.u32 %v13857_v24, %v9365_v23  ;;  %2108 = vmatpush.bf16.msra.mxu3 %v10166_v25 }
  0x29   :  { %v13921_v27 = vld [vmem:[#allocation8 + $0x35c] sm:$0xf0] }
  0x2a   :  { %v9877_v28 = vld [vmem:[#allocation8 + $0x540] sm:$0xf]  ;;  %v9622_v33 = vor.u32 %v13921_v27, %v9621_v26  ;;  %2070 = vmatpush.bf16.msra.mxu0 %v9366_v29 }
  0x2b   :  { %v13985_v30 = vld [vmem:[#allocation8 + $0x55c] sm:$0xf0] }
  0x2c   :  { %v10133_v31 = vld [vmem:[#allocation8 + $0x740] sm:$0xf]  ;;  %v9878_v34 = vor.u32 %v13985_v30, %v9877_v28  ;;  %2083 = vmatpush.bf16.msra.mxu1 %v9622_v33  ;;  %v13869_v30 = vld [vmem:[#allocation8 + $0x1c4] sm:$0xf] }
  0x2d   :  { %v14049_v32 = vld [vmem:[#allocation8 + $0x75c] sm:$0xf0]  ;;  %v13933_v33 = vld [vmem:[#allocation8 + $0x3c4] sm:$0xf] }
  0x2e   :  { %v9333_v35 = vld [vmem:[#allocation8 + $0x100] sm:$0xf]  ;;  %v10134_v38 = vor.u32 %v14049_v32, %v10133_v31  ;;  %2096 = vmatpush.bf16.msra.mxu2 %v9878_v34  ;;  %v9431_v32 = vld [vmem:[#allocation8 + $0x1e0] sm:$0xf0] }
  0x2f   :  { %v13849_v36 = vld [vmem:[#allocation8 + $0x11c] sm:$0xf0]  ;;  %v9687_v34 = vld [vmem:[#allocation8 + $0x3e0] sm:$0xf0] }
  0x30   :  { %v9589_v37 = vld [vmem:[#allocation8 + $0x300] sm:$0xf]  ;;  %v9334_v44 = vor.u32 %v13849_v36, %v9333_v35  ;;  %2109 = vmatpush.bf16.msra.mxu3 %v10134_v38  ;;  %v9943_v38 = vld [vmem:[#allocation8 + $0x5e0] sm:$0xf0] }
  0x31   :  { %v13913_v39 = vld [vmem:[#allocation8 + $0x31c] sm:$0xf0] }
  0x32   :  { %v9845_v40 = vld [vmem:[#allocation8 + $0x500] sm:$0xf]  ;;  %v9590_v45 = vor.u32 %v13913_v39, %v9589_v37  ;;  %2071 = vmatpush.bf16.msra.mxu0 %v9334_v44  ;;  %v13997_v37 = vld [vmem:[#allocation8 + $0x5c4] sm:$0xf] }
  0x33   :  { %v13977_v41 = vld [vmem:[#allocation8 + $0x51c] sm:$0xf0] }
  0x34   :  { %v10101_v42 = vld [vmem:[#allocation8 + $0x700] sm:$0xf]  ;;  %v9846_v46 = vor.u32 %v13977_v41, %v9845_v40  ;;  %2084 = vmatpush.bf16.msra.mxu1 %v9590_v45  ;;  %v9434_v41 = vor.u32 %v13869_v30, %v9431_v32  ;;  %v13861_v45 = vld [vmem:[#allocation8 + $0x184] sm:$0xf] }
  0x35   :  { %v14041_v43 = vld [vmem:[#allocation8 + $0x71c] sm:$0xf0]  ;;  %v13965_v30 = vld [vmem:[#allocation8 + $0x4c4] sm:$0xf] }
  0x36   :  { %v9301_v47 = vld [vmem:[#allocation8 + $0xc0] sm:$0xf]  ;;  %v10102_v50 = vor.u32 %v14041_v43, %v10101_v42  ;;  %2097 = vmatpush.bf16.msra.mxu2 %v9846_v46  ;;  %v9690_v42 = vor.u32 %v13933_v33, %v9687_v34  ;;  %v9946_v46 = vor.u32 %v13997_v37, %v9943_v38  ;;  %v13829_v37 = vld [vmem:[#allocation8 + $0x84] sm:$0xf] }
  0x37   :  { %v13841_v48 = vld [vmem:[#allocation8 + $0xdc] sm:$0xf0] }
  0x38   :  { %v9557_v49 = vld [vmem:[#allocation8 + $0x2c0] sm:$0xf]  ;;  %v9302_v56 = vor.u32 %v13841_v48, %v9301_v47  ;;  %2110 = vmatpush.bf16.msra.mxu3 %v10102_v50  ;;  %v9399_v47 = vld [vmem:[#allocation8 + $0x1a0] sm:$0xf0] }
  0x39   :  { %v13905_v51 = vld [vmem:[#allocation8 + $0x2dc] sm:$0xf0]  ;;  %v13925_v48 = vld [vmem:[#allocation8 + $0x384] sm:$0xf] }
  0x3a   :  { %v9813_v52 = vld [vmem:[#allocation8 + $0x4c0] sm:$0xf]  ;;  %v9558_v57 = vor.u32 %v13905_v51, %v9557_v49  ;;  %2072 = vmatpush.bf16.msra.mxu0 %v9302_v56  ;;  %v9655_v49 = vld [vmem:[#allocation8 + $0x3a0] sm:$0xf0] }
  0x3b   :  { %v13969_v53 = vld [vmem:[#allocation8 + $0x4dc] sm:$0xf0]  ;;  %v13989_v50 = vld [vmem:[#allocation8 + $0x584] sm:$0xf] }
  0x3c   :  { %v10069_v54 = vld [vmem:[#allocation8 + $0x6c0] sm:$0xf]  ;;  %v9814_v58 = vor.u32 %v13969_v53, %v9813_v52  ;;  %2085 = vmatpush.bf16.msra.mxu1 %v9558_v57  ;;  %v9911_v51 = vld [vmem:[#allocation8 + $0x5a0] sm:$0xf0] }
  0x3d   :  { %v14033_v55 = vld [vmem:[#allocation8 + $0x6dc] sm:$0xf0]  ;;  %v13853_v57 = vld [vmem:[#allocation8 + $0x144] sm:$0xf] }
  0x3e   :  { %v9269_v59 = vld [vmem:[#allocation8 + $0x80] sm:$0xf]  ;;  %v10070_v62 = vor.u32 %v14033_v55, %v10069_v54  ;;  %2098 = vmatpush.bf16.msra.mxu2 %v9814_v58  ;;  %v9402_v54 = vor.u32 %v13861_v45, %v9399_v47  ;;  %v9658_v55 = vor.u32 %v13925_v48, %v9655_v49  ;;  %v9367_v58 = vld [vmem:[#allocation8 + $0x160] sm:$0xf0] }
  0x3f   :  { %v13833_v60 = vld [vmem:[#allocation8 + $0x9c] sm:$0xf0]  ;;  %v13821_v49 = vld [vmem:[#allocation8 + $0x44] sm:$0xf] }
  0x40   :  { %v9525_v61 = vld [vmem:[#allocation8 + $0x280] sm:$0xf]  ;;  %v9270_v4 = vor.u32 %v13833_v60, %v9269_v59  ;;  %2111 = vmatpush.bf16.msra.mxu3 %v10070_v62  ;;  %v9914_v59 = vor.u32 %v13989_v50, %v9911_v51  ;;  %v13917_v60 = vld [vmem:[#allocation8 + $0x344] sm:$0xf] }
  0x41   :  { %v13897_v63 = vld [vmem:[#allocation8 + $0x29c] sm:$0xf0]  ;;  %v13981_v62 = vld [vmem:[#allocation8 + $0x544] sm:$0xf] }
  0x42   :  { %v9781_v0 = vld [vmem:[#allocation8 + $0x480] sm:$0xf]  ;;  %v9526_v5 = vor.u32 %v13897_v63, %v9525_v61  ;;  %2073 = vmatpush.bf16.msra.mxu0 %v9270_v4  ;;  %v9623_v61 = vld [vmem:[#allocation8 + $0x360] sm:$0xf0]  ;;  %v120_v4 = vld [vmem:[#allocation5] sm:$0xff] }
  0x43   :  { %v13961_v1 = vld [vmem:[#allocation8 + $0x49c] sm:$0xf0]  ;;  %v9879_v63 = vld [vmem:[#allocation8 + $0x560] sm:$0xf0] }
  0x44   :  { %v10037_v2 = vld [vmem:[#allocation8 + $0x680] sm:$0xf]  ;;  %v9782_v6 = vor.u32 %v13961_v1, %v9781_v0  ;;  %2086 = vmatpush.bf16.msra.mxu1 %v9526_v5  ;;  %v9370_v1 = vor.u32 %v13853_v57, %v9367_v58  ;;  %v9626_v5 = vor.u32 %v13917_v60, %v9623_v61  ;;  %v9239_v51 = vld [vmem:[#allocation8 + $0x60] sm:$0xf0] }
  0x45   :  { %v14025_v3 = vld [vmem:[#allocation8 + $0x69c] sm:$0xf0]  ;;  %v13813_v61 = vld [vmem:[#allocation8 + $0x4] sm:$0xf] }
  0x46   :  { %v9237_v7 = vld [vmem:[#allocation8 + $0x40] sm:$0xf]  ;;  %v10038_v10 = vor.u32 %v14025_v3, %v10037_v2  ;;  %2099 = vmatpush.bf16.msra.mxu2 %v9782_v6  ;;  %v122_v3 = vld [vmem:[#allocation5 + $0x10] sm:$0xff] }
  0x47   :  { %v13825_v8 = vld [vmem:[#allocation8 + $0x5c] sm:$0xf0] }
  0x48   :  { %v9493_v9 = vld [vmem:[#allocation8 + $0x240] sm:$0xf]  ;;  %v9238_v16 = vor.u32 %v13825_v8, %v9237_v7  ;;  %2112 = vmatpush.bf16.msra.mxu3 %v10038_v10  ;;  %v13845_v7 = vld [vmem:[#allocation8 + $0x104] sm:$0xf]  ;;  %v15290_v8 = vpack.c.bf16 %v122_v3, %v122_v3  ;;  %v123_v10 = vld [vmem:[#allocation5 + $0x18] sm:$0xff] }
  0x49   :  { %v13889_v11 = vld [vmem:[#allocation8 + $0x25c] sm:$0xf0]  ;;  %v9719_v3 = vld [vmem:[#allocation8 + $0x420] sm:$0xf0] }
  0x4a   :  { %v9749_v12 = vld [vmem:[#allocation8 + $0x440] sm:$0xf]  ;;  %v9494_v19 = vor.u32 %v13889_v11, %v9493_v9  ;;  %2074 = vmatpush.bf16.msra.mxu0 %v9238_v16  ;;  %v15292_v9 = vpack.c.bf16 %v120_v4, %v120_v4  ;;  %v9882_v11 = vor.u32 %v13981_v62, %v9879_v63  ;;  %v13973_v16 = vld [vmem:[#allocation8 + $0x504] sm:$0xf] }
  0x4b   :  { %v13953_v13 = vld [vmem:[#allocation8 + $0x45c] sm:$0xf0]  ;;  %v9207_v62 = vld [vmem:[#allocation8 + $0x20] sm:$0xf0] }
  0x4c   :  { %v10005_v14 = vld [vmem:[#allocation8 + $0x640] sm:$0xf]  ;;  %v9750_v20 = vor.u32 %v13953_v13, %v9749_v12  ;;  %2087 = vmatpush.bf16.msra.mxu1 %v9494_v19  ;;  %v9335_v12 = vld [vmem:[#allocation8 + $0x120] sm:$0xf0] }
  0x4d   :  { %v14017_v15 = vld [vmem:[#allocation8 + $0x65c] sm:$0xf0]  ;;  %v13909_v13 = vld [vmem:[#allocation8 + $0x304] sm:$0xf] }
  0x4e   :  { %v9205_v17 = vld [vmem:[#allocation8] sm:$0xf]  ;;  %v10006_v24 = vor.u32 %v14017_v15, %v10005_v14  ;;  %2100 = vmatpush.bf16.msra.mxu2 %v9750_v20  ;;  %v9591_v14 = vld [vmem:[#allocation8 + $0x320] sm:$0xf0]  ;;  %v15294_v15 = vpack.c.bf16 %v123_v10, %v123_v10  ;;  %v9338_v20 = vor.u32 %v13845_v7, %v9335_v12  ;;  %v13874_v12 = vld [vmem:[#allocation8 + $0x1e4] sm:$0xf0] }
  0x4f   :  { %v13817_v18 = vld [vmem:[#allocation8 + $0x1c] sm:$0xf0]  ;;  %v13877_v63 = vld [vmem:[#allocation8 + $0x204] sm:$0xf] }
  0x50   :  { %v9461_v21 = vld [vmem:[#allocation8 + $0x200] sm:$0xf]  ;;  %v9206_v31 = vor.u32 %v13817_v18, %v9205_v17  ;;  %2113 = vmatpush.bf16.msra.mxu3 %v10006_v24  ;;  %v9847_v17 = vld [vmem:[#allocation8 + $0x520] sm:$0xf0] }
  0x51   :  { %v13881_v22 = vld [vmem:[#allocation8 + $0x21c] sm:$0xf0]  ;;  %v13837_v24 = vld [vmem:[#allocation8 + $0xc4] sm:$0xf] }
  0x52   :  { %v9717_v23 = vld [vmem:[#allocation8 + $0x400] sm:$0xf]  ;;  %v9462_v35 = vor.u32 %v13881_v22, %v9461_v21  ;;  %2075 = vmatpush.bf16.msra.mxu0 %v9206_v31  ;;  %v9594_v21 = vor.u32 %v13909_v13, %v9591_v14  ;;  %v9815_v31 = vld [vmem:[#allocation8 + $0x4e0] sm:$0xf0]  ;;  %v9210_v13 = vor.u32 %v13813_v61, %v9207_v62 }
  0x53   :  { %v13945_v25 = vld [vmem:[#allocation8 + $0x41c] sm:$0xf0]  ;;  %v9818_v38 = vor.u32 %v13965_v30, %v9815_v31  ;;  %v14061_v4 = vld [vmem:[#allocation8 + $0x7c4] sm:$0xf]  ;;  %v13866_v30 = vld [vmem:[#allocation8 + $0x1a4] sm:$0xf0] }
  0x54   :  { %v9973_v26 = vld [vmem:[#allocation8 + $0x600] sm:$0xf]  ;;  %v9718_v36 = vor.u32 %v13945_v25, %v9717_v23  ;;  %2088 = vmatpush.bf16.msra.mxu1 %v9462_v35  ;;  %v10455_v10 = vld [vmem:[#allocation8 + $0x9e0] sm:$0xf0] }
  0x55   :  { %v14009_v27 = vld [vmem:[#allocation8 + $0x61c] sm:$0xf0]  ;;  %2076 = vmatmul.bf16.vlgmr.msra.gmra.mxu0 %v15292_v9  ;;  %v14029_v61 = vld [vmem:[#allocation8 + $0x6c4] sm:$0xf] }
  0x56   :  { %v10453_v28 = vld [vmem:[#allocation8 + $0x9c0] sm:$0xf]  ;;  %v9974_v39 = vor.u32 %v14009_v27, %v9973_v26  ;;  %2101 = vmatpush.bf16.msra.mxu2 %v9718_v36  ;;  %v9850_v26 = vor.u32 %v13973_v16, %v9847_v17  ;;  %v9303_v27 = vld [vmem:[#allocation8 + $0xe0] sm:$0xf0]  ;;  %v9693_v16 = vld [vmem:[#allocation8 + $0x3c8] sm:$0xf] }
  0x57   :  { %v14129_v29 = vld [vmem:[#allocation8 + $0x9dc] sm:$0xf0]  ;;  %v9306_v33 = vor.u32 %v13837_v24, %v9303_v27  ;;  %v13938_v17 = vld [vmem:[#allocation8 + $0x3e4] sm:$0xf0]  ;;  %v10167_v24 = vld [vmem:[#allocation8 + $0x7a0] sm:$0xf0] }
  0x58   :  { %v10454_v40 = vor.u32 %v14129_v29, %v10453_v28  ;;  %v10421_v43 = vld [vmem:[#allocation8 + $0x980] sm:$0xf]  ;;  %2114 = vmatpush.bf16.msra.mxu3 %v9974_v39  ;;  %2133 = vmatpush.bf16.msrb.mxu1 %v9434_v41  ;;  %v13901_v28 = vld [vmem:[#allocation8 + $0x2c4] sm:$0xf]  ;;  %v9694_v27 = vor.u32 %v13938_v17, %v9693_v16  ;;  %v9277_v17 = vld [vmem:[#allocation8 + $0x88] sm:$0xf] }
  0x59   :  { %v14121_v44 = vld [vmem:[#allocation8 + $0x99c] sm:$0xf0]  ;;  %2102 = vmatmul.bf16.vlgmr.msra.gmra.mxu2 %v15290_v8  ;;  %v9559_v29 = vld [vmem:[#allocation8 + $0x2e0] sm:$0xf0] }
  0x5a   :  { %2120 = vmatpush.bf16.msrb.mxu0 %v10454_v40  ;;  %v10422_v52 = vor.u32 %v14121_v44, %v10421_v43  ;;  %v10389_v53 = vld [vmem:[#allocation8 + $0x940] sm:$0xf]  ;;  %2146 = vmatpush.bf16.msrb.mxu2 %v9690_v42  ;;  %v9562_v34 = vor.u32 %v13901_v28, %v9559_v29  ;;  %v9271_v39 = vld [vmem:[#allocation8 + $0xa0] sm:$0xf0]  ;;  %v9405_v29 = vld [vmem:[#allocation8 + $0x188] sm:$0xf] }
  0x5b   :  { %v14113_v56 = vld [vmem:[#allocation8 + $0x95c] sm:$0xf0]  ;;  %2115 = vmatmul.bf16.vlgmr.msra.gmra.mxu3 %v15294_v15  ;;  %v13893_v40 = vld [vmem:[#allocation8 + $0x284] sm:$0xf]  ;;  %v9274_v45 = vor.u32 %v13829_v37, %v9271_v39 }
  0x5c   :  { %2159 = vmatpush.bf16.msrb.mxu3 %v9946_v46  ;;  %v10390_v0 = vor.u32 %v14113_v56, %v10389_v53  ;;  %v10357_v2 = vld [vmem:[#allocation8 + $0x900] sm:$0xf]  ;;  %2134 = vmatpush.bf16.msrb.mxu1 %v9402_v54  ;;  %v9527_v41 = vld [vmem:[#allocation8 + $0x2a0] sm:$0xf0] }
  0x5d   :  { %v14105_v6 = vld [vmem:[#allocation8 + $0x91c] sm:$0xf0]  ;;  %v13957_v42 = vld [vmem:[#allocation8 + $0x484] sm:$0xf]  ;;  %v9530_v46 = vor.u32 %v13893_v40, %v9527_v41 }
  0x5e   :  { %2121 = vmatpush.bf16.msrb.mxu0 %v10422_v52  ;;  %2147 = vmatpush.bf16.msrb.mxu2 %v9658_v55  ;;  %v10358_v18 = vor.u32 %v14105_v6, %v10357_v2  ;;  %v121_v19 = vld [vmem:[#allocation5 + $0x8] sm:$0xff] }
  0x5f   :  { %v10325_v22 = vld [vmem:[#allocation8 + $0x8c0] sm:$0xf]  ;;  %v15299_v25 = vpack.c.bf16 %v121_v19, %v121_v19  ;;  %v9783_v43 = vld [vmem:[#allocation8 + $0x4a0] sm:$0xf0] }
  0x60   :  { %2160 = vmatpush.bf16.msrb.mxu3 %v9914_v59  ;;  %2135 = vmatpush.bf16.msrb.mxu1 %v9370_v1  ;;  %v14097_v23 = vld [vmem:[#allocation8 + $0x8dc] sm:$0xf0]  ;;  %v9786_v50 = vor.u32 %v13957_v42, %v9783_v43  ;;  %v13885_v52 = vld [vmem:[#allocation8 + $0x244] sm:$0xf]  ;;  %v9242_v59 = vor.u32 %v13821_v49, %v9239_v51  ;;  %v9373_v42 = vld [vmem:[#allocation8 + $0x148] sm:$0xf] }
  0x61   :  { %2089 = vmatmul.bf16.vlgmr.msra.gmra.mxu1 %v15299_v25  ;;  %v10326_v32 = vor.u32 %v14097_v23, %v10325_v22  ;;  %v10293_v35 = vld [vmem:[#allocation8 + $0x880] sm:$0xf]  ;;  %v9495_v53 = vld [vmem:[#allocation8 + $0x260] sm:$0xf0]  ;;  %v13858_v43 = vld [vmem:[#allocation8 + $0x164] sm:$0xf0] }
  0x62   :  { %2122 = vmatpush.bf16.msrb.mxu0 %v10390_v0  ;;  %2148 = vmatpush.bf16.msrb.mxu2 %v9626_v5  ;;  %v14089_v36 = vld [vmem:[#allocation8 + $0x89c] sm:$0xf0]  ;;  %v13949_v54 = vld [vmem:[#allocation8 + $0x444] sm:$0xf]  ;;  %v9498_v60 = vor.u32 %v13885_v52, %v9495_v53 }
  0x63   :  { %v10294_v44 = vor.u32 %v14089_v36, %v10293_v35  ;;  %v10261_v47 = vld [vmem:[#allocation8 + $0x840] sm:$0xf]  ;;  %v9751_v55 = vld [vmem:[#allocation8 + $0x460] sm:$0xf0]  ;;  %v9406_v36 = vor.u32 %v13866_v30, %v9405_v29  ;;  %v9245_v30 = vld [vmem:[#allocation8 + $0x48] sm:$0xf] }
  0x64   :  { %2161 = vmatpush.bf16.msrb.mxu3 %v9882_v11  ;;  %2136 = vmatpush.bf16.msrb.mxu1 %v9338_v20  ;;  %v14081_v48 = vld [vmem:[#allocation8 + $0x85c] sm:$0xf0]  ;;  %v9754_v0 = vor.u32 %v13949_v54, %v9751_v55  ;;  %v9463_v1 = vld [vmem:[#allocation8 + $0x220] sm:$0xf0]  ;;  %v9437_v11 = vld [vmem:[#allocation8 + $0x1c8] sm:$0xf] }
  0x65   :  { %v10262_v56 = vor.u32 %v14081_v48, %v10261_v47  ;;  %v10229_v57 = vld [vmem:[#allocation8 + $0x800] sm:$0xf]  ;;  %v13941_v2 = vld [vmem:[#allocation8 + $0x404] sm:$0xf]  ;;  %v9466_v14 = vor.u32 %v13877_v63, %v9463_v1  ;;  %v9438_v22 = vor.u32 %v13874_v12, %v9437_v11  ;;  %v9374_v48 = vor.u32 %v13858_v43, %v9373_v42  ;;  %v9341_v54 = vld [vmem:[#allocation8 + $0x108] sm:$0xf] }
  0x66   :  { %2123 = vmatpush.bf16.msrb.mxu0 %v10358_v18  ;;  %2149 = vmatpush.bf16.msrb.mxu2 %v9594_v21  ;;  %v14073_v58 = vld [vmem:[#allocation8 + $0x81c] sm:$0xf0]  ;;  %v10199_v5 = vld [vmem:[#allocation8 + $0x7e0] sm:$0xf0]  ;;  %v124_v18 = vld [vmem:[#allocation5 + $0x20] sm:$0xff]  ;;  %v9722_v19 = vor.u32 %v13941_v2, %v9719_v3 }
  0x67   :  { %v14125_v6 = vld [vmem:[#allocation8 + $0x9c4] sm:$0xf]  ;;  %v10230_v7 = vor.u32 %v14073_v58, %v10229_v57  ;;  %v10202_v20 = vor.u32 %v14061_v4, %v10199_v5  ;;  %v15302_v31 = vpack.c.bf16 %v124_v18, %v124_v18  ;;  %v13850_v55 = vld [vmem:[#allocation8 + $0x124] sm:$0xf0] }
  0x68   :  { %2162 = vmatpush.bf16.msrb.mxu3 %v9850_v26  ;;  %2137 = vmatpush.bf16.msrb.mxu1 %v9306_v33  ;;  %v10458_v21 = vor.u32 %v14125_v6, %v10455_v10  ;;  %v14053_v23 = vld [vmem:[#allocation8 + $0x784] sm:$0xf]  ;;  %v13930_v33 = vld [vmem:[#allocation8 + $0x3a4] sm:$0xf0] }
  0x69   :  { %v14117_v26 = vld [vmem:[#allocation8 + $0x984] sm:$0xf]  ;;  %v13914_v57 = vld [vmem:[#allocation8 + $0x324] sm:$0xf0] }
  0x6a   :  { %2124 = vmatpush.bf16.msrb.mxu0 %v10326_v32  ;;  %2150 = vmatpush.bf16.msrb.mxu2 %v9562_v34  ;;  %v10423_v28 = vld [vmem:[#allocation8 + $0x9a0] sm:$0xf0]  ;;  %v9661_v32 = vld [vmem:[#allocation8 + $0x388] sm:$0xf]  ;;  %v10170_v34 = vor.u32 %v14053_v23, %v10167_v24 }
  0x6b   :  { %v10426_v35 = vor.u32 %v14117_v26, %v10423_v28  ;;  %v14045_v37 = vld [vmem:[#allocation8 + $0x744] sm:$0xf]  ;;  %v9662_v40 = vor.u32 %v13930_v33, %v9661_v32  ;;  %v9309_v2 = vld [vmem:[#allocation8 + $0xc8] sm:$0xf] }
  0x6c   :  { %2163 = vmatpush.bf16.msrb.mxu3 %v9818_v38  ;;  %2138 = vmatpush.bf16.msrb.mxu1 %v9274_v45  ;;  %v10135_v38 = vld [vmem:[#allocation8 + $0x760] sm:$0xf0]  ;;  %v13922_v45 = vld [vmem:[#allocation8 + $0x364] sm:$0xf0] }
  0x6d   :  { %v14109_v39 = vld [vmem:[#allocation8 + $0x944] sm:$0xf]  ;;  %v13842_v3 = vld [vmem:[#allocation8 + $0xe4] sm:$0xf0] }
  0x6e   :  { %2125 = vmatpush.bf16.msrb.mxu0 %v10294_v44  ;;  %2151 = vmatpush.bf16.msrb.mxu2 %v9530_v46  ;;  %v10391_v41 = vld [vmem:[#allocation8 + $0x960] sm:$0xf0]  ;;  %v9629_v44 = vld [vmem:[#allocation8 + $0x348] sm:$0xf]  ;;  %v10138_v46 = vor.u32 %v14045_v37, %v10135_v38  ;;  %v9310_v10 = vor.u32 %v13842_v3, %v9309_v2 }
  0x6f   :  { %v10394_v47 = vor.u32 %v14109_v39, %v10391_v41  ;;  %v14037_v49 = vld [vmem:[#allocation8 + $0x704] sm:$0xf]  ;;  %v9630_v52 = vor.u32 %v13922_v45, %v9629_v44  ;;  %v9565_v4 = vld [vmem:[#allocation8 + $0x2c8] sm:$0xf] }
  0x70   :  { %2164 = vmatpush.bf16.msrb.mxu3 %v9786_v50  ;;  %2139 = vmatpush.bf16.msrb.mxu1 %v9242_v59  ;;  %v10103_v50 = vld [vmem:[#allocation8 + $0x720] sm:$0xf0]  ;;  %v13906_v5 = vld [vmem:[#allocation8 + $0x2e4] sm:$0xf0] }
  0x71   :  { %v14101_v51 = vld [vmem:[#allocation8 + $0x904] sm:$0xf]  ;;  %v10106_v58 = vor.u32 %v14037_v49, %v10103_v50  ;;  %v13834_v18 = vld [vmem:[#allocation8 + $0xa4] sm:$0xf0] }
  0x72   :  { %2126 = vmatpush.bf16.msrb.mxu0 %v10262_v56  ;;  %2152 = vmatpush.bf16.msrb.mxu2 %v9498_v60  ;;  %v10359_v53 = vld [vmem:[#allocation8 + $0x920] sm:$0xf0]  ;;  %v9597_v56 = vld [vmem:[#allocation8 + $0x308] sm:$0xf]  ;;  %v9342_v60 = vor.u32 %v13850_v55, %v9341_v54  ;;  %v9278_v23 = vor.u32 %v13834_v18, %v9277_v17 }
  0x73   :  { %v10362_v59 = vor.u32 %v14101_v51, %v10359_v53  ;;  %v10071_v62 = vld [vmem:[#allocation8 + $0x6e0] sm:$0xf0]  ;;  %v13826_v32 = vld [vmem:[#allocation8 + $0x64] sm:$0xf0] }
  0x74   :  { %2165 = vmatpush.bf16.msrb.mxu3 %v9754_v0  ;;  %2140 = vmatpush.bf16.msrb.mxu1 %v9210_v13  ;;  %v14093_v63 = vld [vmem:[#allocation8 + $0x8c4] sm:$0xf]  ;;  %v9598_v0 = vor.u32 %v13914_v57, %v9597_v56  ;;  %v10074_v6 = vor.u32 %v14029_v61, %v10071_v62  ;;  %v9501_v33 = vld [vmem:[#allocation8 + $0x248] sm:$0xf]  ;;  %v9246_v39 = vor.u32 %v13826_v32, %v9245_v30  ;;  %v13870_v56 = vld [vmem:[#allocation8 + $0x1cc] sm:$0xf] }
  0x75   :  { %v10327_v1 = vld [vmem:[#allocation8 + $0x8e0] sm:$0xf0]  ;;  %v9213_v42 = vld [vmem:[#allocation8 + $0x8] sm:$0xf]  ;;  %v9439_v57 = vld [vmem:[#allocation8 + $0x1e8] sm:$0xf0] }
  0x76   :  { %2127 = vmatpush.bf16.msrb.mxu0 %v10230_v7  ;;  %2153 = vmatpush.bf16.msrb.mxu2 %v9466_v14  ;;  %v10330_v7 = vor.u32 %v14093_v63, %v10327_v1  ;;  %v14021_v11 = vld [vmem:[#allocation8 + $0x684] sm:$0xf]  ;;  %v9566_v14 = vor.u32 %v13906_v5, %v9565_v4  ;;  %v13818_v44 = vld [vmem:[#allocation8 + $0x24] sm:$0xf0]  ;;  %v9442_v1 = vor.u32 %v13870_v56, %v9439_v57  ;;  %v13862_v5 = vld [vmem:[#allocation8 + $0x18c] sm:$0xf] }
  0x77   :  { %2141 = vmatmul.bf16.vlgmr.msrb.gmra.mxu1 %v15292_v9  ;;  %v10039_v12 = vld [vmem:[#allocation8 + $0x6a0] sm:$0xf0]  ;;  %v9469_v45 = vld [vmem:[#allocation8 + $0x208] sm:$0xf]  ;;  %v9214_v55 = vor.u32 %v13818_v44, %v9213_v42 }
  0x78   :  { %2166 = vmatpush.bf16.msrb.mxu3 %v9722_v19  ;;  %2185 = vmatpush.bf16.msra.mxu1 %v10458_v21  ;;  %v14085_v13 = vld [vmem:[#allocation8 + $0x884] sm:$0xf]  ;;  %v9533_v19 = vld [vmem:[#allocation8 + $0x288] sm:$0xf]  ;;  %v10042_v21 = vor.u32 %v14021_v11, %v10039_v12 }
  0x79   :  { %2128 = vmatmul.bf16.vlgmr.msrb.gmra.mxu0 %v15302_v31  ;;  %2154 = vmatmul.bf16.vlgmr.msrb.gmra.mxu2 %v15299_v25  ;;  %v10295_v16 = vld [vmem:[#allocation8 + $0x8a0] sm:$0xf0]  ;;  %v10205_v49 = vld [vmem:[#allocation8 + $0x7c8] sm:$0xf] }
  0x7a   :  { %2172 = vmatpush.bf16.msra.mxu0 %v10202_v20  ;;  %2198 = vmatpush.bf16.msra.mxu2 %v9438_v22  ;;  %v13898_v20 = vld [vmem:[#allocation8 + $0x2a4] sm:$0xf0]  ;;  %v10298_v22 = vor.u32 %v14085_v13, %v10295_v16  ;;  %v14013_v24 = vld [vmem:[#allocation8 + $0x644] sm:$0xf] }
  0x7b   :  { %2167 = vmatmul.bf16.vlgmr.msrb.gmra.mxu3 %v15290_v8  ;;  %v10007_v26 = vld [vmem:[#allocation8 + $0x660] sm:$0xf0]  ;;  %v9534_v28 = vor.u32 %v13898_v20, %v9533_v19  ;;  %v14066_v51 = vld [vmem:[#allocation8 + $0x7e4] sm:$0xf0]  ;;  %v13854_v20 = vld [vmem:[#allocation8 + $0x14c] sm:$0xf] }
  0x7c   :  { %2211 = vmatpush.bf16.msra.mxu3 %v9694_v27  ;;  %2186 = vmatpush.bf16.msra.mxu1 %v10426_v35  ;;  %v14077_v27 = vld [vmem:[#allocation8 + $0x844] sm:$0xf]  ;;  %v10010_v35 = vor.u32 %v14013_v24, %v10007_v26  ;;  %v14130_v53 = vld [vmem:[#allocation8 + $0x9e4] sm:$0xf0] }
  0x7d   :  { %v10263_v29 = vld [vmem:[#allocation8 + $0x860] sm:$0xf0]  ;;  %v9917_v62 = vld [vmem:[#allocation8 + $0x588] sm:$0xf] }
  0x7e   :  { %2173 = vmatpush.bf16.msra.mxu0 %v10170_v34  ;;  %2199 = vmatpush.bf16.msra.mxu2 %v9406_v36  ;;  %v13890_v34 = vld [vmem:[#allocation8 + $0x264] sm:$0xf0]  ;;  %v14005_v36 = vld [vmem:[#allocation8 + $0x604] sm:$0xf]  ;;  %v10266_v38 = vor.u32 %v14077_v27, %v10263_v29 }
  0x7f   :  { %v9975_v37 = vld [vmem:[#allocation8 + $0x620] sm:$0xf0]  ;;  %v9502_v43 = vor.u32 %v13890_v34, %v9501_v33  ;;  %v13994_v63 = vld [vmem:[#allocation8 + $0x5a4] sm:$0xf0]  ;;  %v13846_v34 = vld [vmem:[#allocation8 + $0x10c] sm:$0xf] }
  0x80   :  { %2212 = vmatpush.bf16.msra.mxu3 %v9662_v40  ;;  %2187 = vmatpush.bf16.msra.mxu1 %v10394_v47  ;;  %v14069_v40 = vld [vmem:[#allocation8 + $0x804] sm:$0xf]  ;;  %v9949_v47 = vld [vmem:[#allocation8 + $0x5c8] sm:$0xf]  ;;  %v9978_v50 = vor.u32 %v14005_v36, %v9975_v37 }
  0x81   :  { %v10231_v41 = vld [vmem:[#allocation8 + $0x820] sm:$0xf0]  ;;  %v14058_v2 = vld [vmem:[#allocation8 + $0x7a4] sm:$0xf0] }
  0x82   :  { %2174 = vmatpush.bf16.msra.mxu0 %v10138_v46  ;;  %2200 = vmatpush.bf16.msra.mxu2 %v9374_v48  ;;  %v13882_v46 = vld [vmem:[#allocation8 + $0x224] sm:$0xf0]  ;;  %v10234_v54 = vor.u32 %v14069_v40, %v10231_v41 }
  0x83   :  { %v14002_v48 = vld [vmem:[#allocation8 + $0x5e4] sm:$0xf0] }
  0x84   :  { %2213 = vmatpush.bf16.msra.mxu3 %v9630_v52  ;;  %2188 = vmatpush.bf16.msra.mxu1 %v10362_v59  ;;  %v10461_v52 = vld [vmem:[#allocation8 + $0x9c8] sm:$0xf]  ;;  %v9950_v59 = vor.u32 %v14002_v48, %v9949_v47  ;;  %v9311_v47 = vld [vmem:[#allocation8 + $0xe8] sm:$0xf0] }
  0x85   :  { %v10462_v61 = vor.u32 %v14130_v53, %v10461_v52  ;;  %v10429_v3 = vld [vmem:[#allocation8 + $0x988] sm:$0xf] }
  0x86   :  { %2175 = vmatpush.bf16.msra.mxu0 %v10106_v58  ;;  %2201 = vmatpush.bf16.msra.mxu2 %v9342_v60  ;;  %v9470_v58 = vor.u32 %v13882_v46, %v9469_v45  ;;  %v10206_v60 = vor.u32 %v14066_v51, %v10205_v49  ;;  %v14122_v4 = vld [vmem:[#allocation8 + $0x9a4] sm:$0xf0]  ;;  %v13838_v46 = vld [vmem:[#allocation8 + $0xcc] sm:$0xf] }
  0x87   :  { %v10430_v11 = vor.u32 %v14122_v4, %v10429_v3  ;;  %v9885_v12 = vld [vmem:[#allocation8 + $0x548] sm:$0xf] }
  0x88   :  { %2214 = vmatpush.bf16.msra.mxu3 %v9598_v0  ;;  %2189 = vmatpush.bf16.msra.mxu1 %v10330_v7  ;;  %v10173_v0 = vld [vmem:[#allocation8 + $0x788] sm:$0xf]  ;;  %v9918_v7 = vor.u32 %v13994_v63, %v9917_v62 }
  0x89   :  { %v13986_v13 = vld [vmem:[#allocation8 + $0x564] sm:$0xf0] }
  0x8a   :  { %2176 = vmatpush.bf16.msra.mxu0 %v10074_v6  ;;  %2202 = vmatpush.bf16.msra.mxu2 %v9310_v10  ;;  %v9407_v6 = vld [vmem:[#allocation8 + $0x1a8] sm:$0xf0]  ;;  %v10174_v10 = vor.u32 %v14058_v2, %v10173_v0  ;;  %v14050_v17 = vld [vmem:[#allocation8 + $0x764] sm:$0xf0] }
  0x8b   :  { %v9410_v16 = vor.u32 %v13862_v5, %v9407_v6  ;;  %v10397_v18 = vld [vmem:[#allocation8 + $0x948] sm:$0xf]  ;;  %v13822_v6 = vld [vmem:[#allocation8 + $0x4c] sm:$0xf] }
  0x8c   :  { %2215 = vmatpush.bf16.msra.mxu3 %v9566_v14  ;;  %2190 = vmatpush.bf16.msra.mxu1 %v10298_v22  ;;  %v10141_v14 = vld [vmem:[#allocation8 + $0x748] sm:$0xf]  ;;  %v9886_v22 = vor.u32 %v13986_v13, %v9885_v12 }
  0x8d   :  { %v14114_v19 = vld [vmem:[#allocation8 + $0x964] sm:$0xf0] }
  0x8e   :  { %2177 = vmatpush.bf16.msra.mxu0 %v10042_v21  ;;  %2203 = vmatpush.bf16.msra.mxu2 %v9278_v23  ;;  %v9375_v21 = vld [vmem:[#allocation8 + $0x168] sm:$0xf0]  ;;  %v10142_v23 = vor.u32 %v14050_v17, %v10141_v14  ;;  %v10398_v24 = vor.u32 %v14114_v19, %v10397_v18  ;;  %v9853_v26 = vld [vmem:[#allocation8 + $0x508] sm:$0xf] }
  0x8f   :  { %v13978_v27 = vld [vmem:[#allocation8 + $0x524] sm:$0xf0]  ;;  %v9378_v29 = vor.u32 %v13854_v20, %v9375_v21  ;;  %v13814_v21 = vld [vmem:[#allocation8 + $0xc] sm:$0xf] }
  0x90   :  { %2216 = vmatpush.bf16.msra.mxu3 %v9534_v28  ;;  %2191 = vmatpush.bf16.msra.mxu1 %v10266_v38  ;;  %v10109_v28 = vld [vmem:[#allocation8 + $0x708] sm:$0xf]  ;;  %v9854_v36 = vor.u32 %v13978_v27, %v9853_v26  ;;  %v13998_v26 = vld [vmem:[#allocation8 + $0x5cc] sm:$0xf] }
  0x91   :  { %v14042_v30 = vld [vmem:[#allocation8 + $0x724] sm:$0xf0] }
  0x92   :  { %2178 = vmatpush.bf16.msra.mxu0 %v10010_v35  ;;  %2204 = vmatpush.bf16.msra.mxu2 %v9246_v39  ;;  %v10365_v32 = vld [vmem:[#allocation8 + $0x908] sm:$0xf]  ;;  %v9343_v35 = vld [vmem:[#allocation8 + $0x128] sm:$0xf0]  ;;  %v10110_v37 = vor.u32 %v14042_v30, %v10109_v28 }
  0x93   :  { %v14106_v33 = vld [vmem:[#allocation8 + $0x924] sm:$0xf0]  ;;  %v9346_v42 = vor.u32 %v13846_v34, %v9343_v35  ;;  %v9951_v28 = vld [vmem:[#allocation8 + $0x5e8] sm:$0xf0] }
  0x94   :  { %2217 = vmatpush.bf16.msra.mxu3 %v9502_v43  ;;  %2192 = vmatpush.bf16.msra.mxu1 %v10234_v54  ;;  %v10366_v38 = vor.u32 %v14106_v33, %v10365_v32  ;;  %v9821_v39 = vld [vmem:[#allocation8 + $0x4c8] sm:$0xf]  ;;  %v9314_v54 = vor.u32 %v13838_v46, %v9311_v47  ;;  %v10207_v30 = vld [vmem:[#allocation8 + $0x7e8] sm:$0xf0] }
  0x95   :  { %v13970_v40 = vld [vmem:[#allocation8 + $0x4e4] sm:$0xf0]  ;;  %v14126_v34 = vld [vmem:[#allocation8 + $0x9cc] sm:$0xf] }
  0x96   :  { %2179 = vmatpush.bf16.msra.mxu0 %v9978_v50  ;;  %2205 = vmatpush.bf16.msra.mxu2 %v9214_v55  ;;  %v10077_v41 = vld [vmem:[#allocation8 + $0x6c8] sm:$0xf]  ;;  %v9822_v48 = vor.u32 %v13970_v40, %v9821_v39  ;;  %v10463_v35 = vld [vmem:[#allocation8 + $0x9e8] sm:$0xf0] }
  0x97   :  { %2193 = vmatmul.bf16.vlgmr.msra.gmra.mxu1 %v15302_v31  ;;  %v14034_v43 = vld [vmem:[#allocation8 + $0x6e4] sm:$0xf0]  ;;  %v13926_v40 = vld [vmem:[#allocation8 + $0x38c] sm:$0xf] }
  0x98   :  { %2218 = vmatpush.bf16.msra.mxu3 %v9470_v58  ;;  %2237 = vmatpush.bf16.msrb.mxu1 %v10206_v60  ;;  %v10333_v44 = vld [vmem:[#allocation8 + $0x8c8] sm:$0xf]  ;;  %v10078_v49 = vor.u32 %v14034_v43, %v10077_v41  ;;  %v13830_v58 = vld [vmem:[#allocation8 + $0x8c] sm:$0xf]  ;;  %v10466_v43 = vor.u32 %v14126_v34, %v10463_v35 }
  0x99   :  { %2180 = vmatmul.bf16.vlgmr.msra.gmra.mxu0 %v15294_v15  ;;  %2206 = vmatmul.bf16.vlgmr.msra.gmra.mxu2 %v15292_v9  ;;  %v14098_v45 = vld [vmem:[#allocation8 + $0x8e4] sm:$0xf0]  ;;  %v9663_v41 = vld [vmem:[#allocation8 + $0x3a8] sm:$0xf0] }
  0x9a   :  { %2224 = vmatpush.bf16.msrb.mxu0 %v9950_v59  ;;  %2250 = vmatpush.bf16.msrb.mxu2 %v10462_v61  ;;  %v10334_v50 = vor.u32 %v14098_v45, %v10333_v44  ;;  %v9789_v51 = vld [vmem:[#allocation8 + $0x488] sm:$0xf]  ;;  %v9279_v59 = vld [vmem:[#allocation8 + $0xa8] sm:$0xf0] }
  0x9b   :  { %2219 = vmatmul.bf16.vlgmr.msra.gmra.mxu3 %v15299_v25  ;;  %v13962_v52 = vld [vmem:[#allocation8 + $0x4a4] sm:$0xf0]  ;;  %v9282_v2 = vor.u32 %v13830_v58, %v9279_v59  ;;  %v9919_v44 = vld [vmem:[#allocation8 + $0x5a8] sm:$0xf0] }
  0x9c   :  { %2263 = vmatpush.bf16.msrb.mxu3 %v9442_v1  ;;  %2238 = vmatpush.bf16.msrb.mxu1 %v10174_v10  ;;  %v10045_v53 = vld [vmem:[#allocation8 + $0x688] sm:$0xf]  ;;  %v9790_v60 = vor.u32 %v13962_v52, %v9789_v51  ;;  %v14054_v45 = vld [vmem:[#allocation8 + $0x78c] sm:$0xf] }
  0x9d   :  { %v14026_v55 = vld [vmem:[#allocation8 + $0x6a4] sm:$0xf0]  ;;  %v10175_v46 = vld [vmem:[#allocation8 + $0x7a8] sm:$0xf0] }
  0x9e   :  { %2225 = vmatpush.bf16.msrb.mxu0 %v9918_v7  ;;  %2251 = vmatpush.bf16.msrb.mxu2 %v10430_v11  ;;  %v10301_v56 = vld [vmem:[#allocation8 + $0x888] sm:$0xf]  ;;  %v10046_v61 = vor.u32 %v14026_v55, %v10045_v53  ;;  %v9247_v7 = vld [vmem:[#allocation8 + $0x68] sm:$0xf0]  ;;  %v10178_v51 = vor.u32 %v14054_v45, %v10175_v46 }
  0x9f   :  { %v14090_v57 = vld [vmem:[#allocation8 + $0x8a4] sm:$0xf0]  ;;  %v9250_v19 = vor.u32 %v13822_v6, %v9247_v7  ;;  %v14118_v47 = vld [vmem:[#allocation8 + $0x98c] sm:$0xf] }
  0xa0   :  { %2264 = vmatpush.bf16.msrb.mxu3 %v9410_v16  ;;  %2239 = vmatpush.bf16.msrb.mxu1 %v10142_v23  ;;  %v10302_v62 = vor.u32 %v14090_v57, %v10301_v56  ;;  %v9757_v63 = vld [vmem:[#allocation8 + $0x448] sm:$0xf]  ;;  %v13934_v23 = vld [vmem:[#allocation8 + $0x3cc] sm:$0xf] }
  0xa1   :  { %v13954_v0 = vld [vmem:[#allocation8 + $0x464] sm:$0xf0]  ;;  %v13918_v52 = vld [vmem:[#allocation8 + $0x34c] sm:$0xf] }
  0xa2   :  { %2226 = vmatpush.bf16.msrb.mxu0 %v9886_v22  ;;  %2252 = vmatpush.bf16.msrb.mxu2 %v10398_v24  ;;  %v10013_v1 = vld [vmem:[#allocation8 + $0x648] sm:$0xf]  ;;  %v9758_v10 = vor.u32 %v13954_v0, %v9757_v63  ;;  %v9215_v22 = vld [vmem:[#allocation8 + $0x28] sm:$0xf0] }
  0xa3   :  { %v14018_v3 = vld [vmem:[#allocation8 + $0x664] sm:$0xf0]  ;;  %v9695_v24 = vld [vmem:[#allocation8 + $0x3e8] sm:$0xf0] }
  0xa4   :  { %2265 = vmatpush.bf16.msrb.mxu3 %v9378_v29  ;;  %2240 = vmatpush.bf16.msrb.mxu1 %v10110_v37  ;;  %v10269_v4 = vld [vmem:[#allocation8 + $0x848] sm:$0xf]  ;;  %v10014_v13 = vor.u32 %v14018_v3, %v10013_v1  ;;  %v14062_v29 = vld [vmem:[#allocation8 + $0x7cc] sm:$0xf]  ;;  %v9698_v37 = vor.u32 %v13934_v23, %v9695_v24 }
  0xa5   :  { %v14082_v5 = vld [vmem:[#allocation8 + $0x864] sm:$0xf0]  ;;  %v10210_v39 = vor.u32 %v14062_v29, %v10207_v30  ;;  %v9631_v53 = vld [vmem:[#allocation8 + $0x368] sm:$0xf0] }
  0xa6   :  { %2227 = vmatpush.bf16.msrb.mxu0 %v9854_v36  ;;  %2253 = vmatpush.bf16.msrb.mxu2 %v10366_v38  ;;  %v9725_v11 = vld [vmem:[#allocation8 + $0x408] sm:$0xf]  ;;  %v10270_v14 = vor.u32 %v14082_v5, %v10269_v4  ;;  %v9218_v36 = vor.u32 %v13814_v21, %v9215_v22  ;;  %v9954_v38 = vor.u32 %v13998_v26, %v9951_v28  ;;  %v9887_v56 = vld [vmem:[#allocation8 + $0x568] sm:$0xf0] }
  0xa7   :  { %v13946_v12 = vld [vmem:[#allocation8 + $0x424] sm:$0xf0]  ;;  %v14046_v57 = vld [vmem:[#allocation8 + $0x74c] sm:$0xf] }
  0xa8   :  { %2266 = vmatpush.bf16.msrb.mxu3 %v9346_v42  ;;  %2241 = vmatpush.bf16.msrb.mxu1 %v10078_v49  ;;  %v9981_v16 = vld [vmem:[#allocation8 + $0x608] sm:$0xf]  ;;  %v9726_v27 = vor.u32 %v13946_v12, %v9725_v11  ;;  %v13990_v42 = vld [vmem:[#allocation8 + $0x58c] sm:$0xf]  ;;  %v9666_v49 = vor.u32 %v13926_v40, %v9663_v41 }
  0xa9   :  { %v14010_v17 = vld [vmem:[#allocation8 + $0x624] sm:$0xf0]  ;;  %v10143_v58 = vld [vmem:[#allocation8 + $0x768] sm:$0xf0] }
  0xaa   :  { %2228 = vmatpush.bf16.msrb.mxu0 %v9822_v48  ;;  %2254 = vmatpush.bf16.msrb.mxu2 %v10334_v50  ;;  %v10237_v18 = vld [vmem:[#allocation8 + $0x808] sm:$0xf]  ;;  %v9982_v32 = vor.u32 %v14010_v17, %v9981_v16  ;;  %v10431_v48 = vld [vmem:[#allocation8 + $0x9a8] sm:$0xf0]  ;;  %v9922_v50 = vor.u32 %v13990_v42, %v9919_v44  ;;  %v10146_v63 = vor.u32 %v14046_v57, %v10143_v58 }
  0xab   :  { %v14074_v20 = vld [vmem:[#allocation8 + $0x824] sm:$0xf0]  ;;  %v10434_v55 = vor.u32 %v14118_v47, %v10431_v48  ;;  %v14110_v59 = vld [vmem:[#allocation8 + $0x94c] sm:$0xf] }
  0xac   :  { %2267 = vmatpush.bf16.msrb.mxu3 %v9314_v54  ;;  %2242 = vmatpush.bf16.msrb.mxu1 %v10046_v61  ;;  %v10238_v33 = vor.u32 %v14074_v20, %v10237_v18  ;;  %v13982_v54 = vld [vmem:[#allocation8 + $0x54c] sm:$0xf]  ;;  %v9634_v61 = vor.u32 %v13918_v52, %v9631_v53 }
  0xad   :  { %v13910_v0 = vld [vmem:[#allocation8 + $0x30c] sm:$0xf] }
  0xae   :  { %2229 = vmatpush.bf16.msrb.mxu0 %v9790_v60  ;;  %2255 = vmatpush.bf16.msrb.mxu2 %v10302_v62  ;;  %v10399_v60 = vld [vmem:[#allocation8 + $0x968] sm:$0xf0]  ;;  %v9890_v62 = vor.u32 %v13982_v54, %v9887_v56 }
  0xaf   :  { %v9599_v1 = vld [vmem:[#allocation8 + $0x328] sm:$0xf0]  ;;  %v10402_v3 = vor.u32 %v14110_v59, %v10399_v60 }
  0xb0   :  { %2268 = vmatpush.bf16.msrb.mxu3 %v9282_v2  ;;  %2243 = vmatpush.bf16.msrb.mxu1 %v10014_v13  ;;  %v13974_v2 = vld [vmem:[#allocation8 + $0x50c] sm:$0xf]  ;;  %v9602_v11 = vor.u32 %v13910_v0, %v9599_v1  ;;  %v9701_v0 = vld [vmem:[#allocation8 + $0x3d0] sm:$0xf] }
  0xb1   :  { %v9855_v4 = vld [vmem:[#allocation8 + $0x528] sm:$0xf0] }
  0xb2   :  { %2230 = vmatpush.bf16.msrb.mxu0 %v9758_v10  ;;  %2256 = vmatpush.bf16.msrb.mxu2 %v10270_v14  ;;  %v14038_v5 = vld [vmem:[#allocation8 + $0x70c] sm:$0xf]  ;;  %v9858_v12 = vor.u32 %v13974_v2, %v9855_v4  ;;  %v13939_v2 = vld [vmem:[#allocation8 + $0x3ec] sm:$0xf0] }
  0xb3   :  { %v10111_v6 = vld [vmem:[#allocation8 + $0x728] sm:$0xf0]  ;;  %v14003_v4 = vld [vmem:[#allocation8 + $0x5ec] sm:$0xf0] }
  0xb4   :  { %2269 = vmatpush.bf16.msrb.mxu3 %v9250_v19  ;;  %2244 = vmatpush.bf16.msrb.mxu1 %v9982_v32  ;;  %v14102_v7 = vld [vmem:[#allocation8 + $0x90c] sm:$0xf]  ;;  %v10114_v13 = vor.u32 %v14038_v5, %v10111_v6 }
  0xb5   :  { %v10367_v10 = vld [vmem:[#allocation8 + $0x928] sm:$0xf0] }
  0xb6   :  { %2231 = vmatpush.bf16.msrb.mxu0 %v9726_v27  ;;  %2257 = vmatpush.bf16.msrb.mxu2 %v10238_v33  ;;  %v13902_v14 = vld [vmem:[#allocation8 + $0x2cc] sm:$0xf]  ;;  %v10370_v18 = vor.u32 %v14102_v7, %v10367_v10  ;;  %v10213_v7 = vld [vmem:[#allocation8 + $0x7d0] sm:$0xf] }
  0xb7   :  { %2245 = vmatmul.bf16.vlgmr.msrb.gmra.mxu1 %v15294_v15  ;;  %v9567_v16 = vld [vmem:[#allocation8 + $0x2e8] sm:$0xf0]  ;;  %v14067_v10 = vld [vmem:[#allocation8 + $0x7ec] sm:$0xf0] }
  0xb8   :  { %2270 = vmatpush.bf16.msrb.mxu3 %v9218_v36  ;;  %2289 = vmatpush.bf16.msra.mxu1 %v9954_v38  ;;  %v13966_v17 = vld [vmem:[#allocation8 + $0x4cc] sm:$0xf]  ;;  %v9570_v24 = vor.u32 %v13902_v14, %v9567_v16  ;;  %v9413_v16 = vld [vmem:[#allocation8 + $0x190] sm:$0xf] }
  0xb9   :  { %2258 = vmatmul.bf16.vlgmr.msrb.gmra.mxu2 %v15302_v31  ;;  %2232 = vmatmul.bf16.vlgmr.msrb.gmra.mxu0 %v15290_v8  ;;  %v9823_v19 = vld [vmem:[#allocation8 + $0x4e8] sm:$0xf0] }
  0xba   :  { %2276 = vmatpush.bf16.msra.mxu0 %v9698_v37  ;;  %2302 = vmatpush.bf16.msra.mxu2 %v10210_v39  ;;  %v14030_v20 = vld [vmem:[#allocation8 + $0x6cc] sm:$0xf]  ;;  %v9826_v26 = vor.u32 %v13966_v17, %v9823_v19  ;;  %v13867_v17 = vld [vmem:[#allocation8 + $0x1ac] sm:$0xf0]  ;;  %v10214_v19 = vor.u32 %v14067_v10, %v10213_v7 }
  0xbb   :  { %2271 = vmatmul.bf16.vlgmr.msrb.gmra.mxu3 %v15292_v9  ;;  %v10079_v21 = vld [vmem:[#allocation8 + $0x6e8] sm:$0xf0]  ;;  %v9541_v7 = vld [vmem:[#allocation8 + $0x290] sm:$0xf] }
  0xbc   :  { %2315 = vmatpush.bf16.msra.mxu3 %v10466_v43  ;;  %2290 = vmatpush.bf16.msra.mxu1 %v9922_v50  ;;  %v14094_v22 = vld [vmem:[#allocation8 + $0x8cc] sm:$0xf]  ;;  %v10082_v27 = vor.u32 %v14030_v20, %v10079_v21  ;;  %v13931_v20 = vld [vmem:[#allocation8 + $0x3ac] sm:$0xf0] }
  0xbd   :  { %v10335_v23 = vld [vmem:[#allocation8 + $0x8e8] sm:$0xf0]  ;;  %v9925_v21 = vld [vmem:[#allocation8 + $0x590] sm:$0xf] }
  0xbe   :  { %2277 = vmatpush.bf16.msra.mxu0 %v9666_v49  ;;  %2303 = vmatpush.bf16.msra.mxu2 %v10178_v51  ;;  %v13894_v28 = vld [vmem:[#allocation8 + $0x28c] sm:$0xf]  ;;  %v10338_v32 = vor.u32 %v14094_v22, %v10335_v23  ;;  %v13995_v22 = vld [vmem:[#allocation8 + $0x5ac] sm:$0xf0] }
  0xbf   :  { %v9535_v29 = vld [vmem:[#allocation8 + $0x2a8] sm:$0xf0]  ;;  %v10181_v23 = vld [vmem:[#allocation8 + $0x790] sm:$0xf] }
  0xc0   :  { %2316 = vmatpush.bf16.msra.mxu3 %v10434_v55  ;;  %2291 = vmatpush.bf16.msra.mxu1 %v9890_v62  ;;  %v13958_v30 = vld [vmem:[#allocation8 + $0x48c] sm:$0xf]  ;;  %v9538_v38 = vor.u32 %v13894_v28, %v9535_v29  ;;  %v9445_v62 = vld [vmem:[#allocation8 + $0x1d0] sm:$0xf]  ;;  %v9926_v28 = vor.u32 %v13995_v22, %v9925_v21 }
  0xc1   :  { %v9791_v33 = vld [vmem:[#allocation8 + $0x4a8] sm:$0xf0]  ;;  %v9381_v29 = vld [vmem:[#allocation8 + $0x150] sm:$0xf] }
  0xc2   :  { %2278 = vmatpush.bf16.msra.mxu0 %v9634_v61  ;;  %2304 = vmatpush.bf16.msra.mxu2 %v10146_v63  ;;  %v14022_v34 = vld [vmem:[#allocation8 + $0x68c] sm:$0xf]  ;;  %v9794_v39 = vor.u32 %v13958_v30, %v9791_v33  ;;  %v13875_v63 = vld [vmem:[#allocation8 + $0x1ec] sm:$0xf0] }
  0xc3   :  { %v10047_v35 = vld [vmem:[#allocation8 + $0x6a8] sm:$0xf0]  ;;  %v13859_v30 = vld [vmem:[#allocation8 + $0x16c] sm:$0xf0] }
  0xc4   :  { %2317 = vmatpush.bf16.msra.mxu3 %v10402_v3  ;;  %2292 = vmatpush.bf16.msra.mxu1 %v9858_v12  ;;  %v14086_v36 = vld [vmem:[#allocation8 + $0x88c] sm:$0xf]  ;;  %v10050_v40 = vor.u32 %v14022_v34, %v10047_v35  ;;  %v9957_v3 = vld [vmem:[#allocation8 + $0x5d0] sm:$0xf]  ;;  %v9446_v12 = vor.u32 %v13875_v63, %v9445_v62 }
  0xc5   :  { %v10303_v37 = vld [vmem:[#allocation8 + $0x8a8] sm:$0xf0]  ;;  %v9958_v14 = vor.u32 %v14003_v4, %v9957_v3  ;;  %v13923_v34 = vld [vmem:[#allocation8 + $0x36c] sm:$0xf0] }
  0xc6   :  { %2279 = vmatpush.bf16.msra.mxu0 %v9602_v11  ;;  %2305 = vmatpush.bf16.msra.mxu2 %v10114_v13  ;;  %v13886_v41 = vld [vmem:[#allocation8 + $0x24c] sm:$0xf]  ;;  %v10306_v44 = vor.u32 %v14086_v36, %v10303_v37  ;;  %v9702_v13 = vor.u32 %v13939_v2, %v9701_v0  ;;  %v9893_v35 = vld [vmem:[#allocation8 + $0x550] sm:$0xf] }
  0xc7   :  { %v9503_v42 = vld [vmem:[#allocation8 + $0x268] sm:$0xf0]  ;;  %v13987_v36 = vld [vmem:[#allocation8 + $0x56c] sm:$0xf0] }
  0xc8   :  { %2318 = vmatpush.bf16.msra.mxu3 %v10370_v18  ;;  %2293 = vmatpush.bf16.msra.mxu1 %v9826_v26  ;;  %v13950_v43 = vld [vmem:[#allocation8 + $0x44c] sm:$0xf]  ;;  %v9506_v50 = vor.u32 %v13886_v41, %v9503_v42  ;;  %v9669_v18 = vld [vmem:[#allocation8 + $0x390] sm:$0xf]  ;;  %v9414_v26 = vor.u32 %v13867_v17, %v9413_v16  ;;  %v9894_v42 = vor.u32 %v13987_v36, %v9893_v35 }
  0xc9   :  { %v9759_v45 = vld [vmem:[#allocation8 + $0x468] sm:$0xf0]  ;;  %v10149_v37 = vld [vmem:[#allocation8 + $0x750] sm:$0xf] }
  0xca   :  { %2280 = vmatpush.bf16.msra.mxu0 %v9570_v24  ;;  %2306 = vmatpush.bf16.msra.mxu2 %v10082_v27  ;;  %v14014_v46 = vld [vmem:[#allocation8 + $0x64c] sm:$0xf]  ;;  %v9762_v53 = vor.u32 %v13950_v43, %v9759_v45  ;;  %v14059_v24 = vld [vmem:[#allocation8 + $0x7ac] sm:$0xf0]  ;;  %v9670_v27 = vor.u32 %v13931_v20, %v9669_v18 }
  0xcb   :  { %v10015_v47 = vld [vmem:[#allocation8 + $0x668] sm:$0xf0]  ;;  %v10182_v33 = vor.u32 %v14059_v24, %v10181_v23  ;;  %v13851_v43 = vld [vmem:[#allocation8 + $0x12c] sm:$0xf0] }
  0xcc   :  { %2319 = vmatpush.bf16.msra.mxu3 %v10338_v32  ;;  %v14078_v48 = vld [vmem:[#allocation8 + $0x84c] sm:$0xf]  ;;  %2294 = vmatpush.bf16.msra.mxu1 %v9794_v39  ;;  %v10018_v54 = vor.u32 %v14014_v46, %v10015_v47  ;;  %v9637_v32 = vld [vmem:[#allocation8 + $0x350] sm:$0xf]  ;;  %v9382_v39 = vor.u32 %v13859_v30, %v9381_v29 }
  0xcd   :  { %v10271_v49 = vld [vmem:[#allocation8 + $0x868] sm:$0xf0]  ;;  %v9638_v41 = vor.u32 %v13923_v34, %v9637_v32  ;;  %v13915_v45 = vld [vmem:[#allocation8 + $0x32c] sm:$0xf0] }
  0xce   :  { %2281 = vmatpush.bf16.msra.mxu0 %v9538_v38  ;;  %v13878_v51 = vld [vmem:[#allocation8 + $0x20c] sm:$0xf]  ;;  %2307 = vmatpush.bf16.msra.mxu2 %v10050_v40  ;;  %v10274_v58 = vor.u32 %v14078_v48, %v10271_v49  ;;  %v14051_v38 = vld [vmem:[#allocation8 + $0x76c] sm:$0xf0]  ;;  %v15320_v49 = vld [vmem:[#allocation10] sm:$0xff] }
  0xcf   :  { %v9471_v52 = vld [vmem:[#allocation8 + $0x228] sm:$0xf0]  ;;  %v9349_v40 = vld [vmem:[#allocation8 + $0x110] sm:$0xf]  ;;  %v10150_v46 = vor.u32 %v14051_v38, %v10149_v37 }
  0xd0   :  { %v13942_v55 = vld [vmem:[#allocation8 + $0x40c] sm:$0xf]  ;;  %2320 = vmatpush.bf16.msra.mxu3 %v10306_v44  ;;  %v9474_v1 = vor.u32 %v13878_v51, %v9471_v52  ;;  %2295 = vmatpush.bf16.msra.mxu1 %v9762_v53  ;;  %v9605_v44 = vld [vmem:[#allocation8 + $0x310] sm:$0xf]  ;;  %v9350_v52 = vor.u32 %v13851_v43, %v9349_v40 }
  0xd1   :  { %v9727_v56 = vld [vmem:[#allocation8 + $0x428] sm:$0xf0]  ;;  %v9861_v47 = vld [vmem:[#allocation8 + $0x510] sm:$0xf] }
  0xd2   :  { %v14006_v57 = vld [vmem:[#allocation8 + $0x60c] sm:$0xf]  ;;  %2282 = vmatpush.bf16.msra.mxu0 %v9506_v50  ;;  %2308 = vmatpush.bf16.msra.mxu2 %v10018_v54  ;;  %v9730_v5 = vor.u32 %v13942_v55, %v9727_v56  ;;  %v13979_v48 = vld [vmem:[#allocation8 + $0x52c] sm:$0xf0]  ;;  %v9606_v54 = vor.u32 %v13915_v45, %v9605_v44  ;;  %v2077_v2 = vpop.f32.mrf.mxu0 }
  0xd3   :  { %v9983_v59 = vld [vmem:[#allocation8 + $0x628] sm:$0xf0]  ;;  %v10117_v50 = vld [vmem:[#allocation8 + $0x710] sm:$0xf]  ;;  %v9862_v55 = vor.u32 %v13979_v48, %v9861_v47 }
  0xd4   :  { %v14070_v60 = vld [vmem:[#allocation8 + $0x80c] sm:$0xf]  ;;  %v9986_v6 = vor.u32 %v14006_v57, %v9983_v59  ;;  %2321 = vmatpush.bf16.msra.mxu3 %v10274_v58  ;;  %2296 = vmatpush.bf16.msra.mxu1 %v9730_v5  ;;  %v14043_v51 = vld [vmem:[#allocation8 + $0x72c] sm:$0xf0]  ;;  %v452_v58 = vperm.slane %v15320_v49, 0 }
  0xd5   :  { %v10239_v61 = vld [vmem:[#allocation8 + $0x828] sm:$0xf0]  ;;  %v9317_v53 = vld [vmem:[#allocation8 + $0xd0] sm:$0xf]  ;;  %v10118_v59 = vor.u32 %v14043_v51, %v10117_v50 }
  0xd6   :  { %v10242_v11 = vor.u32 %v14070_v60, %v10239_v61  ;;  %2283 = vmatpush.bf16.msra.mxu0 %v9474_v1  ;;  %2309 = vmatpush.bf16.msra.mxu2 %v9986_v6  ;;  %v13843_v56 = vld [vmem:[#allocation8 + $0xec] sm:$0xf0]  ;;  %v2078_v10 = vadd.f32 %v2077_v2, %v452_v58  ;;  %v9703_v58 = vld [vmem:[#allocation8 + $0x3f0] sm:$0xf0] }
  0xd7   :  { %2297 = vmatmul.bf16.vlgmr.msra.gmra.mxu1 %v15290_v8  ;;  %v9573_v57 = vld [vmem:[#allocation8 + $0x2d0] sm:$0xf]  ;;  %v9318_v1 = vor.u32 %v13843_v56, %v9317_v53  ;;  %v9447_v56 = vld [vmem:[#allocation8 + $0x1f0] sm:$0xf0] }
  0xd8   :  { %2322 = vmatpush.bf16.msra.mxu3 %v10242_v11  ;;  %2341 = vmatpush.bf16.msrb.mxu1 %v9702_v13  ;;  %v13907_v60 = vld [vmem:[#allocation8 + $0x2ec] sm:$0xf0] }
  0xd9   :  { %2310 = vmatmul.bf16.vlgmr.msra.gmra.mxu2 %v15294_v15  ;;  %2284 = vmatmul.bf16.vlgmr.msra.gmra.mxu0 %v15299_v25  ;;  %v9829_v61 = vld [vmem:[#allocation8 + $0x4d0] sm:$0xf]  ;;  %v9574_v3 = vor.u32 %v13907_v60, %v9573_v57  ;;  %v13935_v57 = vld [vmem:[#allocation8 + $0x3d4] sm:$0xf] }
  0xda   :  { %2328 = vmatpush.bf16.msrb.mxu0 %v9446_v12  ;;  %2354 = vmatpush.bf16.msrb.mxu2 %v9958_v14  ;;  %v13971_v62 = vld [vmem:[#allocation8 + $0x4ec] sm:$0xf0]  ;;  %v2079_v40 = vpop.f32.mrf.mxu0 }
  0xdb   :  { %2323 = vmatmul.bf16.vlgmr.msra.gmra.mxu3 %v15302_v31  ;;  %v10085_v63 = vld [vmem:[#allocation8 + $0x6d0] sm:$0xf]  ;;  %v9830_v4 = vor.u32 %v13971_v62, %v9829_v61  ;;  %v13999_v62 = vld [vmem:[#allocation8 + $0x5d4] sm:$0xf] }
  0xdc   :  { %2367 = vmatpush.bf16.msrb.mxu3 %v10214_v19  ;;  %2342 = vmatpush.bf16.msrb.mxu1 %v9670_v27  ;;  %v14035_v0 = vld [vmem:[#allocation8 + $0x6ec] sm:$0xf0]  ;;  %v2103_v32 = vpop.f32.mrf.mxu2  ;;  %v13911_v40 = vld [vmem:[#allocation8 + $0x314] sm:$0xf] }
  0xdd   :  { %v9285_v5 = vld [vmem:[#allocation8 + $0x90] sm:$0xf]  ;;  %v10086_v11 = vor.u32 %v14035_v0, %v10085_v63  ;;  %v9959_v63 = vld [vmem:[#allocation8 + $0x5f0] sm:$0xf0] }
  0xde   :  { %2329 = vmatpush.bf16.msrb.mxu0 %v9414_v26  ;;  %2355 = vmatpush.bf16.msrb.mxu2 %v9926_v28  ;;  %v13835_v6 = vld [vmem:[#allocation8 + $0xac] sm:$0xf0]  ;;  %v2090_v19 = vpop.f32.mrf.mxu1  ;;  %v2116_v36 = vpop.f32.mrf.mxu3 }
  0xdf   :  { %v13899_v12 = vld [vmem:[#allocation8 + $0x2ac] sm:$0xf0]  ;;  %v9286_v18 = vor.u32 %v13835_v6, %v9285_v5  ;;  %v2091_v26 = vadd.f32 %v2090_v19, %v2078_v10 }
  0xe0   :  { %2368 = vmatpush.bf16.msrb.mxu3 %v10182_v33  ;;  %2343 = vmatpush.bf16.msrb.mxu1 %v9638_v41  ;;  %v9797_v13 = vld [vmem:[#allocation8 + $0x490] sm:$0xf]  ;;  %v9542_v20 = vor.u32 %v13899_v12, %v9541_v7  ;;  %v13863_v7 = vld [vmem:[#allocation8 + $0x194] sm:$0xf] }
  0xe1   :  { %v13963_v14 = vld [vmem:[#allocation8 + $0x4ac] sm:$0xf0]  ;;  %v2104_v35 = vadd.f32 %v2103_v32, %v2091_v26  ;;  %v9415_v12 = vld [vmem:[#allocation8 + $0x1b0] sm:$0xf0] }
  0xe2   :  { %2330 = vmatpush.bf16.msrb.mxu0 %v9382_v39  ;;  %2356 = vmatpush.bf16.msrb.mxu2 %v9894_v42  ;;  %v10053_v16 = vld [vmem:[#allocation8 + $0x690] sm:$0xf]  ;;  %v9798_v21 = vor.u32 %v13963_v14, %v9797_v13  ;;  %v13927_v13 = vld [vmem:[#allocation8 + $0x394] sm:$0xf]  ;;  %v9418_v19 = vor.u32 %v13863_v7, %v9415_v12 }
  0xe3   :  { %v14027_v17 = vld [vmem:[#allocation8 + $0x6ac] sm:$0xf0]  ;;  %v9671_v14 = vld [vmem:[#allocation8 + $0x3b0] sm:$0xf0] }
  0xe4   :  { %2369 = vmatpush.bf16.msrb.mxu3 %v10150_v46  ;;  %2344 = vmatpush.bf16.msrb.mxu1 %v9606_v54  ;;  %v9253_v22 = vld [vmem:[#allocation8 + $0x50] sm:$0xf]  ;;  %v10054_v27 = vor.u32 %v14027_v17, %v10053_v16  ;;  %v15323_v46 = vadd.f32 %v2116_v36, %v2104_v35  ;;  %v13871_v54 = vld [vmem:[#allocation8 + $0x1d4] sm:$0xf]  ;;  %v2105_v2 = vpop.f32.mrf.mxu2 }
  0xe5   :  { %v13827_v23 = vld [vmem:[#allocation8 + $0x6c] sm:$0xf0]  ;;  %v13991_v16 = vld [vmem:[#allocation8 + $0x594] sm:$0xf] }
  0xe6   :  { %2331 = vmatpush.bf16.msrb.mxu0 %v9350_v52  ;;  %2357 = vmatpush.bf16.msrb.mxu2 %v9862_v55  ;;  %v9509_v24 = vld [vmem:[#allocation8 + $0x250] sm:$0xf]  ;;  %v9254_v37 = vor.u32 %v13827_v23, %v9253_v22  ;;  %v2118_v10 = vpop.f32.mrf.mxu3  ;;  %v9927_v17 = vld [vmem:[#allocation8 + $0x5b0] sm:$0xf0] }
  0xe7   :  { %v13891_v28 = vld [vmem:[#allocation8 + $0x26c] sm:$0xf0]  ;;  %v13855_v23 = vld [vmem:[#allocation8 + $0x154] sm:$0xf] }
  0xe8   :  { %2370 = vmatpush.bf16.msrb.mxu3 %v10118_v59  ;;  %2345 = vmatpush.bf16.msrb.mxu1 %v9574_v3  ;;  %v9765_v29 = vld [vmem:[#allocation8 + $0x450] sm:$0xf]  ;;  %v9510_v41 = vor.u32 %v13891_v28, %v9509_v24  ;;  %v2092_v59 = vpop.f32.mrf.mxu1  ;;  %v9450_v3 = vor.u32 %v13871_v54, %v9447_v56  ;;  %v9930_v24 = vor.u32 %v13991_v16, %v9927_v17  ;;  %v9383_v26 = vld [vmem:[#allocation8 + $0x170] sm:$0xf0] }
  0xe9   :  { %v13955_v30 = vld [vmem:[#allocation8 + $0x46c] sm:$0xf0]  ;;  %v9639_v28 = vld [vmem:[#allocation8 + $0x370] sm:$0xf0] }
  0xea   :  { %2332 = vmatpush.bf16.msrb.mxu0 %v9318_v1  ;;  %2358 = vmatpush.bf16.msrb.mxu2 %v9830_v4  ;;  %v10021_v33 = vld [vmem:[#allocation8 + $0x650] sm:$0xf]  ;;  %v9766_v42 = vor.u32 %v13955_v30, %v9765_v29  ;;  %v9706_v4 = vor.u32 %v13935_v57, %v9703_v58  ;;  %v13983_v29 = vld [vmem:[#allocation8 + $0x554] sm:$0xf] }
  0xeb   :  { %v14019_v34 = vld [vmem:[#allocation8 + $0x66c] sm:$0xf0]  ;;  %v9895_v30 = vld [vmem:[#allocation8 + $0x570] sm:$0xf0] }
  0xec   :  { %2371 = vmatpush.bf16.msrb.mxu3 %v10086_v11  ;;  %v9221_v38 = vld [vmem:[#allocation8 + $0x10] sm:$0xf]  ;;  %2346 = vmatpush.bf16.msrb.mxu1 %v9542_v20  ;;  %v10022_v47 = vor.u32 %v14019_v34, %v10021_v33  ;;  %v9962_v11 = vor.u32 %v13999_v62, %v9959_v63  ;;  %v9674_v20 = vor.u32 %v13927_v13, %v9671_v14  ;;  %v13839_v54 = vld [vmem:[#allocation8 + $0xd4] sm:$0xf] }
  0xed   :  { %v13819_v39 = vld [vmem:[#allocation8 + $0x2c] sm:$0xf0]  ;;  %v9386_v33 = vor.u32 %v13855_v23, %v9383_v26  ;;  %v9319_v57 = vld [vmem:[#allocation8 + $0xf0] sm:$0xf0] }
  0xee   :  { %2333 = vmatpush.bf16.msrb.mxu0 %v9286_v18  ;;  %2359 = vmatpush.bf16.msrb.mxu2 %v9798_v21  ;;  %v9477_v43 = vld [vmem:[#allocation8 + $0x210] sm:$0xf]  ;;  %v9222_v55 = vor.u32 %v13819_v39, %v9221_v38  ;;  %v9898_v38 = vor.u32 %v13983_v29, %v9895_v30  ;;  %v9351_v39 = vld [vmem:[#allocation8 + $0x130] sm:$0xf0] }
  0xef   :  { %v13883_v44 = vld [vmem:[#allocation8 + $0x22c] sm:$0xf0]  ;;  %v13903_v58 = vld [vmem:[#allocation8 + $0x2d4] sm:$0xf] }
  0xf0   :  { %v9733_v45 = vld [vmem:[#allocation8 + $0x410] sm:$0xf]  ;;  %2372 = vmatpush.bf16.msrb.mxu3 %v10054_v27  ;;  %2347 = vmatpush.bf16.msrb.mxu1 %v9510_v41  ;;  %v9478_v60 = vor.u32 %v13883_v44, %v9477_v43  ;;  %v13919_v27 = vld [vmem:[#allocation8 + $0x354] sm:$0xf] }
  0xf1   :  { %v13947_v48 = vld [vmem:[#allocation8 + $0x42c] sm:$0xf0]  ;;  %v9642_v34 = vor.u32 %v13919_v27, %v9639_v28  ;;  %v9607_v41 = vld [vmem:[#allocation8 + $0x330] sm:$0xf0] }
  0xf2   :  { %v9989_v50 = vld [vmem:[#allocation8 + $0x610] sm:$0xf]  ;;  %2334 = vmatpush.bf16.msrb.mxu0 %v9254_v37  ;;  %2360 = vmatpush.bf16.msrb.mxu2 %v9766_v42  ;;  %v9734_v61 = vor.u32 %v13947_v48, %v9733_v45  ;;  %v13847_v37 = vld [vmem:[#allocation8 + $0x114] sm:$0xf]  ;;  %v453_v45 = vperm.slane %v15320_v49, 1 }
  0xf3   :  { %v14011_v51 = vld [vmem:[#allocation8 + $0x62c] sm:$0xf0]  ;;  %v13975_v42 = vld [vmem:[#allocation8 + $0x514] sm:$0xf] }
  0xf4   :  { %v10469_v52 = vld [vmem:[#allocation8 + $0x9d0] sm:$0xf]  ;;  %2373 = vmatpush.bf16.msrb.mxu3 %v10022_v47  ;;  %v9990_v0 = vor.u32 %v14011_v51, %v9989_v50  ;;  %2348 = vmatpush.bf16.msrb.mxu1 %v9478_v60  ;;  %v9863_v43 = vld [vmem:[#allocation8 + $0x530] sm:$0xf0]  ;;  %v9354_v50 = vor.u32 %v13847_v37, %v9351_v39  ;;  %v9610_v51 = vor.u32 %v13911_v40, %v9607_v41 }
  0xf5   :  { %v14131_v53 = vld [vmem:[#allocation8 + $0x9ec] sm:$0xf0]  ;;  %v9866_v56 = vor.u32 %v13975_v42, %v9863_v43  ;;  %v9575_v59 = vld [vmem:[#allocation8 + $0x2f0] sm:$0xf0] }
  0xf6   :  { %v10470_v1 = vor.u32 %v14131_v53, %v10469_v52  ;;  %v10437_v5 = vld [vmem:[#allocation8 + $0x990] sm:$0xf]  ;;  %2335 = vmatpush.bf16.msrb.mxu0 %v9222_v55  ;;  %2361 = vmatpush.bf16.msrb.mxu2 %v9734_v61  ;;  %v2129_v44 = vpop.f32.mrf.mxu0  ;;  %v2142_v55 = vpop.f32.mrf.mxu1  ;;  %v13967_v61 = vld [vmem:[#allocation8 + $0x4d4] sm:$0xf]  ;;  %v9578_v2 = vor.u32 %v13903_v58, %v9575_v59  ;;  %v9453_v58 = vld [vmem:[#allocation8 + $0x1d8] sm:$0xf] }
  0xf7   :  { %v14123_v6 = vld [vmem:[#allocation8 + $0x9ac] sm:$0xf0]  ;;  %2349 = vmatmul.bf16.vlgmr.msrb.gmra.mxu1 %v15299_v25  ;;  %v2130_v48 = vadd.f32 %v2129_v44, %v15323_v46  ;;  %v9831_v62 = vld [vmem:[#allocation8 + $0x4f0] sm:$0xf0]  ;;  %v2143_v63 = vadd.f32 %v2142_v55, %v453_v45  ;;  %v13876_v59 = vld [vmem:[#allocation8 + $0x1f4] sm:$0xf0] }
  0xf8   :  { %2374 = vmatpush.bf16.msrb.mxu3 %v9990_v0  ;;  %v10438_v18 = vor.u32 %v14123_v6, %v10437_v5  ;;  %2393 = vmatpush.bf16.msra.mxu1 %v9450_v3  ;;  %v10405_v21 = vld [vmem:[#allocation8 + $0x950] sm:$0xf]  ;;  %v13831_v5 = vld [vmem:[#allocation8 + $0x94] sm:$0xf]  ;;  %v9834_v6 = vor.u32 %v13967_v61, %v9831_v62  ;;  %v9709_v62 = vld [vmem:[#allocation8 + $0x3d8] sm:$0xf] }
  0xf9   :  { %v14115_v22 = vld [vmem:[#allocation8 + $0x96c] sm:$0xf0]  ;;  %2362 = vmatmul.bf16.vlgmr.msrb.gmra.mxu2 %v15290_v8  ;;  %2336 = vmatmul.bf16.vlgmr.msrb.gmra.mxu0 %v15292_v9  ;;  %v2588_v60 = vpack.c.bf16 %v2130_v48, %v2130_v48  ;;  %v9287_v7 = vld [vmem:[#allocation8 + $0xb0] sm:$0xf0] }
  0xfa   :  { %2380 = vmatpush.bf16.msra.mxu0 %v10470_v1  ;;  %2406 = vmatpush.bf16.msra.mxu2 %v9706_v4  ;;  %v10406_v32 = vor.u32 %v14115_v22, %v10405_v21  ;;  %v10373_v35 = vld [vmem:[#allocation8 + $0x910] sm:$0xf]  ;;  %v9322_v1 = vor.u32 %v13839_v54, %v9319_v57  ;;  %v13895_v10 = vld [vmem:[#allocation8 + $0x294] sm:$0xf] }
  0xfb   :  { %2375 = vmatmul.bf16.vlgmr.msrb.gmra.mxu3 %v15294_v15  ;;  %v14107_v36 = vld [vmem:[#allocation8 + $0x92c] sm:$0xf0]  ;;  %v2596_v46 = vunpack.c.l.bf16 %v2588_v60  ;;  %v13959_v14 = vld [vmem:[#allocation8 + $0x494] sm:$0xf] }
  0xfc   :  { %2419 = vmatpush.bf16.msra.mxu3 %v9962_v11  ;;  %2394 = vmatpush.bf16.msra.mxu1 %v9418_v19  ;;  %v10374_v47 = vor.u32 %v14107_v36, %v10373_v35  ;;  %v10341_v52 = vld [vmem:[#allocation8 + $0x8d0] sm:$0xf]  ;;  %v9543_v11 = vld [vmem:[#allocation8 + $0x2b0] sm:$0xf0]  ;;  %v2155_v12 = vpop.f32.mrf.mxu2 }
  0xfd   :  { %v14099_v53 = vld [vmem:[#allocation8 + $0x8ec] sm:$0xf0]  ;;  %14975 = vtanh.f32 %v2596_v46  ;;  %v9799_v16 = vld [vmem:[#allocation8 + $0x4b0] sm:$0xf0]  ;;  %v2156_v17 = vadd.f32 %v2155_v12, %v2143_v63  ;;  %v9546_v21 = vor.u32 %v13895_v10, %v9543_v11  ;;  %v13940_v63 = vld [vmem:[#allocation8 + $0x3f4] sm:$0xf0] }
  0xfe   :  { %2381 = vmatpush.bf16.msra.mxu0 %v10438_v18  ;;  %2407 = vmatpush.bf16.msra.mxu2 %v9674_v20  ;;  %v10342_v0 = vor.u32 %v14099_v53, %v10341_v52  ;;  %v10309_v3 = vld [vmem:[#allocation8 + $0x890] sm:$0xf]  ;;  %v2168_v13 = vpop.f32.mrf.mxu3  ;;  %v2131_v18 = vpop.f32.mrf.mxu0  ;;  %v9290_v20 = vor.u32 %v13831_v5, %v9287_v7  ;;  %v9802_v28 = vor.u32 %v13959_v14, %v9799_v16  ;;  %v9255_v29 = vld [vmem:[#allocation8 + $0x70] sm:$0xf0]  ;;  %v9421_v10 = vld [vmem:[#allocation8 + $0x198] sm:$0xf] }
  0xff   :  { %v14091_v4 = vld [vmem:[#allocation8 + $0x8ac] sm:$0xf0]  ;;  %v15331_v26 = vadd.f32 %v2168_v13, %v2156_v17  ;;  %v2144_v27 = vpop.f32.mrf.mxu1  ;;  %v13887_v30 = vld [vmem:[#allocation8 + $0x254] sm:$0xf]  ;;  %v13868_v11 = vld [vmem:[#allocation8 + $0x1b4] sm:$0xf0] }
 0x100   :  { %2420 = vmatpush.bf16.msra.mxu3 %v9930_v24  ;;  %2395 = vmatpush.bf16.msra.mxu1 %v9386_v33  ;;  %v10310_v19 = vor.u32 %v14091_v4, %v10309_v3  ;;  %v10277_v22 = vld [vmem:[#allocation8 + $0x850] sm:$0xf]  ;;  %v13823_v24 = vld [vmem:[#allocation8 + $0x54] sm:$0xf]  ;;  %v9677_v12 = vld [vmem:[#allocation8 + $0x398] sm:$0xf]  ;;  %v9422_v17 = vor.u32 %v13868_v11, %v9421_v10 }
 0x101   :  { %v14083_v23 = vld [vmem:[#allocation8 + $0x86c] sm:$0xf0]  ;;  %v13951_v33 = vld [vmem:[#allocation8 + $0x454] sm:$0xf]  ;;  %v9258_v40 = vor.u32 %v13823_v24, %v9255_v29  ;;  %v13932_v13 = vld [vmem:[#allocation8 + $0x3b4] sm:$0xf0] }
 0x102   :  { %2382 = vmatpush.bf16.msra.mxu0 %v10406_v32  ;;  %2408 = vmatpush.bf16.msra.mxu2 %v9642_v34  ;;  %v9511_v32 = vld [vmem:[#allocation8 + $0x270] sm:$0xf0]  ;;  %v10278_v36 = vor.u32 %v14083_v23, %v10277_v22  ;;  %v10245_v37 = vld [vmem:[#allocation8 + $0x810] sm:$0xf]  ;;  %v9389_v23 = vld [vmem:[#allocation8 + $0x158] sm:$0xf] }
 0x103   :  { %v9767_v34 = vld [vmem:[#allocation8 + $0x470] sm:$0xf0]  ;;  %v14976_v35 = vpop.eup %14975  ;;  %v9514_v41 = vor.u32 %v13887_v30, %v9511_v32  ;;  %v13860_v24 = vld [vmem:[#allocation8 + $0x174] sm:$0xf0] }
 0x104   :  { %2421 = vmatpush.bf16.msra.mxu3 %v9898_v38  ;;  %2396 = vmatpush.bf16.msra.mxu1 %v9354_v50  ;;  %v14075_v38 = vld [vmem:[#allocation8 + $0x82c] sm:$0xf0]  ;;  %v15333_v39 = vpack.c.bf16 %v14976_v35, %v14976_v35  ;;  %v13815_v42 = vld [vmem:[#allocation8 + $0x14] sm:$0xf]  ;;  %v9770_v45 = vor.u32 %v13951_v33, %v9767_v34  ;;  %v9645_v27 = vld [vmem:[#allocation8 + $0x358] sm:$0xf]  ;;  %v9390_v32 = vor.u32 %v13860_v24, %v9389_v23 }
 0x105   :  { %v9223_v43 = vld [vmem:[#allocation8 + $0x30] sm:$0xf0]  ;;  %v9549_v11 = vld [vmem:[#allocation8 + $0x298] sm:$0xf] }
 0x106   :  { %2383 = vmatpush.bf16.msra.mxu0 %v10374_v47  ;;  %2409 = vmatpush.bf16.msra.mxu2 %v9610_v51  ;;  %v13879_v44 = vld [vmem:[#allocation8 + $0x214] sm:$0xf]  ;;  %v2157_v51 = vpop.f32.mrf.mxu2  ;;  %v2170_v52 = vpop.f32.mrf.mxu3  ;;  %v9226_v60 = vor.u32 %v13815_v42, %v9223_v43  ;;  %v13916_v42 = vld [vmem:[#allocation8 + $0x334] sm:$0xf0] }
 0x107   :  { %v9479_v47 = vld [vmem:[#allocation8 + $0x230] sm:$0xf0] }
 0x108   :  { %2422 = vmatpush.bf16.msra.mxu3 %v9866_v56  ;;  %2397 = vmatpush.bf16.msra.mxu1 %v9322_v1  ;;  %v13943_v48 = vld [vmem:[#allocation8 + $0x414] sm:$0xf]  ;;  %v10246_v56 = vor.u32 %v14075_v38, %v10245_v37  ;;  %v9482_v61 = vor.u32 %v13879_v44, %v9479_v47  ;;  %v9357_v38 = vld [vmem:[#allocation8 + $0x118] sm:$0xf] }
 0x109   :  { %v9735_v50 = vld [vmem:[#allocation8 + $0x430] sm:$0xf0] }
 0x10a   :  { %2384 = vmatpush.bf16.msra.mxu0 %v10342_v0  ;;  %2410 = vmatpush.bf16.msra.mxu2 %v9578_v2  ;;  %v14063_v53 = vld [vmem:[#allocation8 + $0x7d4] sm:$0xf]  ;;  %v9738_v0 = vor.u32 %v13943_v48, %v9735_v50  ;;  %v9454_v2 = vor.u32 %v13876_v59, %v9453_v58  ;;  %v9581_v59 = vld [vmem:[#allocation8 + $0x2d8] sm:$0xf] }
 0x10b   :  { %v10215_v54 = vld [vmem:[#allocation8 + $0x7f0] sm:$0xf0] }
 0x10c   :  { %2423 = vmatpush.bf16.msra.mxu3 %v9834_v6  ;;  %2398 = vmatpush.bf16.msra.mxu1 %v9290_v20  ;;  %v14127_v55 = vld [vmem:[#allocation8 + $0x9d4] sm:$0xf]  ;;  %v10218_v46 = vor.u32 %v14063_v53, %v10215_v54  ;;  %v9710_v6 = vor.u32 %v13940_v63, %v9709_v62 }
 0x10d   :  { %v10471_v57 = vld [vmem:[#allocation8 + $0x9f0] sm:$0xf0] }
 0x10e   :  { %2385 = vmatpush.bf16.msra.mxu0 %v10310_v19  ;;  %2411 = vmatpush.bf16.msra.mxu2 %v9546_v21  ;;  %v10474_v1 = vor.u32 %v14127_v55, %v10471_v57  ;;  %v14055_v3 = vld [vmem:[#allocation8 + $0x794] sm:$0xf]  ;;  %v9678_v21 = vor.u32 %v13932_v13, %v9677_v12  ;;  %v13844_v57 = vld [vmem:[#allocation8 + $0xf4] sm:$0xf0] }
 0x10f   :  { %v10183_v4 = vld [vmem:[#allocation8 + $0x7b0] sm:$0xf0]  ;;  %v13900_v12 = vld [vmem:[#allocation8 + $0x2b4] sm:$0xf0] }
 0x110   :  { %2424 = vmatpush.bf16.msra.mxu3 %v9802_v28  ;;  %2399 = vmatpush.bf16.msra.mxu1 %v9258_v40  ;;  %v14119_v5 = vld [vmem:[#allocation8 + $0x994] sm:$0xf]  ;;  %v10186_v14 = vor.u32 %v14055_v3, %v10183_v4  ;;  %v13924_v28 = vld [vmem:[#allocation8 + $0x374] sm:$0xf0]  ;;  %v9550_v24 = vor.u32 %v13900_v12, %v9549_v11  ;;  %v9423_v11 = vld [vmem:[#allocation8 + $0x1b8] sm:$0xf0] }
 0x111   :  { %v10439_v7 = vld [vmem:[#allocation8 + $0x9b0] sm:$0xf0]  ;;  %v13852_v40 = vld [vmem:[#allocation8 + $0x134] sm:$0xf0] }
 0x112   :  { %2386 = vmatpush.bf16.msra.mxu0 %v10278_v36  ;;  %2412 = vmatpush.bf16.msra.mxu2 %v9514_v41  ;;  %v10442_v16 = vor.u32 %v14119_v5, %v10439_v7  ;;  %v14047_v18 = vld [vmem:[#allocation8 + $0x754] sm:$0xf]  ;;  %v9646_v36 = vor.u32 %v13924_v28, %v9645_v27  ;;  %v9613_v41 = vld [vmem:[#allocation8 + $0x318] sm:$0xf]  ;;  %v9358_v50 = vor.u32 %v13852_v40, %v9357_v38 }
 0x113   :  { %v10151_v19 = vld [vmem:[#allocation8 + $0x770] sm:$0xf0]  ;;  %v9614_v54 = vor.u32 %v13916_v42, %v9613_v41  ;;  %v9293_v5 = vld [vmem:[#allocation8 + $0x98] sm:$0xf] }
 0x114   :  { %2425 = vmatpush.bf16.msra.mxu3 %v9770_v45  ;;  %2400 = vmatpush.bf16.msra.mxu1 %v9226_v60  ;;  %v14111_v20 = vld [vmem:[#allocation8 + $0x954] sm:$0xf]  ;;  %v10154_v29 = vor.u32 %v14047_v18, %v10151_v19  ;;  %v2194_v47 = vpop.f32.mrf.mxu1  ;;  %v13908_v60 = vld [vmem:[#allocation8 + $0x2f4] sm:$0xf0] }
 0x115   :  { %v10407_v22 = vld [vmem:[#allocation8 + $0x970] sm:$0xf0]  ;;  %v9582_v3 = vor.u32 %v13908_v60, %v9581_v59  ;;  %v9261_v28 = vld [vmem:[#allocation8 + $0x58] sm:$0xf] }
 0x116   :  { %2387 = vmatpush.bf16.msra.mxu0 %v10246_v56  ;;  %2413 = vmatpush.bf16.msra.mxu2 %v9482_v61  ;;  %v10410_v30 = vor.u32 %v14111_v20, %v10407_v22  ;;  %v14039_v33 = vld [vmem:[#allocation8 + $0x714] sm:$0xf]  ;;  %v2181_v43 = vpop.f32.mrf.mxu0  ;;  %v9325_v56 = vld [vmem:[#allocation8 + $0xd8] sm:$0xf]  ;;  %v454_v61 = vperm.slane %v15320_v49, 2 }
 0x117   :  { %2401 = vmatmul.bf16.vlgmr.msra.gmra.mxu1 %v15292_v9  ;;  %v10119_v34 = vld [vmem:[#allocation8 + $0x730] sm:$0xf0]  ;;  %v2182_v45 = vadd.f32 %v2181_v43, %v15331_v26  ;;  %v9229_v41 = vld [vmem:[#allocation8 + $0x18] sm:$0xf] }
 0x118   :  { %2426 = vmatpush.bf16.msra.mxu3 %v9738_v0  ;;  %2445 = vmatpush.bf16.msrb.mxu1 %v10474_v1  ;;  %v14103_v35 = vld [vmem:[#allocation8 + $0x914] sm:$0xf]  ;;  %v10122_v44 = vor.u32 %v14039_v33, %v10119_v34  ;;  %v9326_v0 = vor.u32 %v13844_v57, %v9325_v56  ;;  %v14068_v56 = vld [vmem:[#allocation8 + $0x7f4] sm:$0xf0] }
 0x119   :  { %2388 = vmatmul.bf16.vlgmr.msra.gmra.mxu0 %v15302_v31  ;;  %2414 = vmatmul.bf16.vlgmr.msra.gmra.mxu2 %v15299_v25  ;;  %v10375_v37 = vld [vmem:[#allocation8 + $0x930] sm:$0xf0]  ;;  %v2195_v58 = vadd.f32 %v2194_v47, %v2182_v45  ;;  %v9485_v45 = vld [vmem:[#allocation8 + $0x218] sm:$0xf] }
 0x11a   :  { %2432 = vmatpush.bf16.msrb.mxu0 %v10218_v46  ;;  %2458 = vmatpush.bf16.msrb.mxu2 %v9454_v2  ;;  %v10378_v48 = vor.u32 %v14103_v35, %v10375_v37  ;;  %v14031_v51 = vld [vmem:[#allocation8 + $0x6d4] sm:$0xf]  ;;  %v13884_v47 = vld [vmem:[#allocation8 + $0x234] sm:$0xf0] }
 0x11b   :  { %2427 = vmatmul.bf16.vlgmr.msra.gmra.mxu3 %v15290_v8  ;;  %v10087_v52 = vld [vmem:[#allocation8 + $0x6f0] sm:$0xf0]  ;;  %v2589_v62 = vpack.c.bf16 %v2195_v58, %v2195_v58  ;;  %v10477_v57 = vld [vmem:[#allocation8 + $0x9d8] sm:$0xf] }
 0x11c   :  { %2471 = vmatpush.bf16.msrb.mxu3 %v9710_v6  ;;  %2446 = vmatpush.bf16.msrb.mxu1 %v10442_v16  ;;  %v14095_v53 = vld [vmem:[#allocation8 + $0x8d4] sm:$0xf]  ;;  %v10090_v26 = vor.u32 %v14031_v51, %v10087_v52  ;;  %v13836_v6 = vld [vmem:[#allocation8 + $0xb4] sm:$0xf0]  ;;  %v2207_v10 = vpop.f32.mrf.mxu2 }
 0x11d   :  { %v10343_v55 = vld [vmem:[#allocation8 + $0x8f0] sm:$0xf0]  ;;  %v2597_v7 = vunpack.c.l.bf16 %v2589_v62  ;;  %v2208_v49 = vadd.f32 %v2207_v10, %v454_v61  ;;  %v9294_v19 = vor.u32 %v13836_v6, %v9293_v5  ;;  %v9965_v51 = vld [vmem:[#allocation8 + $0x5d8] sm:$0xf]  ;;  %v13872_v61 = vld [vmem:[#allocation8 + $0x1dc] sm:$0xf]  ;;  %v9486_v62 = vor.u32 %v13884_v47, %v9485_v45 }
 0x11e   :  { %2433 = vmatpush.bf16.msrb.mxu0 %v10186_v14  ;;  %2459 = vmatpush.bf16.msrb.mxu2 %v9422_v17  ;;  %v10346_v63 = vor.u32 %v14095_v53, %v10343_v55  ;;  %v14023_v46 = vld [vmem:[#allocation8 + $0x694] sm:$0xf]  ;;  %v2220_v13 = vpop.f32.mrf.mxu3  ;;  %v2183_v14 = vpop.f32.mrf.mxu0  ;;  %v14004_v52 = vld [vmem:[#allocation8 + $0x5f4] sm:$0xf0]  ;;  %v13864_v10 = vld [vmem:[#allocation8 + $0x19c] sm:$0xf] }
 0x11f   :  { %v10055_v1 = vld [vmem:[#allocation8 + $0x6b0] sm:$0xf0]  ;;  %14977 = vtanh.f32 %v2597_v7  ;;  %v2196_v17 = vpop.f32.mrf.mxu1  ;;  %v15341_v23 = vadd.f32 %v2220_v13, %v2208_v49  ;;  %v10221_v53 = vld [vmem:[#allocation8 + $0x7d8] sm:$0xf] }
 0x120   :  { %2472 = vmatpush.bf16.msrb.mxu3 %v9678_v21  ;;  %2447 = vmatpush.bf16.msrb.mxu1 %v10410_v30  ;;  %v14087_v2 = vld [vmem:[#allocation8 + $0x894] sm:$0xf]  ;;  %v10058_v16 = vor.u32 %v14023_v46, %v10055_v1  ;;  %v9517_v30 = vld [vmem:[#allocation8 + $0x258] sm:$0xf] }
 0x121   :  { %v10311_v4 = vld [vmem:[#allocation8 + $0x8b0] sm:$0xf0]  ;;  %v14132_v58 = vld [vmem:[#allocation8 + $0x9f4] sm:$0xf0] }
 0x122   :  { %2434 = vmatpush.bf16.msrb.mxu0 %v10154_v29  ;;  %2460 = vmatpush.bf16.msrb.mxu2 %v9390_v32  ;;  %v10314_v18 = vor.u32 %v14087_v2, %v10311_v4  ;;  %v14015_v20 = vld [vmem:[#allocation8 + $0x654] sm:$0xf]  ;;  %v13828_v29 = vld [vmem:[#allocation8 + $0x74] sm:$0xf0]  ;;  %v10478_v46 = vor.u32 %v14132_v58, %v10477_v57  ;;  %v13840_v57 = vld [vmem:[#allocation8 + $0xdc] sm:$0xf] }
 0x123   :  { %v10023_v21 = vld [vmem:[#allocation8 + $0x670] sm:$0xf0]  ;;  %v13892_v32 = vld [vmem:[#allocation8 + $0x274] sm:$0xf0]  ;;  %v9262_v37 = vor.u32 %v13828_v29, %v9261_v28  ;;  %v9327_v58 = vld [vmem:[#allocation8 + $0xf8] sm:$0xf0] }
 0x124   :  { %2473 = vmatpush.bf16.msrb.mxu3 %v9646_v36  ;;  %2448 = vmatpush.bf16.msrb.mxu1 %v10378_v48  ;;  %v14079_v22 = vld [vmem:[#allocation8 + $0x854] sm:$0xf]  ;;  %v10026_v33 = vor.u32 %v14015_v20, %v10023_v21  ;;  %v9518_v43 = vor.u32 %v13892_v32, %v9517_v30  ;;  %v2209_v48 = vpop.f32.mrf.mxu2  ;;  %v9933_v1 = vld [vmem:[#allocation8 + $0x598] sm:$0xf] }
 0x125   :  { %v10279_v27 = vld [vmem:[#allocation8 + $0x870] sm:$0xf0]  ;;  %v14978_v42 = vpop.eup %14977  ;;  %v13996_v2 = vld [vmem:[#allocation8 + $0x5b4] sm:$0xf0] }
 0x126   :  { %2435 = vmatpush.bf16.msrb.mxu0 %v10122_v44  ;;  %2461 = vmatpush.bf16.msrb.mxu2 %v9358_v50  ;;  %v14007_v34 = vld [vmem:[#allocation8 + $0x614] sm:$0xf]  ;;  %v10282_v36 = vor.u32 %v14079_v22, %v10279_v27  ;;  %v13820_v44 = vld [vmem:[#allocation8 + $0x34] sm:$0xf0]  ;;  %v15343_v50 = vpack.c.bf16 %v14978_v42, %v14978_v42  ;;  %v9934_v12 = vor.u32 %v13996_v2, %v9933_v1  ;;  %v13856_v22 = vld [vmem:[#allocation8 + $0x15c] sm:$0xf] }
 0x127   :  { %v9991_v35 = vld [vmem:[#allocation8 + $0x630] sm:$0xf0]  ;;  %v9230_v60 = vor.u32 %v13820_v44, %v9229_v41  ;;  %v14060_v5 = vld [vmem:[#allocation8 + $0x7b4] sm:$0xf0] }
 0x128   :  { %2474 = vmatpush.bf16.msrb.mxu3 %v9614_v54  ;;  %2449 = vmatpush.bf16.msrb.mxu1 %v10346_v63  ;;  %v14071_v38 = vld [vmem:[#allocation8 + $0x814] sm:$0xf]  ;;  %v2222_v54 = vpop.f32.mrf.mxu3  ;;  %v9994_v55 = vor.u32 %v14007_v34, %v9991_v35  ;;  %v9966_v63 = vor.u32 %v14004_v52, %v9965_v51  ;;  %v10445_v6 = vld [vmem:[#allocation8 + $0x998] sm:$0xf] }
 0x129   :  { %v10247_v40 = vld [vmem:[#allocation8 + $0x830] sm:$0xf0]  ;;  %v14124_v7 = vld [vmem:[#allocation8 + $0x9b4] sm:$0xf0] }
 0x12a   :  { %2436 = vmatpush.bf16.msrb.mxu0 %v10090_v26  ;;  %2462 = vmatpush.bf16.msrb.mxu2 %v9326_v0  ;;  %v10250_v59 = vor.u32 %v14071_v38, %v10247_v40  ;;  %v9455_v26 = vld [vmem:[#allocation8 + $0x1f8] sm:$0xf0]  ;;  %v10222_v0 = vor.u32 %v14068_v56, %v10221_v53  ;;  %v10446_v13 = vor.u32 %v14124_v7, %v10445_v6  ;;  %v9901_v14 = vld [vmem:[#allocation8 + $0x558] sm:$0xf] }
 0x12b   :  { %v9458_v4 = vor.u32 %v13872_v61, %v9455_v26  ;;  %v10157_v17 = vld [vmem:[#allocation8 + $0x758] sm:$0xf]  ;;  %v13848_v38 = vld [vmem:[#allocation8 + $0x11c] sm:$0xf] }
 0x12c   :  { %2475 = vmatpush.bf16.msrb.mxu3 %v9582_v3  ;;  %2450 = vmatpush.bf16.msrb.mxu1 %v10314_v18  ;;  %v10189_v3 = vld [vmem:[#allocation8 + $0x798] sm:$0xf]  ;;  %v9426_v18 = vor.u32 %v13864_v10, %v9423_v11  ;;  %v9359_v40 = vld [vmem:[#allocation8 + $0x138] sm:$0xf0] }
 0x12d   :  { %v10190_v49 = vor.u32 %v14060_v5, %v10189_v3  ;;  %v10413_v20 = vld [vmem:[#allocation8 + $0x958] sm:$0xf]  ;;  %v9362_v53 = vor.u32 %v13848_v38, %v9359_v40  ;;  %v13832_v5 = vld [vmem:[#allocation8 + $0x9c] sm:$0xf] }
 0x12e   :  { %2437 = vmatpush.bf16.msrb.mxu0 %v10058_v16  ;;  %2463 = vmatpush.bf16.msrb.mxu2 %v9294_v19  ;;  %v13988_v16 = vld [vmem:[#allocation8 + $0x574] sm:$0xf0]  ;;  %v9295_v6 = vld [vmem:[#allocation8 + $0xb8] sm:$0xf0] }
 0x12f   :  { %v14052_v19 = vld [vmem:[#allocation8 + $0x774] sm:$0xf0]  ;;  %v9902_v27 = vor.u32 %v13988_v16, %v9901_v14 }
 0x130   :  { %2476 = vmatpush.bf16.msrb.mxu3 %v9550_v24  ;;  %2451 = vmatpush.bf16.msrb.mxu1 %v10282_v36  ;;  %v14116_v21 = vld [vmem:[#allocation8 + $0x974] sm:$0xf0]  ;;  %v9391_v24 = vld [vmem:[#allocation8 + $0x178] sm:$0xf0]  ;;  %v10158_v28 = vor.u32 %v14052_v19, %v10157_v17  ;;  %v9298_v19 = vor.u32 %v13832_v5, %v9295_v6 }
 0x131   :  { %v10414_v29 = vor.u32 %v14116_v21, %v10413_v20  ;;  %v9869_v30 = vld [vmem:[#allocation8 + $0x518] sm:$0xf]  ;;  %v9394_v34 = vor.u32 %v13856_v22, %v9391_v24  ;;  %v14120_v5 = vld [vmem:[#allocation8 + $0x99c] sm:$0xf] }
 0x132   :  { %2438 = vmatpush.bf16.msrb.mxu0 %v10026_v33  ;;  %2464 = vmatpush.bf16.msrb.mxu2 %v9262_v37  ;;  %v13980_v32 = vld [vmem:[#allocation8 + $0x534] sm:$0xf0]  ;;  %v10447_v6 = vld [vmem:[#allocation8 + $0x9b8] sm:$0xf0] }
 0x133   :  { %v10125_v33 = vld [vmem:[#allocation8 + $0x718] sm:$0xf]  ;;  %v9870_v41 = vor.u32 %v13980_v32, %v9869_v30 }
 0x134   :  { %2477 = vmatpush.bf16.msrb.mxu3 %v9518_v43  ;;  %2452 = vmatpush.bf16.msrb.mxu1 %v10250_v59  ;;  %v14044_v35 = vld [vmem:[#allocation8 + $0x734] sm:$0xf0]  ;;  %v2246_v43 = vpop.f32.mrf.mxu1 }
 0x135   :  { %v10381_v36 = vld [vmem:[#allocation8 + $0x918] sm:$0xf]  ;;  %v10126_v44 = vor.u32 %v14044_v35, %v10125_v33 }
 0x136   :  { %2439 = vmatpush.bf16.msrb.mxu0 %v9994_v55  ;;  %2465 = vmatpush.bf16.msrb.mxu2 %v9230_v60  ;;  %v14108_v37 = vld [vmem:[#allocation8 + $0x934] sm:$0xf0]  ;;  %v2233_v42 = vpop.f32.mrf.mxu0 }
 0x137   :  { %2453 = vmatmul.bf16.vlgmr.msrb.gmra.mxu1 %v15302_v31  ;;  %v10382_v45 = vor.u32 %v14108_v37, %v10381_v36  ;;  %v9837_v47 = vld [vmem:[#allocation8 + $0x4d8] sm:$0xf]  ;;  %v2234_v52 = vadd.f32 %v2233_v42, %v15341_v23  ;;  %v9330_v23 = vor.u32 %v13840_v57, %v9327_v58  ;;  %v13816_v42 = vld [vmem:[#allocation8 + $0x1c] sm:$0xf] }
 0x138   :  { %2478 = vmatpush.bf16.msrb.mxu3 %v9486_v62  ;;  %2497 = vmatpush.bf16.msra.mxu1 %v10222_v0  ;;  %v13972_v48 = vld [vmem:[#allocation8 + $0x4f4] sm:$0xf0]  ;;  %v14128_v57 = vld [vmem:[#allocation8 + $0x9dc] sm:$0xf] }
 0x139   :  { %2440 = vmatmul.bf16.vlgmr.msrb.gmra.mxu0 %v15294_v15  ;;  %2466 = vmatmul.bf16.vlgmr.msrb.gmra.mxu2 %v15292_v9  ;;  %v10093_v51 = vld [vmem:[#allocation8 + $0x6d8] sm:$0xf]  ;;  %v2247_v59 = vadd.f32 %v2246_v43, %v2234_v52  ;;  %v9838_v60 = vor.u32 %v13972_v48, %v9837_v47  ;;  %v9231_v43 = vld [vmem:[#allocation8 + $0x38] sm:$0xf0] }
 0x13a   :  { %2484 = vmatpush.bf16.msra.mxu0 %v9966_v63  ;;  %2510 = vmatpush.bf16.msra.mxu2 %v10478_v46  ;;  %v14036_v54 = vld [vmem:[#allocation8 + $0x6f4] sm:$0xf0]  ;;  %v14000_v47 = vld [vmem:[#allocation8 + $0x5dc] sm:$0xf] }
 0x13b   :  { %2479 = vmatmul.bf16.vlgmr.msrb.gmra.mxu3 %v15299_v25  ;;  %v10349_v55 = vld [vmem:[#allocation8 + $0x8d8] sm:$0xf]  ;;  %v10094_v61 = vor.u32 %v14036_v54, %v10093_v51  ;;  %v9967_v52 = vld [vmem:[#allocation8 + $0x5f8] sm:$0xf0] }
 0x13c   :  { %2523 = vmatpush.bf16.msra.mxu3 %v9458_v4  ;;  %2498 = vmatpush.bf16.msra.mxu1 %v10190_v49  ;;  %v14100_v56 = vld [vmem:[#allocation8 + $0x8f4] sm:$0xf0]  ;;  %v2259_v46 = vpop.f32.mrf.mxu2  ;;  %v2248_v49 = vpop.f32.mrf.mxu1  ;;  %v10223_v54 = vld [vmem:[#allocation8 + $0x7f8] sm:$0xf0] }
 0x13d   :  { %v10350_v26 = vor.u32 %v14100_v56, %v10349_v55  ;;  %v9805_v62 = vld [vmem:[#allocation8 + $0x498] sm:$0xf]  ;;  %v2260_v4 = vadd.f32 %v2259_v46, %v2247_v59  ;;  %v10479_v58 = vld [vmem:[#allocation8 + $0x9f8] sm:$0xf0] }
 0x13e   :  { %2485 = vmatpush.bf16.msra.mxu0 %v9934_v12  ;;  %2511 = vmatpush.bf16.msra.mxu2 %v10446_v13  ;;  %v13964_v63 = vld [vmem:[#allocation8 + $0x4b4] sm:$0xf0]  ;;  %v15350_v7 = vpop.f32.mrf.mxu3  ;;  %v2235_v12 = vpop.f32.mrf.mxu0  ;;  %v9679_v46 = vld [vmem:[#allocation8 + $0x3b8] sm:$0xf0] }
 0x13f   :  { %v10061_v0 = vld [vmem:[#allocation8 + $0x698] sm:$0xf]  ;;  %v9806_v10 = vor.u32 %v13964_v63, %v9805_v62  ;;  %v2590_v11 = vpack.c.bf16 %v2260_v4, %v2260_v4  ;;  %v9970_v62 = vor.u32 %v14000_v47, %v9967_v52  ;;  %v10191_v4 = vld [vmem:[#allocation8 + $0x7b8] sm:$0xf0] }
 0x140   :  { %2524 = vmatpush.bf16.msra.mxu3 %v9426_v18  ;;  %2499 = vmatpush.bf16.msra.mxu1 %v10158_v28  ;;  %v14028_v1 = vld [vmem:[#allocation8 + $0x6b4] sm:$0xf0]  ;;  %v9263_v28 = vld [vmem:[#allocation8 + $0x78] sm:$0xf0] }
 0x141   :  { %v10317_v2 = vld [vmem:[#allocation8 + $0x898] sm:$0xf]  ;;  %v10062_v13 = vor.u32 %v14028_v1, %v10061_v0  ;;  %v2598_v20 = vunpack.c.l.bf16 %v2590_v11  ;;  %v13928_v0 = vld [vmem:[#allocation8 + $0x39c] sm:$0xf]  ;;  %v10482_v1 = vor.u32 %v14128_v57, %v10479_v58 }
 0x142   :  { %2486 = vmatpush.bf16.msra.mxu0 %v9902_v27  ;;  %2512 = vmatpush.bf16.msra.mxu2 %v10414_v29  ;;  %v14092_v3 = vld [vmem:[#allocation8 + $0x8b4] sm:$0xf0]  ;;  %v13824_v27 = vld [vmem:[#allocation8 + $0x5c] sm:$0xf] }
 0x143   :  { %v10318_v14 = vor.u32 %v14092_v3, %v10317_v2  ;;  %v9773_v16 = vld [vmem:[#allocation8 + $0x458] sm:$0xf]  ;;  %14979 = vtanh.f32 %v2598_v20  ;;  %v9266_v40 = vor.u32 %v13824_v27, %v9263_v28  ;;  %v9935_v2 = vld [vmem:[#allocation8 + $0x5b8] sm:$0xf0] }
 0x144   :  { %2525 = vmatpush.bf16.msra.mxu3 %v9394_v34  ;;  %2500 = vmatpush.bf16.msra.mxu1 %v10126_v44  ;;  %v13956_v17 = vld [vmem:[#allocation8 + $0x474] sm:$0xf0]  ;;  %v2261_v38 = vpop.f32.mrf.mxu2  ;;  %v13936_v44 = vld [vmem:[#allocation8 + $0x3dc] sm:$0xf] }
 0x145   :  { %v10029_v18 = vld [vmem:[#allocation8 + $0x658] sm:$0xf]  ;;  %v9774_v29 = vor.u32 %v13956_v17, %v9773_v16  ;;  %v14056_v3 = vld [vmem:[#allocation8 + $0x79c] sm:$0xf]  ;;  %v15354_v16 = vld [vmem:[#allocation10] sm:$0xff] }
 0x146   :  { %2487 = vmatpush.bf16.msra.mxu0 %v9870_v41  ;;  %2513 = vmatpush.bf16.msra.mxu2 %v10382_v45  ;;  %v14020_v21 = vld [vmem:[#allocation8 + $0x674] sm:$0xf0]  ;;  %v9711_v45 = vld [vmem:[#allocation8 + $0x3f8] sm:$0xf0]  ;;  %v2274_v48 = vpop.f32.mrf.mxu3  ;;  %v10194_v49 = vor.u32 %v14056_v3, %v10191_v4  ;;  %v455_v17 = vperm.slane %v15354_v16, 3 }
 0x147   :  { %v10285_v22 = vld [vmem:[#allocation8 + $0x858] sm:$0xf]  ;;  %v10030_v33 = vor.u32 %v14020_v21, %v10029_v18  ;;  %v13920_v11 = vld [vmem:[#allocation8 + $0x35c] sm:$0xf]  ;;  %v10450_v18 = vor.u32 %v14120_v5, %v10447_v6 }
 0x148   :  { %2526 = vmatpush.bf16.msra.mxu3 %v9362_v53  ;;  %2501 = vmatpush.bf16.msra.mxu1 %v10094_v61  ;;  %v14084_v24 = vld [vmem:[#allocation8 + $0x874] sm:$0xf0]  ;;  %v14064_v53 = vld [vmem:[#allocation8 + $0x7dc] sm:$0xf]  ;;  %v9714_v61 = vor.u32 %v13936_v44, %v9711_v45 }
 0x149   :  { %v9741_v30 = vld [vmem:[#allocation8 + $0x418] sm:$0xf]  ;;  %v10286_v34 = vor.u32 %v14084_v24, %v10285_v22  ;;  %v14980_v59 = vpop.eup %14979  ;;  %v10226_v63 = vor.u32 %v14064_v53, %v10223_v54  ;;  %v14048_v20 = vld [vmem:[#allocation8 + $0x75c] sm:$0xf] }
 0x14a   :  { %2488 = vmatpush.bf16.msra.mxu0 %v9838_v60  ;;  %2514 = vmatpush.bf16.msra.mxu2 %v10350_v26  ;;  %v13948_v32 = vld [vmem:[#allocation8 + $0x434] sm:$0xf0]  ;;  %v9234_v60 = vor.u32 %v13816_v42, %v9231_v43  ;;  %v15352_v26 = vpack.c.bf16 %v14980_v59, %v14980_v59  ;;  %v10159_v21 = vld [vmem:[#allocation8 + $0x778] sm:$0xf0] }
 0x14b   :  { %v9997_v35 = vld [vmem:[#allocation8 + $0x618] sm:$0xf]  ;;  %v9742_v51 = vor.u32 %v13948_v32, %v9741_v30  ;;  %v14112_v22 = vld [vmem:[#allocation8 + $0x95c] sm:$0xf]  ;;  %v2273_v30 = vadd.f32 %v15350_v7, %v455_v17 }
 0x14c   :  { %2527 = vmatpush.bf16.msra.mxu3 %v9330_v23  ;;  %2502 = vmatpush.bf16.msra.mxu1 %v10062_v13  ;;  %v14012_v36 = vld [vmem:[#allocation8 + $0x634] sm:$0xf0]  ;;  %v13992_v23 = vld [vmem:[#allocation8 + $0x59c] sm:$0xf] }
 0x14d   :  { %v10253_v37 = vld [vmem:[#allocation8 + $0x818] sm:$0xf]  ;;  %v9998_v55 = vor.u32 %v14012_v36, %v9997_v35  ;;  %v9938_v12 = vor.u32 %v13992_v23, %v9935_v2  ;;  %v9647_v13 = vld [vmem:[#allocation8 + $0x378] sm:$0xf0] }
 0x14e   :  { %2489 = vmatpush.bf16.msra.mxu0 %v9806_v10  ;;  %2515 = vmatpush.bf16.msra.mxu2 %v10318_v14  ;;  %v14076_v41 = vld [vmem:[#allocation8 + $0x834] sm:$0xf0]  ;;  %v9682_v10 = vor.u32 %v13928_v0, %v9679_v46  ;;  %v13984_v14 = vld [vmem:[#allocation8 + $0x55c] sm:$0xf]  ;;  %v9650_v27 = vor.u32 %v13920_v11, %v9647_v13 }
 0x14f   :  { %v10254_v56 = vor.u32 %v14076_v41, %v10253_v37  ;;  %v10415_v24 = vld [vmem:[#allocation8 + $0x978] sm:$0xf0] }
 0x150   :  { %2528 = vmatpush.bf16.msra.mxu3 %v9298_v19  ;;  %2503 = vmatpush.bf16.msra.mxu1 %v10030_v33  ;;  %v9903_v19 = vld [vmem:[#allocation8 + $0x578] sm:$0xf0]  ;;  %v10418_v35 = vor.u32 %v14112_v22, %v10415_v24 }
 0x151   :  { %v9906_v28 = vor.u32 %v13984_v14, %v9903_v19  ;;  %v13912_v32 = vld [vmem:[#allocation8 + $0x31c] sm:$0xf] }
 0x152   :  { %2490 = vmatpush.bf16.msra.mxu0 %v9774_v29  ;;  %2516 = vmatpush.bf16.msra.mxu2 %v10286_v34  ;;  %v10162_v29 = vor.u32 %v14048_v20, %v10159_v21  ;;  %v9615_v33 = vld [vmem:[#allocation8 + $0x338] sm:$0xf0] }
 0x153   :  { %v13976_v34 = vld [vmem:[#allocation8 + $0x51c] sm:$0xf]  ;;  %v9618_v41 = vor.u32 %v13912_v32, %v9615_v33 }
 0x154   :  { %2529 = vmatpush.bf16.msra.mxu3 %v9266_v40  ;;  %2504 = vmatpush.bf16.msra.mxu1 %v9998_v55  ;;  %v9871_v36 = vld [vmem:[#allocation8 + $0x538] sm:$0xf0] }
 0x155   :  { %v14040_v37 = vld [vmem:[#allocation8 + $0x71c] sm:$0xf]  ;;  %v9874_v43 = vor.u32 %v13976_v34, %v9871_v36 }
 0x156   :  { %2491 = vmatpush.bf16.msra.mxu0 %v9742_v51  ;;  %2517 = vmatpush.bf16.msra.mxu2 %v10254_v56  ;;  %v10127_v38 = vld [vmem:[#allocation8 + $0x738] sm:$0xf0]  ;;  %v2285_v42 = vpop.f32.mrf.mxu0  ;;  %v2298_v51 = vpop.f32.mrf.mxu1 }
 0x157   :  { %2505 = vmatmul.bf16.vlgmr.msra.gmra.mxu1 %v15294_v15  ;;  %v14104_v40 = vld [vmem:[#allocation8 + $0x91c] sm:$0xf]  ;;  %v10130_v44 = vor.u32 %v14040_v37, %v10127_v38  ;;  %v2286_v48 = vadd.f32 %v2285_v42, %v2273_v30 }
 0x158   :  { %2530 = vmatpush.bf16.msra.mxu3 %v9234_v60  ;;  %2549 = vmatpush.bf16.msrb.mxu1 %v9970_v62  ;;  %v13904_v45 = vld [vmem:[#allocation8 + $0x2dc] sm:$0xf] }
 0x159   :  { %2518 = vmatmul.bf16.vlgmr.msra.gmra.mxu2 %v15302_v31  ;;  %2492 = vmatmul.bf16.vlgmr.msra.gmra.mxu0 %v15290_v8  ;;  %v9583_v47 = vld [vmem:[#allocation8 + $0x2f8] sm:$0xf0]  ;;  %v2299_v58 = vadd.f32 %v2298_v51, %v2286_v48 }
 0x15a   :  { %2536 = vmatpush.bf16.msrb.mxu0 %v9714_v61  ;;  %2562 = vmatpush.bf16.msrb.mxu2 %v10226_v63  ;;  %v13968_v7 = vld [vmem:[#allocation8 + $0x4dc] sm:$0xf]  ;;  %v9586_v59 = vor.u32 %v13904_v45, %v9583_v47 }
 0x15b   :  { %2531 = vmatmul.bf16.vlgmr.msra.gmra.mxu3 %v15292_v9  ;;  %v10383_v9 = vld [vmem:[#allocation8 + $0x938] sm:$0xf0] }
 0x15c   :  { %2575 = vmatpush.bf16.msrb.mxu3 %v10482_v1  ;;  %2550 = vmatpush.bf16.msrb.mxu1 %v9938_v12  ;;  %v10386_v52 = vor.u32 %v14104_v40, %v10383_v9  ;;  %v9839_v53 = vld [vmem:[#allocation8 + $0x4f8] sm:$0xf0]  ;;  %v2311_v46 = vpop.f32.mrf.mxu2 }
 0x15d   :  { %v14032_v54 = vld [vmem:[#allocation8 + $0x6dc] sm:$0xf]  ;;  %v9842_v60 = vor.u32 %v13968_v7, %v9839_v53  ;;  %v2312_v4 = vadd.f32 %v2311_v46, %v2299_v58 }
 0x15e   :  { %2537 = vmatpush.bf16.msrb.mxu0 %v9682_v10  ;;  %2563 = vmatpush.bf16.msrb.mxu2 %v10194_v49  ;;  %v10095_v55 = vld [vmem:[#allocation8 + $0x6f8] sm:$0xf0]  ;;  %v2324_v5 = vpop.f32.mrf.mxu3  ;;  %v2287_v49 = vpop.f32.mrf.mxu0 }
 0x15f   :  { %v14096_v56 = vld [vmem:[#allocation8 + $0x8dc] sm:$0xf]  ;;  %v10098_v61 = vor.u32 %v14032_v54, %v10095_v55  ;;  %v2325_v12 = vadd.f32 %v2324_v5, %v2312_v4  ;;  %v2300_v20 = vpop.f32.mrf.mxu1  ;;  %v456_v55 = vperm.slane %v15354_v16, 4 }
 0x160   :  { %2576 = vmatpush.bf16.msrb.mxu3 %v10450_v18  ;;  %2551 = vmatpush.bf16.msrb.mxu1 %v9906_v28  ;;  %v10351_v57 = vld [vmem:[#allocation8 + $0x8f8] sm:$0xf0] }
 0x161   :  { %v13896_v62 = vld [vmem:[#allocation8 + $0x29c] sm:$0xf]  ;;  %v10354_v23 = vor.u32 %v14096_v56, %v10351_v57  ;;  %v2591_v28 = vpack.c.bf16 %v2325_v12, %v2325_v12 }
 0x162   :  { %2538 = vmatpush.bf16.msrb.mxu0 %v9650_v27  ;;  %2564 = vmatpush.bf16.msrb.mxu2 %v10162_v29  ;;  %v9551_v63 = vld [vmem:[#allocation8 + $0x2b8] sm:$0xf0] }
 0x163   :  { %v13960_v0 = vld [vmem:[#allocation8 + $0x49c] sm:$0xf]  ;;  %v9554_v11 = vor.u32 %v13896_v62, %v9551_v63  ;;  %v2599_v33 = vunpack.c.l.bf16 %v2591_v28 }
 0x164   :  { %2577 = vmatpush.bf16.msrb.mxu3 %v10418_v35  ;;  %2552 = vmatpush.bf16.msrb.mxu1 %v9874_v43  ;;  %v9807_v1 = vld [vmem:[#allocation8 + $0x4b8] sm:$0xf0]  ;;  %v2313_v40 = vpop.f32.mrf.mxu2 }
 0x165   :  { %v14024_v2 = vld [vmem:[#allocation8 + $0x69c] sm:$0xf]  ;;  %v9810_v13 = vor.u32 %v13960_v0, %v9807_v1  ;;  %14981 = vtanh.f32 %v2599_v33 }
 0x166   :  { %2539 = vmatpush.bf16.msrb.mxu0 %v9618_v41  ;;  %2565 = vmatpush.bf16.msrb.mxu2 %v10130_v44  ;;  %v10063_v3 = vld [vmem:[#allocation8 + $0x6b8] sm:$0xf0]  ;;  %v2326_v44 = vpop.f32.mrf.mxu3 }
 0x167   :  { %v14088_v6 = vld [vmem:[#allocation8 + $0x89c] sm:$0xf]  ;;  %v10066_v14 = vor.u32 %v14024_v2, %v10063_v3 }
 0x168   :  { %2578 = vmatpush.bf16.msrb.mxu3 %v10386_v52  ;;  %v10319_v10 = vld [vmem:[#allocation8 + $0x8b8] sm:$0xf0]  ;;  %2553 = vmatpush.bf16.msrb.mxu1 %v9842_v60 }
 0x169   :  { %v13888_v17 = vld [vmem:[#allocation8 + $0x25c] sm:$0xf]  ;;  %v10322_v21 = vor.u32 %v14088_v6, %v10319_v10 }
 0x16a   :  { %2540 = vmatpush.bf16.msrb.mxu0 %v9586_v59  ;;  %2566 = vmatpush.bf16.msrb.mxu2 %v10098_v61  ;;  %v9519_v18 = vld [vmem:[#allocation8 + $0x278] sm:$0xf0] }
 0x16b   :  { %v13952_v19 = vld [vmem:[#allocation8 + $0x45c] sm:$0xf]  ;;  %v9522_v32 = vor.u32 %v13888_v17, %v9519_v18  ;;  %v14982_v53 = vpop.eup %14981 }
 0x16c   :  { %2579 = vmatpush.bf16.msrb.mxu3 %v10354_v23  ;;  %v9775_v22 = vld [vmem:[#allocation8 + $0x478] sm:$0xf0]  ;;  %2554 = vmatpush.bf16.msrb.mxu1 %v9810_v13  ;;  %v15362_v54 = vpack.c.bf16 %v14982_v53, %v14982_v53 }
 0x16d   :  { %v14016_v24 = vld [vmem:[#allocation8 + $0x65c] sm:$0xf]  ;;  %v9778_v34 = vor.u32 %v13952_v19, %v9775_v22 }
 0x16e   :  { %v10031_v27 = vld [vmem:[#allocation8 + $0x678] sm:$0xf0]  ;;  %2541 = vmatpush.bf16.msrb.mxu0 %v9554_v11  ;;  %2567 = vmatpush.bf16.msrb.mxu2 %v10066_v14 }
 0x16f   :  { %v14080_v29 = vld [vmem:[#allocation8 + $0x85c] sm:$0xf]  ;;  %v10034_v35 = vor.u32 %v14016_v24, %v10031_v27 }
 0x170   :  { %v10287_v30 = vld [vmem:[#allocation8 + $0x878] sm:$0xf0]  ;;  %2580 = vmatpush.bf16.msrb.mxu3 %v10322_v21  ;;  %2555 = vmatpush.bf16.msrb.mxu1 %v9778_v34 }
 0x171   :  { %v13880_v36 = vld [vmem:[#allocation8 + $0x21c] sm:$0xf]  ;;  %v10290_v9 = vor.u32 %v14080_v29, %v10287_v30 }
 0x172   :  { %v9487_v37 = vld [vmem:[#allocation8 + $0x238] sm:$0xf0]  ;;  %2542 = vmatpush.bf16.msrb.mxu0 %v9522_v32  ;;  %2568 = vmatpush.bf16.msrb.mxu2 %v10034_v35 }
 0x173   :  { %v13944_v38 = vld [vmem:[#allocation8 + $0x41c] sm:$0xf]  ;;  %v9490_v7 = vor.u32 %v13880_v36, %v9487_v37  ;;  %v458_v37 = vperm.slane %v15354_v16, 6 }
 0x174   :  { %v9743_v41 = vld [vmem:[#allocation8 + $0x438] sm:$0xf0]  ;;  %2581 = vmatpush.bf16.msrb.mxu3 %v10290_v9  ;;  %v2350_v58 = vpop.f32.mrf.mxu1 }
 0x175   :  { %v14008_v42 = vld [vmem:[#allocation8 + $0x61c] sm:$0xf]  ;;  %v9746_v48 = vor.u32 %v13944_v38, %v9743_v41 }
 0x176   :  { %v9999_v43 = vld [vmem:[#allocation8 + $0x638] sm:$0xf0]  ;;  %2543 = vmatpush.bf16.msrb.mxu0 %v9490_v7  ;;  %v2337_v56 = vpop.f32.mrf.mxu0 }
 0x177   :  { %v14072_v45 = vld [vmem:[#allocation8 + $0x81c] sm:$0xf]  ;;  %v10002_v51 = vor.u32 %v14008_v42, %v9999_v43  ;;  %2556 = vmatpush.bf16.msrb.mxu1 %v9746_v48  ;;  %v2338_v57 = vadd.f32 %v2337_v56, %v456_v55 }
 0x178   :  { %v10255_v47 = vld [vmem:[#allocation8 + $0x838] sm:$0xf0] }
 0x179   :  { %v10258_v52 = vor.u32 %v14072_v45, %v10255_v47  ;;  %2569 = vmatpush.bf16.msrb.mxu2 %v10002_v51  ;;  %2544 = vmatmul.bf16.vlgmr.msrb.gmra.mxu0 %v15299_v25  ;;  %v2351_v59 = vadd.f32 %v2350_v58, %v2338_v57  ;;  %v459_v58 = vperm.slane %v15354_v16, 7 }
 0x17a   :  { %2557 = vmatmul.bf16.vlgmr.msrb.gmra.mxu1 %v15290_v8 }
 0x17b   :  { %2582 = vmatpush.bf16.msrb.mxu3 %v10258_v52 }
 0x17c   :  { %2570 = vmatmul.bf16.vlgmr.msrb.gmra.mxu2 %v15294_v15  ;;  %v2363_v60 = vpop.f32.mrf.mxu2  ;;  %v2352_v46 = vpop.f32.mrf.mxu1 }
 0x17d   :  { %v2364_v61 = vadd.f32 %v2363_v60, %v2351_v59 }
 0x17e   :  { %2583 = vmatmul.bf16.vlgmr.msrb.gmra.mxu3 %v15302_v31  ;;  %v2376_v62 = vpop.f32.mrf.mxu3  ;;  %v2339_v0 = vpop.f32.mrf.mxu0  ;;  %v457_v31 = vperm.slane %v15354_v16, 5 }
 0x17f   :  { %v2377_v63 = vadd.f32 %v2376_v62, %v2364_v61 }
 0x184   :  { %v2365_v8 = vpop.f32.mrf.mxu2 }
 0x186   :  { %v2378_v15 = vpop.f32.mrf.mxu3 }
 0x194   :  { %v2402_v1 = vpop.f32.mrf.mxu1 }
 0x195   :  { %v2403_v3 = vadd.f32 %v2402_v1, %v457_v31 }
 0x196   :  { %v2389_v25 = vpop.f32.mrf.mxu0 }
 0x197   :  { %v2390_v23 = vadd.f32 %v2389_v25, %v2377_v63 }
 0x199   :  { %v2592_v2 = vpack.c.bf16 %v2390_v23, %v2390_v23 }
 0x19b   :  { %v2600_v4 = vunpack.c.l.bf16 %v2592_v2 }
 0x19c   :  { %v2415_v5 = vpop.f32.mrf.mxu2  ;;  %v2404_v49 = vpop.f32.mrf.mxu1 }
 0x19d   :  { %14983 = vtanh.f32 %v2600_v4  ;;  %v2416_v10 = vadd.f32 %v2415_v5, %v2403_v3 }
 0x19e   :  { %v2428_v6 = vpop.f32.mrf.mxu3  ;;  %v2391_v11 = vpop.f32.mrf.mxu0 }
 0x19f   :  { %v2429_v12 = vadd.f32 %v2428_v6, %v2416_v10 }
 0x1a3   :  { %v14984_v13 = vpop.eup %14983 }
 0x1a4   :  { %v15376_v14 = vpack.c.bf16 %v14984_v13, %v14984_v13  ;;  %v2417_v17 = vpop.f32.mrf.mxu2 }
 0x1a6   :  { %v2430_v18 = vpop.f32.mrf.mxu3 }
 0x1b4   :  { %v2454_v21 = vpop.f32.mrf.mxu1 }
 0x1b6   :  { %v2441_v19 = vpop.f32.mrf.mxu0 }
 0x1b7   :  { %v2442_v20 = vadd.f32 %v2441_v19, %v2429_v12 }
 0x1b9   :  { %v2455_v22 = vadd.f32 %v2454_v21, %v2442_v20 }
 0x1bb   :  { %v2593_v24 = vpack.c.bf16 %v2455_v22, %v2455_v22 }
 0x1bc   :  { %v2467_v28 = vpop.f32.mrf.mxu2  ;;  %v2456_v32 = vpop.f32.mrf.mxu1 }
 0x1bd   :  { %v2601_v27 = vunpack.c.l.bf16 %v2593_v24  ;;  %v2468_v38 = vadd.f32 %v2467_v28, %v458_v37 }
 0x1be   :  { %v2480_v29 = vpop.f32.mrf.mxu3  ;;  %v2443_v30 = vpop.f32.mrf.mxu0 }
 0x1bf   :  { %14985 = vtanh.f32 %v2601_v27  ;;  %v2481_v40 = vadd.f32 %v2480_v29, %v2468_v38 }
 0x1c4   :  { %v2469_v34 = vpop.f32.mrf.mxu2 }
 0x1c5   :  { %v14986_v33 = vpop.eup %14985 }
 0x1c6   :  { %v15378_v35 = vpack.c.bf16 %v14986_v33, %v14986_v33  ;;  %v2482_v36 = vpop.f32.mrf.mxu3 }
 0x1d4   :  { %v2506_v42 = vpop.f32.mrf.mxu1 }
 0x1d6   :  { %v2493_v9 = vpop.f32.mrf.mxu0 }
 0x1d7   :  { %v2494_v41 = vadd.f32 %v2493_v9, %v2481_v40 }
 0x1d9   :  { %v2507_v43 = vadd.f32 %v2506_v42, %v2494_v41 }
 0x1dc   :  { %v2519_v44 = vpop.f32.mrf.mxu2  ;;  %v2508_v51 = vpop.f32.mrf.mxu1 }
 0x1dd   :  { %v2520_v45 = vadd.f32 %v2519_v44, %v2507_v43 }
 0x1de   :  { %v2532_v47 = vpop.f32.mrf.mxu3  ;;  %v2495_v48 = vpop.f32.mrf.mxu0 }
 0x1df   :  { %v2594_v7 = vpack.c.bf16 %v2520_v45, %v2520_v45  ;;  %v2533_v59 = vadd.f32 %v2532_v47, %v459_v58 }
 0x1e1   :  { %v2602_v52 = vunpack.c.l.bf16 %v2594_v7 }
 0x1e3   :  { %14987 = vtanh.f32 %v2602_v52 }
 0x1e4   :  { %v2521_v53 = vpop.f32.mrf.mxu2 }
 0x1e6   :  { %v2534_v55 = vpop.f32.mrf.mxu3 }
 0x1e9   :  { %v14988_v56 = vpop.eup %14987 }
 0x1ea   :  { %v15381_v57 = vpack.c.bf16 %v14988_v56, %v14988_v56 }
 0x1f6   :  { %v2545_v60 = vpop.f32.mrf.mxu0 }
 0x1f7   :  { %v2558_v61 = vpop.f32.mrf.mxu1  ;;  %v2546_v62 = vadd.f32 %v2545_v60, %v2533_v59 }
 0x1f9   :  { %v2559_v63 = vadd.f32 %v2558_v61, %v2546_v62 }
 0x1fe   :  { %v2547_v15 = vpop.f32.mrf.mxu0 }
 0x1ff   :  { %v2571_v0 = vpop.f32.mrf.mxu2  ;;  %v2560_v25 = vpop.f32.mrf.mxu1 }
 0x200   :  { %v2572_v46 = vadd.f32 %v2571_v0, %v2559_v63 }
 0x201   :  { %v2584_v8 = vpop.f32.mrf.mxu3 }
 0x202   :  { %v2585_v31 = vadd.f32 %v2584_v8, %v2572_v46 }
 0x204   :  { %v2595_v23 = vpack.c.bf16 %v2585_v31, %v2585_v31 }
 0x206   :  { %v2603_v1 = vunpack.c.l.bf16 %v2595_v23 }
 0x207   :  { %v2573_v2 = vpop.f32.mrf.mxu2 }
 0x208   :  { %14989 = vtanh.f32 %v2603_v1 }
 0x209   :  { %v2586_v3 = vpop.f32.mrf.mxu3 }
 0x20e   :  { %v14990_v4 = vpop.eup %14989 }
 0x20f   :  { %v15384_v5 = vpack.c.bf16 %v14990_v4, %v14990_v4 }
 0x210   :  { %15219 = dma.done.wait [#allocation4], 65536 }
 0x211   :  { %15220 = vsyncadd [#allocation4], 4294901760  ;;  %v10709_v16 = vld [vmem:[#allocation2 + $0x1c0] sm:$0xf] }
 0x212   :  { %v14193_v6 = vld [vmem:[#allocation2 + $0x1dc] sm:$0xf0] }
 0x213   :  { %v10965_v10 = vld [vmem:[#allocation2 + $0x3c0] sm:$0xf]  ;;  %v10710_v11 = vor.u32 %v14193_v6, %v10709_v16 }
 0x214   :  { %v14257_v12 = vld [vmem:[#allocation2 + $0x3dc] sm:$0xf0] }
 0x215   :  { %v11221_v49 = vld [vmem:[#allocation2 + $0x5c0] sm:$0xf]  ;;  %v10966_v17 = vor.u32 %v14257_v12, %v10965_v10  ;;  %5714 = vmatpush.bf16.msra.mxu0 %v10710_v11 }
 0x216   :  { %v14321_v13 = vld [vmem:[#allocation2 + $0x5dc] sm:$0xf0] }
 0x217   :  { %v11222_v18 = vor.u32 %v14321_v13, %v11221_v49  ;;  %v11477_v19 = vld [vmem:[#allocation2 + $0x7c0] sm:$0xf]  ;;  %5727 = vmatpush.bf16.msra.mxu1 %v10966_v17 }
 0x218   :  { %v14385_v20 = vld [vmem:[#allocation2 + $0x7dc] sm:$0xf0] }
 0x219   :  { %v10677_v21 = vld [vmem:[#allocation2 + $0x180] sm:$0xf]  ;;  %v11478_v22 = vor.u32 %v14385_v20, %v11477_v19  ;;  %5740 = vmatpush.bf16.msra.mxu2 %v11222_v18 }
 0x21a   :  { %v14185_v24 = vld [vmem:[#allocation2 + $0x19c] sm:$0xf0] }
 0x21b   :  { %v10933_v27 = vld [vmem:[#allocation2 + $0x380] sm:$0xf]  ;;  %v10678_v29 = vor.u32 %v14185_v24, %v10677_v21  ;;  %5753 = vmatpush.bf16.msra.mxu3 %v11478_v22 }
 0x21c   :  { %v14249_v28 = vld [vmem:[#allocation2 + $0x39c] sm:$0xf0] }
 0x21d   :  { %v10934_v30 = vor.u32 %v14249_v28, %v10933_v27  ;;  %v11189_v32 = vld [vmem:[#allocation2 + $0x580] sm:$0xf]  ;;  %5715 = vmatpush.bf16.msra.mxu0 %v10678_v29 }
 0x21e   :  { %v14313_v33 = vld [vmem:[#allocation2 + $0x59c] sm:$0xf0] }
 0x21f   :  { %v11445_v34 = vld [vmem:[#allocation2 + $0x780] sm:$0xf]  ;;  %v11190_v36 = vor.u32 %v14313_v33, %v11189_v32  ;;  %5728 = vmatpush.bf16.msra.mxu1 %v10934_v30 }
 0x220   :  { %v14377_v37 = vld [vmem:[#allocation2 + $0x79c] sm:$0xf0] }
 0x221   :  { %v10645_v38 = vld [vmem:[#allocation2 + $0x140] sm:$0xf]  ;;  %v11446_v9 = vor.u32 %v14377_v37, %v11445_v34  ;;  %5741 = vmatpush.bf16.msra.mxu2 %v11190_v36 }
 0x222   :  { %v14177_v40 = vld [vmem:[#allocation2 + $0x15c] sm:$0xf0] }
 0x223   :  { %v10901_v41 = vld [vmem:[#allocation2 + $0x340] sm:$0xf]  ;;  %v10646_v44 = vor.u32 %v14177_v40, %v10645_v38  ;;  %5754 = vmatpush.bf16.msra.mxu3 %v11446_v9 }
 0x224   :  { %v14241_v42 = vld [vmem:[#allocation2 + $0x35c] sm:$0xf0] }
 0x225   :  { %v11157_v43 = vld [vmem:[#allocation2 + $0x540] sm:$0xf]  ;;  %v10902_v48 = vor.u32 %v14241_v42, %v10901_v41  ;;  %5716 = vmatpush.bf16.msra.mxu0 %v10646_v44 }
 0x226   :  { %v14305_v45 = vld [vmem:[#allocation2 + $0x55c] sm:$0xf0] }
 0x227   :  { %v11413_v47 = vld [vmem:[#allocation2 + $0x740] sm:$0xf]  ;;  %v11158_v51 = vor.u32 %v14305_v45, %v11157_v43  ;;  %5729 = vmatpush.bf16.msra.mxu1 %v10902_v48 }
 0x228   :  { %v14369_v7 = vld [vmem:[#allocation2 + $0x75c] sm:$0xf0] }
 0x229   :  { %v10613_v52 = vld [vmem:[#allocation2 + $0x100] sm:$0xf]  ;;  %v11414_v56 = vor.u32 %v14369_v7, %v11413_v47  ;;  %5742 = vmatpush.bf16.msra.mxu2 %v11158_v51 }
 0x22a   :  { %v14169_v53 = vld [vmem:[#allocation2 + $0x11c] sm:$0xf0] }
 0x22b   :  { %v10869_v55 = vld [vmem:[#allocation2 + $0x300] sm:$0xf]  ;;  %v10614_v63 = vor.u32 %v14169_v53, %v10613_v52  ;;  %5755 = vmatpush.bf16.msra.mxu3 %v11414_v56 }
 0x22c   :  { %v14233_v58 = vld [vmem:[#allocation2 + $0x31c] sm:$0xf0] }
 0x22d   :  { %v11125_v59 = vld [vmem:[#allocation2 + $0x500] sm:$0xf]  ;;  %v10870_v0 = vor.u32 %v14233_v58, %v10869_v55  ;;  %5717 = vmatpush.bf16.msra.mxu0 %v10614_v63 }
 0x22e   :  { %v14297_v60 = vld [vmem:[#allocation2 + $0x51c] sm:$0xf0] }
 0x22f   :  { %v11381_v61 = vld [vmem:[#allocation2 + $0x700] sm:$0xf]  ;;  %v11126_v46 = vor.u32 %v14297_v60, %v11125_v59  ;;  %5730 = vmatpush.bf16.msra.mxu1 %v10870_v0 }
 0x230   :  { %v14361_v62 = vld [vmem:[#allocation2 + $0x71c] sm:$0xf0] }
 0x231   :  { %v10581_v8 = vld [vmem:[#allocation2 + $0xc0] sm:$0xf]  ;;  %v11382_v31 = vor.u32 %v14361_v62, %v11381_v61  ;;  %5743 = vmatpush.bf16.msra.mxu2 %v11126_v46 }
 0x232   :  { %v14161_v15 = vld [vmem:[#allocation2 + $0xdc] sm:$0xf0] }
 0x233   :  { %v10837_v25 = vld [vmem:[#allocation2 + $0x2c0] sm:$0xf]  ;;  %v10582_v16 = vor.u32 %v14161_v15, %v10581_v8  ;;  %5756 = vmatpush.bf16.msra.mxu3 %v11382_v31 }
 0x234   :  { %v14225_v23 = vld [vmem:[#allocation2 + $0x2dc] sm:$0xf0] }
 0x235   :  { %v11093_v1 = vld [vmem:[#allocation2 + $0x4c0] sm:$0xf]  ;;  %v10838_v6 = vor.u32 %v14225_v23, %v10837_v25  ;;  %5718 = vmatpush.bf16.msra.mxu0 %v10582_v16 }
 0x236   :  { %v14289_v2 = vld [vmem:[#allocation2 + $0x4dc] sm:$0xf0] }
 0x237   :  { %v11349_v3 = vld [vmem:[#allocation2 + $0x6c0] sm:$0xf]  ;;  %v11094_v10 = vor.u32 %v14289_v2, %v11093_v1  ;;  %5731 = vmatpush.bf16.msra.mxu1 %v10838_v6 }
 0x238   :  { %v14353_v4 = vld [vmem:[#allocation2 + $0x6dc] sm:$0xf0] }
 0x239   :  { %v10549_v11 = vld [vmem:[#allocation2 + $0x80] sm:$0xf]  ;;  %v11350_v13 = vor.u32 %v14353_v4, %v11349_v3  ;;  %5744 = vmatpush.bf16.msra.mxu2 %v11094_v10 }
 0x23a   :  { %v14153_v12 = vld [vmem:[#allocation2 + $0x9c] sm:$0xf0] }
 0x23b   :  { %v10805_v49 = vld [vmem:[#allocation2 + $0x280] sm:$0xf]  ;;  %v10550_v22 = vor.u32 %v14153_v12, %v10549_v11  ;;  %5757 = vmatpush.bf16.msra.mxu3 %v11350_v13 }
 0x23c   :  { %v14217_v17 = vld [vmem:[#allocation2 + $0x29c] sm:$0xf0] }
 0x23d   :  { %v11061_v18 = vld [vmem:[#allocation2 + $0x480] sm:$0xf]  ;;  %v10806_v24 = vor.u32 %v14217_v17, %v10805_v49  ;;  %5719 = vmatpush.bf16.msra.mxu0 %v10550_v22 }
 0x23e   :  { %v14281_v19 = vld [vmem:[#allocation2 + $0x49c] sm:$0xf0] }
 0x23f   :  { %v11317_v20 = vld [vmem:[#allocation2 + $0x680] sm:$0xf]  ;;  %v11062_v27 = vor.u32 %v14281_v19, %v11061_v18  ;;  %5732 = vmatpush.bf16.msra.mxu1 %v10806_v24 }
 0x240   :  { %v14345_v21 = vld [vmem:[#allocation2 + $0x69c] sm:$0xf0] }
 0x241   :  { %v10517_v28 = vld [vmem:[#allocation2 + $0x40] sm:$0xf]  ;;  %v11318_v32 = vor.u32 %v14345_v21, %v11317_v20  ;;  %5745 = vmatpush.bf16.msra.mxu2 %v11062_v27 }
 0x242   :  { %v14145_v29 = vld [vmem:[#allocation2 + $0x5c] sm:$0xf0] }
 0x243   :  { %v10773_v30 = vld [vmem:[#allocation2 + $0x240] sm:$0xf]  ;;  %v10518_v40 = vor.u32 %v14145_v29, %v10517_v28  ;;  %5758 = vmatpush.bf16.msra.mxu3 %v11318_v32 }
 0x244   :  { %v14209_v33 = vld [vmem:[#allocation2 + $0x25c] sm:$0xf0] }
 0x245   :  { %v11029_v34 = vld [vmem:[#allocation2 + $0x440] sm:$0xf]  ;;  %v10774_v42 = vor.u32 %v14209_v33, %v10773_v30  ;;  %5720 = vmatpush.bf16.msra.mxu0 %v10518_v40 }
 0x246   :  { %v14273_v36 = vld [vmem:[#allocation2 + $0x45c] sm:$0xf0] }
 0x247   :  { %v11285_v37 = vld [vmem:[#allocation2 + $0x640] sm:$0xf]  ;;  %v11030_v43 = vor.u32 %v14273_v36, %v11029_v34  ;;  %5733 = vmatpush.bf16.msra.mxu1 %v10774_v42 }
 0x248   :  { %v14337_v38 = vld [vmem:[#allocation2 + $0x65c] sm:$0xf0] }
 0x249   :  { %v10485_v9 = vld [vmem:[#allocation2] sm:$0xf]  ;;  %v11286_v7 = vor.u32 %v14337_v38, %v11285_v37  ;;  %5746 = vmatpush.bf16.msra.mxu2 %v11030_v43 }
 0x24a   :  { %v14137_v41 = vld [vmem:[#allocation2 + $0x1c] sm:$0xf0] }
 0x24b   :  { %v10741_v44 = vld [vmem:[#allocation2 + $0x200] sm:$0xf]  ;;  %v10486_v58 = vor.u32 %v14137_v41, %v10485_v9  ;;  %5759 = vmatpush.bf16.msra.mxu3 %v11286_v7 }
 0x24c   :  { %v14201_v45 = vld [vmem:[#allocation2 + $0x21c] sm:$0xf0] }
 0x24d   :  { %v10997_v47 = vld [vmem:[#allocation2 + $0x400] sm:$0xf]  ;;  %v10742_v62 = vor.u32 %v14201_v45, %v10741_v44  ;;  %5721 = vmatpush.bf16.msra.mxu0 %v10486_v58 }
 0x24e   :  { %v14265_v48 = vld [vmem:[#allocation2 + $0x41c] sm:$0xf0] }
 0x24f   :  { %v11253_v51 = vld [vmem:[#allocation2 + $0x600] sm:$0xf]  ;;  %v10998_v63 = vor.u32 %v14265_v48, %v10997_v47  ;;  %5734 = vmatpush.bf16.msra.mxu1 %v10742_v62 }
 0x250   :  { %v14329_v52 = vld [vmem:[#allocation2 + $0x61c] sm:$0xf0]  ;;  %5722 = vmatmul.bf16.vlgmr.msra.gmra.mxu0 %v15333_v39 }
 0x251   :  { %v11733_v53 = vld [vmem:[#allocation2 + $0x9c0] sm:$0xf]  ;;  %v11254_v8 = vor.u32 %v14329_v52, %v11253_v51  ;;  %5747 = vmatpush.bf16.msra.mxu2 %v10998_v63 }
 0x252   :  { %v14449_v55 = vld [vmem:[#allocation2 + $0x9dc] sm:$0xf0]  ;;  %5735 = vmatmul.bf16.vlgmr.msra.gmra.mxu1 %v15343_v50 }
 0x253   :  { %v11989_v56 = vld [vmem:[#allocation2 + $0xbc0] sm:$0xf]  ;;  %v11734_v15 = vor.u32 %v14449_v55, %v11733_v53  ;;  %5760 = vmatpush.bf16.msra.mxu3 %v11254_v8 }
 0x254   :  { %v14513_v59 = vld [vmem:[#allocation2 + $0xbdc] sm:$0xf0]  ;;  %5748 = vmatmul.bf16.vlgmr.msra.gmra.mxu2 %v15352_v26 }
 0x255   :  { %v12245_v60 = vld [vmem:[#allocation2 + $0xdc0] sm:$0xf]  ;;  %v11990_v25 = vor.u32 %v14513_v59, %v11989_v56  ;;  %5766 = vmatpush.bf16.msrb.mxu0 %v11734_v15 }
 0x256   :  { %v14577_v61 = vld [vmem:[#allocation2 + $0xddc] sm:$0xf0]  ;;  %5761 = vmatmul.bf16.vlgmr.msra.gmra.mxu3 %v15362_v54 }
 0x257   :  { %v12501_v0 = vld [vmem:[#allocation2 + $0xfc0] sm:$0xf]  ;;  %v12246_v31 = vor.u32 %v14577_v61, %v12245_v60  ;;  %5779 = vmatpush.bf16.msrb.mxu1 %v11990_v25 }
 0x258   :  { %v14641_v46 = vld [vmem:[#allocation2 + $0xfdc] sm:$0xf0] }
 0x259   :  { %v11701_v23 = vld [vmem:[#allocation2 + $0x980] sm:$0xf]  ;;  %v12502_v3 = vor.u32 %v14641_v46, %v12501_v0  ;;  %5792 = vmatpush.bf16.msrb.mxu2 %v12246_v31 }
 0x25a   :  { %v14441_v1 = vld [vmem:[#allocation2 + $0x99c] sm:$0xf0] }
 0x25b   :  { %v11957_v2 = vld [vmem:[#allocation2 + $0xb80] sm:$0xf]  ;;  %v11702_v12 = vor.u32 %v14441_v1, %v11701_v23  ;;  %5805 = vmatpush.bf16.msrb.mxu3 %v12502_v3 }
 0x25c   :  { %v14505_v4 = vld [vmem:[#allocation2 + $0xb9c] sm:$0xf0] }
 0x25d   :  { %v12213_v16 = vld [vmem:[#allocation2 + $0xd80] sm:$0xf]  ;;  %v11958_v49 = vor.u32 %v14505_v4, %v11957_v2  ;;  %5767 = vmatpush.bf16.msrb.mxu0 %v11702_v12 }
 0x25e   :  { %v14569_v6 = vld [vmem:[#allocation2 + $0xd9c] sm:$0xf0] }
 0x25f   :  { %v12469_v10 = vld [vmem:[#allocation2 + $0xf80] sm:$0xf]  ;;  %v12214_v13 = vor.u32 %v14569_v6, %v12213_v16  ;;  %5780 = vmatpush.bf16.msrb.mxu1 %v11958_v49 }
 0x260   :  { %v14633_v11 = vld [vmem:[#allocation2 + $0xf9c] sm:$0xf0] }
 0x261   :  { %v11669_v17 = vld [vmem:[#allocation2 + $0x940] sm:$0xf]  ;;  %v12470_v20 = vor.u32 %v14633_v11, %v12469_v10  ;;  %5793 = vmatpush.bf16.msrb.mxu2 %v12214_v13 }
 0x262   :  { %v14433_v18 = vld [vmem:[#allocation2 + $0x95c] sm:$0xf0] }
 0x263   :  { %v11925_v19 = vld [vmem:[#allocation2 + $0xb40] sm:$0xf]  ;;  %v11670_v29 = vor.u32 %v14433_v18, %v11669_v17  ;;  %5806 = vmatpush.bf16.msrb.mxu3 %v12470_v20 }
 0x264   :  { %v14497_v21 = vld [vmem:[#allocation2 + $0xb5c] sm:$0xf0] }
 0x265   :  { %v12181_v22 = vld [vmem:[#allocation2 + $0xd40] sm:$0xf]  ;;  %v11926_v30 = vor.u32 %v14497_v21, %v11925_v19  ;;  %5768 = vmatpush.bf16.msrb.mxu0 %v11670_v29 }
 0x266   :  { %v14561_v24 = vld [vmem:[#allocation2 + $0xd5c] sm:$0xf0] }
 0x267   :  { %v12437_v27 = vld [vmem:[#allocation2 + $0xf40] sm:$0xf]  ;;  %v12182_v32 = vor.u32 %v14561_v24, %v12181_v22  ;;  %5781 = vmatpush.bf16.msrb.mxu1 %v11926_v30 }
 0x268   :  { %v14625_v28 = vld [vmem:[#allocation2 + $0xf5c] sm:$0xf0] }
 0x269   :  { %v11637_v33 = vld [vmem:[#allocation2 + $0x900] sm:$0xf]  ;;  %v12438_v37 = vor.u32 %v14625_v28, %v12437_v27  ;;  %5794 = vmatpush.bf16.msrb.mxu2 %v12182_v32 }
 0x26a   :  { %v14425_v34 = vld [vmem:[#allocation2 + $0x91c] sm:$0xf0] }
 0x26b   :  { %v11893_v36 = vld [vmem:[#allocation2 + $0xb00] sm:$0xf]  ;;  %v11638_v43 = vor.u32 %v14425_v34, %v11637_v33  ;;  %5807 = vmatpush.bf16.msrb.mxu3 %v12438_v37  ;;  %v14189_v34 = vld [vmem:[#allocation2 + $0x1c4] sm:$0xf] }
 0x26c   :  { %v14489_v38 = vld [vmem:[#allocation2 + $0xb1c] sm:$0xf0]  ;;  %v14253_v37 = vld [vmem:[#allocation2 + $0x3c4] sm:$0xf] }
 0x26d   :  { %v12149_v40 = vld [vmem:[#allocation2 + $0xd00] sm:$0xf]  ;;  %v11894_v44 = vor.u32 %v14489_v38, %v11893_v36  ;;  %5769 = vmatpush.bf16.msrb.mxu0 %v11638_v43  ;;  %v10711_v36 = vld [vmem:[#allocation2 + $0x1e0] sm:$0xf0] }
 0x26e   :  { %v14553_v9 = vld [vmem:[#allocation2 + $0xd1c] sm:$0xf0] }
 0x26f   :  { %v12405_v41 = vld [vmem:[#allocation2 + $0xf00] sm:$0xf]  ;;  %v12150_v45 = vor.u32 %v14553_v9, %v12149_v40  ;;  %5782 = vmatpush.bf16.msrb.mxu1 %v11894_v44  ;;  %v10967_v40 = vld [vmem:[#allocation2 + $0x3e0] sm:$0xf0] }
 0x270   :  { %v14617_v42 = vld [vmem:[#allocation2 + $0xf1c] sm:$0xf0]  ;;  %v14317_v9 = vld [vmem:[#allocation2 + $0x5c4] sm:$0xf] }
 0x271   :  { %v11605_v47 = vld [vmem:[#allocation2 + $0x8c0] sm:$0xf]  ;;  %v12406_v51 = vor.u32 %v14617_v42, %v12405_v41  ;;  %5795 = vmatpush.bf16.msrb.mxu2 %v12150_v45  ;;  %v11223_v41 = vld [vmem:[#allocation2 + $0x5e0] sm:$0xf0] }
 0x272   :  { %v14417_v7 = vld [vmem:[#allocation2 + $0x8dc] sm:$0xf0]  ;;  %v14381_v44 = vld [vmem:[#allocation2 + $0x7c4] sm:$0xf] }
 0x273   :  { %v11861_v48 = vld [vmem:[#allocation2 + $0xac0] sm:$0xf]  ;;  %v11606_v59 = vor.u32 %v14417_v7, %v11605_v47  ;;  %5808 = vmatpush.bf16.msrb.mxu3 %v12406_v51  ;;  %v11479_v45 = vld [vmem:[#allocation2 + $0x7e0] sm:$0xf0]  ;;  %v10714_v7 = vor.u32 %v14189_v34, %v10711_v36  ;;  %v11226_v51 = vor.u32 %v14317_v9, %v11223_v41 }
 0x274   :  { %v14481_v52 = vld [vmem:[#allocation2 + $0xadc] sm:$0xf0]  ;;  %v14285_v34 = vld [vmem:[#allocation2 + $0x4c4] sm:$0xf] }
 0x275   :  { %v12117_v53 = vld [vmem:[#allocation2 + $0xcc0] sm:$0xf]  ;;  %v11862_v60 = vor.u32 %v14481_v52, %v11861_v48  ;;  %5770 = vmatpush.bf16.msrb.mxu0 %v11606_v59  ;;  %v10970_v48 = vor.u32 %v14253_v37, %v10967_v40  ;;  %v14181_v52 = vld [vmem:[#allocation2 + $0x184] sm:$0xf] }
 0x276   :  { %v14545_v55 = vld [vmem:[#allocation2 + $0xcdc] sm:$0xf0]  ;;  %v14309_v59 = vld [vmem:[#allocation2 + $0x584] sm:$0xf] }
 0x277   :  { %v12373_v56 = vld [vmem:[#allocation2 + $0xec0] sm:$0xf]  ;;  %v12118_v61 = vor.u32 %v14545_v55, %v12117_v53  ;;  %5783 = vmatpush.bf16.msrb.mxu1 %v11862_v60  ;;  %v10679_v53 = vld [vmem:[#allocation2 + $0x1a0] sm:$0xf0] }
 0x278   :  { %v14609_v58 = vld [vmem:[#allocation2 + $0xedc] sm:$0xf0]  ;;  %v14245_v55 = vld [vmem:[#allocation2 + $0x384] sm:$0xf] }
 0x279   :  { %v11573_v62 = vld [vmem:[#allocation2 + $0x880] sm:$0xf]  ;;  %v12374_v46 = vor.u32 %v14609_v58, %v12373_v56  ;;  %5796 = vmatpush.bf16.msrb.mxu2 %v12118_v61  ;;  %v11482_v56 = vor.u32 %v14381_v44, %v11479_v45  ;;  %v10935_v58 = vld [vmem:[#allocation2 + $0x3a0] sm:$0xf0] }
 0x27a   :  { %v14409_v63 = vld [vmem:[#allocation2 + $0x89c] sm:$0xf0]  ;;  %v11191_v60 = vld [vmem:[#allocation2 + $0x5a0] sm:$0xf0] }
 0x27b   :  { %v11829_v0 = vld [vmem:[#allocation2 + $0xa80] sm:$0xf]  ;;  %v11574_v1 = vor.u32 %v14409_v63, %v11573_v62  ;;  %5809 = vmatpush.bf16.msrb.mxu3 %v12374_v46  ;;  %v14373_v61 = vld [vmem:[#allocation2 + $0x784] sm:$0xf]  ;;  %v10682_v63 = vor.u32 %v14181_v52, %v10679_v53  ;;  %v11194_v46 = vor.u32 %v14309_v59, %v11191_v60 }
 0x27c   :  { %v14473_v8 = vld [vmem:[#allocation2 + $0xa9c] sm:$0xf0]  ;;  %v11447_v62 = vld [vmem:[#allocation2 + $0x7a0] sm:$0xf0] }
 0x27d   :  { %v12085_v15 = vld [vmem:[#allocation2 + $0xc80] sm:$0xf]  ;;  %v11830_v2 = vor.u32 %v14473_v8, %v11829_v0  ;;  %5771 = vmatpush.bf16.msrb.mxu0 %v11574_v1  ;;  %v10938_v0 = vor.u32 %v14245_v55, %v10935_v58  ;;  %v14173_v8 = vld [vmem:[#allocation2 + $0x144] sm:$0xf] }
 0x27e   :  { %v14537_v25 = vld [vmem:[#allocation2 + $0xc9c] sm:$0xf0]  ;;  %v14301_v1 = vld [vmem:[#allocation2 + $0x544] sm:$0xf] }
 0x27f   :  { %v12341_v31 = vld [vmem:[#allocation2 + $0xe80] sm:$0xf]  ;;  %v12086_v3 = vor.u32 %v14537_v25, %v12085_v15  ;;  %5784 = vmatpush.bf16.msrb.mxu1 %v11830_v2  ;;  %v10647_v15 = vld [vmem:[#allocation2 + $0x160] sm:$0xf0] }
 0x280   :  { %v14601_v23 = vld [vmem:[#allocation2 + $0xe9c] sm:$0xf0]  ;;  %v14237_v25 = vld [vmem:[#allocation2 + $0x344] sm:$0xf] }
 0x281   :  { %v11541_v4 = vld [vmem:[#allocation2 + $0x840] sm:$0xf]  ;;  %v12342_v10 = vor.u32 %v14601_v23, %v12341_v31  ;;  %5797 = vmatpush.bf16.msrb.mxu2 %v12086_v3  ;;  %v11450_v31 = vor.u32 %v14373_v61, %v11447_v62  ;;  %v10903_v23 = vld [vmem:[#allocation2 + $0x360] sm:$0xf0] }
 0x282   :  { %v14401_v16 = vld [vmem:[#allocation2 + $0x85c] sm:$0xf0]  ;;  %v11159_v2 = vld [vmem:[#allocation2 + $0x560] sm:$0xf0] }
 0x283   :  { %v11797_v6 = vld [vmem:[#allocation2 + $0xa40] sm:$0xf]  ;;  %v11542_v18 = vor.u32 %v14401_v16, %v11541_v4  ;;  %5810 = vmatpush.bf16.msrb.mxu3 %v12342_v10  ;;  %v14365_v3 = vld [vmem:[#allocation2 + $0x744] sm:$0xf]  ;;  %v10650_v16 = vor.u32 %v14173_v8, %v10647_v15  ;;  %v11162_v10 = vor.u32 %v14301_v1, %v11159_v2 }
 0x284   :  { %v14465_v11 = vld [vmem:[#allocation2 + $0xa5c] sm:$0xf0]  ;;  %v11415_v4 = vld [vmem:[#allocation2 + $0x760] sm:$0xf0] }
 0x285   :  { %v12053_v12 = vld [vmem:[#allocation2 + $0xc40] sm:$0xf]  ;;  %v11798_v21 = vor.u32 %v14465_v11, %v11797_v6  ;;  %5772 = vmatpush.bf16.msrb.mxu0 %v11542_v18  ;;  %v10906_v6 = vor.u32 %v14237_v25, %v10903_v23  ;;  %v14165_v11 = vld [vmem:[#allocation2 + $0x104] sm:$0xf] }
 0x286   :  { %v14529_v49 = vld [vmem:[#allocation2 + $0xc5c] sm:$0xf0]  ;;  %v14293_v18 = vld [vmem:[#allocation2 + $0x504] sm:$0xf] }
 0x287   :  { %v12309_v13 = vld [vmem:[#allocation2 + $0xe40] sm:$0xf]  ;;  %v12054_v22 = vor.u32 %v14529_v49, %v12053_v12  ;;  %5785 = vmatpush.bf16.msrb.mxu1 %v11798_v21  ;;  %v10615_v12 = vld [vmem:[#allocation2 + $0x120] sm:$0xf0] }
 0x288   :  { %v14593_v17 = vld [vmem:[#allocation2 + $0xe5c] sm:$0xf0]  ;;  %v14229_v49 = vld [vmem:[#allocation2 + $0x304] sm:$0xf] }
 0x289   :  { %v11509_v19 = vld [vmem:[#allocation2 + $0x800] sm:$0xf]  ;;  %v12310_v29 = vor.u32 %v14593_v17, %v12309_v13  ;;  %5798 = vmatpush.bf16.msrb.mxu2 %v12054_v22  ;;  %v11418_v13 = vor.u32 %v14365_v3, %v11415_v4  ;;  %v10871_v17 = vld [vmem:[#allocation2 + $0x320] sm:$0xf0]  ;;  %v10618_v22 = vor.u32 %v14165_v11, %v10615_v12 }
 0x28a   :  { %v14393_v20 = vld [vmem:[#allocation2 + $0x81c] sm:$0xf0]  ;;  %v11383_v21 = vld [vmem:[#allocation2 + $0x720] sm:$0xf0] }
 0x28b   :  { %v11765_v24 = vld [vmem:[#allocation2 + $0xa00] sm:$0xf]  ;;  %v11510_v38 = vor.u32 %v14393_v20, %v11509_v19  ;;  %5811 = vmatpush.bf16.msrb.mxu3 %v12310_v29  ;;  %v11127_v19 = vld [vmem:[#allocation2 + $0x520] sm:$0xf0] }
 0x28c   :  { %v14457_v27 = vld [vmem:[#allocation2 + $0xa1c] sm:$0xf0]  ;;  %v14357_v20 = vld [vmem:[#allocation2 + $0x704] sm:$0xf] }
 0x28d   :  { %v12021_v28 = vld [vmem:[#allocation2 + $0xc00] sm:$0xf]  ;;  %v11766_v42 = vor.u32 %v14457_v27, %v11765_v24  ;;  %5773 = vmatpush.bf16.msrb.mxu0 %v11510_v38  ;;  %v10874_v24 = vor.u32 %v14229_v49, %v10871_v17  ;;  %v11130_v27 = vor.u32 %v14293_v18, %v11127_v19  ;;  %v10583_v29 = vld [vmem:[#allocation2 + $0xe0] sm:$0xf0] }
 0x28e   :  { %v14521_v30 = vld [vmem:[#allocation2 + $0xc1c] sm:$0xf0]  ;;  %v11095_v36 = vld [vmem:[#allocation2 + $0x4e0] sm:$0xf0] }
 0x28f   :  { %v12277_v32 = vld [vmem:[#allocation2 + $0xe00] sm:$0xf]  ;;  %v12022_v43 = vor.u32 %v14521_v30, %v12021_v28  ;;  %5786 = vmatpush.bf16.msrb.mxu1 %v11766_v42  ;;  %v14157_v28 = vld [vmem:[#allocation2 + $0xc4] sm:$0xf]  ;;  %v11098_v41 = vor.u32 %v14285_v34, %v11095_v36 }
 0x290   :  { %v14585_v33 = vld [vmem:[#allocation2 + $0xe1c] sm:$0xf0]  ;;  %5774 = vmatmul.bf16.vlgmr.msrb.gmra.mxu0 %v15376_v14  ;;  %v14221_v30 = vld [vmem:[#allocation2 + $0x2c4] sm:$0xf]  ;;  %v10586_v40 = vor.u32 %v14157_v28, %v10583_v29 }
 0x291   :  { %v12278_v47 = vor.u32 %v14585_v33, %v12277_v32  ;;  %5799 = vmatpush.bf16.msrb.mxu2 %v12022_v43  ;;  %5818 = vmatpush.bf16.msra.mxu0 %v10714_v7  ;;  %v11386_v32 = vor.u32 %v14357_v20, %v11383_v21  ;;  %v10839_v33 = vld [vmem:[#allocation2 + $0x2e0] sm:$0xf0] }
 0x292   :  { %5787 = vmatmul.bf16.vlgmr.msrb.gmra.mxu1 %v15378_v35  ;;  %v14349_v37 = vld [vmem:[#allocation2 + $0x6c4] sm:$0xf]  ;;  %v10842_v9 = vor.u32 %v14221_v30, %v10839_v33 }
 0x293   :  { %5812 = vmatpush.bf16.msrb.mxu3 %v12278_v47  ;;  %5831 = vmatpush.bf16.msra.mxu1 %v10970_v48  ;;  %v11351_v38 = vld [vmem:[#allocation2 + $0x6e0] sm:$0xf0] }
 0x294   :  { %5800 = vmatmul.bf16.vlgmr.msrb.gmra.mxu2 %v15381_v57  ;;  %v14149_v42 = vld [vmem:[#allocation2 + $0x84] sm:$0xf]  ;;  %v11354_v45 = vor.u32 %v14349_v37, %v11351_v38 }
 0x295   :  { %5844 = vmatpush.bf16.msra.mxu2 %v11226_v51  ;;  %5819 = vmatpush.bf16.msra.mxu0 %v10682_v63  ;;  %v10551_v43 = vld [vmem:[#allocation2 + $0xa0] sm:$0xf0] }
 0x296   :  { %5813 = vmatmul.bf16.vlgmr.msrb.gmra.mxu3 %v15384_v5  ;;  %v14213_v44 = vld [vmem:[#allocation2 + $0x284] sm:$0xf]  ;;  %v10554_v53 = vor.u32 %v14149_v42, %v10551_v43 }
 0x297   :  { %5857 = vmatpush.bf16.msra.mxu3 %v11482_v56  ;;  %5832 = vmatpush.bf16.msra.mxu1 %v10938_v0  ;;  %v10807_v47 = vld [vmem:[#allocation2 + $0x2a0] sm:$0xf0] }
 0x298   :  { %v14277_v7 = vld [vmem:[#allocation2 + $0x484] sm:$0xf]  ;;  %v10810_v55 = vor.u32 %v14213_v44, %v10807_v47 }
 0x299   :  { %5845 = vmatpush.bf16.msra.mxu2 %v11194_v46  ;;  %5820 = vmatpush.bf16.msra.mxu0 %v10650_v16  ;;  %v11063_v48 = vld [vmem:[#allocation2 + $0x4a0] sm:$0xf0] }
 0x29a   :  { %v14341_v51 = vld [vmem:[#allocation2 + $0x684] sm:$0xf]  ;;  %v11066_v56 = vor.u32 %v14277_v7, %v11063_v48 }
 0x29b   :  { %5858 = vmatpush.bf16.msra.mxu3 %v11450_v31  ;;  %5833 = vmatpush.bf16.msra.mxu1 %v10906_v6  ;;  %v11319_v52 = vld [vmem:[#allocation2 + $0x6a0] sm:$0xf0] }
 0x29c   :  { %v14141_v58 = vld [vmem:[#allocation2 + $0x44] sm:$0xf]  ;;  %v11322_v61 = vor.u32 %v14341_v51, %v11319_v52 }
 0x29d   :  { %5846 = vmatpush.bf16.msra.mxu2 %v11162_v10  ;;  %5821 = vmatpush.bf16.msra.mxu0 %v10618_v22  ;;  %v10519_v59 = vld [vmem:[#allocation2 + $0x60] sm:$0xf0] }
 0x29e   :  { %v14205_v60 = vld [vmem:[#allocation2 + $0x244] sm:$0xf]  ;;  %v10522_v15 = vor.u32 %v14141_v58, %v10519_v59 }
 0x29f   :  { %5859 = vmatpush.bf16.msra.mxu3 %v11418_v13  ;;  %5834 = vmatpush.bf16.msra.mxu1 %v10874_v24  ;;  %v10775_v62 = vld [vmem:[#allocation2 + $0x260] sm:$0xf0] }
 0x2a0   :  { %v14269_v63 = vld [vmem:[#allocation2 + $0x444] sm:$0xf]  ;;  %v10778_v23 = vor.u32 %v14205_v60, %v10775_v62 }
 0x2a1   :  { %5847 = vmatpush.bf16.msra.mxu2 %v11130_v27  ;;  %5822 = vmatpush.bf16.msra.mxu0 %v10586_v40  ;;  %v11031_v0 = vld [vmem:[#allocation2 + $0x460] sm:$0xf0] }
 0x2a2   :  { %v14333_v46 = vld [vmem:[#allocation2 + $0x644] sm:$0xf]  ;;  %v11034_v1 = vor.u32 %v14269_v63, %v11031_v0 }
 0x2a3   :  { %5860 = vmatpush.bf16.msra.mxu3 %v11386_v32  ;;  %5835 = vmatpush.bf16.msra.mxu1 %v10842_v9  ;;  %v11287_v8 = vld [vmem:[#allocation2 + $0x660] sm:$0xf0] }
 0x2a4   :  { %v14133_v25 = vld [vmem:[#allocation2 + $0x4] sm:$0xf]  ;;  %v11290_v16 = vor.u32 %v14333_v46, %v11287_v8 }
 0x2a5   :  { %5848 = vmatpush.bf16.msra.mxu2 %v11098_v41  ;;  %5823 = vmatpush.bf16.msra.mxu0 %v10554_v53  ;;  %v10487_v31 = vld [vmem:[#allocation2 + $0x20] sm:$0xf0] }
 0x2a6   :  { %v14197_v2 = vld [vmem:[#allocation2 + $0x204] sm:$0xf]  ;;  %v10490_v17 = vor.u32 %v14133_v25, %v10487_v31 }
 0x2a7   :  { %5861 = vmatpush.bf16.msra.mxu3 %v11354_v45  ;;  %5836 = vmatpush.bf16.msra.mxu1 %v10810_v55  ;;  %v10743_v3 = vld [vmem:[#allocation2 + $0x220] sm:$0xf0] }
 0x2a8   :  { %v14261_v4 = vld [vmem:[#allocation2 + $0x404] sm:$0xf]  ;;  %v10746_v21 = vor.u32 %v14197_v2, %v10743_v3 }
 0x2a9   :  { %5849 = vmatpush.bf16.msra.mxu2 %v11066_v56  ;;  %v10999_v6 = vld [vmem:[#allocation2 + $0x420] sm:$0xf0]  ;;  %5824 = vmatpush.bf16.msra.mxu0 %v10522_v15 }
 0x2aa   :  { %v14325_v10 = vld [vmem:[#allocation2 + $0x604] sm:$0xf]  ;;  %v11002_v22 = vor.u32 %v14261_v4, %v10999_v6 }
 0x2ab   :  { %5862 = vmatpush.bf16.msra.mxu3 %v11322_v61  ;;  %v11255_v11 = vld [vmem:[#allocation2 + $0x620] sm:$0xf0]  ;;  %5837 = vmatpush.bf16.msra.mxu1 %v10778_v23 }
 0x2ac   :  { %v14445_v12 = vld [vmem:[#allocation2 + $0x9c4] sm:$0xf]  ;;  %v11258_v28 = vor.u32 %v14325_v10, %v11255_v11 }
 0x2ad   :  { %v11735_v49 = vld [vmem:[#allocation2 + $0x9e0] sm:$0xf0]  ;;  %5850 = vmatpush.bf16.msra.mxu2 %v11034_v1  ;;  %5825 = vmatpush.bf16.msra.mxu0 %v10490_v17 }
 0x2ae   :  { %v14509_v13 = vld [vmem:[#allocation2 + $0xbc4] sm:$0xf]  ;;  %v11738_v29 = vor.u32 %v14445_v12, %v11735_v49 }
 0x2af   :  { %v11991_v18 = vld [vmem:[#allocation2 + $0xbe0] sm:$0xf0]  ;;  %5863 = vmatpush.bf16.msra.mxu3 %v11290_v16  ;;  %5838 = vmatpush.bf16.msra.mxu1 %v10746_v21 }
 0x2b0   :  { %v14573_v19 = vld [vmem:[#allocation2 + $0xdc4] sm:$0xf]  ;;  %v11994_v30 = vor.u32 %v14509_v13, %v11991_v18  ;;  %5826 = vmatmul.bf16.vlgmr.msra.gmra.mxu0 %v15333_v39 }
 0x2b1   :  { %v12247_v20 = vld [vmem:[#allocation2 + $0xde0] sm:$0xf0]  ;;  %5851 = vmatpush.bf16.msra.mxu2 %v11002_v22  ;;  %5870 = vmatpush.bf16.msrb.mxu0 %v11738_v29 }
 0x2b2   :  { %v14637_v24 = vld [vmem:[#allocation2 + $0xfc4] sm:$0xf]  ;;  %v12250_v32 = vor.u32 %v14573_v19, %v12247_v20  ;;  %5839 = vmatmul.bf16.vlgmr.msra.gmra.mxu1 %v15343_v50 }
 0x2b3   :  { %v12503_v27 = vld [vmem:[#allocation2 + $0xfe0] sm:$0xf0]  ;;  %5864 = vmatpush.bf16.msra.mxu3 %v11258_v28  ;;  %5883 = vmatpush.bf16.msrb.mxu1 %v11994_v30 }
 0x2b4   :  { %v14437_v33 = vld [vmem:[#allocation2 + $0x984] sm:$0xf]  ;;  %v12506_v37 = vor.u32 %v14637_v24, %v12503_v27  ;;  %5852 = vmatmul.bf16.vlgmr.msra.gmra.mxu2 %v15352_v26 }
 0x2b5   :  { %v11703_v34 = vld [vmem:[#allocation2 + $0x9a0] sm:$0xf0]  ;;  %5896 = vmatpush.bf16.msrb.mxu2 %v12250_v32 }
 0x2b6   :  { %v14501_v36 = vld [vmem:[#allocation2 + $0xb84] sm:$0xf]  ;;  %v11706_v43 = vor.u32 %v14437_v33, %v11703_v34  ;;  %5865 = vmatmul.bf16.vlgmr.msra.gmra.mxu3 %v15362_v54 }
 0x2b7   :  { %v11959_v38 = vld [vmem:[#allocation2 + $0xba0] sm:$0xf0]  ;;  %5909 = vmatpush.bf16.msrb.mxu3 %v12506_v37 }
 0x2b8   :  { %v14565_v40 = vld [vmem:[#allocation2 + $0xd84] sm:$0xf]  ;;  %v11962_v44 = vor.u32 %v14501_v36, %v11959_v38  ;;  %5871 = vmatpush.bf16.msrb.mxu0 %v11706_v43 }
 0x2b9   :  { %v12215_v9 = vld [vmem:[#allocation2 + $0xda0] sm:$0xf0] }
 0x2ba   :  { %v14629_v41 = vld [vmem:[#allocation2 + $0xf84] sm:$0xf]  ;;  %v12218_v45 = vor.u32 %v14565_v40, %v12215_v9  ;;  %5884 = vmatpush.bf16.msrb.mxu1 %v11962_v44 }
 0x2bb   :  { %v12471_v42 = vld [vmem:[#allocation2 + $0xfa0] sm:$0xf0] }
 0x2bc   :  { %v14429_v47 = vld [vmem:[#allocation2 + $0x944] sm:$0xf]  ;;  %v12474_v51 = vor.u32 %v14629_v41, %v12471_v42  ;;  %5897 = vmatpush.bf16.msrb.mxu2 %v12218_v45 }
 0x2bd   :  { %v11671_v7 = vld [vmem:[#allocation2 + $0x960] sm:$0xf0] }
 0x2be   :  { %v14493_v48 = vld [vmem:[#allocation2 + $0xb44] sm:$0xf]  ;;  %v11674_v59 = vor.u32 %v14429_v47, %v11671_v7  ;;  %5910 = vmatpush.bf16.msrb.mxu3 %v12474_v51 }
 0x2bf   :  { %v11927_v52 = vld [vmem:[#allocation2 + $0xb60] sm:$0xf0] }
 0x2c0   :  { %v14557_v53 = vld [vmem:[#allocation2 + $0xd44] sm:$0xf]  ;;  %v11930_v60 = vor.u32 %v14493_v48, %v11927_v52  ;;  %5872 = vmatpush.bf16.msrb.mxu0 %v11674_v59 }
 0x2c1   :  { %v12183_v55 = vld [vmem:[#allocation2 + $0xd60] sm:$0xf0] }
 0x2c2   :  { %v14621_v56 = vld [vmem:[#allocation2 + $0xf44] sm:$0xf]  ;;  %v12186_v61 = vor.u32 %v14557_v53, %v12183_v55  ;;  %5885 = vmatpush.bf16.msrb.mxu1 %v11930_v60 }
 0x2c3   :  { %v12439_v58 = vld [vmem:[#allocation2 + $0xf60] sm:$0xf0] }
 0x2c4   :  { %v14421_v62 = vld [vmem:[#allocation2 + $0x904] sm:$0xf]  ;;  %v12442_v46 = vor.u32 %v14621_v56, %v12439_v58  ;;  %5898 = vmatpush.bf16.msrb.mxu2 %v12186_v61 }
 0x2c5   :  { %v11639_v63 = vld [vmem:[#allocation2 + $0x920] sm:$0xf0] }
 0x2c6   :  { %v14485_v0 = vld [vmem:[#allocation2 + $0xb04] sm:$0xf]  ;;  %v11642_v1 = vor.u32 %v14421_v62, %v11639_v63  ;;  %5911 = vmatpush.bf16.msrb.mxu3 %v12442_v46  ;;  %v10717_v63 = vld [vmem:[#allocation2 + $0x1c8] sm:$0xf] }
 0x2c7   :  { %v11895_v8 = vld [vmem:[#allocation2 + $0xb20] sm:$0xf0]  ;;  %v10973_v46 = vld [vmem:[#allocation2 + $0x3c8] sm:$0xf] }
 0x2c8   :  { %v14549_v15 = vld [vmem:[#allocation2 + $0xd04] sm:$0xf]  ;;  %v11898_v2 = vor.u32 %v14485_v0, %v11895_v8  ;;  %5873 = vmatpush.bf16.msrb.mxu0 %v11642_v1  ;;  %v14194_v0 = vld [vmem:[#allocation2 + $0x1e4] sm:$0xf0] }
 0x2c9   :  { %v12151_v25 = vld [vmem:[#allocation2 + $0xd20] sm:$0xf0] }
 0x2ca   :  { %v14613_v31 = vld [vmem:[#allocation2 + $0xf04] sm:$0xf]  ;;  %v12154_v3 = vor.u32 %v14549_v15, %v12151_v25  ;;  %5886 = vmatpush.bf16.msrb.mxu1 %v11898_v2  ;;  %v14258_v15 = vld [vmem:[#allocation2 + $0x3e4] sm:$0xf0] }
 0x2cb   :  { %v12407_v23 = vld [vmem:[#allocation2 + $0xf20] sm:$0xf0]  ;;  %v11229_v25 = vld [vmem:[#allocation2 + $0x5c8] sm:$0xf] }
 0x2cc   :  { %v14413_v4 = vld [vmem:[#allocation2 + $0x8c4] sm:$0xf]  ;;  %v12410_v10 = vor.u32 %v14613_v31, %v12407_v23  ;;  %5899 = vmatpush.bf16.msrb.mxu2 %v12154_v3  ;;  %v14322_v31 = vld [vmem:[#allocation2 + $0x5e4] sm:$0xf0] }
 0x2cd   :  { %v11607_v16 = vld [vmem:[#allocation2 + $0x8e0] sm:$0xf0]  ;;  %v11485_v2 = vld [vmem:[#allocation2 + $0x7c8] sm:$0xf] }
 0x2ce   :  { %v14477_v6 = vld [vmem:[#allocation2 + $0xac4] sm:$0xf]  ;;  %v11610_v18 = vor.u32 %v14413_v4, %v11607_v16  ;;  %5912 = vmatpush.bf16.msrb.mxu3 %v12410_v10  ;;  %v14386_v3 = vld [vmem:[#allocation2 + $0x7e4] sm:$0xf0]  ;;  %v10718_v16 = vor.u32 %v14194_v0, %v10717_v63  ;;  %v11230_v10 = vor.u32 %v14322_v31, %v11229_v25 }
 0x2cf   :  { %v11863_v11 = vld [vmem:[#allocation2 + $0xae0] sm:$0xf0]  ;;  %v11101_v63 = vld [vmem:[#allocation2 + $0x4c8] sm:$0xf] }
 0x2d0   :  { %v14541_v12 = vld [vmem:[#allocation2 + $0xcc4] sm:$0xf]  ;;  %v11866_v19 = vor.u32 %v14477_v6, %v11863_v11  ;;  %5874 = vmatpush.bf16.msrb.mxu0 %v11610_v18  ;;  %v10974_v6 = vor.u32 %v14258_v15, %v10973_v46  ;;  %v10685_v11 = vld [vmem:[#allocation2 + $0x188] sm:$0xf] }
 0x2d1   :  { %v12119_v49 = vld [vmem:[#allocation2 + $0xce0] sm:$0xf0]  ;;  %v11197_v18 = vld [vmem:[#allocation2 + $0x588] sm:$0xf] }
 0x2d2   :  { %v14605_v13 = vld [vmem:[#allocation2 + $0xec4] sm:$0xf]  ;;  %v12122_v20 = vor.u32 %v14541_v12, %v12119_v49  ;;  %5887 = vmatpush.bf16.msrb.mxu1 %v11866_v19  ;;  %v14186_v12 = vld [vmem:[#allocation2 + $0x1a4] sm:$0xf0] }
 0x2d3   :  { %v12375_v17 = vld [vmem:[#allocation2 + $0xee0] sm:$0xf0]  ;;  %v10941_v49 = vld [vmem:[#allocation2 + $0x388] sm:$0xf] }
 0x2d4   :  { %v14405_v21 = vld [vmem:[#allocation2 + $0x884] sm:$0xf]  ;;  %v12378_v27 = vor.u32 %v14605_v13, %v12375_v17  ;;  %5900 = vmatpush.bf16.msrb.mxu2 %v12122_v20  ;;  %v11486_v13 = vor.u32 %v14386_v3, %v11485_v2  ;;  %v14250_v17 = vld [vmem:[#allocation2 + $0x3a4] sm:$0xf0] }
 0x2d5   :  { %v11575_v22 = vld [vmem:[#allocation2 + $0x8a0] sm:$0xf0]  ;;  %v14314_v19 = vld [vmem:[#allocation2 + $0x5a4] sm:$0xf0] }
 0x2d6   :  { %v14469_v24 = vld [vmem:[#allocation2 + $0xa84] sm:$0xf]  ;;  %v11578_v34 = vor.u32 %v14405_v21, %v11575_v22  ;;  %5913 = vmatpush.bf16.msrb.mxu3 %v12378_v27  ;;  %v11453_v20 = vld [vmem:[#allocation2 + $0x788] sm:$0xf]  ;;  %v10686_v22 = vor.u32 %v14186_v12, %v10685_v11  ;;  %v11198_v27 = vor.u32 %v14314_v19, %v11197_v18 }
 0x2d7   :  { %v11831_v28 = vld [vmem:[#allocation2 + $0xaa0] sm:$0xf0]  ;;  %v14378_v21 = vld [vmem:[#allocation2 + $0x7a4] sm:$0xf0] }
 0x2d8   :  { %v14533_v29 = vld [vmem:[#allocation2 + $0xc84] sm:$0xf]  ;;  %v11834_v36 = vor.u32 %v14469_v24, %v11831_v28  ;;  %5875 = vmatpush.bf16.msrb.mxu0 %v11578_v34  ;;  %v10942_v24 = vor.u32 %v14250_v17, %v10941_v49  ;;  %v10653_v28 = vld [vmem:[#allocation2 + $0x148] sm:$0xf] }
 0x2d9   :  { %v12087_v30 = vld [vmem:[#allocation2 + $0xca0] sm:$0xf0]  ;;  %v11165_v34 = vld [vmem:[#allocation2 + $0x548] sm:$0xf] }
 0x2da   :  { %v14597_v32 = vld [vmem:[#allocation2 + $0xe84] sm:$0xf]  ;;  %v12090_v37 = vor.u32 %v14533_v29, %v12087_v30  ;;  %5888 = vmatpush.bf16.msrb.mxu1 %v11834_v36  ;;  %v14178_v29 = vld [vmem:[#allocation2 + $0x164] sm:$0xf0] }
 0x2db   :  { %v12343_v33 = vld [vmem:[#allocation2 + $0xea0] sm:$0xf0]  ;;  %v10909_v30 = vld [vmem:[#allocation2 + $0x348] sm:$0xf] }
 0x2dc   :  { %v14397_v38 = vld [vmem:[#allocation2 + $0x844] sm:$0xf]  ;;  %v12346_v41 = vor.u32 %v14597_v32, %v12343_v33  ;;  %5901 = vmatpush.bf16.msrb.mxu2 %v12090_v37  ;;  %v11454_v32 = vor.u32 %v14378_v21, %v11453_v20  ;;  %v14242_v33 = vld [vmem:[#allocation2 + $0x364] sm:$0xf0] }
 0x2dd   :  { %v11543_v40 = vld [vmem:[#allocation2 + $0x860] sm:$0xf0]  ;;  %v14306_v36 = vld [vmem:[#allocation2 + $0x564] sm:$0xf0] }
 0x2de   :  { %v14461_v9 = vld [vmem:[#allocation2 + $0xa44] sm:$0xf]  ;;  %v11546_v7 = vor.u32 %v14397_v38, %v11543_v40  ;;  %5914 = vmatpush.bf16.msrb.mxu3 %v12346_v41  ;;  %v11421_v37 = vld [vmem:[#allocation2 + $0x748] sm:$0xf]  ;;  %v10654_v40 = vor.u32 %v14178_v29, %v10653_v28  ;;  %v11166_v41 = vor.u32 %v14306_v36, %v11165_v34 }
 0x2df   :  { %v11799_v42 = vld [vmem:[#allocation2 + $0xa60] sm:$0xf0]  ;;  %v14370_v38 = vld [vmem:[#allocation2 + $0x764] sm:$0xf0] }
 0x2e0   :  { %v14525_v43 = vld [vmem:[#allocation2 + $0xc44] sm:$0xf]  ;;  %v11802_v52 = vor.u32 %v14461_v9, %v11799_v42  ;;  %5876 = vmatpush.bf16.msrb.mxu0 %v11546_v7  ;;  %v10910_v9 = vor.u32 %v14242_v33, %v10909_v30  ;;  %v10621_v42 = vld [vmem:[#allocation2 + $0x108] sm:$0xf] }
 0x2e1   :  { %v12055_v44 = vld [vmem:[#allocation2 + $0xc60] sm:$0xf0]  ;;  %v11133_v7 = vld [vmem:[#allocation2 + $0x508] sm:$0xf] }
 0x2e2   :  { %v14589_v45 = vld [vmem:[#allocation2 + $0xe44] sm:$0xf]  ;;  %v12058_v53 = vor.u32 %v14525_v43, %v12055_v44  ;;  %5889 = vmatpush.bf16.msrb.mxu1 %v11802_v52  ;;  %v14170_v43 = vld [vmem:[#allocation2 + $0x124] sm:$0xf0] }
 0x2e3   :  { %v12311_v47 = vld [vmem:[#allocation2 + $0xe60] sm:$0xf0]  ;;  %v10877_v44 = vld [vmem:[#allocation2 + $0x308] sm:$0xf] }
 0x2e4   :  { %v14389_v48 = vld [vmem:[#allocation2 + $0x804] sm:$0xf]  ;;  %v12314_v59 = vor.u32 %v14589_v45, %v12311_v47  ;;  %5902 = vmatpush.bf16.msrb.mxu2 %v12058_v53  ;;  %v11422_v45 = vor.u32 %v14370_v38, %v11421_v37  ;;  %v14234_v47 = vld [vmem:[#allocation2 + $0x324] sm:$0xf0]  ;;  %v10622_v53 = vor.u32 %v14170_v43, %v10621_v42 }
 0x2e5   :  { %v11511_v51 = vld [vmem:[#allocation2 + $0x820] sm:$0xf0]  ;;  %v14362_v52 = vld [vmem:[#allocation2 + $0x724] sm:$0xf0] }
 0x2e6   :  { %v14453_v55 = vld [vmem:[#allocation2 + $0xa04] sm:$0xf]  ;;  %v11514_v8 = vor.u32 %v14389_v48, %v11511_v51  ;;  %5915 = vmatpush.bf16.msrb.mxu3 %v12314_v59  ;;  %v14298_v48 = vld [vmem:[#allocation2 + $0x524] sm:$0xf0] }
 0x2e7   :  { %v11767_v56 = vld [vmem:[#allocation2 + $0xa20] sm:$0xf0]  ;;  %v11389_v51 = vld [vmem:[#allocation2 + $0x708] sm:$0xf] }
 0x2e8   :  { %v14517_v58 = vld [vmem:[#allocation2 + $0xc04] sm:$0xf]  ;;  %v11770_v23 = vor.u32 %v14453_v55, %v11767_v56  ;;  %5877 = vmatpush.bf16.msrb.mxu0 %v11514_v8  ;;  %v10878_v55 = vor.u32 %v14234_v47, %v10877_v44  ;;  %v11134_v56 = vor.u32 %v14298_v48, %v11133_v7  ;;  %v14162_v59 = vld [vmem:[#allocation2 + $0xe4] sm:$0xf0] }
 0x2e9   :  { %v12023_v60 = vld [vmem:[#allocation2 + $0xc20] sm:$0xf0]  ;;  %v14290_v0 = vld [vmem:[#allocation2 + $0x4e4] sm:$0xf0] }
 0x2ea   :  { %v14581_v61 = vld [vmem:[#allocation2 + $0xe04] sm:$0xf]  ;;  %v12026_v1 = vor.u32 %v14517_v58, %v12023_v60  ;;  %5890 = vmatpush.bf16.msrb.mxu1 %v11770_v23  ;;  %v10589_v58 = vld [vmem:[#allocation2 + $0xc8] sm:$0xf]  ;;  %v11102_v31 = vor.u32 %v14290_v0, %v11101_v63 }
 0x2eb   :  { %v12279_v62 = vld [vmem:[#allocation2 + $0xe20] sm:$0xf0]  ;;  %5878 = vmatmul.bf16.vlgmr.msrb.gmra.mxu0 %v15376_v14  ;;  %v10845_v60 = vld [vmem:[#allocation2 + $0x2c8] sm:$0xf]  ;;  %v10590_v15 = vor.u32 %v14162_v59, %v10589_v58 }
 0x2ec   :  { %v12282_v4 = vor.u32 %v14581_v61, %v12279_v62  ;;  %5903 = vmatpush.bf16.msrb.mxu2 %v12026_v1  ;;  %5922 = vmatpush.bf16.msra.mxu0 %v10718_v16  ;;  %v11390_v61 = vor.u32 %v14362_v52, %v11389_v51  ;;  %v14226_v62 = vld [vmem:[#allocation2 + $0x2e4] sm:$0xf0] }
 0x2ed   :  { %5891 = vmatmul.bf16.vlgmr.msrb.gmra.mxu1 %v15378_v35  ;;  %v11357_v46 = vld [vmem:[#allocation2 + $0x6c8] sm:$0xf]  ;;  %v10846_v25 = vor.u32 %v14226_v62, %v10845_v60 }
 0x2ee   :  { %5916 = vmatpush.bf16.msrb.mxu3 %v12282_v4  ;;  %5935 = vmatpush.bf16.msra.mxu1 %v10974_v6  ;;  %v14354_v8 = vld [vmem:[#allocation2 + $0x6e4] sm:$0xf0] }
 0x2ef   :  { %5904 = vmatmul.bf16.vlgmr.msrb.gmra.mxu2 %v15381_v57  ;;  %v10557_v23 = vld [vmem:[#allocation2 + $0x88] sm:$0xf]  ;;  %v11358_v3 = vor.u32 %v14354_v8, %v11357_v46 }
 0x2f0   :  { %5948 = vmatpush.bf16.msra.mxu2 %v11230_v10  ;;  %5923 = vmatpush.bf16.msra.mxu0 %v10686_v22  ;;  %v14154_v1 = vld [vmem:[#allocation2 + $0xa4] sm:$0xf0] }
 0x2f1   :  { %5917 = vmatmul.bf16.vlgmr.msrb.gmra.mxu3 %v15384_v5  ;;  %v10813_v2 = vld [vmem:[#allocation2 + $0x288] sm:$0xf]  ;;  %v10558_v12 = vor.u32 %v14154_v1, %v10557_v23 }
 0x2f2   :  { %5961 = vmatpush.bf16.msra.mxu3 %v11486_v13  ;;  %5936 = vmatpush.bf16.msra.mxu1 %v10942_v24  ;;  %v14218_v4 = vld [vmem:[#allocation2 + $0x2a4] sm:$0xf0] }
 0x2f3   :  { %v11069_v16 = vld [vmem:[#allocation2 + $0x488] sm:$0xf]  ;;  %v10814_v49 = vor.u32 %v14218_v4, %v10813_v2 }
 0x2f4   :  { %5949 = vmatpush.bf16.msra.mxu2 %v11198_v27  ;;  %5924 = vmatpush.bf16.msra.mxu0 %v10654_v40  ;;  %v14282_v6 = vld [vmem:[#allocation2 + $0x4a4] sm:$0xf0] }
 0x2f5   :  { %v11325_v10 = vld [vmem:[#allocation2 + $0x688] sm:$0xf]  ;;  %v11070_v13 = vor.u32 %v14282_v6, %v11069_v16 }
 0x2f6   :  { %5962 = vmatpush.bf16.msra.mxu3 %v11454_v32  ;;  %5937 = vmatpush.bf16.msra.mxu1 %v10910_v9  ;;  %v14346_v11 = vld [vmem:[#allocation2 + $0x6a4] sm:$0xf0] }
 0x2f7   :  { %v10525_v17 = vld [vmem:[#allocation2 + $0x48] sm:$0xf]  ;;  %v11326_v20 = vor.u32 %v14346_v11, %v11325_v10 }
 0x2f8   :  { %5950 = vmatpush.bf16.msra.mxu2 %v11166_v41  ;;  %5925 = vmatpush.bf16.msra.mxu0 %v10622_v53  ;;  %v14146_v18 = vld [vmem:[#allocation2 + $0x64] sm:$0xf0] }
 0x2f9   :  { %v10781_v19 = vld [vmem:[#allocation2 + $0x248] sm:$0xf]  ;;  %v10526_v29 = vor.u32 %v14146_v18, %v10525_v17 }
 0x2fa   :  { %5963 = vmatpush.bf16.msra.mxu3 %v11422_v45  ;;  %5938 = vmatpush.bf16.msra.mxu1 %v10878_v55  ;;  %v14210_v21 = vld [vmem:[#allocation2 + $0x264] sm:$0xf0] }
 0x2fb   :  { %v11037_v22 = vld [vmem:[#allocation2 + $0x448] sm:$0xf]  ;;  %v10782_v33 = vor.u32 %v14210_v21, %v10781_v19 }
 0x2fc   :  { %5951 = vmatpush.bf16.msra.mxu2 %v11134_v56  ;;  %5926 = vmatpush.bf16.msra.mxu0 %v10590_v15  ;;  %v14274_v24 = vld [vmem:[#allocation2 + $0x464] sm:$0xf0] }
 0x2fd   :  { %v11293_v27 = vld [vmem:[#allocation2 + $0x648] sm:$0xf]  ;;  %v11038_v34 = vor.u32 %v14274_v24, %v11037_v22 }
 0x2fe   :  { %5964 = vmatpush.bf16.msra.mxu3 %v11390_v61  ;;  %5939 = vmatpush.bf16.msra.mxu1 %v10846_v25  ;;  %v14338_v28 = vld [vmem:[#allocation2 + $0x664] sm:$0xf0] }
 0x2ff   :  { %v10493_v30 = vld [vmem:[#allocation2 + $0x8] sm:$0xf]  ;;  %v11294_v40 = vor.u32 %v14338_v28, %v11293_v27 }
 0x300   :  { %5952 = vmatpush.bf16.msra.mxu2 %v11102_v31  ;;  %5927 = vmatpush.bf16.msra.mxu0 %v10558_v12  ;;  %v14138_v32 = vld [vmem:[#allocation2 + $0x24] sm:$0xf0] }
 0x301   :  { %v10749_v36 = vld [vmem:[#allocation2 + $0x208] sm:$0xf]  ;;  %v10494_v47 = vor.u32 %v14138_v32, %v10493_v30 }
 0x302   :  { %5965 = vmatpush.bf16.msra.mxu3 %v11358_v3  ;;  %5940 = vmatpush.bf16.msra.mxu1 %v10814_v49  ;;  %v14202_v37 = vld [vmem:[#allocation2 + $0x224] sm:$0xf0] }
 0x303   :  { %v11005_v38 = vld [vmem:[#allocation2 + $0x408] sm:$0xf]  ;;  %v10750_v52 = vor.u32 %v14202_v37, %v10749_v36 }
 0x304   :  { %5953 = vmatpush.bf16.msra.mxu2 %v11070_v13  ;;  %v14266_v9 = vld [vmem:[#allocation2 + $0x424] sm:$0xf0]  ;;  %5928 = vmatpush.bf16.msra.mxu0 %v10526_v29  ;;  %v15403_v13 = vld [vmem:[#allocation11] sm:$0xff] }
 0x305   :  { %v11261_v41 = vld [vmem:[#allocation2 + $0x608] sm:$0xf]  ;;  %v11006_v53 = vor.u32 %v14266_v9, %v11005_v38  ;;  %v3138_v28 = vperm.slane %v15403_v13, 0  ;;  %v5723_v38 = vpop.f32.mrf.mxu0 }
 0x306   :  { %5966 = vmatpush.bf16.msra.mxu3 %v11326_v20  ;;  %v14330_v42 = vld [vmem:[#allocation2 + $0x624] sm:$0xf0]  ;;  %5941 = vmatpush.bf16.msra.mxu1 %v10782_v33 }
 0x307   :  { %v11741_v43 = vld [vmem:[#allocation2 + $0x9c8] sm:$0xf]  ;;  %v11262_v58 = vor.u32 %v14330_v42, %v11261_v41 }
 0x308   :  { %v14450_v44 = vld [vmem:[#allocation2 + $0x9e4] sm:$0xf0]  ;;  %5954 = vmatpush.bf16.msra.mxu2 %v11038_v34  ;;  %5929 = vmatpush.bf16.msra.mxu0 %v10494_v47 }
 0x309   :  { %v11997_v45 = vld [vmem:[#allocation2 + $0xbc8] sm:$0xf]  ;;  %v11742_v59 = vor.u32 %v14450_v44, %v11741_v43  ;;  %v5724_v44 = vadd.f32 %v5723_v38, %v3138_v28 }
 0x30a   :  { %v14514_v7 = vld [vmem:[#allocation2 + $0xbe4] sm:$0xf0]  ;;  %5967 = vmatpush.bf16.msra.mxu3 %v11294_v40  ;;  %5942 = vmatpush.bf16.msra.mxu1 %v10750_v52 }
 0x30b   :  { %v12253_v48 = vld [vmem:[#allocation2 + $0xdc8] sm:$0xf]  ;;  %v11998_v60 = vor.u32 %v14514_v7, %v11997_v45  ;;  %5930 = vmatmul.bf16.vlgmr.msra.gmra.mxu0 %v15333_v39  ;;  %v5736_v45 = vpop.f32.mrf.mxu1 }
 0x30c   :  { %v14578_v51 = vld [vmem:[#allocation2 + $0xde4] sm:$0xf0]  ;;  %5955 = vmatpush.bf16.msra.mxu2 %v11006_v53  ;;  %5974 = vmatpush.bf16.msrb.mxu0 %v11742_v59 }
 0x30d   :  { %v12509_v55 = vld [vmem:[#allocation2 + $0xfc8] sm:$0xf]  ;;  %v12254_v61 = vor.u32 %v14578_v51, %v12253_v48  ;;  %5943 = vmatmul.bf16.vlgmr.msra.gmra.mxu1 %v15343_v50 }
 0x30e   :  { %v14642_v56 = vld [vmem:[#allocation2 + $0xfe4] sm:$0xf0]  ;;  %5968 = vmatpush.bf16.msra.mxu3 %v11262_v58  ;;  %5987 = vmatpush.bf16.msrb.mxu1 %v11998_v60 }
 0x30f   :  { %v11709_v62 = vld [vmem:[#allocation2 + $0x988] sm:$0xf]  ;;  %v12510_v46 = vor.u32 %v14642_v56, %v12509_v55  ;;  %5956 = vmatmul.bf16.vlgmr.msra.gmra.mxu2 %v15352_v26  ;;  %v5737_v55 = vadd.f32 %v5736_v45, %v5724_v44  ;;  %v14254_v44 = vld [vmem:[#allocation2 + $0x3cc] sm:$0xf] }
 0x310   :  { %v14442_v63 = vld [vmem:[#allocation2 + $0x9a4] sm:$0xf0]  ;;  %6000 = vmatpush.bf16.msrb.mxu2 %v12254_v61 }
 0x311   :  { %v11965_v0 = vld [vmem:[#allocation2 + $0xb88] sm:$0xf]  ;;  %v11710_v1 = vor.u32 %v14442_v63, %v11709_v62  ;;  %5969 = vmatmul.bf16.vlgmr.msra.gmra.mxu3 %v15362_v54  ;;  %v5749_v63 = vpop.f32.mrf.mxu2 }
 0x312   :  { %v14506_v8 = vld [vmem:[#allocation2 + $0xba4] sm:$0xf0]  ;;  %6013 = vmatpush.bf16.msrb.mxu3 %v12510_v46 }
 0x313   :  { %v12221_v15 = vld [vmem:[#allocation2 + $0xd88] sm:$0xf]  ;;  %v11966_v3 = vor.u32 %v14506_v8, %v11965_v0  ;;  %5975 = vmatpush.bf16.msrb.mxu0 %v11710_v1 }
 0x314   :  { %v14570_v25 = vld [vmem:[#allocation2 + $0xda4] sm:$0xf0] }
 0x315   :  { %v12477_v31 = vld [vmem:[#allocation2 + $0xf88] sm:$0xf]  ;;  %v12222_v4 = vor.u32 %v14570_v25, %v12221_v15  ;;  %5988 = vmatpush.bf16.msrb.mxu1 %v11966_v3  ;;  %v5750_v25 = vadd.f32 %v5749_v63, %v5737_v55  ;;  %v11487_v55 = vld [vmem:[#allocation2 + $0x7e8] sm:$0xf0] }
 0x316   :  { %v14634_v23 = vld [vmem:[#allocation2 + $0xfa4] sm:$0xf0]  ;;  %v14246_v63 = vld [vmem:[#allocation2 + $0x38c] sm:$0xf] }
 0x317   :  { %v11677_v2 = vld [vmem:[#allocation2 + $0x948] sm:$0xf]  ;;  %v12478_v11 = vor.u32 %v14634_v23, %v12477_v31  ;;  %6001 = vmatpush.bf16.msrb.mxu2 %v12222_v4  ;;  %v5762_v31 = vpop.f32.mrf.mxu3  ;;  %v5725_v4 = vpop.f32.mrf.mxu0 }
 0x318   :  { %v14434_v16 = vld [vmem:[#allocation2 + $0x964] sm:$0xf0]  ;;  %v15409_v3 = vadd.f32 %v5762_v31, %v5750_v25  ;;  %v14374_v25 = vld [vmem:[#allocation2 + $0x78c] sm:$0xf] }
 0x319   :  { %v11933_v6 = vld [vmem:[#allocation2 + $0xb48] sm:$0xf]  ;;  %v11678_v19 = vor.u32 %v14434_v16, %v11677_v2  ;;  %6014 = vmatpush.bf16.msrb.mxu3 %v12478_v11  ;;  %v11455_v31 = vld [vmem:[#allocation2 + $0x7a8] sm:$0xf0] }
 0x31a   :  { %v14498_v10 = vld [vmem:[#allocation2 + $0xb64] sm:$0xf0]  ;;  %v14174_v4 = vld [vmem:[#allocation2 + $0x14c] sm:$0xf] }
 0x31b   :  { %v12189_v12 = vld [vmem:[#allocation2 + $0xd48] sm:$0xf]  ;;  %v11934_v21 = vor.u32 %v14498_v10, %v11933_v6  ;;  %5976 = vmatpush.bf16.msrb.mxu0 %v11678_v19 }
 0x31c   :  { %v14562_v49 = vld [vmem:[#allocation2 + $0xd64] sm:$0xf0] }
 0x31d   :  { %v12445_v17 = vld [vmem:[#allocation2 + $0xf48] sm:$0xf]  ;;  %v12190_v22 = vor.u32 %v14562_v49, %v12189_v12  ;;  %5989 = vmatpush.bf16.msrb.mxu1 %v11934_v21  ;;  %v5738_v49 = vpop.f32.mrf.mxu1 }
 0x31e   :  { %v14626_v18 = vld [vmem:[#allocation2 + $0xf64] sm:$0xf0]  ;;  %v11167_v49 = vld [vmem:[#allocation2 + $0x568] sm:$0xf0] }
 0x31f   :  { %v11645_v20 = vld [vmem:[#allocation2 + $0x908] sm:$0xf]  ;;  %v12446_v29 = vor.u32 %v14626_v18, %v12445_v17  ;;  %6002 = vmatpush.bf16.msrb.mxu2 %v12190_v22 }
 0x320   :  { %v14426_v24 = vld [vmem:[#allocation2 + $0x924] sm:$0xf0] }
 0x321   :  { %v11901_v27 = vld [vmem:[#allocation2 + $0xb08] sm:$0xf]  ;;  %v11646_v37 = vor.u32 %v14426_v24, %v11645_v20  ;;  %6015 = vmatpush.bf16.msrb.mxu3 %v12446_v29 }
 0x322   :  { %v14490_v30 = vld [vmem:[#allocation2 + $0xb24] sm:$0xf0] }
 0x323   :  { %v12157_v32 = vld [vmem:[#allocation2 + $0xd08] sm:$0xf]  ;;  %v11902_v40 = vor.u32 %v14490_v30, %v11901_v27  ;;  %5977 = vmatpush.bf16.msrb.mxu0 %v11646_v37 }
 0x324   :  { %v14554_v33 = vld [vmem:[#allocation2 + $0xd24] sm:$0xf0] }
 0x325   :  { %v12413_v34 = vld [vmem:[#allocation2 + $0xf08] sm:$0xf]  ;;  %v12158_v9 = vor.u32 %v14554_v33, %v12157_v32  ;;  %5990 = vmatpush.bf16.msrb.mxu1 %v11902_v40 }
 0x326   :  { %v14618_v36 = vld [vmem:[#allocation2 + $0xf24] sm:$0xf0] }
 0x327   :  { %v11613_v41 = vld [vmem:[#allocation2 + $0x8c8] sm:$0xf]  ;;  %v12414_v47 = vor.u32 %v14618_v36, %v12413_v34  ;;  %6003 = vmatpush.bf16.msrb.mxu2 %v12158_v9  ;;  %v5751_v36 = vpop.f32.mrf.mxu2 }
 0x328   :  { %v14418_v42 = vld [vmem:[#allocation2 + $0x8e4] sm:$0xf0] }
 0x329   :  { %v11869_v43 = vld [vmem:[#allocation2 + $0xac8] sm:$0xf]  ;;  %v11614_v56 = vor.u32 %v14418_v42, %v11613_v41  ;;  %6016 = vmatpush.bf16.msrb.mxu3 %v12414_v47  ;;  %v5764_v41 = vpop.f32.mrf.mxu3  ;;  %v14190_v42 = vld [vmem:[#allocation2 + $0x1cc] sm:$0xf] }
 0x32a   :  { %v14482_v7 = vld [vmem:[#allocation2 + $0xae4] sm:$0xf0]  ;;  %v10975_v47 = vld [vmem:[#allocation2 + $0x3e8] sm:$0xf0] }
 0x32b   :  { %v12125_v48 = vld [vmem:[#allocation2 + $0xcc8] sm:$0xf]  ;;  %v11870_v58 = vor.u32 %v14482_v7, %v11869_v43  ;;  %5978 = vmatpush.bf16.msrb.mxu0 %v11614_v56  ;;  %v10719_v43 = vld [vmem:[#allocation2 + $0x1e8] sm:$0xf0] }
 0x32c   :  { %v14546_v51 = vld [vmem:[#allocation2 + $0xce4] sm:$0xf0]  ;;  %v14318_v7 = vld [vmem:[#allocation2 + $0x5cc] sm:$0xf] }
 0x32d   :  { %v12381_v52 = vld [vmem:[#allocation2 + $0xec8] sm:$0xf]  ;;  %v12126_v59 = vor.u32 %v14546_v51, %v12125_v48  ;;  %5991 = vmatpush.bf16.msrb.mxu1 %v11870_v58  ;;  %v11231_v48 = vld [vmem:[#allocation2 + $0x5e8] sm:$0xf0]  ;;  %v10722_v58 = vor.u32 %v14190_v42, %v10719_v43 }
 0x32e   :  { %v14610_v53 = vld [vmem:[#allocation2 + $0xee4] sm:$0xf0]  ;;  %v10591_v41 = vld [vmem:[#allocation2 + $0xe8] sm:$0xf0] }
 0x32f   :  { %v11581_v60 = vld [vmem:[#allocation2 + $0x888] sm:$0xf]  ;;  %v12382_v0 = vor.u32 %v14610_v53, %v12381_v52  ;;  %6004 = vmatpush.bf16.msrb.mxu2 %v12126_v59  ;;  %v14382_v53 = vld [vmem:[#allocation2 + $0x7cc] sm:$0xf]  ;;  %v10978_v59 = vor.u32 %v14254_v44, %v10975_v47  ;;  %v5788_v44 = vpop.f32.mrf.mxu1 }
 0x330   :  { %v14410_v61 = vld [vmem:[#allocation2 + $0x8a4] sm:$0xf0]  ;;  %v14222_v42 = vld [vmem:[#allocation2 + $0x2cc] sm:$0xf] }
 0x331   :  { %v11837_v62 = vld [vmem:[#allocation2 + $0xa88] sm:$0xf]  ;;  %v11582_v2 = vor.u32 %v14410_v61, %v11581_v60  ;;  %6017 = vmatpush.bf16.msrb.mxu3 %v12382_v0  ;;  %v11234_v60 = vor.u32 %v14318_v7, %v11231_v48  ;;  %v14182_v61 = vld [vmem:[#allocation2 + $0x18c] sm:$0xf]  ;;  %v11490_v0 = vor.u32 %v14382_v53, %v11487_v55 }
 0x332   :  { %v14474_v46 = vld [vmem:[#allocation2 + $0xaa4] sm:$0xf0]  ;;  %v10847_v47 = vld [vmem:[#allocation2 + $0x2e8] sm:$0xf0] }
 0x333   :  { %v12093_v8 = vld [vmem:[#allocation2 + $0xc88] sm:$0xf]  ;;  %v11838_v16 = vor.u32 %v14474_v46, %v11837_v62  ;;  %5979 = vmatpush.bf16.msrb.mxu0 %v11582_v2  ;;  %v10687_v62 = vld [vmem:[#allocation2 + $0x1a8] sm:$0xf0] }
 0x334   :  { %v14538_v15 = vld [vmem:[#allocation2 + $0xca4] sm:$0xf0]  ;;  %v10943_v46 = vld [vmem:[#allocation2 + $0x3a8] sm:$0xf0] }
 0x335   :  { %v12349_v23 = vld [vmem:[#allocation2 + $0xe88] sm:$0xf]  ;;  %v12094_v6 = vor.u32 %v14538_v15, %v12093_v8  ;;  %5992 = vmatpush.bf16.msrb.mxu1 %v11838_v16  ;;  %v14310_v8 = vld [vmem:[#allocation2 + $0x58c] sm:$0xf] }
 0x336   :  { %v14602_v1 = vld [vmem:[#allocation2 + $0xea4] sm:$0xf0]  ;;  %v11199_v15 = vld [vmem:[#allocation2 + $0x5a8] sm:$0xf0] }
 0x337   :  { %v11549_v10 = vld [vmem:[#allocation2 + $0x848] sm:$0xf]  ;;  %v12350_v17 = vor.u32 %v14602_v1, %v12349_v23  ;;  %6005 = vmatpush.bf16.msrb.mxu2 %v12094_v6  ;;  %v10690_v23 = vor.u32 %v14182_v61, %v10687_v62  ;;  %v10946_v1 = vor.u32 %v14246_v63, %v10943_v46  ;;  %v11202_v2 = vor.u32 %v14310_v8, %v11199_v15  ;;  %v10655_v16 = vld [vmem:[#allocation2 + $0x168] sm:$0xf0]  ;;  %v5801_v62 = vpop.f32.mrf.mxu2  ;;  %v5814_v15 = vpop.f32.mrf.mxu3 }
 0x338   :  { %v14402_v11 = vld [vmem:[#allocation2 + $0x864] sm:$0xf0]  ;;  %v14238_v6 = vld [vmem:[#allocation2 + $0x34c] sm:$0xf] }
 0x339   :  { %v11805_v12 = vld [vmem:[#allocation2 + $0xa48] sm:$0xf]  ;;  %v11550_v24 = vor.u32 %v14402_v11, %v11549_v10  ;;  %6018 = vmatpush.bf16.msrb.mxu3 %v12350_v17  ;;  %v11458_v10 = vor.u32 %v14374_v25, %v11455_v31  ;;  %v10911_v11 = vld [vmem:[#allocation2 + $0x368] sm:$0xf0] }
 0x33a   :  { %v14466_v18 = vld [vmem:[#allocation2 + $0xa64] sm:$0xf0]  ;;  %v14366_v17 = vld [vmem:[#allocation2 + $0x74c] sm:$0xf] }
 0x33b   :  { %v12061_v19 = vld [vmem:[#allocation2 + $0xc48] sm:$0xf]  ;;  %v11806_v29 = vor.u32 %v14466_v18, %v11805_v12  ;;  %5980 = vmatpush.bf16.msrb.mxu0 %v11550_v24  ;;  %v14302_v12 = vld [vmem:[#allocation2 + $0x54c] sm:$0xf] }
 0x33c   :  { %v14530_v20 = vld [vmem:[#allocation2 + $0xc64] sm:$0xf0]  ;;  %v11423_v18 = vld [vmem:[#allocation2 + $0x768] sm:$0xf0] }
 0x33d   :  { %v12317_v21 = vld [vmem:[#allocation2 + $0xe48] sm:$0xf]  ;;  %v12062_v30 = vor.u32 %v14530_v20, %v12061_v19  ;;  %5993 = vmatpush.bf16.msrb.mxu1 %v11806_v29  ;;  %v10658_v19 = vor.u32 %v14174_v4, %v10655_v16  ;;  %v10914_v20 = vor.u32 %v14238_v6, %v10911_v11  ;;  %v10623_v24 = vld [vmem:[#allocation2 + $0x128] sm:$0xf0] }
 0x33e   :  { %v14594_v22 = vld [vmem:[#allocation2 + $0xe64] sm:$0xf0]  ;;  %v10879_v29 = vld [vmem:[#allocation2 + $0x328] sm:$0xf0] }
 0x33f   :  { %v11517_v27 = vld [vmem:[#allocation2 + $0x808] sm:$0xf]  ;;  %v12318_v37 = vor.u32 %v14594_v22, %v12317_v21  ;;  %6006 = vmatpush.bf16.msrb.mxu2 %v12062_v30  ;;  %v11170_v21 = vor.u32 %v14302_v12, %v11167_v49  ;;  %v14166_v22 = vld [vmem:[#allocation2 + $0x10c] sm:$0xf]  ;;  %v5790_v12 = vpop.f32.mrf.mxu1 }
 0x340   :  { %v14394_v28 = vld [vmem:[#allocation2 + $0x824] sm:$0xf0]  ;;  %v14294_v30 = vld [vmem:[#allocation2 + $0x50c] sm:$0xf]  ;;  %v10626_v36 = vor.u32 %v14166_v22, %v10623_v24 }
 0x341   :  { %v11773_v32 = vld [vmem:[#allocation2 + $0xa08] sm:$0xf]  ;;  %v11518_v45 = vor.u32 %v14394_v28, %v11517_v27  ;;  %6019 = vmatpush.bf16.msrb.mxu3 %v12318_v37  ;;  %v14230_v27 = vld [vmem:[#allocation2 + $0x30c] sm:$0xf]  ;;  %v11426_v28 = vor.u32 %v14366_v17, %v11423_v18  ;;  %v5775_v37 = vpop.f32.mrf.mxu0 }
 0x342   :  { %v14458_v33 = vld [vmem:[#allocation2 + $0xa24] sm:$0xf0]  ;;  %v5776_v43 = vadd.f32 %v5775_v37, %v15409_v3  ;;  %v14286_v7 = vld [vmem:[#allocation2 + $0x4cc] sm:$0xf]  ;;  %v5803_v37 = vpop.f32.mrf.mxu2 }
 0x343   :  { %v12029_v34 = vld [vmem:[#allocation2 + $0xc08] sm:$0xf]  ;;  %v11774_v51 = vor.u32 %v14458_v33, %v11773_v32  ;;  %5981 = vmatpush.bf16.msrb.mxu0 %v11518_v45  ;;  %v11135_v32 = vld [vmem:[#allocation2 + $0x528] sm:$0xf0] }
 0x344   :  { %v14522_v38 = vld [vmem:[#allocation2 + $0xc24] sm:$0xf0]  ;;  %v14358_v33 = vld [vmem:[#allocation2 + $0x70c] sm:$0xf]  ;;  %v5789_v53 = vadd.f32 %v5788_v44, %v5776_v43 }
 0x345   :  { %v12285_v40 = vld [vmem:[#allocation2 + $0xe08] sm:$0xf]  ;;  %v12030_v52 = vor.u32 %v14522_v38, %v12029_v34  ;;  %5994 = vmatpush.bf16.msrb.mxu1 %v11774_v51  ;;  %v11391_v34 = vld [vmem:[#allocation2 + $0x728] sm:$0xf0]  ;;  %v10882_v38 = vor.u32 %v14230_v27, %v10879_v29 }
 0x346   :  { %v14586_v9 = vld [vmem:[#allocation2 + $0xe24] sm:$0xf0]  ;;  %5982 = vmatmul.bf16.vlgmr.msrb.gmra.mxu0 %v15376_v14  ;;  %v11394_v45 = vor.u32 %v14358_v33, %v11391_v34  ;;  %v11103_v48 = vld [vmem:[#allocation2 + $0x4e8] sm:$0xf0]  ;;  %v5802_v8 = vadd.f32 %v5801_v62, %v5789_v53 }
 0x347   :  { %v12286_v56 = vor.u32 %v14586_v9, %v12285_v40  ;;  %6007 = vmatpush.bf16.msrb.mxu2 %v12030_v52  ;;  %6026 = vmatpush.bf16.msra.mxu0 %v10722_v58  ;;  %v11138_v40 = vor.u32 %v14294_v30, %v11135_v32  ;;  %v14158_v9 = vld [vmem:[#allocation2 + $0xcc] sm:$0xf]  ;;  %v11106_v58 = vor.u32 %v14286_v7, %v11103_v48 }
 0x348   :  { %5995 = vmatmul.bf16.vlgmr.msrb.gmra.mxu1 %v15378_v35  ;;  %v14350_v51 = vld [vmem:[#allocation2 + $0x6cc] sm:$0xf]  ;;  %v10594_v55 = vor.u32 %v14158_v9, %v10591_v41 }
 0x349   :  { %6020 = vmatpush.bf16.msrb.mxu3 %v12286_v56  ;;  %6039 = vmatpush.bf16.msra.mxu1 %v10978_v59  ;;  %v11359_v52 = vld [vmem:[#allocation2 + $0x6e8] sm:$0xf0]  ;;  %v10850_v56 = vor.u32 %v14222_v42, %v10847_v47  ;;  %v5816_v42 = vpop.f32.mrf.mxu3 }
 0x34a   :  { %6008 = vmatmul.bf16.vlgmr.msrb.gmra.mxu2 %v15381_v57  ;;  %v14150_v59 = vld [vmem:[#allocation2 + $0x8c] sm:$0xf]  ;;  %v11362_v3 = vor.u32 %v14350_v51, %v11359_v52 }
 0x34b   :  { %6052 = vmatpush.bf16.msra.mxu2 %v11234_v60  ;;  %6027 = vmatpush.bf16.msra.mxu0 %v10690_v23  ;;  %v10559_v60 = vld [vmem:[#allocation2 + $0xa8] sm:$0xf0] }
 0x34c   :  { %6021 = vmatmul.bf16.vlgmr.msrb.gmra.mxu3 %v15384_v5  ;;  %v14214_v61 = vld [vmem:[#allocation2 + $0x28c] sm:$0xf]  ;;  %v10562_v23 = vor.u32 %v14150_v59, %v10559_v60 }
 0x34d   :  { %6065 = vmatpush.bf16.msra.mxu3 %v11490_v0  ;;  %6040 = vmatpush.bf16.msra.mxu1 %v10946_v1  ;;  %v10815_v63 = vld [vmem:[#allocation2 + $0x2a8] sm:$0xf0]  ;;  %v5815_v1 = vadd.f32 %v5814_v15, %v5802_v8 }
 0x34e   :  { %v14278_v0 = vld [vmem:[#allocation2 + $0x48c] sm:$0xf]  ;;  %v10818_v4 = vor.u32 %v14214_v61, %v10815_v63 }
 0x34f   :  { %6053 = vmatpush.bf16.msra.mxu2 %v11202_v2  ;;  %6028 = vmatpush.bf16.msra.mxu0 %v10658_v19  ;;  %v11071_v46 = vld [vmem:[#allocation2 + $0x4a8] sm:$0xf0]  ;;  %v5777_v2 = vpop.f32.mrf.mxu0 }
 0x350   :  { %v14342_v25 = vld [vmem:[#allocation2 + $0x68c] sm:$0xf]  ;;  %v11074_v16 = vor.u32 %v14278_v0, %v11071_v46 }
 0x351   :  { %6066 = vmatpush.bf16.msra.mxu3 %v11458_v10  ;;  %6041 = vmatpush.bf16.msra.mxu1 %v10914_v20  ;;  %v11327_v31 = vld [vmem:[#allocation2 + $0x6a8] sm:$0xf0]  ;;  %v6546_v20 = vpack.c.bf16 %v5815_v1, %v5815_v1 }
 0x352   :  { %v14142_v6 = vld [vmem:[#allocation2 + $0x4c] sm:$0xf]  ;;  %v11330_v49 = vor.u32 %v14342_v25, %v11327_v31 }
 0x353   :  { %6054 = vmatpush.bf16.msra.mxu2 %v11170_v21  ;;  %6029 = vmatpush.bf16.msra.mxu0 %v10626_v36  ;;  %v10527_v10 = vld [vmem:[#allocation2 + $0x68] sm:$0xf0]  ;;  %v6554_v27 = vunpack.c.l.bf16 %v6546_v20 }
 0x354   :  { %v14206_v11 = vld [vmem:[#allocation2 + $0x24c] sm:$0xf]  ;;  %v10530_v24 = vor.u32 %v14142_v6, %v10527_v10 }
 0x355   :  { %6067 = vmatpush.bf16.msra.mxu3 %v11426_v28  ;;  %6042 = vmatpush.bf16.msra.mxu1 %v10882_v38  ;;  %v10783_v17 = vld [vmem:[#allocation2 + $0x268] sm:$0xf0]  ;;  %14992 = vtanh.f32 %v6554_v27 }
 0x356   :  { %v14270_v18 = vld [vmem:[#allocation2 + $0x44c] sm:$0xf]  ;;  %v10786_v30 = vor.u32 %v14206_v11, %v10783_v17 }
 0x357   :  { %6055 = vmatpush.bf16.msra.mxu2 %v11138_v40  ;;  %6030 = vmatpush.bf16.msra.mxu0 %v10594_v55  ;;  %v11039_v19 = vld [vmem:[#allocation2 + $0x468] sm:$0xf0] }
 0x358   :  { %v14334_v21 = vld [vmem:[#allocation2 + $0x64c] sm:$0xf]  ;;  %v11042_v32 = vor.u32 %v14270_v18, %v11039_v19 }
 0x359   :  { %6068 = vmatpush.bf16.msra.mxu3 %v11394_v45  ;;  %6043 = vmatpush.bf16.msra.mxu1 %v10850_v56  ;;  %v11295_v22 = vld [vmem:[#allocation2 + $0x668] sm:$0xf0] }
 0x35a   :  { %v14134_v28 = vld [vmem:[#allocation2 + $0xc] sm:$0xf]  ;;  %v11298_v38 = vor.u32 %v14334_v21, %v11295_v22 }
 0x35b   :  { %6056 = vmatpush.bf16.msra.mxu2 %v11106_v58  ;;  %6031 = vmatpush.bf16.msra.mxu0 %v10562_v23  ;;  %v10495_v29 = vld [vmem:[#allocation2 + $0x28] sm:$0xf0]  ;;  %v14993_v0 = vpop.eup %14992 }
 0x35c   :  { %v14198_v33 = vld [vmem:[#allocation2 + $0x20c] sm:$0xf]  ;;  %v10498_v47 = vor.u32 %v14134_v28, %v10495_v29  ;;  %v15416_v31 = vpack.c.bf16 %v14993_v0, %v14993_v0 }
 0x35d   :  { %6069 = vmatpush.bf16.msra.mxu3 %v11362_v3  ;;  %6044 = vmatpush.bf16.msra.mxu1 %v10818_v4  ;;  %v10751_v34 = vld [vmem:[#allocation2 + $0x228] sm:$0xf0] }
 0x35e   :  { %v14262_v36 = vld [vmem:[#allocation2 + $0x40c] sm:$0xf]  ;;  %v10754_v52 = vor.u32 %v14198_v33, %v10751_v34 }
 0x35f   :  { %6057 = vmatpush.bf16.msra.mxu2 %v11074_v16  ;;  %v11007_v40 = vld [vmem:[#allocation2 + $0x428] sm:$0xf0]  ;;  %6032 = vmatpush.bf16.msra.mxu0 %v10530_v24 }
 0x360   :  { %v14326_v9 = vld [vmem:[#allocation2 + $0x60c] sm:$0xf]  ;;  %v11010_v53 = vor.u32 %v14262_v36, %v11007_v40 }
 0x361   :  { %6070 = vmatpush.bf16.msra.mxu3 %v11330_v49  ;;  %v11263_v41 = vld [vmem:[#allocation2 + $0x628] sm:$0xf0]  ;;  %6045 = vmatpush.bf16.msra.mxu1 %v10786_v30  ;;  %v3139_v30 = vperm.slane %v15403_v13, 1 }
 0x362   :  { %v14446_v43 = vld [vmem:[#allocation2 + $0x9cc] sm:$0xf]  ;;  %v11266_v58 = vor.u32 %v14326_v9, %v11263_v41  ;;  %v5827_v9 = vpop.f32.mrf.mxu0 }
 0x363   :  { %v11743_v44 = vld [vmem:[#allocation2 + $0x9e8] sm:$0xf0]  ;;  %6058 = vmatpush.bf16.msra.mxu2 %v11042_v32  ;;  %6033 = vmatpush.bf16.msra.mxu0 %v10498_v47  ;;  %v5828_v47 = vadd.f32 %v5827_v9, %v3139_v30 }
 0x364   :  { %v14510_v45 = vld [vmem:[#allocation2 + $0xbcc] sm:$0xf]  ;;  %v11746_v59 = vor.u32 %v14446_v43, %v11743_v44 }
 0x365   :  { %v11999_v7 = vld [vmem:[#allocation2 + $0xbe8] sm:$0xf0]  ;;  %6071 = vmatpush.bf16.msra.mxu3 %v11298_v38  ;;  %6046 = vmatpush.bf16.msra.mxu1 %v10754_v52 }
 0x366   :  { %v14574_v48 = vld [vmem:[#allocation2 + $0xdcc] sm:$0xf]  ;;  %v12002_v60 = vor.u32 %v14510_v45, %v11999_v7  ;;  %6034 = vmatmul.bf16.vlgmr.msra.gmra.mxu0 %v15333_v39  ;;  %v5840_v7 = vpop.f32.mrf.mxu1 }
 0x367   :  { %v12255_v51 = vld [vmem:[#allocation2 + $0xde8] sm:$0xf0]  ;;  %6059 = vmatpush.bf16.msra.mxu2 %v11010_v53  ;;  %6078 = vmatpush.bf16.msrb.mxu0 %v11746_v59 }
 0x368   :  { %v14638_v55 = vld [vmem:[#allocation2 + $0xfcc] sm:$0xf]  ;;  %v12258_v61 = vor.u32 %v14574_v48, %v12255_v51  ;;  %6047 = vmatmul.bf16.vlgmr.msra.gmra.mxu1 %v15343_v50 }
 0x369   :  { %v12511_v56 = vld [vmem:[#allocation2 + $0xfe8] sm:$0xf0]  ;;  %6072 = vmatpush.bf16.msra.mxu3 %v11266_v58  ;;  %6091 = vmatpush.bf16.msrb.mxu1 %v12002_v60 }
 0x36a   :  { %v14438_v62 = vld [vmem:[#allocation2 + $0x98c] sm:$0xf]  ;;  %v12514_v46 = vor.u32 %v14638_v55, %v12511_v56  ;;  %6060 = vmatmul.bf16.vlgmr.msra.gmra.mxu2 %v15352_v26  ;;  %v5841_v56 = vadd.f32 %v5840_v7, %v5828_v47  ;;  %v10981_v47 = vld [vmem:[#allocation2 + $0x3d0] sm:$0xf] }
 0x36b   :  { %v11711_v3 = vld [vmem:[#allocation2 + $0x9a8] sm:$0xf0]  ;;  %6104 = vmatpush.bf16.msrb.mxu2 %v12258_v61 }
 0x36c   :  { %v14502_v63 = vld [vmem:[#allocation2 + $0xb8c] sm:$0xf]  ;;  %v11714_v2 = vor.u32 %v14438_v62, %v11711_v3  ;;  %6073 = vmatmul.bf16.vlgmr.msra.gmra.mxu3 %v15362_v54 }
 0x36d   :  { %v11967_v8 = vld [vmem:[#allocation2 + $0xba8] sm:$0xf0]  ;;  %6117 = vmatpush.bf16.msrb.mxu3 %v12514_v46 }
 0x36e   :  { %v14566_v15 = vld [vmem:[#allocation2 + $0xd8c] sm:$0xf]  ;;  %v11970_v4 = vor.u32 %v14502_v63, %v11967_v8  ;;  %6079 = vmatpush.bf16.msrb.mxu0 %v11714_v2  ;;  %v5853_v63 = vpop.f32.mrf.mxu2 }
 0x36f   :  { %v12223_v25 = vld [vmem:[#allocation2 + $0xda8] sm:$0xf0] }
 0x370   :  { %v14630_v23 = vld [vmem:[#allocation2 + $0xf8c] sm:$0xf]  ;;  %v12226_v16 = vor.u32 %v14566_v15, %v12223_v25  ;;  %6092 = vmatpush.bf16.msrb.mxu1 %v11970_v4  ;;  %v5854_v25 = vadd.f32 %v5853_v63, %v5841_v56  ;;  %v14387_v56 = vld [vmem:[#allocation2 + $0x7ec] sm:$0xf0] }
 0x371   :  { %v12479_v1 = vld [vmem:[#allocation2 + $0xfa8] sm:$0xf0]  ;;  %v10949_v63 = vld [vmem:[#allocation2 + $0x390] sm:$0xf] }
 0x372   :  { %v14430_v6 = vld [vmem:[#allocation2 + $0x94c] sm:$0xf]  ;;  %v12482_v12 = vor.u32 %v14630_v23, %v12479_v1  ;;  %6105 = vmatpush.bf16.msrb.mxu2 %v12226_v16  ;;  %v5866_v23 = vpop.f32.mrf.mxu3 }
 0x373   :  { %v11679_v10 = vld [vmem:[#allocation2 + $0x968] sm:$0xf0]  ;;  %v15423_v16 = vadd.f32 %v5866_v23, %v5854_v25  ;;  %v11461_v25 = vld [vmem:[#allocation2 + $0x790] sm:$0xf] }
 0x374   :  { %v14494_v11 = vld [vmem:[#allocation2 + $0xb4c] sm:$0xf]  ;;  %v11682_v21 = vor.u32 %v14430_v6, %v11679_v10  ;;  %6118 = vmatpush.bf16.msrb.mxu3 %v12482_v12  ;;  %v5829_v6 = vpop.f32.mrf.mxu0  ;;  %v14379_v23 = vld [vmem:[#allocation2 + $0x7ac] sm:$0xf0] }
 0x375   :  { %v11935_v49 = vld [vmem:[#allocation2 + $0xb68] sm:$0xf0]  ;;  %v10661_v6 = vld [vmem:[#allocation2 + $0x150] sm:$0xf] }
 0x376   :  { %v14558_v17 = vld [vmem:[#allocation2 + $0xd4c] sm:$0xf]  ;;  %v11938_v24 = vor.u32 %v14494_v11, %v11935_v49  ;;  %6080 = vmatpush.bf16.msrb.mxu0 %v11682_v21 }
 0x377   :  { %v12191_v18 = vld [vmem:[#allocation2 + $0xd68] sm:$0xf0] }
 0x378   :  { %v14622_v19 = vld [vmem:[#allocation2 + $0xf4c] sm:$0xf]  ;;  %v12194_v27 = vor.u32 %v14558_v17, %v12191_v18  ;;  %6093 = vmatpush.bf16.msrb.mxu1 %v11938_v24  ;;  %v5842_v18 = vpop.f32.mrf.mxu1 }
 0x379   :  { %v12447_v20 = vld [vmem:[#allocation2 + $0xf68] sm:$0xf0]  ;;  %v14307_v18 = vld [vmem:[#allocation2 + $0x56c] sm:$0xf0] }
 0x37a   :  { %v14422_v22 = vld [vmem:[#allocation2 + $0x90c] sm:$0xf]  ;;  %v12450_v32 = vor.u32 %v14622_v19, %v12447_v20  ;;  %6106 = vmatpush.bf16.msrb.mxu2 %v12194_v27 }
 0x37b   :  { %v11647_v28 = vld [vmem:[#allocation2 + $0x928] sm:$0xf0] }
 0x37c   :  { %v14486_v29 = vld [vmem:[#allocation2 + $0xb0c] sm:$0xf]  ;;  %v11650_v40 = vor.u32 %v14422_v22, %v11647_v28  ;;  %6119 = vmatpush.bf16.msrb.mxu3 %v12450_v32 }
 0x37d   :  { %v11903_v33 = vld [vmem:[#allocation2 + $0xb28] sm:$0xf0] }
 0x37e   :  { %v14550_v34 = vld [vmem:[#allocation2 + $0xd0c] sm:$0xf]  ;;  %v11906_v41 = vor.u32 %v14486_v29, %v11903_v33  ;;  %6081 = vmatpush.bf16.msrb.mxu0 %v11650_v40 }
 0x37f   :  { %v12159_v36 = vld [vmem:[#allocation2 + $0xd28] sm:$0xf0] }
 0x380   :  { %v14614_v37 = vld [vmem:[#allocation2 + $0xf0c] sm:$0xf]  ;;  %v12162_v42 = vor.u32 %v14550_v34, %v12159_v36  ;;  %6094 = vmatpush.bf16.msrb.mxu1 %v11906_v41 }
 0x381   :  { %v12415_v38 = vld [vmem:[#allocation2 + $0xf28] sm:$0xf0] }
 0x382   :  { %v14414_v43 = vld [vmem:[#allocation2 + $0x8cc] sm:$0xf]  ;;  %v12418_v13 = vor.u32 %v14614_v37, %v12415_v38  ;;  %6107 = vmatpush.bf16.msrb.mxu2 %v12162_v42  ;;  %v5855_v38 = vpop.f32.mrf.mxu2 }
 0x383   :  { %v11615_v44 = vld [vmem:[#allocation2 + $0x8e8] sm:$0xf0] }
 0x384   :  { %v14478_v45 = vld [vmem:[#allocation2 + $0xacc] sm:$0xf]  ;;  %v11618_v58 = vor.u32 %v14414_v43, %v11615_v44  ;;  %6120 = vmatpush.bf16.msrb.mxu3 %v12418_v13  ;;  %v5868_v43 = vpop.f32.mrf.mxu3  ;;  %v10725_v44 = vld [vmem:[#allocation2 + $0x1d0] sm:$0xf] }
 0x385   :  { %v11871_v48 = vld [vmem:[#allocation2 + $0xae8] sm:$0xf0]  ;;  %v14259_v13 = vld [vmem:[#allocation2 + $0x3ec] sm:$0xf0] }
 0x386   :  { %v14542_v51 = vld [vmem:[#allocation2 + $0xccc] sm:$0xf]  ;;  %v11874_v59 = vor.u32 %v14478_v45, %v11871_v48  ;;  %6082 = vmatpush.bf16.msrb.mxu0 %v11618_v58  ;;  %v14195_v45 = vld [vmem:[#allocation2 + $0x1ec] sm:$0xf0] }
 0x387   :  { %v12127_v52 = vld [vmem:[#allocation2 + $0xce8] sm:$0xf0]  ;;  %v11237_v48 = vld [vmem:[#allocation2 + $0x5d0] sm:$0xf] }
 0x388   :  { %v14606_v53 = vld [vmem:[#allocation2 + $0xecc] sm:$0xf]  ;;  %v12130_v60 = vor.u32 %v14542_v51, %v12127_v52  ;;  %6095 = vmatpush.bf16.msrb.mxu1 %v11874_v59  ;;  %v14323_v51 = vld [vmem:[#allocation2 + $0x5ec] sm:$0xf0]  ;;  %v10726_v59 = vor.u32 %v14195_v45, %v10725_v44 }
 0x389   :  { %v12383_v55 = vld [vmem:[#allocation2 + $0xee8] sm:$0xf0]  ;;  %v14163_v43 = vld [vmem:[#allocation2 + $0xec] sm:$0xf0] }
 0x38a   :  { %v14406_v61 = vld [vmem:[#allocation2 + $0x88c] sm:$0xf]  ;;  %v12386_v0 = vor.u32 %v14606_v53, %v12383_v55  ;;  %6108 = vmatpush.bf16.msrb.mxu2 %v12130_v60  ;;  %v11493_v55 = vld [vmem:[#allocation2 + $0x7d0] sm:$0xf]  ;;  %v10982_v60 = vor.u32 %v14259_v13, %v10981_v47  ;;  %v5892_v47 = vpop.f32.mrf.mxu1 }
 0x38b   :  { %v11583_v62 = vld [vmem:[#allocation2 + $0x8a8] sm:$0xf0]  ;;  %v10853_v44 = vld [vmem:[#allocation2 + $0x2d0] sm:$0xf] }
 0x38c   :  { %v14470_v3 = vld [vmem:[#allocation2 + $0xa8c] sm:$0xf]  ;;  %v11586_v4 = vor.u32 %v14406_v61, %v11583_v62  ;;  %6121 = vmatpush.bf16.msrb.mxu3 %v12386_v0  ;;  %v11238_v61 = vor.u32 %v14323_v51, %v11237_v48  ;;  %v10693_v62 = vld [vmem:[#allocation2 + $0x190] sm:$0xf]  ;;  %v11494_v0 = vor.u32 %v14387_v56, %v11493_v55 }
 0x38d   :  { %v11839_v46 = vld [vmem:[#allocation2 + $0xaa8] sm:$0xf0]  ;;  %v14227_v13 = vld [vmem:[#allocation2 + $0x2ec] sm:$0xf0] }
 0x38e   :  { %v14534_v8 = vld [vmem:[#allocation2 + $0xc8c] sm:$0xf]  ;;  %v11842_v10 = vor.u32 %v14470_v3, %v11839_v46  ;;  %6083 = vmatpush.bf16.msrb.mxu0 %v11586_v4  ;;  %v14187_v3 = vld [vmem:[#allocation2 + $0x1ac] sm:$0xf0] }
 0x38f   :  { %v12095_v15 = vld [vmem:[#allocation2 + $0xca8] sm:$0xf0]  ;;  %v14251_v46 = vld [vmem:[#allocation2 + $0x3ac] sm:$0xf0] }
 0x390   :  { %v14598_v1 = vld [vmem:[#allocation2 + $0xe8c] sm:$0xf]  ;;  %v12098_v11 = vor.u32 %v14534_v8, %v12095_v15  ;;  %6096 = vmatpush.bf16.msrb.mxu1 %v11842_v10  ;;  %v11205_v8 = vld [vmem:[#allocation2 + $0x590] sm:$0xf] }
 0x391   :  { %v12351_v2 = vld [vmem:[#allocation2 + $0xea8] sm:$0xf0]  ;;  %v14315_v15 = vld [vmem:[#allocation2 + $0x5ac] sm:$0xf0] }
 0x392   :  { %v14398_v12 = vld [vmem:[#allocation2 + $0x84c] sm:$0xf]  ;;  %v12354_v19 = vor.u32 %v14598_v1, %v12351_v2  ;;  %6109 = vmatpush.bf16.msrb.mxu2 %v12098_v11  ;;  %v10694_v1 = vor.u32 %v14187_v3, %v10693_v62  ;;  %v10950_v2 = vor.u32 %v14251_v46, %v10949_v63  ;;  %v11206_v4 = vor.u32 %v14315_v15, %v11205_v8  ;;  %v14179_v10 = vld [vmem:[#allocation2 + $0x16c] sm:$0xf0]  ;;  %v5905_v3 = vpop.f32.mrf.mxu2  ;;  %v5918_v15 = vpop.f32.mrf.mxu3 }
 0x393   :  { %v11551_v49 = vld [vmem:[#allocation2 + $0x868] sm:$0xf0]  ;;  %v10917_v11 = vld [vmem:[#allocation2 + $0x350] sm:$0xf] }
 0x394   :  { %v14462_v17 = vld [vmem:[#allocation2 + $0xa4c] sm:$0xf]  ;;  %v11554_v28 = vor.u32 %v14398_v12, %v11551_v49  ;;  %6122 = vmatpush.bf16.msrb.mxu3 %v12354_v19  ;;  %v11462_v12 = vor.u32 %v14379_v23, %v11461_v25  ;;  %v14243_v49 = vld [vmem:[#allocation2 + $0x36c] sm:$0xf0] }
 0x395   :  { %v11807_v20 = vld [vmem:[#allocation2 + $0xa68] sm:$0xf0]  ;;  %v11429_v19 = vld [vmem:[#allocation2 + $0x750] sm:$0xf] }
 0x396   :  { %v14526_v21 = vld [vmem:[#allocation2 + $0xc4c] sm:$0xf]  ;;  %v11810_v32 = vor.u32 %v14462_v17, %v11807_v20  ;;  %6084 = vmatpush.bf16.msrb.mxu0 %v11554_v28  ;;  %v11173_v17 = vld [vmem:[#allocation2 + $0x550] sm:$0xf] }
 0x397   :  { %v12063_v22 = vld [vmem:[#allocation2 + $0xc68] sm:$0xf0]  ;;  %v14371_v20 = vld [vmem:[#allocation2 + $0x76c] sm:$0xf0] }
 0x398   :  { %v14590_v24 = vld [vmem:[#allocation2 + $0xe4c] sm:$0xf]  ;;  %v12066_v33 = vor.u32 %v14526_v21, %v12063_v22  ;;  %6097 = vmatpush.bf16.msrb.mxu1 %v11810_v32  ;;  %v10662_v21 = vor.u32 %v14179_v10, %v10661_v6  ;;  %v10918_v22 = vor.u32 %v14243_v49, %v10917_v11  ;;  %v14171_v28 = vld [vmem:[#allocation2 + $0x12c] sm:$0xf0] }
 0x399   :  { %v12319_v27 = vld [vmem:[#allocation2 + $0xe68] sm:$0xf0]  ;;  %v14235_v32 = vld [vmem:[#allocation2 + $0x32c] sm:$0xf0] }
 0x39a   :  { %v14390_v29 = vld [vmem:[#allocation2 + $0x80c] sm:$0xf]  ;;  %v12322_v40 = vor.u32 %v14590_v24, %v12319_v27  ;;  %6110 = vmatpush.bf16.msrb.mxu2 %v12066_v33  ;;  %v11174_v24 = vor.u32 %v14307_v18, %v11173_v17  ;;  %v10629_v27 = vld [vmem:[#allocation2 + $0x110] sm:$0xf]  ;;  %v5894_v17 = vpop.f32.mrf.mxu1 }
 0x39b   :  { %v11519_v30 = vld [vmem:[#allocation2 + $0x828] sm:$0xf0]  ;;  %v11141_v33 = vld [vmem:[#allocation2 + $0x510] sm:$0xf]  ;;  %v10630_v38 = vor.u32 %v14171_v28, %v10629_v27 }
 0x39c   :  { %v14454_v34 = vld [vmem:[#allocation2 + $0xa0c] sm:$0xf]  ;;  %v11522_v7 = vor.u32 %v14390_v29, %v11519_v30  ;;  %6123 = vmatpush.bf16.msrb.mxu3 %v12322_v40  ;;  %v10885_v29 = vld [vmem:[#allocation2 + $0x310] sm:$0xf]  ;;  %v11430_v30 = vor.u32 %v14371_v20, %v11429_v19  ;;  %v5879_v40 = vpop.f32.mrf.mxu0 }
 0x39d   :  { %v11775_v36 = vld [vmem:[#allocation2 + $0xa28] sm:$0xf0]  ;;  %v5880_v45 = vadd.f32 %v5879_v40, %v15423_v16  ;;  %v11109_v48 = vld [vmem:[#allocation2 + $0x4d0] sm:$0xf]  ;;  %v5907_v40 = vpop.f32.mrf.mxu2 }
 0x39e   :  { %v14518_v37 = vld [vmem:[#allocation2 + $0xc0c] sm:$0xf]  ;;  %v11778_v52 = vor.u32 %v14454_v34, %v11775_v36  ;;  %6085 = vmatpush.bf16.msrb.mxu0 %v11522_v7  ;;  %v14299_v34 = vld [vmem:[#allocation2 + $0x52c] sm:$0xf0] }
 0x39f   :  { %v12031_v9 = vld [vmem:[#allocation2 + $0xc28] sm:$0xf0]  ;;  %v11397_v36 = vld [vmem:[#allocation2 + $0x710] sm:$0xf]  ;;  %v5893_v55 = vadd.f32 %v5892_v47, %v5880_v45 }
 0x3a0   :  { %v14582_v41 = vld [vmem:[#allocation2 + $0xe0c] sm:$0xf]  ;;  %v12034_v53 = vor.u32 %v14518_v37, %v12031_v9  ;;  %6098 = vmatpush.bf16.msrb.mxu1 %v11778_v52  ;;  %v14363_v37 = vld [vmem:[#allocation2 + $0x72c] sm:$0xf0]  ;;  %v10886_v9 = vor.u32 %v14235_v32, %v10885_v29 }
 0x3a1   :  { %v12287_v42 = vld [vmem:[#allocation2 + $0xe28] sm:$0xf0]  ;;  %6086 = vmatmul.bf16.vlgmr.msrb.gmra.mxu0 %v15376_v14  ;;  %v11398_v7 = vor.u32 %v14363_v37, %v11397_v36  ;;  %v14291_v51 = vld [vmem:[#allocation2 + $0x4ec] sm:$0xf0]  ;;  %v5906_v8 = vadd.f32 %v5905_v3, %v5893_v55 }
 0x3a2   :  { %v12290_v58 = vor.u32 %v14582_v41, %v12287_v42  ;;  %6111 = vmatpush.bf16.msrb.mxu2 %v12034_v53  ;;  %6130 = vmatpush.bf16.msra.mxu0 %v10726_v59  ;;  %v11142_v41 = vor.u32 %v14299_v34, %v11141_v33  ;;  %v10597_v42 = vld [vmem:[#allocation2 + $0xd0] sm:$0xf]  ;;  %v11110_v59 = vor.u32 %v14291_v51, %v11109_v48 }
 0x3a3   :  { %6099 = vmatmul.bf16.vlgmr.msrb.gmra.mxu1 %v15378_v35  ;;  %v11365_v52 = vld [vmem:[#allocation2 + $0x6d0] sm:$0xf]  ;;  %v10598_v56 = vor.u32 %v14163_v43, %v10597_v42 }
 0x3a4   :  { %6124 = vmatpush.bf16.msrb.mxu3 %v12290_v58  ;;  %6143 = vmatpush.bf16.msra.mxu1 %v10982_v60  ;;  %v14355_v53 = vld [vmem:[#allocation2 + $0x6ec] sm:$0xf0]  ;;  %v10854_v58 = vor.u32 %v14227_v13, %v10853_v44  ;;  %v5920_v44 = vpop.f32.mrf.mxu3 }
 0x3a5   :  { %6112 = vmatmul.bf16.vlgmr.msrb.gmra.mxu2 %v15381_v57  ;;  %v10565_v60 = vld [vmem:[#allocation2 + $0x90] sm:$0xf]  ;;  %v11366_v16 = vor.u32 %v14355_v53, %v11365_v52 }
 0x3a6   :  { %6156 = vmatpush.bf16.msra.mxu2 %v11238_v61  ;;  %6131 = vmatpush.bf16.msra.mxu0 %v10694_v1  ;;  %v14155_v61 = vld [vmem:[#allocation2 + $0xac] sm:$0xf0] }
 0x3a7   :  { %6125 = vmatmul.bf16.vlgmr.msrb.gmra.mxu3 %v15384_v5  ;;  %v10821_v62 = vld [vmem:[#allocation2 + $0x290] sm:$0xf]  ;;  %v10566_v1 = vor.u32 %v14155_v61, %v10565_v60 }
 0x3a8   :  { %6169 = vmatpush.bf16.msra.mxu3 %v11494_v0  ;;  %6144 = vmatpush.bf16.msra.mxu1 %v10950_v2  ;;  %v14219_v63 = vld [vmem:[#allocation2 + $0x2ac] sm:$0xf0]  ;;  %v5919_v2 = vadd.f32 %v5918_v15, %v5906_v8 }
 0x3a9   :  { %v11077_v0 = vld [vmem:[#allocation2 + $0x490] sm:$0xf]  ;;  %v10822_v6 = vor.u32 %v14219_v63, %v10821_v62 }
 0x3aa   :  { %6157 = vmatpush.bf16.msra.mxu2 %v11206_v4  ;;  %6132 = vmatpush.bf16.msra.mxu0 %v10662_v21  ;;  %v14283_v46 = vld [vmem:[#allocation2 + $0x4ac] sm:$0xf0]  ;;  %v5881_v4 = vpop.f32.mrf.mxu0 }
 0x3ab   :  { %v11333_v25 = vld [vmem:[#allocation2 + $0x690] sm:$0xf]  ;;  %v11078_v10 = vor.u32 %v14283_v46, %v11077_v0 }
 0x3ac   :  { %6170 = vmatpush.bf16.msra.mxu3 %v11462_v12  ;;  %6145 = vmatpush.bf16.msra.mxu1 %v10918_v22  ;;  %v14347_v23 = vld [vmem:[#allocation2 + $0x6ac] sm:$0xf0]  ;;  %v6547_v22 = vpack.c.bf16 %v5919_v2, %v5919_v2 }
 0x3ad   :  { %v10533_v11 = vld [vmem:[#allocation2 + $0x50] sm:$0xf]  ;;  %v11334_v18 = vor.u32 %v14347_v23, %v11333_v25 }
 0x3ae   :  { %6158 = vmatpush.bf16.msra.mxu2 %v11174_v24  ;;  %6133 = vmatpush.bf16.msra.mxu0 %v10630_v38  ;;  %v14147_v12 = vld [vmem:[#allocation2 + $0x6c] sm:$0xf0]  ;;  %v6555_v29 = vunpack.c.l.bf16 %v6547_v22 }
 0x3af   :  { %v10789_v49 = vld [vmem:[#allocation2 + $0x250] sm:$0xf]  ;;  %v10534_v28 = vor.u32 %v14147_v12, %v10533_v11 }
 0x3b0   :  { %6171 = vmatpush.bf16.msra.mxu3 %v11430_v30  ;;  %6146 = vmatpush.bf16.msra.mxu1 %v10886_v9  ;;  %v14211_v19 = vld [vmem:[#allocation2 + $0x26c] sm:$0xf0]  ;;  %14994 = vtanh.f32 %v6555_v29 }
 0x3b1   :  { %v11045_v20 = vld [vmem:[#allocation2 + $0x450] sm:$0xf]  ;;  %v10790_v33 = vor.u32 %v14211_v19, %v10789_v49 }
 0x3b2   :  { %6159 = vmatpush.bf16.msra.mxu2 %v11142_v41  ;;  %6134 = vmatpush.bf16.msra.mxu0 %v10598_v56  ;;  %v14275_v21 = vld [vmem:[#allocation2 + $0x46c] sm:$0xf0] }
 0x3b3   :  { %v11301_v24 = vld [vmem:[#allocation2 + $0x650] sm:$0xf]  ;;  %v11046_v34 = vor.u32 %v14275_v21, %v11045_v20 }
 0x3b4   :  { %6172 = vmatpush.bf16.msra.mxu3 %v11398_v7  ;;  %6147 = vmatpush.bf16.msra.mxu1 %v10854_v58  ;;  %v14339_v27 = vld [vmem:[#allocation2 + $0x66c] sm:$0xf0] }
 0x3b5   :  { %v10501_v30 = vld [vmem:[#allocation2 + $0x10] sm:$0xf]  ;;  %v11302_v9 = vor.u32 %v14339_v27, %v11301_v24 }
 0x3b6   :  { %6160 = vmatpush.bf16.msra.mxu2 %v11110_v59  ;;  %6135 = vmatpush.bf16.msra.mxu0 %v10566_v1  ;;  %v14139_v32 = vld [vmem:[#allocation2 + $0x2c] sm:$0xf0]  ;;  %v14995_v0 = vpop.eup %14994 }
 0x3b7   :  { %v10757_v36 = vld [vmem:[#allocation2 + $0x210] sm:$0xf]  ;;  %v10502_v13 = vor.u32 %v14139_v32, %v10501_v30  ;;  %v15430_v23 = vpack.c.bf16 %v14995_v0, %v14995_v0 }
 0x3b8   :  { %6173 = vmatpush.bf16.msra.mxu3 %v11366_v16  ;;  %6148 = vmatpush.bf16.msra.mxu1 %v10822_v6  ;;  %v14203_v37 = vld [vmem:[#allocation2 + $0x22c] sm:$0xf0] }
 0x3b9   :  { %v11013_v38 = vld [vmem:[#allocation2 + $0x410] sm:$0xf]  ;;  %v10758_v53 = vor.u32 %v14203_v37, %v10757_v36 }
 0x3ba   :  { %6161 = vmatpush.bf16.msra.mxu2 %v11078_v10  ;;  %v14267_v41 = vld [vmem:[#allocation2 + $0x42c] sm:$0xf0]  ;;  %6136 = vmatpush.bf16.msra.mxu0 %v10534_v28 }
 0x3bb   :  { %v11269_v42 = vld [vmem:[#allocation2 + $0x610] sm:$0xf]  ;;  %v11014_v55 = vor.u32 %v14267_v41, %v11013_v38 }
 0x3bc   :  { %6174 = vmatpush.bf16.msra.mxu3 %v11334_v18  ;;  %v14331_v43 = vld [vmem:[#allocation2 + $0x62c] sm:$0xf0]  ;;  %6149 = vmatpush.bf16.msra.mxu1 %v10790_v33 }
 0x3bd   :  { %v11749_v45 = vld [vmem:[#allocation2 + $0x9d0] sm:$0xf]  ;;  %v11270_v59 = vor.u32 %v14331_v43, %v11269_v42  ;;  %v5931_v43 = vpop.f32.mrf.mxu0 }
 0x3be   :  { %v14451_v47 = vld [vmem:[#allocation2 + $0x9ec] sm:$0xf0]  ;;  %6162 = vmatpush.bf16.msra.mxu2 %v11046_v34  ;;  %6137 = vmatpush.bf16.msra.mxu0 %v10502_v13 }
 0x3bf   :  { %v12005_v7 = vld [vmem:[#allocation2 + $0xbd0] sm:$0xf]  ;;  %v11750_v60 = vor.u32 %v14451_v47, %v11749_v45 }
 0x3c0   :  { %v14515_v48 = vld [vmem:[#allocation2 + $0xbec] sm:$0xf0]  ;;  %6175 = vmatpush.bf16.msra.mxu3 %v11302_v9  ;;  %6150 = vmatpush.bf16.msra.mxu1 %v10758_v53 }
 0x3c1   :  { %v12261_v51 = vld [vmem:[#allocation2 + $0xdd0] sm:$0xf]  ;;  %v12006_v61 = vor.u32 %v14515_v48, %v12005_v7  ;;  %6138 = vmatmul.bf16.vlgmr.msra.gmra.mxu0 %v15333_v39 }
 0x3c2   :  { %v14579_v52 = vld [vmem:[#allocation2 + $0xdec] sm:$0xf0]  ;;  %6163 = vmatpush.bf16.msra.mxu2 %v11014_v55  ;;  %6182 = vmatpush.bf16.msrb.mxu0 %v11750_v60 }
 0x3c3   :  { %v12517_v56 = vld [vmem:[#allocation2 + $0xfd0] sm:$0xf]  ;;  %v12262_v62 = vor.u32 %v14579_v52, %v12261_v51  ;;  %6151 = vmatmul.bf16.vlgmr.msra.gmra.mxu1 %v15343_v50  ;;  %v5944_v51 = vpop.f32.mrf.mxu1 }
 0x3c4   :  { %v14643_v58 = vld [vmem:[#allocation2 + $0xfec] sm:$0xf0]  ;;  %6176 = vmatpush.bf16.msra.mxu3 %v11270_v59  ;;  %6195 = vmatpush.bf16.msrb.mxu1 %v12006_v61 }
 0x3c5   :  { %v11717_v3 = vld [vmem:[#allocation2 + $0x990] sm:$0xf]  ;;  %v12518_v46 = vor.u32 %v14643_v58, %v12517_v56  ;;  %6164 = vmatmul.bf16.vlgmr.msra.gmra.mxu2 %v15352_v26 }
 0x3c6   :  { %v14443_v16 = vld [vmem:[#allocation2 + $0x9ac] sm:$0xf0]  ;;  %6208 = vmatpush.bf16.msrb.mxu2 %v12262_v62 }
 0x3c7   :  { %v11973_v63 = vld [vmem:[#allocation2 + $0xb90] sm:$0xf]  ;;  %v11718_v4 = vor.u32 %v14443_v16, %v11717_v3  ;;  %6177 = vmatmul.bf16.vlgmr.msra.gmra.mxu3 %v15362_v54 }
 0x3c8   :  { %v14507_v8 = vld [vmem:[#allocation2 + $0xbac] sm:$0xf0]  ;;  %6221 = vmatpush.bf16.msrb.mxu3 %v12518_v46  ;;  %v5957_v46 = vpop.f32.mrf.mxu2 }
 0x3c9   :  { %v12229_v15 = vld [vmem:[#allocation2 + $0xd90] sm:$0xf]  ;;  %v11974_v6 = vor.u32 %v14507_v8, %v11973_v63  ;;  %6183 = vmatpush.bf16.msrb.mxu0 %v11718_v4  ;;  %v5970_v4 = vpop.f32.mrf.mxu3 }
 0x3ca   :  { %v14571_v25 = vld [vmem:[#allocation2 + $0xdac] sm:$0xf0] }
 0x3cb   :  { %v12485_v1 = vld [vmem:[#allocation2 + $0xf90] sm:$0xf]  ;;  %v12230_v10 = vor.u32 %v14571_v25, %v12229_v15  ;;  %6196 = vmatpush.bf16.msrb.mxu1 %v11974_v6 }
 0x3cc   :  { %v14635_v2 = vld [vmem:[#allocation2 + $0xfac] sm:$0xf0] }
 0x3cd   :  { %v11685_v11 = vld [vmem:[#allocation2 + $0x950] sm:$0xf]  ;;  %v12486_v17 = vor.u32 %v14635_v2, %v12485_v1  ;;  %6209 = vmatpush.bf16.msrb.mxu2 %v12230_v10 }
 0x3ce   :  { %v14435_v12 = vld [vmem:[#allocation2 + $0x96c] sm:$0xf0] }
 0x3cf   :  { %v11941_v49 = vld [vmem:[#allocation2 + $0xb50] sm:$0xf]  ;;  %v11686_v24 = vor.u32 %v14435_v12, %v11685_v11  ;;  %6222 = vmatpush.bf16.msrb.mxu3 %v12486_v17 }
 0x3d0   :  { %v14499_v18 = vld [vmem:[#allocation2 + $0xb6c] sm:$0xf0] }
 0x3d1   :  { %v12197_v19 = vld [vmem:[#allocation2 + $0xd50] sm:$0xf]  ;;  %v11942_v28 = vor.u32 %v14499_v18, %v11941_v49  ;;  %6184 = vmatpush.bf16.msrb.mxu0 %v11686_v24  ;;  %v5933_v49 = vpop.f32.mrf.mxu0 }
 0x3d2   :  { %v14563_v20 = vld [vmem:[#allocation2 + $0xd6c] sm:$0xf0] }
 0x3d3   :  { %v12453_v21 = vld [vmem:[#allocation2 + $0xf50] sm:$0xf]  ;;  %v12198_v29 = vor.u32 %v14563_v20, %v12197_v19  ;;  %6197 = vmatpush.bf16.msrb.mxu1 %v11942_v28 }
 0x3d4   :  { %v14627_v22 = vld [vmem:[#allocation2 + $0xf6c] sm:$0xf0] }
 0x3d5   :  { %v11653_v27 = vld [vmem:[#allocation2 + $0x910] sm:$0xf]  ;;  %v12454_v36 = vor.u32 %v14627_v22, %v12453_v21  ;;  %6210 = vmatpush.bf16.msrb.mxu2 %v12198_v29  ;;  %v5946_v22 = vpop.f32.mrf.mxu1 }
 0x3d6   :  { %v14427_v30 = vld [vmem:[#allocation2 + $0x92c] sm:$0xf0]  ;;  %v10919_v22 = vld [vmem:[#allocation2 + $0x370] sm:$0xf0] }
 0x3d7   :  { %v11909_v32 = vld [vmem:[#allocation2 + $0xb10] sm:$0xf]  ;;  %v11654_v42 = vor.u32 %v14427_v30, %v11653_v27  ;;  %6223 = vmatpush.bf16.msrb.mxu3 %v12454_v36 }
 0x3d8   :  { %v15436_v33 = vld [vmem:[#allocation11] sm:$0xff] }
 0x3d9   :  { %v3140_v34 = vperm.slane %v15436_v33, 2  ;;  %v14491_v37 = vld [vmem:[#allocation2 + $0xb2c] sm:$0xf0]  ;;  %6185 = vmatpush.bf16.msrb.mxu0 %v11654_v42 }
 0x3da   :  { %v12165_v38 = vld [vmem:[#allocation2 + $0xd10] sm:$0xf]  ;;  %v11910_v44 = vor.u32 %v14491_v37, %v11909_v32 }
 0x3db   :  { %v14555_v40 = vld [vmem:[#allocation2 + $0xd2c] sm:$0xf0]  ;;  %v5932_v48 = vadd.f32 %v5931_v43, %v3140_v34  ;;  %v5959_v43 = vpop.f32.mrf.mxu2 }
 0x3dc   :  { %v12421_v9 = vld [vmem:[#allocation2 + $0xf10] sm:$0xf]  ;;  %v12166_v45 = vor.u32 %v14555_v40, %v12165_v38  ;;  %6198 = vmatpush.bf16.msrb.mxu1 %v11910_v44  ;;  %v14359_v43 = vld [vmem:[#allocation2 + $0x714] sm:$0xf] }
 0x3dd   :  { %v14619_v41 = vld [vmem:[#allocation2 + $0xf2c] sm:$0xf0]  ;;  %v5945_v60 = vadd.f32 %v5944_v51, %v5932_v48  ;;  %v14191_v48 = vld [vmem:[#allocation2 + $0x1d4] sm:$0xf] }
 0x3de   :  { %v11621_v47 = vld [vmem:[#allocation2 + $0x8d0] sm:$0xf]  ;;  %v12422_v52 = vor.u32 %v14619_v41, %v12421_v9  ;;  %6211 = vmatpush.bf16.msrb.mxu2 %v12166_v45  ;;  %v10727_v51 = vld [vmem:[#allocation2 + $0x1f0] sm:$0xf0] }
 0x3df   :  { %v14419_v7 = vld [vmem:[#allocation2 + $0x8ec] sm:$0xf0]  ;;  %v5958_v2 = vadd.f32 %v5957_v46, %v5945_v60  ;;  %v14183_v46 = vld [vmem:[#allocation2 + $0x194] sm:$0xf] }
 0x3e0   :  { %v11877_v13 = vld [vmem:[#allocation2 + $0xad0] sm:$0xf]  ;;  %v11622_v61 = vor.u32 %v14419_v7, %v11621_v47  ;;  %6224 = vmatpush.bf16.msrb.mxu3 %v12422_v52  ;;  %v14255_v52 = vld [vmem:[#allocation2 + $0x3d4] sm:$0xf] }
 0x3e1   :  { %v14483_v53 = vld [vmem:[#allocation2 + $0xaec] sm:$0xf0]  ;;  %v15439_v12 = vadd.f32 %v5970_v4, %v5958_v2  ;;  %v14311_v2 = vld [vmem:[#allocation2 + $0x594] sm:$0xf] }
 0x3e2   :  { %v12133_v55 = vld [vmem:[#allocation2 + $0xcd0] sm:$0xf]  ;;  %v11878_v62 = vor.u32 %v14483_v53, %v11877_v13  ;;  %6186 = vmatpush.bf16.msrb.mxu0 %v11622_v61  ;;  %v5972_v13 = vpop.f32.mrf.mxu3  ;;  %v14383_v61 = vld [vmem:[#allocation2 + $0x7d4] sm:$0xf] }
 0x3e3   :  { %v14547_v56 = vld [vmem:[#allocation2 + $0xcec] sm:$0xf0]  ;;  %v11207_v4 = vld [vmem:[#allocation2 + $0x5b0] sm:$0xf0] }
 0x3e4   :  { %v12389_v58 = vld [vmem:[#allocation2 + $0xed0] sm:$0xf]  ;;  %v12134_v3 = vor.u32 %v14547_v56, %v12133_v55  ;;  %6199 = vmatpush.bf16.msrb.mxu1 %v11878_v62  ;;  %v10983_v55 = vld [vmem:[#allocation2 + $0x3f0] sm:$0xf0] }
 0x3e5   :  { %v14611_v59 = vld [vmem:[#allocation2 + $0xeec] sm:$0xf0]  ;;  %v14319_v56 = vld [vmem:[#allocation2 + $0x5d4] sm:$0xf] }
 0x3e6   :  { %v11589_v16 = vld [vmem:[#allocation2 + $0x890] sm:$0xf]  ;;  %v12390_v8 = vor.u32 %v14611_v59, %v12389_v58  ;;  %6212 = vmatpush.bf16.msrb.mxu2 %v12134_v3  ;;  %v11239_v58 = vld [vmem:[#allocation2 + $0x5f0] sm:$0xf0] }
 0x3e7   :  { %v14411_v63 = vld [vmem:[#allocation2 + $0x8ac] sm:$0xf0]  ;;  %v11495_v62 = vld [vmem:[#allocation2 + $0x7f0] sm:$0xf0] }
 0x3e8   :  { %v11845_v0 = vld [vmem:[#allocation2 + $0xa90] sm:$0xf]  ;;  %v11590_v11 = vor.u32 %v14411_v63, %v11589_v16  ;;  %6225 = vmatpush.bf16.msrb.mxu3 %v12390_v8  ;;  %v10730_v16 = vor.u32 %v14191_v48, %v10727_v51  ;;  %v10986_v63 = vor.u32 %v14255_v52, %v10983_v55  ;;  %v10695_v8 = vld [vmem:[#allocation2 + $0x1b0] sm:$0xf0]  ;;  %v5996_v55 = vpop.f32.mrf.mxu1 }
 0x3e9   :  { %v14475_v15 = vld [vmem:[#allocation2 + $0xaac] sm:$0xf0]  ;;  %v14159_v48 = vld [vmem:[#allocation2 + $0xd4] sm:$0xf] }
 0x3ea   :  { %v12101_v25 = vld [vmem:[#allocation2 + $0xc90] sm:$0xf]  ;;  %v11846_v17 = vor.u32 %v14475_v15, %v11845_v0  ;;  %6187 = vmatpush.bf16.msrb.mxu0 %v11590_v11  ;;  %v11242_v0 = vor.u32 %v14319_v56, %v11239_v58  ;;  %v14247_v15 = vld [vmem:[#allocation2 + $0x394] sm:$0xf]  ;;  %v10698_v11 = vor.u32 %v14183_v46, %v10695_v8 }
 0x3eb   :  { %v14539_v1 = vld [vmem:[#allocation2 + $0xcac] sm:$0xf0]  ;;  %v10599_v51 = vld [vmem:[#allocation2 + $0xf0] sm:$0xf0] }
 0x3ec   :  { %v12357_v6 = vld [vmem:[#allocation2 + $0xe90] sm:$0xf]  ;;  %v12102_v18 = vor.u32 %v14539_v1, %v12101_v25  ;;  %6200 = vmatpush.bf16.msrb.mxu1 %v11846_v17  ;;  %v11498_v25 = vor.u32 %v14383_v61, %v11495_v62  ;;  %v10951_v1 = vld [vmem:[#allocation2 + $0x3b0] sm:$0xf0]  ;;  %v11210_v17 = vor.u32 %v14311_v2, %v11207_v4 }
 0x3ed   :  { %v14603_v10 = vld [vmem:[#allocation2 + $0xeac] sm:$0xf0]  ;;  %v10954_v49 = vor.u32 %v14247_v15, %v10951_v1  ;;  %v14223_v52 = vld [vmem:[#allocation2 + $0x2d4] sm:$0xf] }
 0x3ee   :  { %v11557_v19 = vld [vmem:[#allocation2 + $0x850] sm:$0xf]  ;;  %v12358_v24 = vor.u32 %v14603_v10, %v12357_v6  ;;  %6213 = vmatpush.bf16.msrb.mxu2 %v12102_v18  ;;  %v14375_v6 = vld [vmem:[#allocation2 + $0x794] sm:$0xf] }
 0x3ef   :  { %v14403_v20 = vld [vmem:[#allocation2 + $0x86c] sm:$0xf0]  ;;  %v11463_v10 = vld [vmem:[#allocation2 + $0x7b0] sm:$0xf0] }
 0x3f0   :  { %v11813_v21 = vld [vmem:[#allocation2 + $0xa50] sm:$0xf]  ;;  %v11558_v34 = vor.u32 %v14403_v20, %v11557_v19  ;;  %6226 = vmatpush.bf16.msrb.mxu3 %v12358_v24  ;;  %v14175_v18 = vld [vmem:[#allocation2 + $0x154] sm:$0xf] }
 0x3f1   :  { %v14467_v27 = vld [vmem:[#allocation2 + $0xa6c] sm:$0xf0]  ;;  %v10663_v19 = vld [vmem:[#allocation2 + $0x170] sm:$0xf0] }
 0x3f2   :  { %v12069_v28 = vld [vmem:[#allocation2 + $0xc50] sm:$0xf]  ;;  %v11814_v38 = vor.u32 %v14467_v27, %v11813_v21  ;;  %6188 = vmatpush.bf16.msrb.mxu0 %v11558_v34  ;;  %v14239_v20 = vld [vmem:[#allocation2 + $0x354] sm:$0xf]  ;;  %v11466_v21 = vor.u32 %v14375_v6, %v11463_v10  ;;  %v6022_v10 = vpop.f32.mrf.mxu3 }
 0x3f3   :  { %v14531_v29 = vld [vmem:[#allocation2 + $0xc6c] sm:$0xf0]  ;;  %v14303_v24 = vld [vmem:[#allocation2 + $0x554] sm:$0xf] }
 0x3f4   :  { %v12325_v30 = vld [vmem:[#allocation2 + $0xe50] sm:$0xf]  ;;  %v12070_v40 = vor.u32 %v14531_v29, %v12069_v28  ;;  %6201 = vmatpush.bf16.msrb.mxu1 %v11814_v38  ;;  %v11175_v27 = vld [vmem:[#allocation2 + $0x570] sm:$0xf0] }
 0x3f5   :  { %v14595_v32 = vld [vmem:[#allocation2 + $0xe6c] sm:$0xf0]  ;;  %v14367_v28 = vld [vmem:[#allocation2 + $0x754] sm:$0xf]  ;;  %v11178_v34 = vor.u32 %v14303_v24, %v11175_v27 }
 0x3f6   :  { %v11525_v36 = vld [vmem:[#allocation2 + $0x810] sm:$0xf]  ;;  %v12326_v44 = vor.u32 %v14595_v32, %v12325_v30  ;;  %6214 = vmatpush.bf16.msrb.mxu2 %v12070_v40  ;;  %v11431_v29 = vld [vmem:[#allocation2 + $0x770] sm:$0xf0]  ;;  %v10666_v30 = vor.u32 %v14175_v18, %v10663_v19  ;;  %v10922_v32 = vor.u32 %v14239_v20, %v10919_v22 }
 0x3f7   :  { %v14395_v37 = vld [vmem:[#allocation2 + $0x82c] sm:$0xf0]  ;;  %v14231_v38 = vld [vmem:[#allocation2 + $0x314] sm:$0xf]  ;;  %v11434_v40 = vor.u32 %v14367_v28, %v11431_v29  ;;  %v5998_v28 = vpop.f32.mrf.mxu1 }
 0x3f8   :  { %v11781_v9 = vld [vmem:[#allocation2 + $0xa10] sm:$0xf]  ;;  %v11526_v53 = vor.u32 %v14395_v37, %v11525_v36  ;;  %6227 = vmatpush.bf16.msrb.mxu3 %v12326_v44  ;;  %v14167_v36 = vld [vmem:[#allocation2 + $0x114] sm:$0xf] }
 0x3f9   :  { %v14459_v41 = vld [vmem:[#allocation2 + $0xa2c] sm:$0xf0]  ;;  %v10631_v37 = vld [vmem:[#allocation2 + $0x130] sm:$0xf0] }
 0x3fa   :  { %v12037_v42 = vld [vmem:[#allocation2 + $0xc10] sm:$0xf]  ;;  %v11782_v59 = vor.u32 %v14459_v41, %v11781_v9  ;;  %6189 = vmatpush.bf16.msrb.mxu0 %v11526_v53  ;;  %v10887_v9 = vld [vmem:[#allocation2 + $0x330] sm:$0xf0] }
 0x3fb   :  { %v14523_v45 = vld [vmem:[#allocation2 + $0xc2c] sm:$0xf0]  ;;  %v14295_v41 = vld [vmem:[#allocation2 + $0x514] sm:$0xf] }
 0x3fc   :  { %v12293_v47 = vld [vmem:[#allocation2 + $0xe10] sm:$0xf]  ;;  %v12038_v60 = vor.u32 %v14523_v45, %v12037_v42  ;;  %6202 = vmatpush.bf16.msrb.mxu1 %v11782_v59  ;;  %v11143_v42 = vld [vmem:[#allocation2 + $0x530] sm:$0xf0]  ;;  %v10634_v45 = vor.u32 %v14167_v36, %v10631_v37 }
 0x3fd   :  { %v14587_v7 = vld [vmem:[#allocation2 + $0xe2c] sm:$0xf0]  ;;  %6190 = vmatmul.bf16.vlgmr.msrb.gmra.mxu0 %v15376_v14  ;;  %v11399_v44 = vld [vmem:[#allocation2 + $0x730] sm:$0xf0]  ;;  %v11146_v13 = vor.u32 %v14295_v41, %v11143_v42 }
 0x3fe   :  { %v12294_v3 = vor.u32 %v14587_v7, %v12293_v47  ;;  %6215 = vmatpush.bf16.msrb.mxu2 %v12038_v60  ;;  %6234 = vmatpush.bf16.msra.mxu0 %v10730_v16  ;;  %v5983_v47 = vpop.f32.mrf.mxu0  ;;  %v10890_v7 = vor.u32 %v14231_v38, %v10887_v9  ;;  %v11402_v56 = vor.u32 %v14359_v43, %v11399_v44  ;;  %v10855_v58 = vld [vmem:[#allocation2 + $0x2f0] sm:$0xf0] }
 0x3ff   :  { %6203 = vmatmul.bf16.vlgmr.msrb.gmra.mxu1 %v15378_v35  ;;  %v5984_v53 = vadd.f32 %v5983_v47, %v15439_v12  ;;  %v14287_v59 = vld [vmem:[#allocation2 + $0x4d4] sm:$0xf]  ;;  %v10602_v16 = vor.u32 %v14159_v48, %v10599_v51 }
 0x400   :  { %6228 = vmatpush.bf16.msrb.mxu3 %v12294_v3  ;;  %6247 = vmatpush.bf16.msra.mxu1 %v10986_v63  ;;  %v11111_v60 = vld [vmem:[#allocation2 + $0x4f0] sm:$0xf0]  ;;  %v10858_v63 = vor.u32 %v14223_v52, %v10855_v58 }
 0x401   :  { %6216 = vmatmul.bf16.vlgmr.msrb.gmra.mxu2 %v15381_v57  ;;  %v14351_v61 = vld [vmem:[#allocation2 + $0x6d4] sm:$0xf]  ;;  %v5997_v3 = vadd.f32 %v5996_v55, %v5984_v53  ;;  %v6024_v55 = vpop.f32.mrf.mxu3 }
 0x402   :  { %6260 = vmatpush.bf16.msra.mxu2 %v11242_v0  ;;  %6235 = vmatpush.bf16.msra.mxu0 %v10698_v11  ;;  %v11367_v62 = vld [vmem:[#allocation2 + $0x6f0] sm:$0xf0]  ;;  %v11114_v0 = vor.u32 %v14287_v59, %v11111_v60 }
 0x403   :  { %6229 = vmatmul.bf16.vlgmr.msrb.gmra.mxu3 %v15384_v5  ;;  %v14151_v46 = vld [vmem:[#allocation2 + $0x94] sm:$0xf]  ;;  %v11370_v12 = vor.u32 %v14351_v61, %v11367_v62 }
 0x404   :  { %6273 = vmatpush.bf16.msra.mxu3 %v11498_v25  ;;  %6248 = vmatpush.bf16.msra.mxu1 %v10954_v49  ;;  %v10567_v8 = vld [vmem:[#allocation2 + $0xb0] sm:$0xf0]  ;;  %v6009_v25 = vpop.f32.mrf.mxu2 }
 0x405   :  { %v14215_v15 = vld [vmem:[#allocation2 + $0x294] sm:$0xf]  ;;  %v6010_v6 = vadd.f32 %v6009_v25, %v5997_v3 }
 0x406   :  { %6261 = vmatpush.bf16.msra.mxu2 %v11210_v17  ;;  %6236 = vmatpush.bf16.msra.mxu0 %v10666_v30  ;;  %v10823_v1 = vld [vmem:[#allocation2 + $0x2b0] sm:$0xf0]  ;;  %v10570_v17 = vor.u32 %v14151_v46, %v10567_v8  ;;  %v5985_v19 = vpop.f32.mrf.mxu0 }
 0x407   :  { %v14279_v2 = vld [vmem:[#allocation2 + $0x494] sm:$0xf]  ;;  %v6023_v18 = vadd.f32 %v6022_v10, %v6010_v6  ;;  %v10826_v20 = vor.u32 %v14215_v15, %v10823_v1 }
 0x408   :  { %6274 = vmatpush.bf16.msra.mxu3 %v11466_v21  ;;  %6249 = vmatpush.bf16.msra.mxu1 %v10922_v32  ;;  %v11079_v4 = vld [vmem:[#allocation2 + $0x4b0] sm:$0xf0] }
 0x409   :  { %v14343_v11 = vld [vmem:[#allocation2 + $0x694] sm:$0xf]  ;;  %v11082_v21 = vor.u32 %v14279_v2, %v11079_v4  ;;  %v6548_v36 = vpack.c.bf16 %v6023_v18, %v6023_v18 }
 0x40a   :  { %6262 = vmatpush.bf16.msra.mxu2 %v11178_v34  ;;  %6237 = vmatpush.bf16.msra.mxu0 %v10634_v45  ;;  %v11335_v49 = vld [vmem:[#allocation2 + $0x6b0] sm:$0xf0] }
 0x40b   :  { %v14143_v22 = vld [vmem:[#allocation2 + $0x54] sm:$0xf]  ;;  %v11338_v29 = vor.u32 %v14343_v11, %v11335_v49  ;;  %v6556_v9 = vunpack.c.l.bf16 %v6548_v36 }
 0x40c   :  { %6275 = vmatpush.bf16.msra.mxu3 %v11434_v40  ;;  %6250 = vmatpush.bf16.msra.mxu1 %v10890_v7  ;;  %v10535_v24 = vld [vmem:[#allocation2 + $0x70] sm:$0xf0] }
 0x40d   :  { %v14207_v27 = vld [vmem:[#allocation2 + $0x254] sm:$0xf]  ;;  %v10538_v40 = vor.u32 %v14143_v22, %v10535_v24  ;;  %14996 = vtanh.f32 %v6556_v9 }
 0x40e   :  { %6263 = vmatpush.bf16.msra.mxu2 %v11146_v13  ;;  %6238 = vmatpush.bf16.msra.mxu0 %v10602_v16  ;;  %v10791_v30 = vld [vmem:[#allocation2 + $0x270] sm:$0xf0]  ;;  %v6011_v13 = vpop.f32.mrf.mxu2  ;;  %v6035_v55 = vpop.f32.mrf.mxu0 }
 0x40f   :  { %v14271_v32 = vld [vmem:[#allocation2 + $0x454] sm:$0xf]  ;;  %v10794_v43 = vor.u32 %v14207_v27, %v10791_v30 }
 0x410   :  { %6276 = vmatpush.bf16.msra.mxu3 %v11402_v56  ;;  %6251 = vmatpush.bf16.msra.mxu1 %v10858_v63  ;;  %v11047_v34 = vld [vmem:[#allocation2 + $0x470] sm:$0xf0] }
 0x411   :  { %v14335_v37 = vld [vmem:[#allocation2 + $0x654] sm:$0xf]  ;;  %v11050_v44 = vor.u32 %v14271_v32, %v11047_v34 }
 0x412   :  { %6264 = vmatpush.bf16.msra.mxu2 %v11114_v0  ;;  %v11303_v38 = vld [vmem:[#allocation2 + $0x670] sm:$0xf0]  ;;  %6239 = vmatpush.bf16.msra.mxu0 %v10570_v17 }
 0x413   :  { %v14135_v41 = vld [vmem:[#allocation2 + $0x14] sm:$0xf]  ;;  %v11306_v48 = vor.u32 %v14335_v37, %v11303_v38  ;;  %v14997_v6 = vpop.eup %14996 }
 0x414   :  { %6277 = vmatpush.bf16.msra.mxu3 %v11370_v12  ;;  %v10503_v42 = vld [vmem:[#allocation2 + $0x30] sm:$0xf0]  ;;  %6252 = vmatpush.bf16.msra.mxu1 %v10826_v20  ;;  %v15446_v18 = vpack.c.bf16 %v14997_v6, %v14997_v6 }
 0x415   :  { %v14199_v45 = vld [vmem:[#allocation2 + $0x214] sm:$0xf]  ;;  %v10506_v60 = vor.u32 %v14135_v41, %v10503_v42 }
 0x416   :  { %6265 = vmatpush.bf16.msra.mxu2 %v11082_v21  ;;  %v10759_v47 = vld [vmem:[#allocation2 + $0x230] sm:$0xf0]  ;;  %6240 = vmatpush.bf16.msra.mxu0 %v10538_v40 }
 0x417   :  { %v14263_v7 = vld [vmem:[#allocation2 + $0x414] sm:$0xf]  ;;  %v10762_v16 = vor.u32 %v14199_v45, %v10759_v47  ;;  %v3141_v45 = vperm.slane %v15436_v33, 3 }
 0x418   :  { %6278 = vmatpush.bf16.msra.mxu3 %v11338_v29  ;;  %v11015_v51 = vld [vmem:[#allocation2 + $0x430] sm:$0xf0]  ;;  %6253 = vmatpush.bf16.msra.mxu1 %v10794_v43 }
 0x419   :  { %v14327_v52 = vld [vmem:[#allocation2 + $0x614] sm:$0xf]  ;;  %v11018_v63 = vor.u32 %v14263_v7, %v11015_v51 }
 0x41a   :  { %v11271_v53 = vld [vmem:[#allocation2 + $0x630] sm:$0xf0]  ;;  %6266 = vmatpush.bf16.msra.mxu2 %v11050_v44  ;;  %6241 = vmatpush.bf16.msra.mxu0 %v10506_v60 }
 0x41b   :  { %v14447_v56 = vld [vmem:[#allocation2 + $0x9d4] sm:$0xf]  ;;  %v11274_v8 = vor.u32 %v14327_v52, %v11271_v53 }
 0x41c   :  { %v11751_v58 = vld [vmem:[#allocation2 + $0x9f0] sm:$0xf0]  ;;  %6279 = vmatpush.bf16.msra.mxu3 %v11306_v48  ;;  %6254 = vmatpush.bf16.msra.mxu1 %v10762_v16 }
 0x41d   :  { %v14511_v59 = vld [vmem:[#allocation2 + $0xbd4] sm:$0xf]  ;;  %v11754_v15 = vor.u32 %v14447_v56, %v11751_v58  ;;  %6242 = vmatmul.bf16.vlgmr.msra.gmra.mxu0 %v15333_v39 }
 0x41e   :  { %v12007_v61 = vld [vmem:[#allocation2 + $0xbf0] sm:$0xf0]  ;;  %6267 = vmatpush.bf16.msra.mxu2 %v11018_v63 }
 0x41f   :  { %v14575_v62 = vld [vmem:[#allocation2 + $0xdd4] sm:$0xf]  ;;  %v12010_v25 = vor.u32 %v14511_v59, %v12007_v61  ;;  %6286 = vmatpush.bf16.msrb.mxu0 %v11754_v15  ;;  %6255 = vmatmul.bf16.vlgmr.msra.gmra.mxu1 %v15343_v50 }
 0x420   :  { %v12263_v3 = vld [vmem:[#allocation2 + $0xdf0] sm:$0xf0]  ;;  %6280 = vmatpush.bf16.msra.mxu3 %v11274_v8 }
 0x421   :  { %v14639_v0 = vld [vmem:[#allocation2 + $0xfd4] sm:$0xf]  ;;  %v12266_v12 = vor.u32 %v14575_v62, %v12263_v3  ;;  %6299 = vmatpush.bf16.msrb.mxu1 %v12010_v25  ;;  %6268 = vmatmul.bf16.vlgmr.msra.gmra.mxu2 %v15352_v26  ;;  %v6036_v62 = vadd.f32 %v6035_v55, %v3141_v45  ;;  %v6048_v3 = vpop.f32.mrf.mxu1 }
 0x422   :  { %v12519_v46 = vld [vmem:[#allocation2 + $0xff0] sm:$0xf0] }
 0x423   :  { %v14439_v1 = vld [vmem:[#allocation2 + $0x994] sm:$0xf]  ;;  %v12522_v10 = vor.u32 %v14639_v0, %v12519_v46  ;;  %6312 = vmatpush.bf16.msrb.mxu2 %v12266_v12  ;;  %6281 = vmatmul.bf16.vlgmr.msra.gmra.mxu3 %v15362_v54  ;;  %v6049_v15 = vadd.f32 %v6048_v3, %v6036_v62  ;;  %v10733_v62 = vld [vmem:[#allocation2 + $0x1d8] sm:$0xf] }
 0x424   :  { %v11719_v2 = vld [vmem:[#allocation2 + $0x9b0] sm:$0xf0]  ;;  %v14196_v3 = vld [vmem:[#allocation2 + $0x1f4] sm:$0xf0] }
 0x425   :  { %v14503_v4 = vld [vmem:[#allocation2 + $0xb94] sm:$0xf]  ;;  %v11722_v21 = vor.u32 %v14439_v1, %v11719_v2  ;;  %6325 = vmatpush.bf16.msrb.mxu3 %v12522_v10  ;;  %v6061_v10 = vpop.f32.mrf.mxu2 }
 0x426   :  { %v11975_v11 = vld [vmem:[#allocation2 + $0xbb0] sm:$0xf0] }
 0x427   :  { %v14567_v49 = vld [vmem:[#allocation2 + $0xd94] sm:$0xf]  ;;  %v11978_v22 = vor.u32 %v14503_v4, %v11975_v11  ;;  %6287 = vmatpush.bf16.msrb.mxu0 %v11722_v21  ;;  %v6074_v21 = vpop.f32.mrf.mxu3 }
 0x428   :  { %v12231_v17 = vld [vmem:[#allocation2 + $0xdb0] sm:$0xf0] }
 0x429   :  { %v14631_v19 = vld [vmem:[#allocation2 + $0xf94] sm:$0xf]  ;;  %v12234_v24 = vor.u32 %v14567_v49, %v12231_v17  ;;  %6300 = vmatpush.bf16.msrb.mxu1 %v11978_v22 }
 0x42a   :  { %v12487_v20 = vld [vmem:[#allocation2 + $0xfb0] sm:$0xf0] }
 0x42b   :  { %v14431_v27 = vld [vmem:[#allocation2 + $0x954] sm:$0xf]  ;;  %v12490_v30 = vor.u32 %v14631_v19, %v12487_v20  ;;  %6313 = vmatpush.bf16.msrb.mxu2 %v12234_v24  ;;  %v6062_v20 = vadd.f32 %v6061_v10, %v6049_v15  ;;  %v10701_v10 = vld [vmem:[#allocation2 + $0x198] sm:$0xf] }
 0x42c   :  { %v11687_v28 = vld [vmem:[#allocation2 + $0x970] sm:$0xf0] }
 0x42d   :  { %v14495_v29 = vld [vmem:[#allocation2 + $0xb54] sm:$0xf]  ;;  %v11690_v40 = vor.u32 %v14431_v27, %v11687_v28  ;;  %6326 = vmatpush.bf16.msrb.mxu3 %v12490_v30  ;;  %v15453_v28 = vadd.f32 %v6074_v21, %v6062_v20  ;;  %v6063_v55 = vpop.f32.mrf.mxu2  ;;  %v11213_v20 = vld [vmem:[#allocation2 + $0x598] sm:$0xf] }
 0x42e   :  { %v11943_v32 = vld [vmem:[#allocation2 + $0xb70] sm:$0xf0]  ;;  %v14316_v21 = vld [vmem:[#allocation2 + $0x5b4] sm:$0xf0] }
 0x42f   :  { %v14559_v34 = vld [vmem:[#allocation2 + $0xd54] sm:$0xf]  ;;  %v11946_v41 = vor.u32 %v14495_v29, %v11943_v32  ;;  %6288 = vmatpush.bf16.msrb.mxu0 %v11690_v40  ;;  %v6037_v29 = vpop.f32.mrf.mxu0  ;;  %v11405_v55 = vld [vmem:[#allocation2 + $0x718] sm:$0xf] }
 0x430   :  { %v12199_v36 = vld [vmem:[#allocation2 + $0xd70] sm:$0xf0] }
 0x431   :  { %v14623_v37 = vld [vmem:[#allocation2 + $0xf54] sm:$0xf]  ;;  %v12202_v42 = vor.u32 %v14559_v34, %v12199_v36  ;;  %6301 = vmatpush.bf16.msrb.mxu1 %v11946_v41 }
 0x432   :  { %v12455_v38 = vld [vmem:[#allocation2 + $0xf70] sm:$0xf0] }
 0x433   :  { %v14423_v9 = vld [vmem:[#allocation2 + $0x914] sm:$0xf]  ;;  %v12458_v47 = vor.u32 %v14623_v37, %v12455_v38  ;;  %6314 = vmatpush.bf16.msrb.mxu2 %v12202_v42  ;;  %v6050_v38 = vpop.f32.mrf.mxu1 }
 0x434   :  { %v11655_v43 = vld [vmem:[#allocation2 + $0x930] sm:$0xf0]  ;;  %v14244_v38 = vld [vmem:[#allocation2 + $0x374] sm:$0xf0] }
 0x435   :  { %v14487_v44 = vld [vmem:[#allocation2 + $0xb14] sm:$0xf]  ;;  %v11658_v53 = vor.u32 %v14423_v9, %v11655_v43  ;;  %6327 = vmatpush.bf16.msrb.mxu3 %v12458_v47 }
 0x436   :  { %v11911_v7 = vld [vmem:[#allocation2 + $0xb30] sm:$0xf0] }
 0x437   :  { %v14551_v13 = vld [vmem:[#allocation2 + $0xd14] sm:$0xf]  ;;  %v11914_v56 = vor.u32 %v14487_v44, %v11911_v7  ;;  %6289 = vmatpush.bf16.msrb.mxu0 %v11658_v53 }
 0x438   :  { %v12167_v48 = vld [vmem:[#allocation2 + $0xd30] sm:$0xf0] }
 0x439   :  { %v14615_v51 = vld [vmem:[#allocation2 + $0xf14] sm:$0xf]  ;;  %v12170_v58 = vor.u32 %v14551_v13, %v12167_v48  ;;  %6302 = vmatpush.bf16.msrb.mxu1 %v11914_v56 }
 0x43a   :  { %v12423_v52 = vld [vmem:[#allocation2 + $0xf30] sm:$0xf0] }
 0x43b   :  { %v14415_v59 = vld [vmem:[#allocation2 + $0x8d4] sm:$0xf]  ;;  %v12426_v33 = vor.u32 %v14615_v51, %v12423_v52  ;;  %6315 = vmatpush.bf16.msrb.mxu2 %v12170_v58 }
 0x43c   :  { %v11623_v60 = vld [vmem:[#allocation2 + $0x8f0] sm:$0xf0] }
 0x43d   :  { %v14479_v61 = vld [vmem:[#allocation2 + $0xad4] sm:$0xf]  ;;  %v11626_v25 = vor.u32 %v14415_v59, %v11623_v60  ;;  %6328 = vmatpush.bf16.msrb.mxu3 %v12426_v33  ;;  %v10989_v33 = vld [vmem:[#allocation2 + $0x3d8] sm:$0xf] }
 0x43e   :  { %v11879_v16 = vld [vmem:[#allocation2 + $0xaf0] sm:$0xf0] }
 0x43f   :  { %v14543_v63 = vld [vmem:[#allocation2 + $0xcd4] sm:$0xf]  ;;  %v11882_v12 = vor.u32 %v14479_v61, %v11879_v16  ;;  %6290 = vmatpush.bf16.msrb.mxu0 %v11626_v25  ;;  %v6076_v61 = vpop.f32.mrf.mxu3  ;;  %v11501_v25 = vld [vmem:[#allocation2 + $0x7d8] sm:$0xf] }
 0x440   :  { %v12135_v0 = vld [vmem:[#allocation2 + $0xcf0] sm:$0xf0] }
 0x441   :  { %v14607_v46 = vld [vmem:[#allocation2 + $0xed4] sm:$0xf]  ;;  %v12138_v1 = vor.u32 %v14543_v63, %v12135_v0  ;;  %6303 = vmatpush.bf16.msrb.mxu1 %v11882_v12  ;;  %v14260_v63 = vld [vmem:[#allocation2 + $0x3f4] sm:$0xf0] }
 0x442   :  { %v12391_v8 = vld [vmem:[#allocation2 + $0xef0] sm:$0xf0]  ;;  %v11245_v0 = vld [vmem:[#allocation2 + $0x5d8] sm:$0xf] }
 0x443   :  { %v14407_v2 = vld [vmem:[#allocation2 + $0x894] sm:$0xf]  ;;  %v12394_v11 = vor.u32 %v14607_v46, %v12391_v8  ;;  %6316 = vmatpush.bf16.msrb.mxu2 %v12138_v1  ;;  %v14324_v46 = vld [vmem:[#allocation2 + $0x5f4] sm:$0xf0] }
 0x444   :  { %v11591_v4 = vld [vmem:[#allocation2 + $0x8b0] sm:$0xf0]  ;;  %v14388_v12 = vld [vmem:[#allocation2 + $0x7f4] sm:$0xf0] }
 0x445   :  { %v14471_v6 = vld [vmem:[#allocation2 + $0xa94] sm:$0xf]  ;;  %v11594_v27 = vor.u32 %v14407_v2, %v11591_v4  ;;  %6329 = vmatpush.bf16.msrb.mxu3 %v12394_v11  ;;  %v10734_v2 = vor.u32 %v14196_v3, %v10733_v62  ;;  %v10990_v4 = vor.u32 %v14260_v63, %v10989_v33  ;;  %v14188_v11 = vld [vmem:[#allocation2 + $0x1b4] sm:$0xf0]  ;;  %v6100_v63 = vpop.f32.mrf.mxu1 }
 0x446   :  { %v11847_v49 = vld [vmem:[#allocation2 + $0xab0] sm:$0xf0]  ;;  %v10605_v62 = vld [vmem:[#allocation2 + $0xd8] sm:$0xf] }
 0x447   :  { %v14535_v17 = vld [vmem:[#allocation2 + $0xc94] sm:$0xf]  ;;  %v11850_v30 = vor.u32 %v14471_v6, %v11847_v49  ;;  %6291 = vmatpush.bf16.msrb.mxu0 %v11594_v27  ;;  %v11246_v6 = vor.u32 %v14324_v46, %v11245_v0  ;;  %v10957_v49 = vld [vmem:[#allocation2 + $0x398] sm:$0xf]  ;;  %v10702_v27 = vor.u32 %v14188_v11, %v10701_v10 }
 0x448   :  { %v12103_v19 = vld [vmem:[#allocation2 + $0xcb0] sm:$0xf0]  ;;  %v14164_v3 = vld [vmem:[#allocation2 + $0xf4] sm:$0xf0] }
 0x449   :  { %v14599_v22 = vld [vmem:[#allocation2 + $0xe94] sm:$0xf]  ;;  %v12106_v32 = vor.u32 %v14535_v17, %v12103_v19  ;;  %6304 = vmatpush.bf16.msrb.mxu1 %v11850_v30  ;;  %v11502_v17 = vor.u32 %v14388_v12, %v11501_v25  ;;  %v14252_v19 = vld [vmem:[#allocation2 + $0x3b4] sm:$0xf0]  ;;  %v11214_v30 = vor.u32 %v14316_v21, %v11213_v20 }
 0x44a   :  { %v12359_v24 = vld [vmem:[#allocation2 + $0xeb0] sm:$0xf0]  ;;  %v10958_v29 = vor.u32 %v14252_v19, %v10957_v49  ;;  %v10861_v33 = vld [vmem:[#allocation2 + $0x2d8] sm:$0xf] }
 0x44b   :  { %v14399_v34 = vld [vmem:[#allocation2 + $0x854] sm:$0xf]  ;;  %v12362_v40 = vor.u32 %v14599_v22, %v12359_v24  ;;  %6317 = vmatpush.bf16.msrb.mxu2 %v12106_v32  ;;  %v11469_v22 = vld [vmem:[#allocation2 + $0x798] sm:$0xf] }
 0x44c   :  { %v11559_v36 = vld [vmem:[#allocation2 + $0x870] sm:$0xf0]  ;;  %v14380_v24 = vld [vmem:[#allocation2 + $0x7b4] sm:$0xf0] }
 0x44d   :  { %v14463_v37 = vld [vmem:[#allocation2 + $0xa54] sm:$0xf]  ;;  %v11562_v45 = vor.u32 %v14399_v34, %v11559_v36  ;;  %6330 = vmatpush.bf16.msrb.mxu3 %v12362_v40  ;;  %v10669_v32 = vld [vmem:[#allocation2 + $0x158] sm:$0xf] }
 0x44e   :  { %v11815_v9 = vld [vmem:[#allocation2 + $0xa70] sm:$0xf0]  ;;  %v14180_v34 = vld [vmem:[#allocation2 + $0x174] sm:$0xf0] }
 0x44f   :  { %v14527_v41 = vld [vmem:[#allocation2 + $0xc54] sm:$0xf]  ;;  %v11818_v13 = vor.u32 %v14463_v37, %v11815_v9  ;;  %6292 = vmatpush.bf16.msrb.mxu0 %v11562_v45  ;;  %v10925_v36 = vld [vmem:[#allocation2 + $0x358] sm:$0xf]  ;;  %v11470_v37 = vor.u32 %v14380_v24, %v11469_v22  ;;  %v6126_v24 = vpop.f32.mrf.mxu3 }
 0x450   :  { %v12071_v42 = vld [vmem:[#allocation2 + $0xc70] sm:$0xf0]  ;;  %v11181_v40 = vld [vmem:[#allocation2 + $0x558] sm:$0xf] }
 0x451   :  { %v14591_v43 = vld [vmem:[#allocation2 + $0xe54] sm:$0xf]  ;;  %v12074_v48 = vor.u32 %v14527_v41, %v12071_v42  ;;  %6305 = vmatpush.bf16.msrb.mxu1 %v11818_v13  ;;  %v14308_v9 = vld [vmem:[#allocation2 + $0x574] sm:$0xf0] }
 0x452   :  { %v12327_v44 = vld [vmem:[#allocation2 + $0xe70] sm:$0xf0]  ;;  %v11437_v41 = vld [vmem:[#allocation2 + $0x758] sm:$0xf]  ;;  %v11182_v45 = vor.u32 %v14308_v9, %v11181_v40 }
 0x453   :  { %v14391_v47 = vld [vmem:[#allocation2 + $0x814] sm:$0xf]  ;;  %v12330_v56 = vor.u32 %v14591_v43, %v12327_v44  ;;  %6318 = vmatpush.bf16.msrb.mxu2 %v12074_v48  ;;  %v14372_v42 = vld [vmem:[#allocation2 + $0x774] sm:$0xf0]  ;;  %v10670_v43 = vor.u32 %v14180_v34, %v10669_v32  ;;  %v10926_v44 = vor.u32 %v14244_v38, %v10925_v36 }
 0x454   :  { %v11527_v7 = vld [vmem:[#allocation2 + $0x830] sm:$0xf0]  ;;  %v10893_v13 = vld [vmem:[#allocation2 + $0x318] sm:$0xf]  ;;  %v11438_v48 = vor.u32 %v14372_v42, %v11437_v41  ;;  %v6102_v41 = vpop.f32.mrf.mxu1 }
 0x455   :  { %v14455_v51 = vld [vmem:[#allocation2 + $0xa14] sm:$0xf]  ;;  %v11530_v16 = vor.u32 %v14391_v47, %v11527_v7  ;;  %6331 = vmatpush.bf16.msrb.mxu3 %v12330_v56  ;;  %v10637_v47 = vld [vmem:[#allocation2 + $0x118] sm:$0xf] }
 0x456   :  { %v11783_v52 = vld [vmem:[#allocation2 + $0xa30] sm:$0xf0]  ;;  %v14172_v7 = vld [vmem:[#allocation2 + $0x134] sm:$0xf0] }
 0x457   :  { %v14519_v53 = vld [vmem:[#allocation2 + $0xc14] sm:$0xf]  ;;  %v11786_v8 = vor.u32 %v14455_v51, %v11783_v52  ;;  %6293 = vmatpush.bf16.msrb.mxu0 %v11530_v16  ;;  %v14236_v51 = vld [vmem:[#allocation2 + $0x334] sm:$0xf0] }
 0x458   :  { %v12039_v58 = vld [vmem:[#allocation2 + $0xc30] sm:$0xf0]  ;;  %v11149_v52 = vld [vmem:[#allocation2 + $0x518] sm:$0xf] }
 0x459   :  { %v14583_v59 = vld [vmem:[#allocation2 + $0xe14] sm:$0xf]  ;;  %v12042_v15 = vor.u32 %v14519_v53, %v12039_v58  ;;  %6306 = vmatpush.bf16.msrb.mxu1 %v11786_v8  ;;  %v14300_v53 = vld [vmem:[#allocation2 + $0x534] sm:$0xf0]  ;;  %v10638_v58 = vor.u32 %v14172_v7, %v10637_v47 }
 0x45a   :  { %v12295_v60 = vld [vmem:[#allocation2 + $0xe30] sm:$0xf0]  ;;  %6294 = vmatmul.bf16.vlgmr.msrb.gmra.mxu0 %v15376_v14  ;;  %v14364_v56 = vld [vmem:[#allocation2 + $0x734] sm:$0xf0]  ;;  %v11150_v61 = vor.u32 %v14300_v53, %v11149_v52 }
 0x45b   :  { %v12298_v1 = vor.u32 %v14583_v59, %v12295_v60  ;;  %6319 = vmatpush.bf16.msrb.mxu2 %v12042_v15  ;;  %6338 = vmatpush.bf16.msra.mxu0 %v10734_v2  ;;  %v6087_v59 = vpop.f32.mrf.mxu0  ;;  %v10894_v60 = vor.u32 %v14236_v51, %v10893_v13  ;;  %v11406_v0 = vor.u32 %v14364_v56, %v11405_v55  ;;  %v14228_v46 = vld [vmem:[#allocation2 + $0x2f4] sm:$0xf0] }
 0x45c   :  { %6307 = vmatmul.bf16.vlgmr.msrb.gmra.mxu1 %v15378_v35  ;;  %v6088_v16 = vadd.f32 %v6087_v59, %v15453_v28  ;;  %v11117_v8 = vld [vmem:[#allocation2 + $0x4d8] sm:$0xf]  ;;  %v10606_v2 = vor.u32 %v14164_v3, %v10605_v62 }
 0x45d   :  { %6332 = vmatpush.bf16.msrb.mxu3 %v12298_v1  ;;  %6351 = vmatpush.bf16.msra.mxu1 %v10990_v4  ;;  %v14292_v15 = vld [vmem:[#allocation2 + $0x4f4] sm:$0xf0]  ;;  %v10862_v4 = vor.u32 %v14228_v46, %v10861_v33 }
 0x45e   :  { %6320 = vmatmul.bf16.vlgmr.msrb.gmra.mxu2 %v15381_v57  ;;  %v11373_v25 = vld [vmem:[#allocation2 + $0x6d8] sm:$0xf]  ;;  %v6101_v1 = vadd.f32 %v6100_v63, %v6088_v16  ;;  %v6128_v63 = vpop.f32.mrf.mxu3 }
 0x45f   :  { %6364 = vmatpush.bf16.msra.mxu2 %v11246_v6  ;;  %6339 = vmatpush.bf16.msra.mxu0 %v10702_v27  ;;  %v14356_v12 = vld [vmem:[#allocation2 + $0x6f4] sm:$0xf0]  ;;  %v11118_v6 = vor.u32 %v14292_v15, %v11117_v8 }
 0x460   :  { %6333 = vmatmul.bf16.vlgmr.msrb.gmra.mxu3 %v15384_v5  ;;  %v10573_v10 = vld [vmem:[#allocation2 + $0x98] sm:$0xf]  ;;  %v11374_v28 = vor.u32 %v14356_v12, %v11373_v25 }
 0x461   :  { %6377 = vmatpush.bf16.msra.mxu3 %v11502_v17  ;;  %6352 = vmatpush.bf16.msra.mxu1 %v10958_v29  ;;  %v14156_v11 = vld [vmem:[#allocation2 + $0xb4] sm:$0xf0]  ;;  %v6113_v17 = vpop.f32.mrf.mxu2 }
 0x462   :  { %v10829_v49 = vld [vmem:[#allocation2 + $0x298] sm:$0xf]  ;;  %v6114_v22 = vadd.f32 %v6113_v17, %v6101_v1 }
 0x463   :  { %6365 = vmatpush.bf16.msra.mxu2 %v11214_v30  ;;  %6340 = vmatpush.bf16.msra.mxu0 %v10670_v43  ;;  %v14220_v19 = vld [vmem:[#allocation2 + $0x2b4] sm:$0xf0]  ;;  %v10574_v30 = vor.u32 %v14156_v11, %v10573_v10  ;;  %v6089_v34 = vpop.f32.mrf.mxu0 }
 0x464   :  { %v11085_v20 = vld [vmem:[#allocation2 + $0x498] sm:$0xf]  ;;  %v6127_v32 = vadd.f32 %v6126_v24, %v6114_v22  ;;  %v10830_v36 = vor.u32 %v14220_v19, %v10829_v49 }
 0x465   :  { %6378 = vmatpush.bf16.msra.mxu3 %v11470_v37  ;;  %6353 = vmatpush.bf16.msra.mxu1 %v10926_v44  ;;  %v14284_v21 = vld [vmem:[#allocation2 + $0x4b4] sm:$0xf0] }
 0x466   :  { %v11341_v27 = vld [vmem:[#allocation2 + $0x698] sm:$0xf]  ;;  %v11086_v37 = vor.u32 %v14284_v21, %v11085_v20  ;;  %v6549_v47 = vpack.c.bf16 %v6127_v32, %v6127_v32 }
 0x467   :  { %6366 = vmatpush.bf16.msra.mxu2 %v11182_v45  ;;  %6341 = vmatpush.bf16.msra.mxu0 %v10638_v58  ;;  %v14348_v29 = vld [vmem:[#allocation2 + $0x6b4] sm:$0xf0] }
 0x468   :  { %v10541_v38 = vld [vmem:[#allocation2 + $0x58] sm:$0xf]  ;;  %v11342_v42 = vor.u32 %v14348_v29, %v11341_v27  ;;  %v6557_v51 = vunpack.c.l.bf16 %v6549_v47 }
 0x469   :  { %6379 = vmatpush.bf16.msra.mxu3 %v11438_v48  ;;  %6354 = vmatpush.bf16.msra.mxu1 %v10894_v60  ;;  %v14148_v40 = vld [vmem:[#allocation2 + $0x74] sm:$0xf0] }
 0x46a   :  { %v10797_v9 = vld [vmem:[#allocation2 + $0x258] sm:$0xf]  ;;  %v10542_v48 = vor.u32 %v14148_v40, %v10541_v38  ;;  %14998 = vtanh.f32 %v6557_v51 }
 0x46b   :  { %6367 = vmatpush.bf16.msra.mxu2 %v11150_v61  ;;  %6342 = vmatpush.bf16.msra.mxu0 %v10606_v2  ;;  %v14212_v43 = vld [vmem:[#allocation2 + $0x274] sm:$0xf0]  ;;  %v6115_v61 = vpop.f32.mrf.mxu2 }
 0x46c   :  { %v11053_v44 = vld [vmem:[#allocation2 + $0x458] sm:$0xf]  ;;  %v10798_v55 = vor.u32 %v14212_v43, %v10797_v9 }
 0x46d   :  { %6380 = vmatpush.bf16.msra.mxu3 %v11406_v0  ;;  %6355 = vmatpush.bf16.msra.mxu1 %v10862_v4  ;;  %v14276_v45 = vld [vmem:[#allocation2 + $0x474] sm:$0xf0] }
 0x46e   :  { %v11309_v7 = vld [vmem:[#allocation2 + $0x658] sm:$0xf]  ;;  %v11054_v56 = vor.u32 %v14276_v45, %v11053_v44 }
 0x46f   :  { %6368 = vmatpush.bf16.msra.mxu2 %v11118_v6  ;;  %v14340_v13 = vld [vmem:[#allocation2 + $0x674] sm:$0xf0]  ;;  %6343 = vmatpush.bf16.msra.mxu0 %v10574_v30 }
 0x470   :  { %v10509_v52 = vld [vmem:[#allocation2 + $0x18] sm:$0xf]  ;;  %v11310_v62 = vor.u32 %v14340_v13, %v11309_v7  ;;  %v14999_v22 = vpop.eup %14998 }
 0x471   :  { %6381 = vmatpush.bf16.msra.mxu3 %v11374_v28  ;;  %v14140_v53 = vld [vmem:[#allocation2 + $0x34] sm:$0xf0]  ;;  %6356 = vmatpush.bf16.msra.mxu1 %v10830_v36  ;;  %v15460_v32 = vpack.c.bf16 %v14999_v22, %v14999_v22 }
 0x472   :  { %v10765_v58 = vld [vmem:[#allocation2 + $0x218] sm:$0xf]  ;;  %v10510_v15 = vor.u32 %v14140_v53, %v10509_v52 }
 0x473   :  { %6369 = vmatpush.bf16.msra.mxu2 %v11086_v37  ;;  %v14204_v59 = vld [vmem:[#allocation2 + $0x234] sm:$0xf0]  ;;  %6344 = vmatpush.bf16.msra.mxu0 %v10542_v48 }
 0x474   :  { %v11021_v60 = vld [vmem:[#allocation2 + $0x418] sm:$0xf]  ;;  %v10766_v2 = vor.u32 %v14204_v59, %v10765_v58  ;;  %v15466_v58 = vld [vmem:[#allocation11] sm:$0xff] }
 0x475   :  { %6382 = vmatpush.bf16.msra.mxu3 %v11342_v42  ;;  %v14268_v3 = vld [vmem:[#allocation2 + $0x434] sm:$0xf0]  ;;  %6357 = vmatpush.bf16.msra.mxu1 %v10798_v55  ;;  %v3142_v59 = vperm.slane %v15466_v58, 4 }
 0x476   :  { %v11277_v33 = vld [vmem:[#allocation2 + $0x618] sm:$0xf]  ;;  %v11022_v4 = vor.u32 %v14268_v3, %v11021_v60 }
 0x477   :  { %v14332_v16 = vld [vmem:[#allocation2 + $0x634] sm:$0xf0]  ;;  %6370 = vmatpush.bf16.msra.mxu2 %v11054_v56  ;;  %6345 = vmatpush.bf16.msra.mxu0 %v10510_v15 }
 0x478   :  { %v11757_v0 = vld [vmem:[#allocation2 + $0x9d8] sm:$0xf]  ;;  %v11278_v11 = vor.u32 %v14332_v16, %v11277_v33 }
 0x479   :  { %v14452_v46 = vld [vmem:[#allocation2 + $0x9f4] sm:$0xf0]  ;;  %6383 = vmatpush.bf16.msra.mxu3 %v11310_v62  ;;  %6358 = vmatpush.bf16.msra.mxu1 %v10766_v2  ;;  %v6152_v2 = vpop.f32.mrf.mxu1 }
 0x47a   :  { %v12013_v8 = vld [vmem:[#allocation2 + $0xbd8] sm:$0xf]  ;;  %v11758_v49 = vor.u32 %v14452_v46, %v11757_v0  ;;  %6346 = vmatmul.bf16.vlgmr.msra.gmra.mxu0 %v15333_v39  ;;  %v6139_v0 = vpop.f32.mrf.mxu0 }
 0x47b   :  { %v14516_v25 = vld [vmem:[#allocation2 + $0xbf4] sm:$0xf0]  ;;  %6371 = vmatpush.bf16.msra.mxu2 %v11022_v4 }
 0x47c   :  { %v12269_v12 = vld [vmem:[#allocation2 + $0xdd8] sm:$0xf]  ;;  %v12014_v17 = vor.u32 %v14516_v25, %v12013_v8  ;;  %6390 = vmatpush.bf16.msrb.mxu0 %v11758_v49  ;;  %6359 = vmatmul.bf16.vlgmr.msra.gmra.mxu1 %v15343_v50 }
 0x47d   :  { %v14580_v1 = vld [vmem:[#allocation2 + $0xdf4] sm:$0xf0]  ;;  %6384 = vmatpush.bf16.msra.mxu3 %v11278_v11 }
 0x47e   :  { %v12525_v6 = vld [vmem:[#allocation2 + $0xfd8] sm:$0xf]  ;;  %v12270_v28 = vor.u32 %v14580_v1, %v12269_v12  ;;  %6403 = vmatpush.bf16.msrb.mxu1 %v12014_v17  ;;  %6372 = vmatmul.bf16.vlgmr.msra.gmra.mxu2 %v15352_v26  ;;  %v6140_v1 = vadd.f32 %v6139_v0, %v3142_v59 }
 0x47f   :  { %v14644_v10 = vld [vmem:[#allocation2 + $0xff4] sm:$0xf0] }
 0x480   :  { %v11725_v19 = vld [vmem:[#allocation2 + $0x998] sm:$0xf]  ;;  %v12526_v24 = vor.u32 %v14644_v10, %v12525_v6  ;;  %6416 = vmatpush.bf16.msrb.mxu2 %v12270_v28  ;;  %6385 = vmatmul.bf16.vlgmr.msra.gmra.mxu3 %v15362_v54  ;;  %v6153_v28 = vadd.f32 %v6152_v2, %v6140_v1 }
 0x481   :  { %v14444_v20 = vld [vmem:[#allocation2 + $0x9b4] sm:$0xf0] }
 0x482   :  { %v11981_v21 = vld [vmem:[#allocation2 + $0xb98] sm:$0xf]  ;;  %v11726_v37 = vor.u32 %v14444_v20, %v11725_v19  ;;  %6429 = vmatpush.bf16.msrb.mxu3 %v12526_v24 }
 0x483   :  { %v14508_v27 = vld [vmem:[#allocation2 + $0xbb4] sm:$0xf0] }
 0x484   :  { %v12237_v29 = vld [vmem:[#allocation2 + $0xd98] sm:$0xf]  ;;  %v11982_v38 = vor.u32 %v14508_v27, %v11981_v21  ;;  %6391 = vmatpush.bf16.msrb.mxu0 %v11726_v37 }
 0x485   :  { %v14572_v30 = vld [vmem:[#allocation2 + $0xdb4] sm:$0xf0] }
 0x486   :  { %v12493_v34 = vld [vmem:[#allocation2 + $0xf98] sm:$0xf]  ;;  %v12238_v40 = vor.u32 %v14572_v30, %v12237_v29  ;;  %6404 = vmatpush.bf16.msrb.mxu1 %v11982_v38  ;;  %v6165_v29 = vpop.f32.mrf.mxu2 }
 0x487   :  { %v14636_v36 = vld [vmem:[#allocation2 + $0xfb4] sm:$0xf0]  ;;  %v6166_v38 = vadd.f32 %v6165_v29, %v6153_v28  ;;  %v11247_v28 = vld [vmem:[#allocation2 + $0x5f8] sm:$0xf0] }
 0x488   :  { %v11693_v9 = vld [vmem:[#allocation2 + $0x958] sm:$0xf]  ;;  %v12494_v43 = vor.u32 %v14636_v36, %v12493_v34  ;;  %6417 = vmatpush.bf16.msrb.mxu2 %v12238_v40  ;;  %v6178_v40 = vpop.f32.mrf.mxu3 }
 0x489   :  { %v14436_v41 = vld [vmem:[#allocation2 + $0x974] sm:$0xf0] }
 0x48a   :  { %v11949_v42 = vld [vmem:[#allocation2 + $0xb58] sm:$0xf]  ;;  %v11694_v48 = vor.u32 %v14436_v41, %v11693_v9  ;;  %6430 = vmatpush.bf16.msrb.mxu3 %v12494_v43  ;;  %v15469_v43 = vadd.f32 %v6178_v40, %v6166_v38  ;;  %v10959_v40 = vld [vmem:[#allocation2 + $0x3b8] sm:$0xf0] }
 0x48b   :  { %v14500_v44 = vld [vmem:[#allocation2 + $0xb74] sm:$0xf0] }
 0x48c   :  { %v12205_v45 = vld [vmem:[#allocation2 + $0xd58] sm:$0xf]  ;;  %v11950_v52 = vor.u32 %v14500_v44, %v11949_v42  ;;  %6392 = vmatpush.bf16.msrb.mxu0 %v11694_v48  ;;  %v6141_v44 = vpop.f32.mrf.mxu0 }
 0x48d   :  { %v14564_v47 = vld [vmem:[#allocation2 + $0xd74] sm:$0xf0]  ;;  %v11471_v44 = vld [vmem:[#allocation2 + $0x7b8] sm:$0xf0] }
 0x48e   :  { %v12461_v7 = vld [vmem:[#allocation2 + $0xf58] sm:$0xf]  ;;  %v12206_v53 = vor.u32 %v14564_v47, %v12205_v45  ;;  %6405 = vmatpush.bf16.msrb.mxu1 %v11950_v52 }
 0x48f   :  { %v14628_v13 = vld [vmem:[#allocation2 + $0xf74] sm:$0xf0] }
 0x490   :  { %v11661_v51 = vld [vmem:[#allocation2 + $0x918] sm:$0xf]  ;;  %v12462_v60 = vor.u32 %v14628_v13, %v12461_v7  ;;  %6418 = vmatpush.bf16.msrb.mxu2 %v12206_v53  ;;  %v6180_v2 = vpop.f32.mrf.mxu3 }
 0x491   :  { %v14428_v55 = vld [vmem:[#allocation2 + $0x934] sm:$0xf0] }
 0x492   :  { %v11917_v56 = vld [vmem:[#allocation2 + $0xb18] sm:$0xf]  ;;  %v11662_v63 = vor.u32 %v14428_v55, %v11661_v51  ;;  %6431 = vmatpush.bf16.msrb.mxu3 %v12462_v60  ;;  %v6154_v51 = vpop.f32.mrf.mxu1 }
 0x493   :  { %v14492_v61 = vld [vmem:[#allocation2 + $0xb34] sm:$0xf0]  ;;  %v14240_v51 = vld [vmem:[#allocation2 + $0x35c] sm:$0xf] }
 0x494   :  { %v12173_v62 = vld [vmem:[#allocation2 + $0xd18] sm:$0xf]  ;;  %v11918_v46 = vor.u32 %v14492_v61, %v11917_v56  ;;  %6393 = vmatpush.bf16.msrb.mxu0 %v11662_v63  ;;  %v6191_v2 = vpop.f32.mrf.mxu0 }
 0x495   :  { %v14556_v3 = vld [vmem:[#allocation2 + $0xd34] sm:$0xf0] }
 0x496   :  { %v12429_v33 = vld [vmem:[#allocation2 + $0xf18] sm:$0xf]  ;;  %v12174_v8 = vor.u32 %v14556_v3, %v12173_v62  ;;  %6406 = vmatpush.bf16.msrb.mxu1 %v11918_v46 }
 0x497   :  { %v14620_v16 = vld [vmem:[#allocation2 + $0xf34] sm:$0xf0] }
 0x498   :  { %v11629_v15 = vld [vmem:[#allocation2 + $0x8d8] sm:$0xf]  ;;  %v12430_v4 = vor.u32 %v14620_v16, %v12429_v33  ;;  %6419 = vmatpush.bf16.msrb.mxu2 %v12174_v8  ;;  %v6167_v8 = vpop.f32.mrf.mxu2 }
 0x499   :  { %v14420_v25 = vld [vmem:[#allocation2 + $0x8f4] sm:$0xf0]  ;;  %v14296_v8 = vld [vmem:[#allocation2 + $0x51c] sm:$0xf] }
 0x49a   :  { %v11885_v12 = vld [vmem:[#allocation2 + $0xad8] sm:$0xf]  ;;  %v11630_v19 = vor.u32 %v14420_v25, %v11629_v15  ;;  %6432 = vmatpush.bf16.msrb.mxu3 %v12430_v4  ;;  %v14192_v4 = vld [vmem:[#allocation2 + $0x1dc] sm:$0xf] }
 0x49b   :  { %v14484_v6 = vld [vmem:[#allocation2 + $0xaf4] sm:$0xf0] }
 0x49c   :  { %v12141_v10 = vld [vmem:[#allocation2 + $0xcd8] sm:$0xf]  ;;  %v11886_v20 = vor.u32 %v14484_v6, %v11885_v12  ;;  %6394 = vmatpush.bf16.msrb.mxu0 %v11630_v19  ;;  %v10735_v6 = vld [vmem:[#allocation2 + $0x1f8] sm:$0xf0] }
 0x49d   :  { %v14548_v11 = vld [vmem:[#allocation2 + $0xcf4] sm:$0xf0] }
 0x49e   :  { %v12397_v49 = vld [vmem:[#allocation2 + $0xed8] sm:$0xf]  ;;  %v12142_v21 = vor.u32 %v14548_v11, %v12141_v10  ;;  %6407 = vmatpush.bf16.msrb.mxu1 %v11886_v20  ;;  %v14256_v10 = vld [vmem:[#allocation2 + $0x3dc] sm:$0xf] }
 0x49f   :  { %v14612_v17 = vld [vmem:[#allocation2 + $0xef4] sm:$0xf0] }
 0x4a0   :  { %v11597_v22 = vld [vmem:[#allocation2 + $0x898] sm:$0xf]  ;;  %v12398_v30 = vor.u32 %v14612_v17, %v12397_v49  ;;  %6420 = vmatpush.bf16.msrb.mxu2 %v12142_v21  ;;  %v10991_v49 = vld [vmem:[#allocation2 + $0x3f8] sm:$0xf0] }
 0x4a1   :  { %v14412_v24 = vld [vmem:[#allocation2 + $0x8b4] sm:$0xf0]  ;;  %v14320_v17 = vld [vmem:[#allocation2 + $0x5dc] sm:$0xf]  ;;  %v10994_v29 = vor.u32 %v14256_v10, %v10991_v49 }
 0x4a2   :  { %v11853_v27 = vld [vmem:[#allocation2 + $0xa98] sm:$0xf]  ;;  %v11598_v42 = vor.u32 %v14412_v24, %v11597_v22  ;;  %6433 = vmatpush.bf16.msrb.mxu3 %v12398_v30  ;;  %v14384_v21 = vld [vmem:[#allocation2 + $0x7dc] sm:$0xf]  ;;  %v11250_v30 = vor.u32 %v14320_v17, %v11247_v28  ;;  %v6192_v17 = vadd.f32 %v6191_v2, %v15469_v43  ;;  %v6204_v28 = vpop.f32.mrf.mxu1 }
 0x4a3   :  { %v14476_v34 = vld [vmem:[#allocation2 + $0xab4] sm:$0xf0]  ;;  %v11503_v22 = vld [vmem:[#allocation2 + $0x7f8] sm:$0xf0] }
 0x4a4   :  { %v12109_v36 = vld [vmem:[#allocation2 + $0xc98] sm:$0xf]  ;;  %v11854_v45 = vor.u32 %v14476_v34, %v11853_v27  ;;  %6395 = vmatpush.bf16.msrb.mxu0 %v11598_v42  ;;  %v10738_v27 = vor.u32 %v14192_v4, %v10735_v6  ;;  %v14184_v34 = vld [vmem:[#allocation2 + $0x19c] sm:$0xf]  ;;  %v11506_v38 = vor.u32 %v14384_v21, %v11503_v22 }
 0x4a5   :  { %v14540_v37 = vld [vmem:[#allocation2 + $0xcb4] sm:$0xf0]  ;;  %v14376_v42 = vld [vmem:[#allocation2 + $0x79c] sm:$0xf] }
 0x4a6   :  { %v12365_v9 = vld [vmem:[#allocation2 + $0xe98] sm:$0xf]  ;;  %v12110_v47 = vor.u32 %v14540_v37, %v12109_v36  ;;  %6408 = vmatpush.bf16.msrb.mxu1 %v11854_v45  ;;  %v10703_v36 = vld [vmem:[#allocation2 + $0x1b8] sm:$0xf0] }
 0x4a7   :  { %v14604_v41 = vld [vmem:[#allocation2 + $0xeb4] sm:$0xf0]  ;;  %v14248_v37 = vld [vmem:[#allocation2 + $0x39c] sm:$0xf]  ;;  %v10706_v45 = vor.u32 %v14184_v34, %v10703_v36 }
 0x4a8   :  { %v11565_v7 = vld [vmem:[#allocation2 + $0x858] sm:$0xf]  ;;  %v12366_v52 = vor.u32 %v14604_v41, %v12365_v9  ;;  %6421 = vmatpush.bf16.msrb.mxu2 %v12110_v47  ;;  %v14312_v9 = vld [vmem:[#allocation2 + $0x59c] sm:$0xf]  ;;  %v10962_v47 = vor.u32 %v14248_v37, %v10959_v40 }
 0x4a9   :  { %v14404_v13 = vld [vmem:[#allocation2 + $0x874] sm:$0xf0]  ;;  %v11215_v41 = vld [vmem:[#allocation2 + $0x5b8] sm:$0xf0] }
 0x4aa   :  { %v11821_v48 = vld [vmem:[#allocation2 + $0xa58] sm:$0xf]  ;;  %v11566_v61 = vor.u32 %v14404_v13, %v11565_v7  ;;  %6434 = vmatpush.bf16.msrb.mxu3 %v12366_v52  ;;  %v11218_v7 = vor.u32 %v14312_v9, %v11215_v41  ;;  %v14176_v13 = vld [vmem:[#allocation2 + $0x15c] sm:$0xf]  ;;  %v11474_v52 = vor.u32 %v14376_v42, %v11471_v44  ;;  %v6217_v9 = vpop.f32.mrf.mxu2 }
 0x4ab   :  { %v14468_v53 = vld [vmem:[#allocation2 + $0xa74] sm:$0xf0]  ;;  %v14160_v10 = vld [vmem:[#allocation2 + $0xdc] sm:$0xf] }
 0x4ac   :  { %v12077_v55 = vld [vmem:[#allocation2 + $0xc58] sm:$0xf]  ;;  %v11822_v33 = vor.u32 %v14468_v53, %v11821_v48  ;;  %6396 = vmatpush.bf16.msrb.mxu0 %v11566_v61  ;;  %v10671_v48 = vld [vmem:[#allocation2 + $0x178] sm:$0xf0] }
 0x4ad   :  { %v14532_v56 = vld [vmem:[#allocation2 + $0xc74] sm:$0xf0]  ;;  %v10927_v53 = vld [vmem:[#allocation2 + $0x378] sm:$0xf0]  ;;  %v10674_v61 = vor.u32 %v14176_v13, %v10671_v48 }
 0x4ae   :  { %v12333_v59 = vld [vmem:[#allocation2 + $0xe58] sm:$0xf]  ;;  %v12078_v16 = vor.u32 %v14532_v56, %v12077_v55  ;;  %6409 = vmatpush.bf16.msrb.mxu1 %v11822_v33  ;;  %v14304_v55 = vld [vmem:[#allocation2 + $0x55c] sm:$0xf] }
 0x4af   :  { %v14596_v60 = vld [vmem:[#allocation2 + $0xe74] sm:$0xf0]  ;;  %v11183_v56 = vld [vmem:[#allocation2 + $0x578] sm:$0xf0] }
 0x4b0   :  { %v11533_v62 = vld [vmem:[#allocation2 + $0x818] sm:$0xf]  ;;  %v12334_v15 = vor.u32 %v14596_v60, %v12333_v59  ;;  %6422 = vmatpush.bf16.msrb.mxu2 %v12078_v16  ;;  %v14368_v59 = vld [vmem:[#allocation2 + $0x75c] sm:$0xf] }
 0x4b1   :  { %v14396_v3 = vld [vmem:[#allocation2 + $0x834] sm:$0xf0]  ;;  %v11439_v60 = vld [vmem:[#allocation2 + $0x778] sm:$0xf0] }
 0x4b2   :  { %v11789_v63 = vld [vmem:[#allocation2 + $0xa18] sm:$0xf]  ;;  %v11534_v11 = vor.u32 %v14396_v3, %v11533_v62  ;;  %6435 = vmatpush.bf16.msrb.mxu3 %v12334_v15  ;;  %v10930_v62 = vor.u32 %v14240_v51, %v10927_v53  ;;  %v11186_v3 = vor.u32 %v14304_v55, %v11183_v56  ;;  %v14168_v33 = vld [vmem:[#allocation2 + $0x11c] sm:$0xf] }
 0x4b3   :  { %v14460_v0 = vld [vmem:[#allocation2 + $0xa34] sm:$0xf0]  ;;  %v10639_v16 = vld [vmem:[#allocation2 + $0x138] sm:$0xf0] }
 0x4b4   :  { %v12045_v46 = vld [vmem:[#allocation2 + $0xc18] sm:$0xf]  ;;  %v11790_v19 = vor.u32 %v14460_v0, %v11789_v63  ;;  %6397 = vmatpush.bf16.msrb.mxu0 %v11534_v11  ;;  %v14232_v63 = vld [vmem:[#allocation2 + $0x31c] sm:$0xf]  ;;  %v11442_v0 = vor.u32 %v14368_v59, %v11439_v60 }
 0x4b5   :  { %v14524_v25 = vld [vmem:[#allocation2 + $0xc34] sm:$0xf0]  ;;  %v11151_v15 = vld [vmem:[#allocation2 + $0x538] sm:$0xf0] }
 0x4b6   :  { %v12301_v12 = vld [vmem:[#allocation2 + $0xe18] sm:$0xf]  ;;  %v12046_v20 = vor.u32 %v14524_v25, %v12045_v46  ;;  %6410 = vmatpush.bf16.msrb.mxu1 %v11790_v19  ;;  %v10895_v46 = vld [vmem:[#allocation2 + $0x338] sm:$0xf0]  ;;  %v11154_v6 = vor.u32 %v14296_v8, %v11151_v15 }
 0x4b7   :  { %v14588_v1 = vld [vmem:[#allocation2 + $0xe34] sm:$0xf0]  ;;  %6398 = vmatmul.bf16.vlgmr.msrb.gmra.mxu0 %v15376_v14  ;;  %v14360_v25 = vld [vmem:[#allocation2 + $0x71c] sm:$0xf]  ;;  %v10898_v4 = vor.u32 %v14232_v63, %v10895_v46 }
 0x4b8   :  { %v12302_v24 = vor.u32 %v14588_v1, %v12301_v12  ;;  %6423 = vmatpush.bf16.msrb.mxu2 %v12046_v20  ;;  %6442 = vmatpush.bf16.msra.mxu0 %v10738_v27  ;;  %v11407_v12 = vld [vmem:[#allocation2 + $0x738] sm:$0xf0]  ;;  %v10642_v1 = vor.u32 %v14168_v33, %v10639_v16 }
 0x4b9   :  { %6411 = vmatmul.bf16.vlgmr.msrb.gmra.mxu1 %v15378_v35  ;;  %v10607_v11 = vld [vmem:[#allocation2 + $0xf8] sm:$0xf0]  ;;  %v11410_v19 = vor.u32 %v14360_v25, %v11407_v12 }
 0x4ba   :  { %6436 = vmatpush.bf16.msrb.mxu3 %v12302_v24  ;;  %6455 = vmatpush.bf16.msra.mxu1 %v10994_v29  ;;  %v14224_v49 = vld [vmem:[#allocation2 + $0x2dc] sm:$0xf]  ;;  %v6205_v29 = vadd.f32 %v6204_v28, %v6192_v17 }
 0x4bb   :  { %6424 = vmatmul.bf16.vlgmr.msrb.gmra.mxu2 %v15381_v57  ;;  %v10863_v20 = vld [vmem:[#allocation2 + $0x2f8] sm:$0xf0] }
 0x4bc   :  { %6468 = vmatpush.bf16.msra.mxu2 %v11250_v30  ;;  %6443 = vmatpush.bf16.msra.mxu0 %v10706_v45  ;;  %v14288_v21 = vld [vmem:[#allocation2 + $0x4dc] sm:$0xf]  ;;  %v10610_v30 = vor.u32 %v14160_v10, %v10607_v11  ;;  %v10866_v34 = vor.u32 %v14224_v49, %v10863_v20  ;;  %v6218_v45 = vadd.f32 %v6217_v9, %v6205_v29  ;;  %v6219_v11 = vpop.f32.mrf.mxu2 }
 0x4bd   :  { %6437 = vmatmul.bf16.vlgmr.msrb.gmra.mxu3 %v15384_v5  ;;  %v11119_v22 = vld [vmem:[#allocation2 + $0x4f8] sm:$0xf0] }
 0x4be   :  { %6481 = vmatpush.bf16.msra.mxu3 %v11506_v38  ;;  %6456 = vmatpush.bf16.msra.mxu1 %v10962_v47  ;;  %v14352_v24 = vld [vmem:[#allocation2 + $0x6dc] sm:$0xf]  ;;  %v11122_v36 = vor.u32 %v14288_v21, %v11119_v22  ;;  %v6230_v47 = vpop.f32.mrf.mxu3 }
 0x4bf   :  { %v11375_v27 = vld [vmem:[#allocation2 + $0x6f8] sm:$0xf0]  ;;  %v6231_v51 = vadd.f32 %v6230_v47, %v6218_v45 }
 0x4c0   :  { %6469 = vmatpush.bf16.msra.mxu2 %v11218_v7  ;;  %6444 = vmatpush.bf16.msra.mxu0 %v10674_v61  ;;  %v14152_v37 = vld [vmem:[#allocation2 + $0x9c] sm:$0xf]  ;;  %v11378_v43 = vor.u32 %v14352_v24, %v11375_v27  ;;  %v6206_v61 = vpop.f32.mrf.mxu1 }
 0x4c1   :  { %v10575_v38 = vld [vmem:[#allocation2 + $0xb8] sm:$0xf0]  ;;  %v6550_v63 = vpack.c.bf16 %v6231_v51, %v6231_v51 }
 0x4c2   :  { %6482 = vmatpush.bf16.msra.mxu3 %v11474_v52  ;;  %6457 = vmatpush.bf16.msra.mxu1 %v10930_v62  ;;  %v14216_v40 = vld [vmem:[#allocation2 + $0x29c] sm:$0xf]  ;;  %v10578_v48 = vor.u32 %v14152_v37, %v10575_v38  ;;  %v6193_v52 = vpop.f32.mrf.mxu0 }
 0x4c3   :  { %v10831_v41 = vld [vmem:[#allocation2 + $0x2b8] sm:$0xf0]  ;;  %v6558_v15 = vunpack.c.l.bf16 %v6550_v63 }
 0x4c4   :  { %6470 = vmatpush.bf16.msra.mxu2 %v11186_v3  ;;  %6445 = vmatpush.bf16.msra.mxu0 %v10642_v1  ;;  %v14280_v42 = vld [vmem:[#allocation2 + $0x49c] sm:$0xf]  ;;  %v10834_v53 = vor.u32 %v14216_v40, %v10831_v41 }
 0x4c5   :  { %v11087_v44 = vld [vmem:[#allocation2 + $0x4b8] sm:$0xf0]  ;;  %15000 = vtanh.f32 %v6558_v15 }
 0x4c6   :  { %6483 = vmatpush.bf16.msra.mxu3 %v11442_v0  ;;  %6458 = vmatpush.bf16.msra.mxu1 %v10898_v4  ;;  %v14344_v7 = vld [vmem:[#allocation2 + $0x69c] sm:$0xf]  ;;  %v11090_v55 = vor.u32 %v14280_v42, %v11087_v44  ;;  %v6232_v20 = vpop.f32.mrf.mxu3 }
 0x4c7   :  { %v11343_v13 = vld [vmem:[#allocation2 + $0x6b8] sm:$0xf0] }
 0x4c8   :  { %6471 = vmatpush.bf16.msra.mxu2 %v11154_v6  ;;  %6446 = vmatpush.bf16.msra.mxu0 %v10610_v30  ;;  %v14144_v56 = vld [vmem:[#allocation2 + $0x5c] sm:$0xf]  ;;  %v11346_v62 = vor.u32 %v14344_v7, %v11343_v13 }
 0x4c9   :  { %v10543_v59 = vld [vmem:[#allocation2 + $0x78] sm:$0xf0] }
 0x4ca   :  { %6484 = vmatpush.bf16.msra.mxu3 %v11410_v19  ;;  %6459 = vmatpush.bf16.msra.mxu1 %v10866_v34  ;;  %v14208_v60 = vld [vmem:[#allocation2 + $0x25c] sm:$0xf]  ;;  %v10546_v8 = vor.u32 %v14144_v56, %v10543_v59 }
 0x4cb   :  { %v10799_v3 = vld [vmem:[#allocation2 + $0x278] sm:$0xf0]  ;;  %v15001_v7 = vpop.eup %15000 }
 0x4cc   :  { %6472 = vmatpush.bf16.msra.mxu2 %v11122_v36  ;;  %v14272_v33 = vld [vmem:[#allocation2 + $0x45c] sm:$0xf]  ;;  %6447 = vmatpush.bf16.msra.mxu0 %v10578_v48  ;;  %v10802_v1 = vor.u32 %v14208_v60, %v10799_v3 }
 0x4cd   :  { %v11055_v16 = vld [vmem:[#allocation2 + $0x478] sm:$0xf0] }
 0x4ce   :  { %6485 = vmatpush.bf16.msra.mxu3 %v11378_v43  ;;  %v14336_v0 = vld [vmem:[#allocation2 + $0x65c] sm:$0xf]  ;;  %6460 = vmatpush.bf16.msra.mxu1 %v10834_v53  ;;  %v11058_v2 = vor.u32 %v14272_v33, %v11055_v16  ;;  %v15476_v53 = vpack.c.bf16 %v15001_v7, %v15001_v7  ;;  %v6269_v7 = vpop.f32.mrf.mxu2 }
 0x4cf   :  { %v11311_v46 = vld [vmem:[#allocation2 + $0x678] sm:$0xf0] }
 0x4d0   :  { %v14136_v25 = vld [vmem:[#allocation2 + $0x1c] sm:$0xf]  ;;  %6473 = vmatpush.bf16.msra.mxu2 %v11090_v55  ;;  %v11314_v49 = vor.u32 %v14336_v0, %v11311_v46  ;;  %6448 = vmatpush.bf16.msra.mxu0 %v10546_v8 }
 0x4d1   :  { %v10511_v12 = vld [vmem:[#allocation2 + $0x38] sm:$0xf0] }
 0x4d2   :  { %v14200_v4 = vld [vmem:[#allocation2 + $0x21c] sm:$0xf]  ;;  %6486 = vmatpush.bf16.msra.mxu3 %v11346_v62  ;;  %v10514_v27 = vor.u32 %v14136_v25, %v10511_v12  ;;  %6461 = vmatpush.bf16.msra.mxu1 %v10802_v1 }
 0x4d3   :  { %v10767_v6 = vld [vmem:[#allocation2 + $0x238] sm:$0xf0] }
 0x4d4   :  { %v14264_v10 = vld [vmem:[#allocation2 + $0x41c] sm:$0xf]  ;;  %6474 = vmatpush.bf16.msra.mxu2 %v11058_v2  ;;  %v10770_v36 = vor.u32 %v14200_v4, %v10767_v6  ;;  %6449 = vmatpush.bf16.msra.mxu0 %v10514_v27  ;;  %v3143_v6 = vperm.slane %v15466_v58, 5 }
 0x4d5   :  { %v11023_v17 = vld [vmem:[#allocation2 + $0x438] sm:$0xf0] }
 0x4d6   :  { %v14328_v28 = vld [vmem:[#allocation2 + $0x61c] sm:$0xf]  ;;  %v11026_v37 = vor.u32 %v14264_v10, %v11023_v17  ;;  %6487 = vmatpush.bf16.msra.mxu3 %v11314_v49  ;;  %6462 = vmatpush.bf16.msra.mxu1 %v10770_v36 }
 0x4d7   :  { %v11279_v19 = vld [vmem:[#allocation2 + $0x638] sm:$0xf0]  ;;  %6450 = vmatmul.bf16.vlgmr.msra.gmra.mxu0 %v15333_v39 }
 0x4d8   :  { %v14448_v21 = vld [vmem:[#allocation2 + $0x9dc] sm:$0xf]  ;;  %v11282_v9 = vor.u32 %v14328_v28, %v11279_v19  ;;  %6475 = vmatpush.bf16.msra.mxu2 %v11026_v37  ;;  %v6243_v19 = vpop.f32.mrf.mxu0 }
 0x4d9   :  { %v11759_v22 = vld [vmem:[#allocation2 + $0x9f8] sm:$0xf0]  ;;  %6463 = vmatmul.bf16.vlgmr.msra.gmra.mxu1 %v15343_v50  ;;  %v6244_v27 = vadd.f32 %v6243_v19, %v3143_v6 }
 0x4da   :  { %v14512_v24 = vld [vmem:[#allocation2 + $0xbdc] sm:$0xf]  ;;  %v11762_v43 = vor.u32 %v14448_v21, %v11759_v22  ;;  %6488 = vmatpush.bf16.msra.mxu3 %v11282_v9 }
 0x4db   :  { %v12015_v29 = vld [vmem:[#allocation2 + $0xbf8] sm:$0xf0]  ;;  %6476 = vmatmul.bf16.vlgmr.msra.gmra.mxu2 %v15352_v26 }
 0x4dc   :  { %v14576_v30 = vld [vmem:[#allocation2 + $0xddc] sm:$0xf]  ;;  %v12018_v41 = vor.u32 %v14512_v24, %v12015_v29  ;;  %6494 = vmatpush.bf16.msrb.mxu0 %v11762_v43  ;;  %v6256_v29 = vpop.f32.mrf.mxu1 }
 0x4dd   :  { %v12271_v34 = vld [vmem:[#allocation2 + $0xdf8] sm:$0xf0]  ;;  %6489 = vmatmul.bf16.vlgmr.msra.gmra.mxu3 %v15362_v54  ;;  %v6257_v9 = vadd.f32 %v6256_v29, %v6244_v27 }
 0x4de   :  { %v14640_v38 = vld [vmem:[#allocation2 + $0xfdc] sm:$0xf]  ;;  %v12274_v42 = vor.u32 %v14576_v30, %v12271_v34  ;;  %6507 = vmatpush.bf16.msrb.mxu1 %v12018_v41 }
 0x4df   :  { %v12527_v40 = vld [vmem:[#allocation2 + $0xff8] sm:$0xf0] }
 0x4e0   :  { %v14440_v44 = vld [vmem:[#allocation2 + $0x99c] sm:$0xf]  ;;  %v12530_v13 = vor.u32 %v14640_v38, %v12527_v40  ;;  %6520 = vmatpush.bf16.msrb.mxu2 %v12274_v42 }
 0x4e1   :  { %v11727_v45 = vld [vmem:[#allocation2 + $0x9b8] sm:$0xf0] }
 0x4e2   :  { %v14504_v47 = vld [vmem:[#allocation2 + $0xb9c] sm:$0xf]  ;;  %v11730_v59 = vor.u32 %v14440_v44, %v11727_v45  ;;  %6533 = vmatpush.bf16.msrb.mxu3 %v12530_v13 }
 0x4e3   :  { %v11983_v48 = vld [vmem:[#allocation2 + $0xbb8] sm:$0xf0] }
 0x4e4   :  { %v14568_v51 = vld [vmem:[#allocation2 + $0xd9c] sm:$0xf]  ;;  %v11986_v60 = vor.u32 %v14504_v47, %v11983_v48  ;;  %6495 = vmatpush.bf16.msrb.mxu0 %v11730_v59 }
 0x4e5   :  { %v12239_v52 = vld [vmem:[#allocation2 + $0xdb8] sm:$0xf0] }
 0x4e6   :  { %v14632_v55 = vld [vmem:[#allocation2 + $0xf9c] sm:$0xf]  ;;  %v12242_v61 = vor.u32 %v14568_v51, %v12239_v52  ;;  %6508 = vmatpush.bf16.msrb.mxu1 %v11986_v60 }
 0x4e7   :  { %v12495_v56 = vld [vmem:[#allocation2 + $0xfb8] sm:$0xf0] }
 0x4e8   :  { %v14432_v62 = vld [vmem:[#allocation2 + $0x95c] sm:$0xf]  ;;  %v12498_v16 = vor.u32 %v14632_v55, %v12495_v56  ;;  %6521 = vmatpush.bf16.msrb.mxu2 %v12242_v61  ;;  %v6270_v55 = vadd.f32 %v6269_v7, %v6257_v9  ;;  %v6282_v56 = vpop.f32.mrf.mxu3 }
 0x4e9   :  { %v11695_v3 = vld [vmem:[#allocation2 + $0x978] sm:$0xf0] }
 0x4ea   :  { %v14496_v33 = vld [vmem:[#allocation2 + $0xb5c] sm:$0xf]  ;;  %v11698_v25 = vor.u32 %v14432_v62, %v11695_v3  ;;  %6534 = vmatpush.bf16.msrb.mxu3 %v12498_v16  ;;  %v6283_v62 = vadd.f32 %v6282_v56, %v6270_v55  ;;  %v6245_v3 = vpop.f32.mrf.mxu0 }
 0x4eb   :  { %v11951_v63 = vld [vmem:[#allocation2 + $0xb78] sm:$0xf0] }
 0x4ec   :  { %v14560_v0 = vld [vmem:[#allocation2 + $0xd5c] sm:$0xf]  ;;  %v11954_v1 = vor.u32 %v14496_v33, %v11951_v63  ;;  %6496 = vmatpush.bf16.msrb.mxu0 %v11698_v25 }
 0x4ed   :  { %v12207_v46 = vld [vmem:[#allocation2 + $0xd78] sm:$0xf0] }
 0x4ee   :  { %v14624_v8 = vld [vmem:[#allocation2 + $0xf5c] sm:$0xf]  ;;  %v12210_v2 = vor.u32 %v14560_v0, %v12207_v46  ;;  %6509 = vmatpush.bf16.msrb.mxu1 %v11954_v1 }
 0x4ef   :  { %v12463_v15 = vld [vmem:[#allocation2 + $0xf78] sm:$0xf0] }
 0x4f0   :  { %v14424_v12 = vld [vmem:[#allocation2 + $0x91c] sm:$0xf]  ;;  %v12466_v10 = vor.u32 %v14624_v8, %v12463_v15  ;;  %6522 = vmatpush.bf16.msrb.mxu2 %v12210_v2  ;;  %v6258_v8 = vpop.f32.mrf.mxu1 }
 0x4f1   :  { %v11663_v4 = vld [vmem:[#allocation2 + $0x938] sm:$0xf0] }
 0x4f2   :  { %v14488_v26 = vld [vmem:[#allocation2 + $0xb1c] sm:$0xf]  ;;  %v11666_v28 = vor.u32 %v14424_v12, %v11663_v4  ;;  %6535 = vmatpush.bf16.msrb.mxu3 %v12466_v10 }
 0x4f3   :  { %v11919_v11 = vld [vmem:[#allocation2 + $0xb38] sm:$0xf0] }
 0x4f4   :  { %v14552_v49 = vld [vmem:[#allocation2 + $0xd1c] sm:$0xf]  ;;  %v11922_v50 = vor.u32 %v14488_v26, %v11919_v11  ;;  %6497 = vmatpush.bf16.msrb.mxu0 %v11666_v28 }
 0x4f5   :  { %v12175_v39 = vld [vmem:[#allocation2 + $0xd38] sm:$0xf0] }
 0x4f6   :  { %v14616_v17 = vld [vmem:[#allocation2 + $0xf1c] sm:$0xf]  ;;  %v12178_v20 = vor.u32 %v14552_v49, %v12175_v39  ;;  %6510 = vmatpush.bf16.msrb.mxu1 %v11922_v50 }
 0x4f7   :  { %v12431_v54 = vld [vmem:[#allocation2 + $0xf38] sm:$0xf0] }
 0x4f8   :  { %v14416_v21 = vld [vmem:[#allocation2 + $0x8dc] sm:$0xf]  ;;  %v12434_v30 = vor.u32 %v14616_v17, %v12431_v54  ;;  %6523 = vmatpush.bf16.msrb.mxu2 %v12178_v20  ;;  %v6271_v17 = vpop.f32.mrf.mxu2  ;;  %v6284_v20 = vpop.f32.mrf.mxu3 }
 0x4f9   :  { %v11631_v22 = vld [vmem:[#allocation2 + $0x8f8] sm:$0xf0]  ;;  %v3145_v20 = vperm.slane %v15466_v58, 7 }
 0x4fa   :  { %v14480_v24 = vld [vmem:[#allocation2 + $0xadc] sm:$0xf]  ;;  %v11634_v43 = vor.u32 %v14416_v21, %v11631_v22  ;;  %6536 = vmatpush.bf16.msrb.mxu3 %v12434_v30 }
 0x4fb   :  { %v11887_v34 = vld [vmem:[#allocation2 + $0xaf8] sm:$0xf0] }
 0x4fc   :  { %v14544_v36 = vld [vmem:[#allocation2 + $0xcdc] sm:$0xf]  ;;  %v11890_v41 = vor.u32 %v14480_v24, %v11887_v34  ;;  %6498 = vmatpush.bf16.msrb.mxu0 %v11634_v43  ;;  %v6295_v34 = vpop.f32.mrf.mxu0 }
 0x4fd   :  { %v12143_v37 = vld [vmem:[#allocation2 + $0xcf8] sm:$0xf0] }
 0x4fe   :  { %v14608_v38 = vld [vmem:[#allocation2 + $0xedc] sm:$0xf]  ;;  %v12146_v42 = vor.u32 %v14544_v36, %v12143_v37  ;;  %6511 = vmatpush.bf16.msrb.mxu1 %v11890_v41  ;;  %v6296_v36 = vadd.f32 %v6295_v34, %v6283_v62  ;;  %v6308_v37 = vpop.f32.mrf.mxu1 }
 0x4ff   :  { %v12399_v40 = vld [vmem:[#allocation2 + $0xef8] sm:$0xf0] }
 0x500   :  { %v14408_v44 = vld [vmem:[#allocation2 + $0x89c] sm:$0xf]  ;;  %v12402_v13 = vor.u32 %v14608_v38, %v12399_v40  ;;  %6524 = vmatpush.bf16.msrb.mxu2 %v12146_v42  ;;  %v6309_v38 = vadd.f32 %v6308_v37, %v6296_v36  ;;  %v6321_v40 = vpop.f32.mrf.mxu2  ;;  %v6334_v43 = vpop.f32.mrf.mxu3 }
 0x501   :  { %v11599_v45 = vld [vmem:[#allocation2 + $0x8b8] sm:$0xf0] }
 0x502   :  { %v14472_v47 = vld [vmem:[#allocation2 + $0xa9c] sm:$0xf]  ;;  %v11602_v61 = vor.u32 %v14408_v44, %v11599_v45  ;;  %6537 = vmatpush.bf16.msrb.mxu3 %v12402_v13  ;;  %v6322_v9 = vadd.f32 %v6321_v40, %v6309_v38 }
 0x503   :  { %v11855_v48 = vld [vmem:[#allocation2 + $0xab8] sm:$0xf0] }
 0x504   :  { %v14536_v51 = vld [vmem:[#allocation2 + $0xc9c] sm:$0xf]  ;;  %v11858_v33 = vor.u32 %v14472_v47, %v11855_v48  ;;  %6499 = vmatpush.bf16.msrb.mxu0 %v11602_v61  ;;  %v6335_v41 = vadd.f32 %v6334_v43, %v6322_v9  ;;  %v6297_v42 = vpop.f32.mrf.mxu0 }
 0x505   :  { %v12111_v52 = vld [vmem:[#allocation2 + $0xcb8] sm:$0xf0] }
 0x506   :  { %v14600_v59 = vld [vmem:[#allocation2 + $0xe9c] sm:$0xf]  ;;  %v12114_v16 = vor.u32 %v14536_v51, %v12111_v52  ;;  %6512 = vmatpush.bf16.msrb.mxu1 %v11858_v33  ;;  %v6310_v44 = vpop.f32.mrf.mxu1  ;;  %v6551_v45 = vpack.c.bf16 %v6335_v41, %v6335_v41 }
 0x507   :  { %v12367_v60 = vld [vmem:[#allocation2 + $0xeb8] sm:$0xf0] }
 0x508   :  { %v14400_v63 = vld [vmem:[#allocation2 + $0x85c] sm:$0xf]  ;;  %v12370_v15 = vor.u32 %v14600_v59, %v12367_v60  ;;  %6525 = vmatpush.bf16.msrb.mxu2 %v12114_v16  ;;  %v6559_v47 = vunpack.c.l.bf16 %v6551_v45  ;;  %v6323_v7 = vpop.f32.mrf.mxu2 }
 0x509   :  { %v11567_v0 = vld [vmem:[#allocation2 + $0x878] sm:$0xf0] }
 0x50a   :  { %v14464_v46 = vld [vmem:[#allocation2 + $0xa5c] sm:$0xf]  ;;  %v11570_v26 = vor.u32 %v14400_v63, %v11567_v0  ;;  %6538 = vmatpush.bf16.msrb.mxu3 %v12370_v15  ;;  %15002 = vtanh.f32 %v6559_v47 }
 0x50b   :  { %v11823_v25 = vld [vmem:[#allocation2 + $0xa78] sm:$0xf0] }
 0x50c   :  { %v14528_v12 = vld [vmem:[#allocation2 + $0xc5c] sm:$0xf]  ;;  %v11826_v6 = vor.u32 %v14464_v46, %v11823_v25  ;;  %6500 = vmatpush.bf16.msrb.mxu0 %v11570_v26 }
 0x50d   :  { %v12079_v1 = vld [vmem:[#allocation2 + $0xc78] sm:$0xf0] }
 0x50e   :  { %v14592_v2 = vld [vmem:[#allocation2 + $0xe5c] sm:$0xf]  ;;  %v12082_v10 = vor.u32 %v14528_v12, %v12079_v1  ;;  %6513 = vmatpush.bf16.msrb.mxu1 %v11826_v6  ;;  %v6360_v51 = vpop.f32.mrf.mxu1 }
 0x50f   :  { %v12335_v4 = vld [vmem:[#allocation2 + $0xe78] sm:$0xf0] }
 0x510   :  { %v14392_v11 = vld [vmem:[#allocation2 + $0x81c] sm:$0xf]  ;;  %v12338_v54 = vor.u32 %v14592_v2, %v12335_v4  ;;  %6526 = vmatpush.bf16.msrb.mxu2 %v12082_v10  ;;  %v6373_v55 = vpop.f32.mrf.mxu2 }
 0x511   :  { %v11535_v49 = vld [vmem:[#allocation2 + $0x838] sm:$0xf0] }
 0x512   :  { %v14456_v39 = vld [vmem:[#allocation2 + $0xa1c] sm:$0xf]  ;;  %v11538_v24 = vor.u32 %v14392_v11, %v11535_v49  ;;  %6539 = vmatpush.bf16.msrb.mxu3 %v12338_v54 }
 0x513   :  { %v11791_v28 = vld [vmem:[#allocation2 + $0xa38] sm:$0xf0] }
 0x514   :  { %v14520_v19 = vld [vmem:[#allocation2 + $0xc1c] sm:$0xf]  ;;  %v11794_v27 = vor.u32 %v14456_v39, %v11791_v28  ;;  %6501 = vmatpush.bf16.msrb.mxu0 %v11538_v24 }
 0x515   :  { %v12047_v50 = vld [vmem:[#allocation2 + $0xc38] sm:$0xf0] }
 0x516   :  { %v14584_v21 = vld [vmem:[#allocation2 + $0xe1c] sm:$0xf]  ;;  %v12050_v29 = vor.u32 %v14520_v19, %v12047_v50  ;;  %6514 = vmatpush.bf16.msrb.mxu1 %v11794_v27  ;;  %v6362_v62 = vpop.f32.mrf.mxu1 }
 0x517   :  { %v12303_v22 = vld [vmem:[#allocation2 + $0xe38] sm:$0xf0]  ;;  %6502 = vmatmul.bf16.vlgmr.msrb.gmra.mxu0 %v15376_v14  ;;  %v6336_v14 = vpop.f32.mrf.mxu3 }
 0x518   :  { %v12306_v30 = vor.u32 %v14584_v21, %v12303_v22  ;;  %6527 = vmatpush.bf16.msrb.mxu2 %v12050_v29  ;;  %v6375_v3 = vpop.f32.mrf.mxu2 }
 0x519   :  { %6515 = vmatmul.bf16.vlgmr.msrb.gmra.mxu1 %v15378_v35  ;;  %v15003_v35 = vpop.eup %15002 }
 0x51a   :  { %6540 = vmatpush.bf16.msrb.mxu3 %v12306_v30  ;;  %v15487_v13 = vpack.c.bf16 %v15003_v35, %v15003_v35 }
 0x51b   :  { %6528 = vmatmul.bf16.vlgmr.msrb.gmra.mxu2 %v15381_v57  ;;  %v3144_v57 = vperm.slane %v15466_v58, 6 }
 0x51d   :  { %6541 = vmatmul.bf16.vlgmr.msrb.gmra.mxu3 %v15384_v5  ;;  %v6347_v5 = vpop.f32.mrf.mxu0 }
 0x51e   :  { %v6348_v48 = vadd.f32 %v6347_v5, %v3144_v57 }
 0x51f   :  { %v6386_v59 = vpop.f32.mrf.mxu3 }
 0x520   :  { %v6361_v52 = vadd.f32 %v6360_v51, %v6348_v48 }
 0x522   :  { %v6374_v56 = vadd.f32 %v6373_v55, %v6361_v52 }
 0x524   :  { %v6387_v60 = vadd.f32 %v6386_v59, %v6374_v56 }
 0x525   :  { %v6349_v61 = vpop.f32.mrf.mxu0 }
 0x527   :  { %v6388_v33 = vpop.f32.mrf.mxu3 }
 0x534   :  { %v6399_v16 = vpop.f32.mrf.mxu0 }
 0x535   :  { %v6400_v63 = vadd.f32 %v6399_v16, %v6387_v60 }
 0x536   :  { %v6412_v0 = vpop.f32.mrf.mxu1 }
 0x537   :  { %v6413_v46 = vadd.f32 %v6412_v0, %v6400_v63 }
 0x53c   :  { %v6401_v1 = vpop.f32.mrf.mxu0 }
 0x53e   :  { %v6425_v8 = vpop.f32.mrf.mxu2  ;;  %v6414_v2 = vpop.f32.mrf.mxu1 }
 0x53f   :  { %v6426_v15 = vadd.f32 %v6425_v8, %v6413_v46 }
 0x540   :  { %v6438_v25 = vpop.f32.mrf.mxu3 }
 0x541   :  { %v6439_v12 = vadd.f32 %v6438_v25, %v6426_v15 }
 0x543   :  { %v6552_v4 = vpack.c.bf16 %v6439_v12, %v6439_v12 }
 0x545   :  { %v6560_v26 = vunpack.c.l.bf16 %v6552_v4 }
 0x546   :  { %v6427_v6 = vpop.f32.mrf.mxu2 }
 0x547   :  { %15004 = vtanh.f32 %v6560_v26 }
 0x548   :  { %v6440_v10 = vpop.f32.mrf.mxu3 }
 0x54d   :  { %v15005_v11 = vpop.eup %15004 }
 0x54e   :  { %v15490_v49 = vpack.c.bf16 %v15005_v11, %v15005_v11 }
 0x554   :  { %v6451_v39 = vpop.f32.mrf.mxu0 }
 0x555   :  { %v6452_v24 = vadd.f32 %v6451_v39, %v3145_v20 }
 0x556   :  { %v6464_v17 = vpop.f32.mrf.mxu1 }
 0x557   :  { %v6465_v27 = vadd.f32 %v6464_v17, %v6452_v24 }
 0x55c   :  { %v6453_v19 = vpop.f32.mrf.mxu0 }
 0x55e   :  { %v6477_v54 = vpop.f32.mrf.mxu2  ;;  %v6466_v50 = vpop.f32.mrf.mxu1 }
 0x55f   :  { %v6478_v29 = vadd.f32 %v6477_v54, %v6465_v27 }
 0x560   :  { %v6490_v28 = vpop.f32.mrf.mxu3 }
 0x561   :  { %v6491_v30 = vadd.f32 %v6490_v28, %v6478_v29 }
 0x566   :  { %v6479_v21 = vpop.f32.mrf.mxu2 }
 0x568   :  { %v6492_v22 = vpop.f32.mrf.mxu3 }
 0x594   :  { %v6503_v34 = vpop.f32.mrf.mxu0 }
 0x595   :  { %v6504_v37 = vadd.f32 %v6503_v34, %v6491_v30 }
 0x596   :  { %v6516_v36 = vpop.f32.mrf.mxu1 }
 0x597   :  { %v6517_v38 = vadd.f32 %v6516_v36, %v6504_v37 }
 0x59c   :  { %v6505_v41 = vpop.f32.mrf.mxu0 }
 0x59e   :  { %v6529_v40 = vpop.f32.mrf.mxu2  ;;  %v6518_v42 = vpop.f32.mrf.mxu1 }
 0x59f   :  { %v6530_v9 = vadd.f32 %v6529_v40, %v6517_v38 }
 0x5a0   :  { %v6542_v43 = vpop.f32.mrf.mxu3 }
 0x5a1   :  { %v6543_v44 = vadd.f32 %v6542_v43, %v6530_v9 }
 0x5a3   :  { %v6553_v45 = vpack.c.bf16 %v6543_v44, %v6543_v44 }
 0x5a5   :  { %v6561_v47 = vunpack.c.l.bf16 %v6553_v45 }
 0x5a6   :  { %v6531_v7 = vpop.f32.mrf.mxu2 }
 0x5a7   :  { %15006 = vtanh.f32 %v6561_v47 }
 0x5a8   :  { %v6544_v58 = vpop.f32.mrf.mxu3 }
 0x5ad   :  { %v15007_v14 = vpop.eup %15006 }
 0x5ae   :  { %v15493_v35 = vpack.c.bf16 %v15007_v14, %v15007_v14 }
 0x5af   :  { %15221 = dma.done.wait [#allocation4 + $0x1], 40960 }
 0x5b0   :  { %15222 = vsyncadd [#allocation4 + $0x1], 4294926336  ;;  %v12673_v57 = vld [vmem:[#allocation3 + $0x118] sm:$0xf]  ;;  %v14682_v5 = vld [vmem:[#allocation3 + $0x128] sm:$0xf0] }
 0x5b1   :  { %v12833_v48 = vld [vmem:[#allocation3 + $0x258] sm:$0xf]  ;;  %v12674_v51 = vor.u32 %v14682_v5, %v12673_v57  ;;  %v14722_v52 = vld [vmem:[#allocation3 + $0x268] sm:$0xf0]  ;;  %v12653_v3 = vld [vmem:[#allocation3 + $0xf0] sm:$0xf] }
 0x5b2   :  { %v12993_v55 = vld [vmem:[#allocation3 + $0x398] sm:$0xf]  ;;  %v14762_v56 = vld [vmem:[#allocation3 + $0x3a8] sm:$0xf0]  ;;  %v12834_v59 = vor.u32 %v14722_v52, %v12833_v48  ;;  %v14677_v16 = vld [vmem:[#allocation3 + $0x100] sm:$0xf0] }
 0x5b3   :  { %v12994_v60 = vor.u32 %v14762_v56, %v12993_v55  ;;  %v13153_v61 = vld [vmem:[#allocation3 + $0x4d8] sm:$0xf]  ;;  %v14802_v62 = vld [vmem:[#allocation3 + $0x4e8] sm:$0xf0]  ;;  %8641 = vmatpush.bf16.msra.mxu0 %v12674_v51  ;;  %v12813_v63 = vld [vmem:[#allocation3 + $0x230] sm:$0xf]  ;;  %v12654_v46 = vor.u32 %v14677_v16, %v12653_v3 }
 0x5b4   :  { %v13154_v33 = vor.u32 %v14802_v62, %v13153_v61  ;;  %v14717_v0 = vld [vmem:[#allocation3 + $0x240] sm:$0xf0]  ;;  %8654 = vmatpush.bf16.msra.mxu1 %v12834_v59  ;;  %v12973_v15 = vld [vmem:[#allocation3 + $0x370] sm:$0xf]  ;;  %v12633_v4 = vld [vmem:[#allocation3 + $0xc8] sm:$0xf] }
 0x5b5   :  { %8667 = vmatpush.bf16.msra.mxu2 %v12994_v60  ;;  %v12814_v8 = vor.u32 %v14717_v0, %v12813_v63  ;;  %v14757_v25 = vld [vmem:[#allocation3 + $0x380] sm:$0xf0]  ;;  %v13133_v12 = vld [vmem:[#allocation3 + $0x4b0] sm:$0xf]  ;;  %v14672_v26 = vld [vmem:[#allocation3 + $0xd8] sm:$0xf0] }
 0x5b6   :  { %8680 = vmatpush.bf16.msra.mxu3 %v13154_v33  ;;  %v12974_v1 = vor.u32 %v14757_v25, %v12973_v15  ;;  %v14797_v2 = vld [vmem:[#allocation3 + $0x4c0] sm:$0xf0]  ;;  %v12793_v10 = vld [vmem:[#allocation3 + $0x208] sm:$0xf]  ;;  %v14712_v11 = vld [vmem:[#allocation3 + $0x218] sm:$0xf0]  ;;  %v12634_v17 = vor.u32 %v14672_v26, %v12633_v4 }
 0x5b7   :  { %v13134_v6 = vor.u32 %v14797_v2, %v13133_v12  ;;  %v12953_v39 = vld [vmem:[#allocation3 + $0x348] sm:$0xf]  ;;  %8642 = vmatpush.bf16.msra.mxu0 %v12654_v46  ;;  %v14752_v54 = vld [vmem:[#allocation3 + $0x358] sm:$0xf0]  ;;  %v12794_v50 = vor.u32 %v14712_v11, %v12793_v10  ;;  %v12613_v21 = vld [vmem:[#allocation3 + $0xa0] sm:$0xf] }
 0x5b8   :  { %v13113_v28 = vld [vmem:[#allocation3 + $0x488] sm:$0xf]  ;;  %v14792_v19 = vld [vmem:[#allocation3 + $0x498] sm:$0xf0]  ;;  %8655 = vmatpush.bf16.msra.mxu1 %v12814_v8  ;;  %v12954_v20 = vor.u32 %v14752_v54, %v12953_v39  ;;  %v14667_v22 = vld [vmem:[#allocation3 + $0xb0] sm:$0xf0] }
 0x5b9   :  { %8668 = vmatpush.bf16.msra.mxu2 %v12974_v1  ;;  %v12773_v24 = vld [vmem:[#allocation3 + $0x1e0] sm:$0xf]  ;;  %v13114_v27 = vor.u32 %v14792_v19, %v13113_v28  ;;  %v14707_v29 = vld [vmem:[#allocation3 + $0x1f0] sm:$0xf0]  ;;  %v12614_v38 = vor.u32 %v14667_v22, %v12613_v21  ;;  %v12593_v43 = vld [vmem:[#allocation3 + $0x78] sm:$0xf] }
 0x5ba   :  { %8681 = vmatpush.bf16.msra.mxu3 %v13134_v6  ;;  %v12933_v30 = vld [vmem:[#allocation3 + $0x320] sm:$0xf]  ;;  %v14747_v34 = vld [vmem:[#allocation3 + $0x330] sm:$0xf0]  ;;  %v12774_v40 = vor.u32 %v14707_v29, %v12773_v24  ;;  %v14662_v41 = vld [vmem:[#allocation3 + $0x88] sm:$0xf0] }
 0x5bb   :  { %v13093_v36 = vld [vmem:[#allocation3 + $0x460] sm:$0xf]  ;;  %v14787_v37 = vld [vmem:[#allocation3 + $0x470] sm:$0xf0]  ;;  %8643 = vmatpush.bf16.msra.mxu0 %v12634_v17  ;;  %v12934_v9 = vor.u32 %v14747_v34, %v12933_v30  ;;  %v12753_v42 = vld [vmem:[#allocation3 + $0x1b8] sm:$0xf]  ;;  %v12594_v57 = vor.u32 %v14662_v41, %v12593_v43 }
 0x5bc   :  { %8656 = vmatpush.bf16.msra.mxu1 %v12794_v50  ;;  %v13094_v44 = vor.u32 %v14787_v37, %v13093_v36  ;;  %v14702_v45 = vld [vmem:[#allocation3 + $0x1c8] sm:$0xf0]  ;;  %v12913_v47 = vld [vmem:[#allocation3 + $0x2f8] sm:$0xf]  ;;  %v12573_v51 = vld [vmem:[#allocation3 + $0x50] sm:$0xf] }
 0x5bd   :  { %8669 = vmatpush.bf16.msra.mxu2 %v12954_v20  ;;  %v14742_v7 = vld [vmem:[#allocation3 + $0x308] sm:$0xf0]  ;;  %v13073_v58 = vld [vmem:[#allocation3 + $0x438] sm:$0xf]  ;;  %v12754_v5 = vor.u32 %v14702_v45, %v12753_v42  ;;  %v14657_v52 = vld [vmem:[#allocation3 + $0x60] sm:$0xf0] }
 0x5be   :  { %8682 = vmatpush.bf16.msra.mxu3 %v13114_v27  ;;  %v14782_v14 = vld [vmem:[#allocation3 + $0x448] sm:$0xf0]  ;;  %v12914_v48 = vor.u32 %v14742_v7, %v12913_v47  ;;  %v12733_v55 = vld [vmem:[#allocation3 + $0x190] sm:$0xf]  ;;  %v14697_v59 = vld [vmem:[#allocation3 + $0x1a0] sm:$0xf0]  ;;  %v12574_v33 = vor.u32 %v14657_v52, %v12573_v51 }
 0x5bf   :  { %8644 = vmatpush.bf16.msra.mxu0 %v12614_v38  ;;  %v13074_v56 = vor.u32 %v14782_v14, %v13073_v58  ;;  %v12893_v60 = vld [vmem:[#allocation3 + $0x2d0] sm:$0xf]  ;;  %v14737_v61 = vld [vmem:[#allocation3 + $0x2e0] sm:$0xf0]  ;;  %v12734_v16 = vor.u32 %v14697_v59, %v12733_v55  ;;  %v12553_v0 = vld [vmem:[#allocation3 + $0x28] sm:$0xf] }
 0x5c0   :  { %8657 = vmatpush.bf16.msra.mxu1 %v12774_v40  ;;  %v13053_v62 = vld [vmem:[#allocation3 + $0x410] sm:$0xf]  ;;  %v14777_v3 = vld [vmem:[#allocation3 + $0x420] sm:$0xf0]  ;;  %v12894_v63 = vor.u32 %v14737_v61, %v12893_v60  ;;  %v14652_v46 = vld [vmem:[#allocation3 + $0x38] sm:$0xf0] }
 0x5c1   :  { %8670 = vmatpush.bf16.msra.mxu2 %v12934_v9  ;;  %v12713_v8 = vld [vmem:[#allocation3 + $0x168] sm:$0xf]  ;;  %v13054_v15 = vor.u32 %v14777_v3, %v13053_v62  ;;  %v14692_v25 = vld [vmem:[#allocation3 + $0x178] sm:$0xf0]  ;;  %v12554_v26 = vor.u32 %v14652_v46, %v12553_v0  ;;  %v12533_v6 = vld [vmem:[#allocation3] sm:$0xf] }
 0x5c2   :  { %8683 = vmatpush.bf16.msra.mxu3 %v13094_v44  ;;  %v12873_v12 = vld [vmem:[#allocation3 + $0x2a8] sm:$0xf]  ;;  %v14732_v1 = vld [vmem:[#allocation3 + $0x2b8] sm:$0xf0]  ;;  %v14647_v10 = vld [vmem:[#allocation3 + $0x10] sm:$0xf0]  ;;  %v12714_v11 = vor.u32 %v14692_v25, %v12713_v8 }
 0x5c3   :  { %8645 = vmatpush.bf16.msra.mxu0 %v12594_v57  ;;  %v13033_v2 = vld [vmem:[#allocation3 + $0x3e8] sm:$0xf]  ;;  %v14772_v4 = vld [vmem:[#allocation3 + $0x3f8] sm:$0xf0]  ;;  %v12874_v39 = vor.u32 %v14732_v1, %v12873_v12  ;;  %v12693_v17 = vld [vmem:[#allocation3 + $0x140] sm:$0xf]  ;;  %v12534_v29 = vor.u32 %v14647_v10, %v12533_v6 }
 0x5c4   :  { %8658 = vmatpush.bf16.msra.mxu1 %v12754_v5  ;;  %v14687_v54 = vld [vmem:[#allocation3 + $0x150] sm:$0xf0]  ;;  %v12853_v28 = vld [vmem:[#allocation3 + $0x280] sm:$0xf]  ;;  %v13034_v19 = vor.u32 %v14772_v4, %v13033_v2  ;;  %v13313_v22 = vld [vmem:[#allocation3 + $0x618] sm:$0xf] }
 0x5c5   :  { %8671 = vmatpush.bf16.msra.mxu2 %v12914_v48  ;;  %v14727_v50 = vld [vmem:[#allocation3 + $0x290] sm:$0xf0]  ;;  %v13013_v20 = vld [vmem:[#allocation3 + $0x3c0] sm:$0xf]  ;;  %v14842_v24 = vld [vmem:[#allocation3 + $0x628] sm:$0xf0]  ;;  %v12694_v37 = vor.u32 %v14687_v54, %v12693_v17 }
 0x5c6   :  { %8684 = vmatpush.bf16.msra.mxu3 %v13074_v56  ;;  %v14767_v21 = vld [vmem:[#allocation3 + $0x3d0] sm:$0xf0]  ;;  %v13473_v27 = vld [vmem:[#allocation3 + $0x758] sm:$0xf]  ;;  %v14882_v30 = vld [vmem:[#allocation3 + $0x768] sm:$0xf0]  ;;  %v12854_v38 = vor.u32 %v14727_v50, %v12853_v28  ;;  %v13314_v41 = vor.u32 %v14842_v24, %v13313_v22 }
 0x5c7   :  { %8646 = vmatpush.bf16.msra.mxu0 %v12574_v33  ;;  %v13633_v34 = vld [vmem:[#allocation3 + $0x898] sm:$0xf]  ;;  %v14922_v36 = vld [vmem:[#allocation3 + $0x8a8] sm:$0xf0]  ;;  %v13014_v43 = vor.u32 %v14767_v21, %v13013_v20  ;;  %v13474_v42 = vor.u32 %v14882_v30, %v13473_v27  ;;  %v13293_v45 = vld [vmem:[#allocation3 + $0x5f0] sm:$0xf] }
 0x5c8   :  { %8659 = vmatpush.bf16.msra.mxu1 %v12734_v16  ;;  %v13793_v40 = vld [vmem:[#allocation3 + $0x9d8] sm:$0xf]  ;;  %v14962_v9 = vld [vmem:[#allocation3 + $0x9e8] sm:$0xf0]  ;;  %v13634_v44 = vor.u32 %v14922_v36, %v13633_v34  ;;  %v14837_v47 = vld [vmem:[#allocation3 + $0x600] sm:$0xf0] }
 0x5c9   :  { %8672 = vmatpush.bf16.msra.mxu2 %v12894_v63  ;;  %v13453_v7 = vld [vmem:[#allocation3 + $0x730] sm:$0xf]  ;;  %v13794_v58 = vor.u32 %v14962_v9, %v13793_v40  ;;  %v14877_v14 = vld [vmem:[#allocation3 + $0x740] sm:$0xf0]  ;;  %v13294_v52 = vor.u32 %v14837_v47, %v13293_v45  ;;  %v13273_v59 = vld [vmem:[#allocation3 + $0x5c8] sm:$0xf] }
 0x5ca   :  { %8685 = vmatpush.bf16.msra.mxu3 %v13054_v15  ;;  %v13613_v57 = vld [vmem:[#allocation3 + $0x870] sm:$0xf]  ;;  %v14917_v5 = vld [vmem:[#allocation3 + $0x880] sm:$0xf0]  ;;  %v13454_v55 = vor.u32 %v14877_v14, %v13453_v7  ;;  %v14832_v60 = vld [vmem:[#allocation3 + $0x5d8] sm:$0xf0] }
 0x5cb   :  { %8647 = vmatpush.bf16.msra.mxu0 %v12554_v26  ;;  %v13773_v48 = vld [vmem:[#allocation3 + $0x9b0] sm:$0xf]  ;;  %v14957_v51 = vld [vmem:[#allocation3 + $0x9c0] sm:$0xf0]  ;;  %v13614_v56 = vor.u32 %v14917_v5, %v13613_v57  ;;  %v13433_v61 = vld [vmem:[#allocation3 + $0x708] sm:$0xf]  ;;  %v13274_v46 = vor.u32 %v14832_v60, %v13273_v59 }
 0x5cc   :  { %8660 = vmatpush.bf16.msra.mxu1 %v12714_v11  ;;  %v13774_v62 = vor.u32 %v14957_v51, %v13773_v48  ;;  %v14872_v3 = vld [vmem:[#allocation3 + $0x718] sm:$0xf0]  ;;  %v13593_v33 = vld [vmem:[#allocation3 + $0x848] sm:$0xf]  ;;  %v13253_v25 = vld [vmem:[#allocation3 + $0x5a0] sm:$0xf] }
 0x5cd   :  { %8673 = vmatpush.bf16.msra.mxu2 %v12874_v39  ;;  %v14912_v16 = vld [vmem:[#allocation3 + $0x858] sm:$0xf0]  ;;  %v13753_v63 = vld [vmem:[#allocation3 + $0x988] sm:$0xf]  ;;  %v13434_v8 = vor.u32 %v14872_v3, %v13433_v61  ;;  %v14827_v12 = vld [vmem:[#allocation3 + $0x5b0] sm:$0xf0] }
 0x5ce   :  { %8686 = vmatpush.bf16.msra.mxu3 %v13034_v19  ;;  %v14952_v0 = vld [vmem:[#allocation3 + $0x998] sm:$0xf0]  ;;  %v13594_v15 = vor.u32 %v14912_v16, %v13593_v33  ;;  %v13413_v1 = vld [vmem:[#allocation3 + $0x6e0] sm:$0xf]  ;;  %v14867_v4 = vld [vmem:[#allocation3 + $0x6f0] sm:$0xf0]  ;;  %v13254_v39 = vor.u32 %v14827_v12, %v13253_v25 }
 0x5cf   :  { %8648 = vmatpush.bf16.msra.mxu0 %v12534_v29  ;;  %v13754_v2 = vor.u32 %v14952_v0, %v13753_v63  ;;  %v13573_v26 = vld [vmem:[#allocation3 + $0x820] sm:$0xf]  ;;  %v14907_v6 = vld [vmem:[#allocation3 + $0x830] sm:$0xf0]  ;;  %v13414_v17 = vor.u32 %v14867_v4, %v13413_v1  ;;  %v13233_v28 = vld [vmem:[#allocation3 + $0x578] sm:$0xf] }
 0x5d0   :  { %8661 = vmatpush.bf16.msra.mxu1 %v12694_v37  ;;  %v13733_v10 = vld [vmem:[#allocation3 + $0x960] sm:$0xf]  ;;  %v14947_v11 = vld [vmem:[#allocation3 + $0x970] sm:$0xf0]  ;;  %v13574_v54 = vor.u32 %v14907_v6, %v13573_v26  ;;  %v14822_v19 = vld [vmem:[#allocation3 + $0x588] sm:$0xf0] }
 0x5d1   :  { %8674 = vmatpush.bf16.msra.mxu2 %v12854_v38  ;;  %v13393_v50 = vld [vmem:[#allocation3 + $0x6b8] sm:$0xf]  ;;  %v13734_v20 = vor.u32 %v14947_v11, %v13733_v10  ;;  %v14862_v21 = vld [vmem:[#allocation3 + $0x6c8] sm:$0xf0]  ;;  %v13234_v30 = vor.u32 %v14822_v19, %v13233_v28  ;;  %v13213_v37 = vld [vmem:[#allocation3 + $0x550] sm:$0xf] }
 0x5d2   :  { %8687 = vmatpush.bf16.msra.mxu3 %v13014_v43  ;;  %8649 = vmatmul.bf16.vlgmr.msra.gmra.mxu0 %v15416_v31  ;;  %v13553_v22 = vld [vmem:[#allocation3 + $0x7f8] sm:$0xf]  ;;  %v14902_v24 = vld [vmem:[#allocation3 + $0x808] sm:$0xf0]  ;;  %v13394_v34 = vor.u32 %v14862_v21, %v13393_v50  ;;  %v14817_v38 = vld [vmem:[#allocation3 + $0x560] sm:$0xf0] }
 0x5d3   :  { %8693 = vmatpush.bf16.msrb.mxu0 %v13314_v41  ;;  %8662 = vmatmul.bf16.vlgmr.msra.gmra.mxu1 %v15430_v23  ;;  %v13713_v27 = vld [vmem:[#allocation3 + $0x938] sm:$0xf]  ;;  %v14942_v29 = vld [vmem:[#allocation3 + $0x948] sm:$0xf0]  ;;  %v13554_v36 = vor.u32 %v14902_v24, %v13553_v22  ;;  %v13373_v40 = vld [vmem:[#allocation3 + $0x690] sm:$0xf]  ;;  %v13214_v47 = vor.u32 %v14817_v38, %v13213_v37 }
 0x5d4   :  { %8706 = vmatpush.bf16.msrb.mxu1 %v13474_v42  ;;  %8675 = vmatmul.bf16.vlgmr.msra.gmra.mxu2 %v15446_v18  ;;  %v13714_v9 = vor.u32 %v14942_v29, %v13713_v27  ;;  %v14857_v43 = vld [vmem:[#allocation3 + $0x6a0] sm:$0xf0]  ;;  %v13533_v41 = vld [vmem:[#allocation3 + $0x7d0] sm:$0xf]  ;;  %v13193_v14 = vld [vmem:[#allocation3 + $0x528] sm:$0xf] }
 0x5d5   :  { %8719 = vmatpush.bf16.msrb.mxu2 %v13634_v44  ;;  %8688 = vmatmul.bf16.vlgmr.msra.gmra.mxu3 %v15460_v32  ;;  %v14897_v42 = vld [vmem:[#allocation3 + $0x7e0] sm:$0xf0]  ;;  %v13693_v44 = vld [vmem:[#allocation3 + $0x910] sm:$0xf]  ;;  %v13374_v7 = vor.u32 %v14857_v43, %v13373_v40  ;;  %v14812_v57 = vld [vmem:[#allocation3 + $0x538] sm:$0xf0] }
 0x5d6   :  { %8732 = vmatpush.bf16.msrb.mxu3 %v13794_v58  ;;  %v14937_v45 = vld [vmem:[#allocation3 + $0x920] sm:$0xf0]  ;;  %v13534_v58 = vor.u32 %v14897_v42, %v13533_v41  ;;  %v13353_v5 = vld [vmem:[#allocation3 + $0x668] sm:$0xf]  ;;  %v14852_v51 = vld [vmem:[#allocation3 + $0x678] sm:$0xf0]  ;;  %v13194_v60 = vor.u32 %v14812_v57, %v13193_v14 }
 0x5d7   :  { %8694 = vmatpush.bf16.msrb.mxu0 %v13294_v52  ;;  %v13694_v48 = vor.u32 %v14937_v45, %v13693_v44  ;;  %v13513_v52 = vld [vmem:[#allocation3 + $0x7a8] sm:$0xf]  ;;  %v14932_v59 = vld [vmem:[#allocation3 + $0x8f8] sm:$0xf0]  ;;  %v13173_v61 = vld [vmem:[#allocation3 + $0x500] sm:$0xf]  ;;  %v13354_v3 = vor.u32 %v14852_v51, %v13353_v5 }
 0x5d8   :  { %8707 = vmatpush.bf16.msrb.mxu1 %v13454_v55  ;;  %v14892_v55 = vld [vmem:[#allocation3 + $0x7b8] sm:$0xf0]  ;;  %v13333_v16 = vld [vmem:[#allocation3 + $0x640] sm:$0xf]  ;;  %v14847_v63 = vld [vmem:[#allocation3 + $0x650] sm:$0xf0] }
 0x5d9   :  { %8720 = vmatpush.bf16.msrb.mxu2 %v13614_v56  ;;  %v13673_v56 = vld [vmem:[#allocation3 + $0x8e8] sm:$0xf]  ;;  %v13514_v33 = vor.u32 %v14892_v55, %v13513_v52  ;;  %v13493_v0 = vld [vmem:[#allocation3 + $0x780] sm:$0xf]  ;;  %v14927_v25 = vld [vmem:[#allocation3 + $0x8d0] sm:$0xf0]  ;;  %v13334_v11 = vor.u32 %v14847_v63, %v13333_v16 }
 0x5da   :  { %8733 = vmatpush.bf16.msrb.mxu3 %v13774_v62  ;;  %v14807_v62 = vld [vmem:[#allocation3 + $0x510] sm:$0xf0]  ;;  %v14680_v12 = vld [vmem:[#allocation3 + $0x11c] sm:$0xf]  ;;  %v12675_v1 = vld [vmem:[#allocation3 + $0x12c] sm:$0xf0] }
 0x5db   :  { %8695 = vmatpush.bf16.msrb.mxu0 %v13274_v46  ;;  %v13674_v46 = vor.u32 %v14932_v59, %v13673_v56  ;;  %v13174_v4 = vor.u32 %v14807_v62, %v13173_v61  ;;  %v12835_v26 = vld [vmem:[#allocation3 + $0x26c] sm:$0xf0]  ;;  %v14760_v6 = vld [vmem:[#allocation3 + $0x39c] sm:$0xf]  ;;  %v12678_v19 = vor.u32 %v14680_v12, %v12675_v1  ;;  %v14675_v21 = vld [vmem:[#allocation3 + $0xf4] sm:$0xf] }
 0x5dc   :  { %8708 = vmatpush.bf16.msrb.mxu1 %v13434_v8  ;;  %v14887_v8 = vld [vmem:[#allocation3 + $0x790] sm:$0xf0]  ;;  %v12995_v10 = vld [vmem:[#allocation3 + $0x3ac] sm:$0xf0]  ;;  %v12655_v22 = vld [vmem:[#allocation3 + $0x104] sm:$0xf0] }
 0x5dd   :  { %8721 = vmatpush.bf16.msrb.mxu2 %v13594_v15  ;;  %v13653_v15 = vld [vmem:[#allocation3 + $0x8c0] sm:$0xf]  ;;  %v14715_v24 = vld [vmem:[#allocation3 + $0x234] sm:$0xf]  ;;  %v12815_v29 = vld [vmem:[#allocation3 + $0x244] sm:$0xf0]  ;;  %v12658_v38 = vor.u32 %v14675_v21, %v12655_v22 }
 0x5de   :  { %8734 = vmatpush.bf16.msrb.mxu3 %v13754_v2  ;;  %v14720_v2 = vld [vmem:[#allocation3 + $0x25c] sm:$0xf]  ;;  %v13654_v28 = vor.u32 %v14927_v25, %v13653_v15  ;;  %v13135_v37 = vld [vmem:[#allocation3 + $0x4c4] sm:$0xf0]  ;;  %v12818_v40 = vor.u32 %v14715_v24, %v12815_v29  ;;  %v14670_v43 = vld [vmem:[#allocation3 + $0xcc] sm:$0xf] }
 0x5df   :  { %8696 = vmatpush.bf16.msrb.mxu0 %v13254_v39  ;;  %v13494_v39 = vor.u32 %v14887_v8, %v13493_v0  ;;  %v12838_v50 = vor.u32 %v14720_v2, %v12835_v26  ;;  %v12635_v41 = vld [vmem:[#allocation3 + $0xdc] sm:$0xf0]  ;;  %v14710_v42 = vld [vmem:[#allocation3 + $0x20c] sm:$0xf]  ;;  %v14665_v51 = vld [vmem:[#allocation3 + $0xa4] sm:$0xf] }
 0x5e0   :  { %8709 = vmatpush.bf16.msrb.mxu1 %v13414_v17  ;;  %v14800_v17 = vld [vmem:[#allocation3 + $0x4dc] sm:$0xf]  ;;  %v12795_v45 = vld [vmem:[#allocation3 + $0x21c] sm:$0xf0]  ;;  %v12638_v57 = vor.u32 %v14670_v43, %v12635_v41  ;;  %v12615_v52 = vld [vmem:[#allocation3 + $0xb4] sm:$0xf0] }
 0x5e1   :  { %8722 = vmatpush.bf16.msrb.mxu2 %v13574_v54  ;;  %v13155_v54 = vld [vmem:[#allocation3 + $0x4ec] sm:$0xf0]  ;;  %v13115_v14 = vld [vmem:[#allocation3 + $0x49c] sm:$0xf0]  ;;  %v12798_v5 = vor.u32 %v14710_v42, %v12795_v45  ;;  %v14705_v55 = vld [vmem:[#allocation3 + $0x1e4] sm:$0xf] }
 0x5e2   :  { %8735 = vmatpush.bf16.msrb.mxu3 %v13734_v20  ;;  %v12998_v20 = vor.u32 %v14760_v6, %v12995_v10  ;;  %v13158_v27 = vor.u32 %v14800_v17, %v13155_v54  ;;  %v12775_v59 = vld [vmem:[#allocation3 + $0x1f4] sm:$0xf0]  ;;  %v14785_v62 = vld [vmem:[#allocation3 + $0x464] sm:$0xf]  ;;  %v14660_v0 = vld [vmem:[#allocation3 + $0x7c] sm:$0xf] }
 0x5e3   :  { %8697 = vmatpush.bf16.msrb.mxu0 %v13234_v30  ;;  %v14755_v30 = vld [vmem:[#allocation3 + $0x374] sm:$0xf]  ;;  %v12935_v61 = vld [vmem:[#allocation3 + $0x334] sm:$0xf0]  ;;  %v12778_v16 = vor.u32 %v14705_v55, %v12775_v59  ;;  %v14700_v8 = vld [vmem:[#allocation3 + $0x1bc] sm:$0xf] }
 0x5e4   :  { %8710 = vmatpush.bf16.msrb.mxu1 %v13394_v34  ;;  %v12975_v34 = vld [vmem:[#allocation3 + $0x384] sm:$0xf0]  ;;  %v12755_v25 = vld [vmem:[#allocation3 + $0x1cc] sm:$0xf0]  ;;  %v14740_v12 = vld [vmem:[#allocation3 + $0x2fc] sm:$0xf] }
 0x5e5   :  { %8723 = vmatpush.bf16.msrb.mxu2 %v13554_v36  ;;  %v14795_v36 = vld [vmem:[#allocation3 + $0x4b4] sm:$0xf]  ;;  %v12915_v1 = vld [vmem:[#allocation3 + $0x30c] sm:$0xf0]  ;;  %v14780_v2 = vld [vmem:[#allocation3 + $0x43c] sm:$0xf]  ;;  %v12758_v6 = vor.u32 %v14700_v8, %v12755_v25 }
 0x5e6   :  { %8736 = vmatpush.bf16.msrb.mxu3 %v13714_v9  ;;  %v12978_v9 = vor.u32 %v14755_v30, %v12975_v34  ;;  %v13138_v44 = vor.u32 %v14795_v36, %v13135_v37  ;;  %v12918_v10 = vor.u32 %v14740_v12, %v12915_v1  ;;  %v14695_v17 = vld [vmem:[#allocation3 + $0x194] sm:$0xf]  ;;  %v13055_v21 = vld [vmem:[#allocation3 + $0x424] sm:$0xf0]  ;;  %v14650_v29 = vld [vmem:[#allocation3 + $0x2c] sm:$0xf] }
 0x5e7   :  { %8698 = vmatpush.bf16.msrb.mxu0 %v13214_v47  ;;  %v14750_v47 = vld [vmem:[#allocation3 + $0x34c] sm:$0xf]  ;;  %v12555_v30 = vld [vmem:[#allocation3 + $0x3c] sm:$0xf0]  ;;  %v14645_v42 = vld [vmem:[#allocation3 + $0x4] sm:$0xf] }
 0x5e8   :  { %8711 = vmatpush.bf16.msrb.mxu1 %v13374_v7  ;;  %v12955_v7 = vld [vmem:[#allocation3 + $0x35c] sm:$0xf0]  ;;  %v14690_v34 = vld [vmem:[#allocation3 + $0x16c] sm:$0xf]  ;;  %v12558_v41 = vor.u32 %v14650_v29, %v12555_v30  ;;  %v13315_v55 = vld [vmem:[#allocation3 + $0x62c] sm:$0xf0] }
 0x5e9   :  { %8724 = vmatpush.bf16.msrb.mxu2 %v13534_v58  ;;  %v14790_v58 = vld [vmem:[#allocation3 + $0x48c] sm:$0xf]  ;;  %v12715_v37 = vld [vmem:[#allocation3 + $0x17c] sm:$0xf0]  ;;  %v14835_v25 = vld [vmem:[#allocation3 + $0x5f4] sm:$0xf] }
 0x5ea   :  { %8737 = vmatpush.bf16.msrb.mxu3 %v13694_v48  ;;  %v12958_v48 = vor.u32 %v14750_v47, %v12955_v7  ;;  %v13118_v56 = vor.u32 %v14790_v58, %v13115_v14  ;;  %v13035_v43 = vld [vmem:[#allocation3 + $0x3fc] sm:$0xf0]  ;;  %v12718_v45 = vor.u32 %v14690_v34, %v12715_v37  ;;  %v14685_v7 = vld [vmem:[#allocation3 + $0x144] sm:$0xf]  ;;  %v12695_v58 = vld [vmem:[#allocation3 + $0x154] sm:$0xf0] }
 0x5eb   :  { %8699 = vmatpush.bf16.msrb.mxu0 %v13194_v60  ;;  %v14745_v60 = vld [vmem:[#allocation3 + $0x324] sm:$0xf]  ;;  %v13295_v12 = vld [vmem:[#allocation3 + $0x604] sm:$0xf0]  ;;  %v14875_v1 = vld [vmem:[#allocation3 + $0x734] sm:$0xf] }
 0x5ec   :  { %8712 = vmatpush.bf16.msrb.mxu1 %v13354_v3  ;;  %v13095_v3 = vld [vmem:[#allocation3 + $0x474] sm:$0xf0]  ;;  %v12938_v63 = vor.u32 %v14745_v60, %v12935_v61  ;;  %v14725_v14 = vld [vmem:[#allocation3 + $0x284] sm:$0xf]  ;;  %v13475_v60 = vld [vmem:[#allocation3 + $0x76c] sm:$0xf0] }
 0x5ed   :  { %8725 = vmatpush.bf16.msrb.mxu2 %v13514_v33  ;;  %v12618_v33 = vor.u32 %v14665_v51, %v12615_v52  ;;  %v13098_v15 = vor.u32 %v14785_v62, %v13095_v3  ;;  %v13015_v51 = vld [vmem:[#allocation3 + $0x3d4] sm:$0xf0]  ;;  %v14840_v52 = vld [vmem:[#allocation3 + $0x61c] sm:$0xf]  ;;  %v13635_v62 = vld [vmem:[#allocation3 + $0x8ac] sm:$0xf0]  ;;  %v12698_v3 = vor.u32 %v14685_v7, %v12695_v58 }
 0x5ee   :  { %8738 = vmatpush.bf16.msrb.mxu3 %v13674_v46  ;;  %v12595_v46 = vld [vmem:[#allocation3 + $0x8c] sm:$0xf0]  ;;  %v14920_v61 = vld [vmem:[#allocation3 + $0x89c] sm:$0xf]  ;;  %v13755_v29 = vld [vmem:[#allocation3 + $0x99c] sm:$0xf0] }
 0x5ef   :  { %8700 = vmatpush.bf16.msrb.mxu0 %v13174_v4  ;;  %v13075_v4 = vld [vmem:[#allocation3 + $0x44c] sm:$0xf0]  ;;  %v12598_v26 = vor.u32 %v14660_v0, %v12595_v46  ;;  %v13318_v46 = vor.u32 %v14840_v52, %v13315_v55  ;;  %v14825_v37 = vld [vmem:[#allocation3 + $0x5a4] sm:$0xf]  ;;  %v14900_v52 = vld [vmem:[#allocation3 + $0x7fc] sm:$0xf] }
 0x5f0   :  { %8713 = vmatpush.bf16.msrb.mxu1 %v13334_v11  ;;  %v14655_v11 = vld [vmem:[#allocation3 + $0x54] sm:$0xf]  ;;  %v13078_v54 = vor.u32 %v14780_v2, %v13075_v4  ;;  %v13455_v4 = vld [vmem:[#allocation3 + $0x744] sm:$0xf0]  ;;  %v13555_v55 = vld [vmem:[#allocation3 + $0x80c] sm:$0xf0] }
 0x5f1   :  { %8726 = vmatpush.bf16.msrb.mxu2 %v13494_v39  ;;  %v12575_v39 = vld [vmem:[#allocation3 + $0x64] sm:$0xf0]  ;;  %s15234_s3 = smov [#allocation14]   ;;  %s9178_s12 = sshll.u32 %s15584_s7, 4  ;;  %s9179_s12 = int_to_ptr.hbm [resolvable:$true] %s9178_s12 }
 0x5f2   :  { %8739 = vmatpush.bf16.msrb.mxu3 %v13654_v28  ;;  %8701 = vmatmul.bf16.vlgmr.msrb.gmra.mxu0 %v15476_v53  ;;  %v12735_v28 = vld [vmem:[#allocation3 + $0x1a4] sm:$0xf0]  ;;  %v12578_v22 = vor.u32 %v14655_v11, %v12575_v39  ;;  %v13298_v39 = vor.u32 %v14835_v25, %v13295_v12  ;;  %s9176_s5 = sshll.u32 %s15234_s3, 4  ;;  %s9177_s5 = int_to_ptr.vmem [resolvable:$true] %s9176_s5 }
 0x5f3   :  { %8745 = vmatpush.bf16.msra.mxu0 %v12678_v19  ;;  %8714 = vmatmul.bf16.vlgmr.msrb.gmra.mxu1 %v15487_v13  ;;  %v14735_v19 = vld [vmem:[#allocation3 + $0x2d4] sm:$0xf]  ;;  %v12738_v24 = vor.u32 %v14695_v17, %v12735_v28  ;;  %v13775_v11 = vld [vmem:[#allocation3 + $0x9c4] sm:$0xf0]  ;;  %v13458_v17 = vor.u32 %v14875_v1, %v13455_v4  ;;  %v14830_v28 = vld [vmem:[#allocation3 + $0x5cc] sm:$0xf] }
 0x5f4   :  { %8758 = vmatpush.bf16.msra.mxu1 %v12838_v50  ;;  %8727 = vmatmul.bf16.vlgmr.msrb.gmra.mxu2 %v15490_v49  ;;  %v12895_v50 = vld [vmem:[#allocation3 + $0x2e4] sm:$0xf0]  ;;  %v14810_v4 = vld [vmem:[#allocation3 + $0x52c] sm:$0xf] }
 0x5f5   :  { %8771 = vmatpush.bf16.msra.mxu2 %v12998_v20  ;;  %8740 = vmatmul.bf16.vlgmr.msrb.gmra.mxu3 %v15493_v35  ;;  %v14775_v20 = vld [vmem:[#allocation3 + $0x414] sm:$0xf]  ;;  %v13695_v25 = vld [vmem:[#allocation3 + $0x924] sm:$0xf0] }
 0x5f6   :  { %8784 = vmatpush.bf16.msra.mxu3 %v13158_v27  ;;  %v12898_v27 = vor.u32 %v14735_v19, %v12895_v50  ;;  %v13058_v36 = vor.u32 %v14775_v20, %v13055_v21  ;;  %v13275_v19 = vld [vmem:[#allocation3 + $0x5dc] sm:$0xf0]  ;;  %v14870_v50 = vld [vmem:[#allocation3 + $0x70c] sm:$0xf] }
 0x5f7   :  { %8746 = vmatpush.bf16.msra.mxu0 %v12658_v38  ;;  %v14730_v38 = vld [vmem:[#allocation3 + $0x2ac] sm:$0xf]  ;;  %v13435_v21 = vld [vmem:[#allocation3 + $0x71c] sm:$0xf0]  ;;  %v13278_v30 = vor.u32 %v14830_v28, %v13275_v19 }
 0x5f8   :  { %8759 = vmatpush.bf16.msra.mxu1 %v12818_v40  ;;  %v12875_v40 = vld [vmem:[#allocation3 + $0x2bc] sm:$0xf0]  ;;  %v13438_v34 = vor.u32 %v14870_v50, %v13435_v21  ;;  %v14805_v50 = vld [vmem:[#allocation3 + $0x504] sm:$0xf] }
 0x5f9   :  { %8772 = vmatpush.bf16.msra.mxu2 %v12978_v9  ;;  %v14770_v9 = vld [vmem:[#allocation3 + $0x3ec] sm:$0xf]  ;;  %v12878_v47 = vor.u32 %v14730_v38, %v12875_v40  ;;  %v13255_v38 = vld [vmem:[#allocation3 + $0x5b4] sm:$0xf0]  ;;  %v14865_v40 = vld [vmem:[#allocation3 + $0x6e4] sm:$0xf] }
 0x5fa   :  { %8785 = vmatpush.bf16.msra.mxu3 %v13138_v44  ;;  %v12535_v44 = vld [vmem:[#allocation3 + $0x14] sm:$0xf0]  ;;  %v13675_v28 = vld [vmem:[#allocation3 + $0x8fc] sm:$0xf0] }
 0x5fb   :  { %8747 = vmatpush.bf16.msra.mxu0 %v12638_v57  ;;  %v13038_v57 = vor.u32 %v14770_v9, %v13035_v43  ;;  %v12538_v59 = vor.u32 %v14645_v42, %v12535_v44  ;;  %v13415_v43 = vld [vmem:[#allocation3 + $0x6f4] sm:$0xf0]  ;;  %v14945_v44 = vld [vmem:[#allocation3 + $0x964] sm:$0xf] }
 0x5fc   :  { %8760 = vmatpush.bf16.msra.mxu1 %v12798_v5  ;;  %v12855_v5 = vld [vmem:[#allocation3 + $0x294] sm:$0xf0]  ;;  %v13418_v7 = vor.u32 %v14865_v40, %v13415_v43  ;;  %v14683_v40 = vld [vmem:[#allocation3 + $0x130] sm:$0xf0] }
 0x5fd   :  { %8773 = vmatpush.bf16.msra.mxu2 %v12958_v48  ;;  %v14765_v48 = vld [vmem:[#allocation3 + $0x3c4] sm:$0xf]  ;;  %v13575_v42 = vld [vmem:[#allocation3 + $0x834] sm:$0xf0] }
 0x5fe   :  { %8786 = vmatpush.bf16.msra.mxu3 %v13118_v56  ;;  %v14880_v56 = vld [vmem:[#allocation3 + $0x75c] sm:$0xf]  ;;  %v13018_v0 = vor.u32 %v14765_v48, %v13015_v51  ;;  %v13395_v51 = vld [vmem:[#allocation3 + $0x6cc] sm:$0xf0] }
 0x5ff   :  { %8748 = vmatpush.bf16.msra.mxu0 %v12618_v33  ;;  %v12858_v33 = vor.u32 %v14725_v14, %v12855_v5  ;;  %v13478_v8 = vor.u32 %v14880_v56, %v13475_v60  ;;  %v14820_v14 = vld [vmem:[#allocation3 + $0x57c] sm:$0xf] }
 0x600   :  { %8761 = vmatpush.bf16.msra.mxu1 %v12778_v16  ;;  %v14960_v16 = vld [vmem:[#allocation3 + $0x9dc] sm:$0xf] }
 0x601   :  { %8774 = vmatpush.bf16.msra.mxu2 %v12938_v63  ;;  %v13795_v63 = vld [vmem:[#allocation3 + $0x9ec] sm:$0xf0]  ;;  %v14860_v5 = vld [vmem:[#allocation3 + $0x6bc] sm:$0xf] }
 0x602   :  { %8787 = vmatpush.bf16.msra.mxu3 %v13098_v15  ;;  %v13638_v15 = vor.u32 %v14920_v61, %v13635_v62  ;;  %v13798_v2 = vor.u32 %v14960_v16, %v13795_v63  ;;  %v14940_v56 = vld [vmem:[#allocation3 + $0x93c] sm:$0xf]  ;;  %v13398_v61 = vor.u32 %v14860_v5, %v13395_v51  ;;  %v13558_v62 = vor.u32 %v14900_v52, %v13555_v55  ;;  %v14855_v16 = vld [vmem:[#allocation3 + $0x694] sm:$0xf]  ;;  %v12661_v51 = vld [vmem:[#allocation3 + $0xf8] sm:$0xf] }
 0x603   :  { %8749 = vmatpush.bf16.msra.mxu0 %v12598_v26  ;;  %v14915_v26 = vld [vmem:[#allocation3 + $0x874] sm:$0xf]  ;;  %v14678_v52 = vld [vmem:[#allocation3 + $0x108] sm:$0xf0]  ;;  %v12821_v55 = vld [vmem:[#allocation3 + $0x238] sm:$0xf] }
 0x604   :  { %8762 = vmatpush.bf16.msra.mxu1 %v12758_v6  ;;  %v13615_v6 = vld [vmem:[#allocation3 + $0x884] sm:$0xf0] }
 0x605   :  { %8775 = vmatpush.bf16.msra.mxu2 %v12918_v10  ;;  %v14955_v10 = vld [vmem:[#allocation3 + $0x9b4] sm:$0xf] }
 0x606   :  { %8788 = vmatpush.bf16.msra.mxu3 %v13078_v54  ;;  %v13618_v54 = vor.u32 %v14915_v26, %v13615_v6  ;;  %v13778_v20 = vor.u32 %v14955_v10, %v13775_v11  ;;  %v13195_v26 = vld [vmem:[#allocation3 + $0x53c] sm:$0xf0]  ;;  %v14850_v6 = vld [vmem:[#allocation3 + $0x66c] sm:$0xf] }
 0x607   :  { %8750 = vmatpush.bf16.msra.mxu0 %v12578_v22  ;;  %v14910_v22 = vld [vmem:[#allocation3 + $0x84c] sm:$0xf]  ;;  %v13355_v11 = vld [vmem:[#allocation3 + $0x67c] sm:$0xf0]  ;;  %v13198_v19 = vor.u32 %v14810_v4, %v13195_v26  ;;  %v14793_v4 = vld [vmem:[#allocation3 + $0x4a0] sm:$0xf0] }
 0x608   :  { %8763 = vmatpush.bf16.msra.mxu1 %v12738_v24  ;;  %v13595_v24 = vld [vmem:[#allocation3 + $0x85c] sm:$0xf0]  ;;  %v13358_v21 = vor.u32 %v14850_v6, %v13355_v11  ;;  %v12621_v11 = vld [vmem:[#allocation3 + $0xa8] sm:$0xf] }
 0x609   :  { %8776 = vmatpush.bf16.msra.mxu2 %v12898_v27  ;;  %v14950_v27 = vld [vmem:[#allocation3 + $0x98c] sm:$0xf] }
 0x60a   :  { %8789 = vmatpush.bf16.msra.mxu3 %v13058_v36  ;;  %v13598_v36 = vor.u32 %v14910_v22, %v13595_v24  ;;  %v13758_v9 = vor.u32 %v14950_v27, %v13755_v29  ;;  %v14845_v24 = vld [vmem:[#allocation3 + $0x644] sm:$0xf]  ;;  %v13335_v27 = vld [vmem:[#allocation3 + $0x654] sm:$0xf0] }
 0x60b   :  { %8751 = vmatpush.bf16.msra.mxu0 %v12558_v41  ;;  %v14905_v41 = vld [vmem:[#allocation3 + $0x824] sm:$0xf] }
 0x60c   :  { %8764 = vmatpush.bf16.msra.mxu1 %v12718_v45  ;;  %v13735_v45 = vld [vmem:[#allocation3 + $0x974] sm:$0xf0]  ;;  %v13578_v58 = vor.u32 %v14905_v41, %v13575_v42  ;;  %v14885_v29 = vld [vmem:[#allocation3 + $0x784] sm:$0xf]  ;;  %v14723_v41 = vld [vmem:[#allocation3 + $0x270] sm:$0xf0] }
 0x60d   :  { %8777 = vmatpush.bf16.msra.mxu2 %v12878_v47  ;;  %v13258_v47 = vor.u32 %v14825_v37, %v13255_v38  ;;  %v13738_v48 = vor.u32 %v14945_v44, %v13735_v45  ;;  %v13655_v37 = vld [vmem:[#allocation3 + $0x8d4] sm:$0xf0]  ;;  %v12681_v38 = vld [vmem:[#allocation3 + $0x120] sm:$0xf]  ;;  %v14763_v44 = vld [vmem:[#allocation3 + $0x3b0] sm:$0xf0]  ;;  %v13338_v45 = vor.u32 %v14845_v24, %v13335_v27 }
 0x60e   :  { %8790 = vmatpush.bf16.msra.mxu3 %v13038_v57  ;;  %v13235_v57 = vld [vmem:[#allocation3 + $0x58c] sm:$0xf0]  ;;  %v13001_v42 = vld [vmem:[#allocation3 + $0x3a0] sm:$0xf] }
 0x60f   :  { %8752 = vmatpush.bf16.msra.mxu0 %v12538_v59  ;;  %v13715_v59 = vld [vmem:[#allocation3 + $0x94c] sm:$0xf0]  ;;  %v13238_v60 = vor.u32 %v14820_v14, %v13235_v57  ;;  %v12682_v57 = vor.u32 %v14683_v40, %v12681_v38  ;;  %v12921_v38 = vld [vmem:[#allocation3 + $0x300] sm:$0xf]  ;;  %v14743_v40 = vld [vmem:[#allocation3 + $0x310] sm:$0xf0] }
 0x610   :  { %8765 = vmatpush.bf16.msra.mxu1 %v12698_v3  ;;  %v14815_v3 = vld [vmem:[#allocation3 + $0x554] sm:$0xf]  ;;  %v13718_v63 = vor.u32 %v14940_v56, %v13715_v59  ;;  %v14718_v59 = vld [vmem:[#allocation3 + $0x248] sm:$0xf0] }
 0x611   :  { %8778 = vmatpush.bf16.msra.mxu2 %v12858_v33  ;;  %v13215_v33 = vld [vmem:[#allocation3 + $0x564] sm:$0xf0] }
 0x612   :  { %8791 = vmatpush.bf16.msra.mxu3 %v13018_v0  ;;  %8753 = vmatmul.bf16.vlgmr.msra.gmra.mxu0 %v15416_v31  ;;  %v13375_v0 = vld [vmem:[#allocation3 + $0x6a4] sm:$0xf0]  ;;  %v13218_v12 = vor.u32 %v14815_v3, %v13215_v33  ;;  %v14798_v3 = vld [vmem:[#allocation3 + $0x4c8] sm:$0xf0]  ;;  %v12662_v33 = vor.u32 %v14678_v52, %v12661_v51 }
 0x613   :  { %8797 = vmatpush.bf16.msrb.mxu0 %v13318_v46  ;;  %8766 = vmatmul.bf16.vlgmr.msra.gmra.mxu1 %v15430_v23  ;;  %v14895_v46 = vld [vmem:[#allocation3 + $0x7d4] sm:$0xf]  ;;  %v13378_v1 = vor.u32 %v14855_v16, %v13375_v0  ;;  %v12822_v16 = vor.u32 %v14718_v59, %v12821_v55  ;;  %v12641_v0 = vld [vmem:[#allocation3 + $0xd0] sm:$0xf]  ;;  %v14778_v51 = vld [vmem:[#allocation3 + $0x428] sm:$0xf0] }
 0x614   :  { %8810 = vmatpush.bf16.msrb.mxu1 %v13478_v8  ;;  %8779 = vmatmul.bf16.vlgmr.msra.gmra.mxu2 %v15446_v18  ;;  %v13535_v8 = vld [vmem:[#allocation3 + $0x7e4] sm:$0xf0]  ;;  %v12561_v59 = vld [vmem:[#allocation3 + $0x30] sm:$0xf] }
 0x615   :  { %8823 = vmatpush.bf16.msrb.mxu2 %v13638_v15  ;;  %8792 = vmatmul.bf16.vlgmr.msra.gmra.mxu3 %v15460_v32  ;;  %v14935_v15 = vld [vmem:[#allocation3 + $0x914] sm:$0xf] }
 0x616   :  { %8836 = vmatpush.bf16.msrb.mxu3 %v13798_v2  ;;  %v13538_v2 = vor.u32 %v14895_v46, %v13535_v8  ;;  %v13698_v10 = vor.u32 %v14935_v15, %v13695_v25  ;;  %v14673_v46 = vld [vmem:[#allocation3 + $0xe0] sm:$0xf0]  ;;  %v12801_v8 = vld [vmem:[#allocation3 + $0x210] sm:$0xf] }
 0x617   :  { %8798 = vmatpush.bf16.msrb.mxu0 %v13298_v39  ;;  %v14890_v39 = vld [vmem:[#allocation3 + $0x7ac] sm:$0xf]  ;;  %v14713_v25 = vld [vmem:[#allocation3 + $0x220] sm:$0xf0]  ;;  %v12642_v26 = vor.u32 %v14673_v46, %v12641_v0 }
 0x618   :  { %8811 = vmatpush.bf16.msrb.mxu1 %v13458_v17  ;;  %v13515_v17 = vld [vmem:[#allocation3 + $0x7bc] sm:$0xf0]  ;;  %v12802_v6 = vor.u32 %v14713_v25, %v12801_v8  ;;  %v14773_v0 = vld [vmem:[#allocation3 + $0x400] sm:$0xf0]  ;;  %v12541_v8 = vld [vmem:[#allocation3 + $0x8] sm:$0xf] }
 0x619   :  { %8824 = vmatpush.bf16.msrb.mxu2 %v13618_v54  ;;  %v14930_v54 = vld [vmem:[#allocation3 + $0x8ec] sm:$0xf]  ;;  %v13518_v22 = vor.u32 %v14890_v39, %v13515_v17  ;;  %v14668_v39 = vld [vmem:[#allocation3 + $0xb8] sm:$0xf0]  ;;  %v12781_v17 = vld [vmem:[#allocation3 + $0x1e8] sm:$0xf] }
 0x61a   :  { %8837 = vmatpush.bf16.msrb.mxu3 %v13778_v20  ;;  %v13175_v20 = vld [vmem:[#allocation3 + $0x514] sm:$0xf0] }
 0x61b   :  { %8799 = vmatpush.bf16.msrb.mxu0 %v13278_v30  ;;  %v13678_v30 = vor.u32 %v14930_v54, %v13675_v28  ;;  %v13178_v43 = vor.u32 %v14805_v50, %v13175_v20  ;;  %v14708_v28 = vld [vmem:[#allocation3 + $0x1f8] sm:$0xf0]  ;;  %v13101_v20 = vld [vmem:[#allocation3 + $0x468] sm:$0xf] }
 0x61c   :  { %8812 = vmatpush.bf16.msrb.mxu1 %v13438_v34  ;;  %v13495_v34 = vld [vmem:[#allocation3 + $0x794] sm:$0xf0]  ;;  %v14748_v50 = vld [vmem:[#allocation3 + $0x338] sm:$0xf0]  ;;  %v12782_v24 = vor.u32 %v14708_v28, %v12781_v17  ;;  %v14843_v17 = vld [vmem:[#allocation3 + $0x630] sm:$0xf0] }
 0x61d   :  { %8825 = vmatpush.bf16.msrb.mxu2 %v13598_v36  ;;  %v14925_v36 = vld [vmem:[#allocation3 + $0x8c4] sm:$0xf] }
 0x61e   :  { %8838 = vmatpush.bf16.msrb.mxu3 %v13758_v9  ;;  %v12841_v9 = vld [vmem:[#allocation3 + $0x260] sm:$0xf]  ;;  %v13658_v14 = vor.u32 %v14925_v36, %v13655_v37  ;;  %v14703_v37 = vld [vmem:[#allocation3 + $0x1d0] sm:$0xf0] }
 0x61f   :  { %8800 = vmatpush.bf16.msrb.mxu0 %v13258_v47  ;;  %v13498_v47 = vor.u32 %v14885_v29, %v13495_v34  ;;  %v12842_v5 = vor.u32 %v14723_v41, %v12841_v9  ;;  %v12601_v29 = vld [vmem:[#allocation3 + $0x80] sm:$0xf] }
 0x620   :  { %8813 = vmatpush.bf16.msrb.mxu1 %v13418_v7  ;;  %v13161_v7 = vld [vmem:[#allocation3 + $0x4e0] sm:$0xf] }
 0x621   :  { %8826 = vmatpush.bf16.msrb.mxu2 %v13578_v58  ;;  %v14803_v58 = vld [vmem:[#allocation3 + $0x4f0] sm:$0xf0]  ;;  %v12761_v34 = vld [vmem:[#allocation3 + $0x1c0] sm:$0xf] }
 0x622   :  { %8839 = vmatpush.bf16.msrb.mxu3 %v13738_v48  ;;  %v13002_v48 = vor.u32 %v14763_v44, %v13001_v42  ;;  %v13162_v56 = vor.u32 %v14803_v58, %v13161_v7  ;;  %v13081_v9 = vld [vmem:[#allocation3 + $0x440] sm:$0xf]  ;;  %v12762_v42 = vor.u32 %v14703_v37, %v12761_v34  ;;  %v12922_v44 = vor.u32 %v14743_v40, %v12921_v38  ;;  %v12741_v7 = vld [vmem:[#allocation3 + $0x198] sm:$0xf]  ;;  %v14838_v38 = vld [vmem:[#allocation3 + $0x608] sm:$0xf0] }
 0x623   :  { %8801 = vmatpush.bf16.msrb.mxu0 %v13238_v60  ;;  %v12981_v60 = vld [vmem:[#allocation3 + $0x378] sm:$0xf] }
 0x624   :  { %8814 = vmatpush.bf16.msrb.mxu1 %v13398_v61  ;;  %v14758_v61 = vld [vmem:[#allocation3 + $0x388] sm:$0xf0]  ;;  %v13301_v37 = vld [vmem:[#allocation3 + $0x5f8] sm:$0xf] }
 0x625   :  { %8827 = vmatpush.bf16.msrb.mxu2 %v13558_v62  ;;  %v13141_v62 = vld [vmem:[#allocation3 + $0x4b8] sm:$0xf] }
 0x626   :  { %8840 = vmatpush.bf16.msrb.mxu3 %v13718_v63  ;;  %v12982_v63 = vor.u32 %v14758_v61, %v12981_v60  ;;  %v13142_v15 = vor.u32 %v14798_v3, %v13141_v62  ;;  %v14653_v60 = vld [vmem:[#allocation3 + $0x40] sm:$0xf0]  ;;  %v12721_v61 = vld [vmem:[#allocation3 + $0x170] sm:$0xf]  ;;  %v13461_v40 = vld [vmem:[#allocation3 + $0x738] sm:$0xf] }
 0x627   :  { %8802 = vmatpush.bf16.msrb.mxu0 %v13218_v12  ;;  %v12961_v12 = vld [vmem:[#allocation3 + $0x350] sm:$0xf]  ;;  %v14693_v3 = vld [vmem:[#allocation3 + $0x180] sm:$0xf0]  ;;  %v12562_v46 = vor.u32 %v14653_v60, %v12561_v59 }
 0x628   :  { %8815 = vmatpush.bf16.msrb.mxu1 %v13378_v1  ;;  %v14753_v1 = vld [vmem:[#allocation3 + $0x360] sm:$0xf0]  ;;  %v12722_v25 = vor.u32 %v14693_v3, %v12721_v61  ;;  %v13261_v3 = vld [vmem:[#allocation3 + $0x5a8] sm:$0xf] }
 0x629   :  { %8828 = vmatpush.bf16.msrb.mxu2 %v13538_v2  ;;  %v13121_v2 = vld [vmem:[#allocation3 + $0x490] sm:$0xf]  ;;  %v14953_v59 = vld [vmem:[#allocation3 + $0x9a0] sm:$0xf0] }
 0x62a   :  { %8841 = vmatpush.bf16.msrb.mxu3 %v13698_v10  ;;  %v12962_v10 = vor.u32 %v14753_v1, %v12961_v12  ;;  %v13122_v54 = vor.u32 %v14793_v4, %v13121_v2  ;;  %v12701_v1 = vld [vmem:[#allocation3 + $0x148] sm:$0xf]  ;;  %v14688_v2 = vld [vmem:[#allocation3 + $0x158] sm:$0xf0] }
 0x62b   :  { %8803 = vmatpush.bf16.msrb.mxu0 %v13198_v19  ;;  %v12941_v19 = vld [vmem:[#allocation3 + $0x328] sm:$0xf] }
 0x62c   :  { %8816 = vmatpush.bf16.msrb.mxu1 %v13358_v21  ;;  %v14788_v21 = vld [vmem:[#allocation3 + $0x478] sm:$0xf0]  ;;  %v12942_v27 = vor.u32 %v14748_v50, %v12941_v19  ;;  %v12861_v4 = vld [vmem:[#allocation3 + $0x288] sm:$0xf]  ;;  %v14883_v19 = vld [vmem:[#allocation3 + $0x770] sm:$0xf0] }
 0x62d   :  { %8829 = vmatpush.bf16.msrb.mxu2 %v13518_v22  ;;  %v12622_v22 = vor.u32 %v14668_v39, %v12621_v11  ;;  %v13102_v36 = vor.u32 %v14788_v21, %v13101_v20  ;;  %v14768_v11 = vld [vmem:[#allocation3 + $0x3d8] sm:$0xf0]  ;;  %v13321_v39 = vld [vmem:[#allocation3 + $0x620] sm:$0xf]  ;;  %v14923_v20 = vld [vmem:[#allocation3 + $0x8b0] sm:$0xf0]  ;;  %v12702_v21 = vor.u32 %v14688_v2, %v12701_v1 }
 0x62e   :  { %8842 = vmatpush.bf16.msrb.mxu3 %v13678_v30  ;;  %v14663_v30 = vld [vmem:[#allocation3 + $0x90] sm:$0xf0]  ;;  %v13641_v50 = vld [vmem:[#allocation3 + $0x8a0] sm:$0xf] }
 0x62f   :  { %8804 = vmatpush.bf16.msrb.mxu0 %v13178_v43  ;;  %v14783_v43 = vld [vmem:[#allocation3 + $0x450] sm:$0xf0]  ;;  %v12602_v41 = vor.u32 %v14663_v30, %v12601_v29  ;;  %v13322_v30 = vor.u32 %v14843_v17, %v13321_v39 }
 0x630   :  { %8817 = vmatpush.bf16.msrb.mxu1 %v13338_v45  ;;  %v12581_v45 = vld [vmem:[#allocation3 + $0x58] sm:$0xf]  ;;  %v13082_v58 = vor.u32 %v14783_v43, %v13081_v9  ;;  %v14878_v43 = vld [vmem:[#allocation3 + $0x748] sm:$0xf0]  ;;  %v14863_v17 = vld [vmem:[#allocation3 + $0x6d0] sm:$0xf0] }
 0x631   :  { %8830 = vmatpush.bf16.msrb.mxu2 %v13498_v47  ;;  %v14658_v47 = vld [vmem:[#allocation3 + $0x68] sm:$0xf0] }
 0x632   :  { %8843 = vmatpush.bf16.msrb.mxu3 %v13658_v14  ;;  %8805 = vmatmul.bf16.vlgmr.msrb.gmra.mxu0 %v15476_v53  ;;  %v14698_v14 = vld [vmem:[#allocation3 + $0x1a8] sm:$0xf0]  ;;  %v12582_v52 = vor.u32 %v14658_v47, %v12581_v45  ;;  %v13302_v47 = vor.u32 %v14838_v38, %v13301_v37  ;;  %v13541_v37 = vld [vmem:[#allocation3 + $0x7d8] sm:$0xf] }
 0x633   :  { %8849 = vmatpush.bf16.msra.mxu0 %v12682_v57  ;;  %8818 = vmatmul.bf16.vlgmr.msrb.gmra.mxu1 %v15487_v13  ;;  %v12901_v57 = vld [vmem:[#allocation3 + $0x2d8] sm:$0xf]  ;;  %v12742_v55 = vor.u32 %v14698_v14, %v12741_v7  ;;  %v14958_v45 = vld [vmem:[#allocation3 + $0x9c8] sm:$0xf0]  ;;  %v13462_v7 = vor.u32 %v14878_v43, %v13461_v40  ;;  %v13281_v14 = vld [vmem:[#allocation3 + $0x5d0] sm:$0xf] }
 0x634   :  { %8862 = vmatpush.bf16.msra.mxu1 %v12842_v5  ;;  %8831 = vmatmul.bf16.vlgmr.msrb.gmra.mxu2 %v15490_v49  ;;  %v14738_v5 = vld [vmem:[#allocation3 + $0x2e8] sm:$0xf0] }
 0x635   :  { %8875 = vmatpush.bf16.msra.mxu2 %v13002_v48  ;;  %8844 = vmatmul.bf16.vlgmr.msrb.gmra.mxu3 %v15493_v35  ;;  %v13061_v48 = vld [vmem:[#allocation3 + $0x418] sm:$0xf]  ;;  %v14898_v38 = vld [vmem:[#allocation3 + $0x7e8] sm:$0xf0] }
 0x636   :  { %8888 = vmatpush.bf16.msra.mxu3 %v13162_v56  ;;  %v12902_v56 = vor.u32 %v14738_v5, %v12901_v57  ;;  %v13062_v62 = vor.u32 %v14778_v51, %v13061_v48  ;;  %v14833_v57 = vld [vmem:[#allocation3 + $0x5e0] sm:$0xf0]  ;;  %v13441_v5 = vld [vmem:[#allocation3 + $0x710] sm:$0xf]  ;;  %v14938_v43 = vld [vmem:[#allocation3 + $0x928] sm:$0xf0] }
 0x637   :  { %8850 = vmatpush.bf16.msra.mxu0 %v12662_v33  ;;  %v12881_v33 = vld [vmem:[#allocation3 + $0x2b0] sm:$0xf]  ;;  %v14873_v51 = vld [vmem:[#allocation3 + $0x720] sm:$0xf0]  ;;  %v13282_v60 = vor.u32 %v14833_v57, %v13281_v14 }
 0x638   :  { %8863 = vmatpush.bf16.msra.mxu1 %v12822_v16  ;;  %v14733_v16 = vld [vmem:[#allocation3 + $0x2c0] sm:$0xf0]  ;;  %v13442_v61 = vor.u32 %v14873_v51, %v13441_v5  ;;  %v13361_v14 = vld [vmem:[#allocation3 + $0x670] sm:$0xf] }
 0x639   :  { %8876 = vmatpush.bf16.msra.mxu2 %v12982_v63  ;;  %v13041_v63 = vld [vmem:[#allocation3 + $0x3f0] sm:$0xf]  ;;  %v12882_v12 = vor.u32 %v14733_v16, %v12881_v33  ;;  %v14828_v33 = vld [vmem:[#allocation3 + $0x5b8] sm:$0xf0]  ;;  %v13421_v16 = vld [vmem:[#allocation3 + $0x6e8] sm:$0xf] }
 0x63a   :  { %8889 = vmatpush.bf16.msra.mxu3 %v13142_v15  ;;  %v14648_v15 = vld [vmem:[#allocation3 + $0x18] sm:$0xf0]  ;;  %v13521_v51 = vld [vmem:[#allocation3 + $0x7b0] sm:$0xf] }
 0x63b   :  { %8851 = vmatpush.bf16.msra.mxu0 %v12642_v26  ;;  %v13042_v26 = vor.u32 %v14773_v0, %v13041_v63  ;;  %v12542_v28 = vor.u32 %v14648_v15, %v12541_v8  ;;  %v14868_v0 = vld [vmem:[#allocation3 + $0x6f8] sm:$0xf0]  ;;  %v13741_v15 = vld [vmem:[#allocation3 + $0x968] sm:$0xf] }
 0x63c   :  { %8864 = vmatpush.bf16.msra.mxu1 %v12802_v6  ;;  %v14728_v6 = vld [vmem:[#allocation3 + $0x298] sm:$0xf0]  ;;  %v13422_v2 = vor.u32 %v14868_v0, %v13421_v16  ;;  %v13341_v16 = vld [vmem:[#allocation3 + $0x648] sm:$0xf] }
 0x63d   :  { %8877 = vmatpush.bf16.msra.mxu2 %v12962_v10  ;;  %v13021_v10 = vld [vmem:[#allocation3 + $0x3c8] sm:$0xf]  ;;  %v14908_v8 = vld [vmem:[#allocation3 + $0x838] sm:$0xf0] }
 0x63e   :  { %8890 = vmatpush.bf16.msra.mxu3 %v13122_v54  ;;  %v13481_v54 = vld [vmem:[#allocation3 + $0x760] sm:$0xf]  ;;  %v13022_v29 = vor.u32 %v14768_v11, %v13021_v10  ;;  %v13501_v0 = vld [vmem:[#allocation3 + $0x788] sm:$0xf] }
 0x63f   :  { %8852 = vmatpush.bf16.msra.mxu0 %v12622_v22  ;;  %v12862_v22 = vor.u32 %v14728_v6, %v12861_v4  ;;  %v13482_v34 = vor.u32 %v14883_v19, %v13481_v54  ;;  %v14823_v6 = vld [vmem:[#allocation3 + $0x590] sm:$0xf0]  ;;  %v13401_v10 = vld [vmem:[#allocation3 + $0x6c0] sm:$0xf] }
 0x640   :  { %8865 = vmatpush.bf16.msra.mxu1 %v12782_v24  ;;  %v13801_v24 = vld [vmem:[#allocation3 + $0x9e0] sm:$0xf] }
 0x641   :  { %8878 = vmatpush.bf16.msra.mxu2 %v12942_v27  ;;  %v14963_v27 = vld [vmem:[#allocation3 + $0x9f0] sm:$0xf0]  ;;  %v13561_v54 = vld [vmem:[#allocation3 + $0x800] sm:$0xf] }
 0x642   :  { %8891 = vmatpush.bf16.msra.mxu3 %v13102_v36  ;;  %v13642_v36 = vor.u32 %v14923_v20, %v13641_v50  ;;  %v13802_v9 = vor.u32 %v14963_v27, %v13801_v24  ;;  %v13721_v19 = vld [vmem:[#allocation3 + $0x940] sm:$0xf]  ;;  %v14943_v50 = vld [vmem:[#allocation3 + $0x950] sm:$0xf0]  ;;  %v13221_v24 = vld [vmem:[#allocation3 + $0x558] sm:$0xf] }
 0x643   :  { %8853 = vmatpush.bf16.msra.mxu0 %v12602_v41  ;;  %v13621_v41 = vld [vmem:[#allocation3 + $0x878] sm:$0xf]  ;;  %v14818_v27 = vld [vmem:[#allocation3 + $0x568] sm:$0xf0] }
 0x644   :  { %8866 = vmatpush.bf16.msra.mxu1 %v12762_v42  ;;  %v14918_v42 = vld [vmem:[#allocation3 + $0x888] sm:$0xf0] }
 0x645   :  { %8879 = vmatpush.bf16.msra.mxu2 %v12922_v44  ;;  %v13781_v44 = vld [vmem:[#allocation3 + $0x9b8] sm:$0xf] }
 0x646   :  { %8892 = vmatpush.bf16.msra.mxu3 %v13082_v58  ;;  %v13622_v58 = vor.u32 %v14918_v42, %v13621_v41  ;;  %v13782_v48 = vor.u32 %v14958_v45, %v13781_v44  ;;  %v13222_v41 = vor.u32 %v14818_v27, %v13221_v24  ;;  %v15523_v42 = vld [vmem:[#allocation13] sm:$0x1f] }
 0x647   :  { %8854 = vmatpush.bf16.msra.mxu0 %v12582_v52  ;;  %v13601_v52 = vld [vmem:[#allocation3 + $0x850] sm:$0xf] }
 0x648   :  { %8867 = vmatpush.bf16.msra.mxu1 %v12742_v55  ;;  %v14913_v55 = vld [vmem:[#allocation3 + $0x860] sm:$0xf0] }
 0x649   :  { %8880 = vmatpush.bf16.msra.mxu2 %v12902_v56  ;;  %v13761_v56 = vld [vmem:[#allocation3 + $0x990] sm:$0xf] }
 0x64a   :  { %8893 = vmatpush.bf16.msra.mxu3 %v13062_v62  ;;  %v13602_v62 = vor.u32 %v14913_v55, %v13601_v52  ;;  %v13762_v63 = vor.u32 %v14953_v59, %v13761_v56  ;;  %v14893_v52 = vld [vmem:[#allocation3 + $0x7c0] sm:$0xf0]  ;;  %v13681_v55 = vld [vmem:[#allocation3 + $0x8f0] sm:$0xf]  ;;  %v6967_v59 = vperm.slane %v15523_v42, 0 }
 0x64b   :  { %8855 = vmatpush.bf16.msra.mxu0 %v12562_v46  ;;  %v13581_v46 = vld [vmem:[#allocation3 + $0x828] sm:$0xf]  ;;  %v14933_v56 = vld [vmem:[#allocation3 + $0x900] sm:$0xf0] }
 0x64c   :  { %8868 = vmatpush.bf16.msra.mxu1 %v12722_v25  ;;  %v14948_v25 = vld [vmem:[#allocation3 + $0x978] sm:$0xf0]  ;;  %v13582_v4 = vor.u32 %v14908_v8, %v13581_v46  ;;  %v13682_v8 = vor.u32 %v14933_v56, %v13681_v55  ;;  %v12963_v55 = vld [vmem:[#allocation3 + $0x364] sm:$0xf0]  ;;  %v14791_v56 = vld [vmem:[#allocation3 + $0x494] sm:$0xf] }
 0x64d   :  { %8881 = vmatpush.bf16.msra.mxu2 %v12882_v12  ;;  %v13262_v12 = vor.u32 %v14828_v33, %v13261_v3  ;;  %v13742_v39 = vor.u32 %v14948_v25, %v13741_v15  ;;  %v13522_v33 = vor.u32 %v14893_v52, %v13521_v51  ;;  %v14888_v15 = vld [vmem:[#allocation3 + $0x798] sm:$0xf0]  ;;  %v13661_v25 = vld [vmem:[#allocation3 + $0x8c8] sm:$0xf]  ;;  %v14751_v52 = vld [vmem:[#allocation3 + $0x354] sm:$0xf] }
 0x64e   :  { %8894 = vmatpush.bf16.msra.mxu3 %v13042_v26  ;;  %v13241_v26 = vld [vmem:[#allocation3 + $0x580] sm:$0xf]  ;;  %v12803_v51 = vld [vmem:[#allocation3 + $0x224] sm:$0xf0] }
 0x64f   :  { %8856 = vmatpush.bf16.msra.mxu0 %v12542_v28  ;;  %v15515_v1 = vpop.f32.mrf.mxu0  ;;  %v14903_v28 = vld [vmem:[#allocation3 + $0x810] sm:$0xf0]  ;;  %v13242_v20 = vor.u32 %v14823_v6, %v13241_v26  ;;  %v12683_v26 = vld [vmem:[#allocation3 + $0x134] sm:$0xf0]  ;;  %v14721_v6 = vld [vmem:[#allocation3 + $0x264] sm:$0xf] }
 0x650   :  { %8869 = vmatpush.bf16.msra.mxu1 %v12702_v21  ;;  %v15517_v11 = vpop.f32.mrf.mxu1  ;;  %v13402_v21 = vor.u32 %v14863_v17, %v13401_v10  ;;  %v8651_v10 = vadd.f32 %v15515_v1, %v6967_v59  ;;  %v12843_v17 = vld [vmem:[#allocation3 + $0x274] sm:$0xf0]  ;;  %v13123_v59 = vld [vmem:[#allocation3 + $0x4a4] sm:$0xf0] }
 0x651   :  { %8882 = vmatpush.bf16.msra.mxu2 %v12862_v22  ;;  %v13562_v22 = vor.u32 %v14903_v28, %v13561_v54  ;;  %v14761_v54 = vld [vmem:[#allocation3 + $0x3a4] sm:$0xf]  ;;  %v13003_v28 = vld [vmem:[#allocation3 + $0x3b4] sm:$0xf0]  ;;  %v12846_v27 = vor.u32 %v14721_v6, %v12843_v17 }
 0x652   :  { %8895 = vmatpush.bf16.msra.mxu3 %v13022_v29  ;;  %8857 = vmatmul.bf16.vlgmr.msra.gmra.mxu0 %v15416_v31  ;;  %v13381_v29 = vld [vmem:[#allocation3 + $0x698] sm:$0xf]  ;;  %v8664_v1 = vadd.f32 %v15517_v11, %v8651_v10  ;;  %v12643_v11 = vld [vmem:[#allocation3 + $0xe4] sm:$0xf0]  ;;  %v14661_v6 = vld [vmem:[#allocation3 + $0x84] sm:$0xf] }
 0x653   :  { %8901 = vmatpush.bf16.msrb.mxu0 %v13322_v30  ;;  %8870 = vmatmul.bf16.vlgmr.msra.gmra.mxu1 %v15430_v23  ;;  %v12603_v10 = vld [vmem:[#allocation3 + $0x94] sm:$0xf0] }
 0x654   :  { %8914 = vmatpush.bf16.msrb.mxu1 %v13482_v34  ;;  %8883 = vmatmul.bf16.vlgmr.msra.gmra.mxu2 %v15446_v18  ;;  %v13722_v34 = vor.u32 %v14943_v50, %v13721_v19  ;;  %v13502_v50 = vor.u32 %v14888_v15, %v13501_v0  ;;  %v12783_v0 = vld [vmem:[#allocation3 + $0x1fc] sm:$0xf0]  ;;  %v14786_v15 = vld [vmem:[#allocation3 + $0x46c] sm:$0xf] }
 0x655   :  { %8927 = vmatpush.bf16.msrb.mxu2 %v13642_v36  ;;  %8896 = vmatmul.bf16.vlgmr.msra.gmra.mxu3 %v15460_v32  ;;  %v14858_v36 = vld [vmem:[#allocation3 + $0x6a8] sm:$0xf0] }
 0x656   :  { %8940 = vmatpush.bf16.msrb.mxu3 %v13802_v9  ;;  %v13701_v9 = vld [vmem:[#allocation3 + $0x918] sm:$0xf]  ;;  %v13382_v45 = vor.u32 %v14858_v36, %v13381_v29  ;;  %v13006_v29 = vor.u32 %v14761_v54, %v13003_v28  ;;  %v12663_v36 = vld [vmem:[#allocation3 + $0x10c] sm:$0xf0] }
 0x657   :  { %8902 = vmatpush.bf16.msrb.mxu0 %v13302_v47  ;;  %v15519_v30 = vpop.f32.mrf.mxu2  ;;  %v8652_v44 = vpop.f32.mrf.mxu0  ;;  %v13542_v47 = vor.u32 %v14898_v38, %v13541_v37  ;;  %v13702_v5 = vor.u32 %v14938_v43, %v13701_v9  ;;  %v14716_v37 = vld [vmem:[#allocation3 + $0x23c] sm:$0xf]  ;;  %v12823_v9 = vld [vmem:[#allocation3 + $0x24c] sm:$0xf0]  ;;  %v12763_v28 = vld [vmem:[#allocation3 + $0x1d4] sm:$0xf0] }
 0x658   :  { %8915 = vmatpush.bf16.msrb.mxu1 %v13462_v7  ;;  %v15521_v40 = vpop.f32.mrf.mxu3  ;;  %v13201_v7 = vld [vmem:[#allocation3 + $0x530] sm:$0xf]  ;;  %v8665_v57 = vpop.f32.mrf.mxu1  ;;  %v14756_v43 = vld [vmem:[#allocation3 + $0x37c] sm:$0xf] }
 0x659   :  { %8928 = vmatpush.bf16.msrb.mxu2 %v13622_v58  ;;  %v14813_v58 = vld [vmem:[#allocation3 + $0x540] sm:$0xf0]  ;;  %v14796_v44 = vld [vmem:[#allocation3 + $0x4bc] sm:$0xf]  ;;  %v14671_v57 = vld [vmem:[#allocation3 + $0xd4] sm:$0xf] }
 0x65a   :  { %8941 = vmatpush.bf16.msrb.mxu3 %v13782_v48  ;;  %v14853_v48 = vld [vmem:[#allocation3 + $0x680] sm:$0xf0] }
 0x65b   :  { %8903 = vmatpush.bf16.msrb.mxu0 %v13282_v60  ;;  %v13202_v60 = vor.u32 %v14813_v58, %v13201_v7  ;;  %v13362_v3 = vor.u32 %v14853_v48, %v13361_v14  ;;  %v12826_v7 = vor.u32 %v14716_v37, %v12823_v9  ;;  %v8677_v14 = vadd.f32 %v15519_v30, %v8664_v1  ;;  %v14696_v37 = vld [vmem:[#allocation3 + $0x19c] sm:$0xf]  ;;  %v12743_v9 = vld [vmem:[#allocation3 + $0x1ac] sm:$0xf0] }
 0x65c   :  { %8916 = vmatpush.bf16.msrb.mxu1 %v13442_v61  ;;  %v13181_v61 = vld [vmem:[#allocation3 + $0x508] sm:$0xf] }
 0x65d   :  { %8929 = vmatpush.bf16.msrb.mxu2 %v13602_v62  ;;  %v14808_v62 = vld [vmem:[#allocation3 + $0x518] sm:$0xf0] }
 0x65e   :  { %8942 = vmatpush.bf16.msrb.mxu3 %v13762_v63  ;;  %v14848_v63 = vld [vmem:[#allocation3 + $0x658] sm:$0xf0] }
 0x65f   :  { %8904 = vmatpush.bf16.msrb.mxu0 %v13262_v12  ;;  %v8678_v46 = vpop.f32.mrf.mxu2  ;;  %v14928_v12 = vld [vmem:[#allocation3 + $0x8d8] sm:$0xf0]  ;;  %v13342_v19 = vor.u32 %v14848_v63, %v13341_v16  ;;  %v14706_v16 = vld [vmem:[#allocation3 + $0x1ec] sm:$0xf]  ;;  %v13126_v63 = vor.u32 %v14791_v56, %v13123_v59  ;;  %v12723_v59 = vld [vmem:[#allocation3 + $0x184] sm:$0xf0] }
 0x660   :  { %8917 = vmatpush.bf16.msrb.mxu1 %v13422_v2  ;;  %v8691_v2 = vpop.f32.mrf.mxu3  ;;  %v14746_v46 = vld [vmem:[#allocation3 + $0x32c] sm:$0xf] }
 0x661   :  { %8930 = vmatpush.bf16.msrb.mxu2 %v13582_v4  ;;  %v14681_v4 = vld [vmem:[#allocation3 + $0x124] sm:$0xf] }
 0x662   :  { %8943 = vmatpush.bf16.msrb.mxu3 %v13742_v39  ;;  %v13182_v39 = vor.u32 %v14808_v62, %v13181_v61  ;;  %v12686_v24 = vor.u32 %v14681_v4, %v12683_v26  ;;  %v12966_v61 = vor.u32 %v14751_v52, %v12963_v55  ;;  %v8690_v62 = vadd.f32 %v15521_v40, %v8677_v14  ;;  %v14701_v40 = vld [vmem:[#allocation3 + $0x1c4] sm:$0xf]  ;;  %v14691_v52 = vld [vmem:[#allocation3 + $0x174] sm:$0xf] }
 0x663   :  { %8905 = vmatpush.bf16.msrb.mxu0 %v13242_v20  ;;  %v14801_v20 = vld [vmem:[#allocation3 + $0x4e4] sm:$0xf]  ;;  %v12786_v4 = vor.u32 %v14706_v16, %v12783_v0  ;;  %v12543_v16 = vld [vmem:[#allocation3 + $0x1c] sm:$0xf0] }
 0x664   :  { %8918 = vmatpush.bf16.msrb.mxu1 %v13402_v21  ;;  %v13163_v21 = vld [vmem:[#allocation3 + $0x4f4] sm:$0xf0] }
 0x665   :  { %8931 = vmatpush.bf16.msrb.mxu2 %v13562_v22  ;;  %v13662_v22 = vor.u32 %v14928_v12, %v13661_v25  ;;  %v13166_v38 = vor.u32 %v14801_v20, %v13163_v21  ;;  %v13103_v25 = vld [vmem:[#allocation3 + $0x47c] sm:$0xf0]  ;;  %v14781_v20 = vld [vmem:[#allocation3 + $0x444] sm:$0xf]  ;;  %v13083_v21 = vld [vmem:[#allocation3 + $0x454] sm:$0xf0] }
 0x666   :  { %8944 = vmatpush.bf16.msrb.mxu3 %v13722_v34  ;;  %v14676_v34 = vld [vmem:[#allocation3 + $0xfc] sm:$0xf]  ;;  %v13106_v54 = vor.u32 %v14786_v15, %v13103_v25  ;;  %v14726_v15 = vld [vmem:[#allocation3 + $0x28c] sm:$0xf] }
 0x667   :  { %8906 = vmatpush.bf16.msrb.mxu0 %v13222_v41  ;;  %v12983_v41 = vld [vmem:[#allocation3 + $0x38c] sm:$0xf0] }
 0x668   :  { %8919 = vmatpush.bf16.msrb.mxu1 %v13382_v45  ;;  %v13143_v45 = vld [vmem:[#allocation3 + $0x4cc] sm:$0xf0]  ;;  %v12986_v58 = vor.u32 %v14756_v43, %v12983_v41  ;;  %v14736_v43 = vld [vmem:[#allocation3 + $0x2dc] sm:$0xf] }
 0x669   :  { %8932 = vmatpush.bf16.msrb.mxu2 %v13542_v47  ;;  %v12666_v47 = vor.u32 %v14676_v34, %v12663_v36  ;;  %v13146_v48 = vor.u32 %v14796_v44, %v13143_v45  ;;  %v14656_v34 = vld [vmem:[#allocation3 + $0x5c] sm:$0xf]  ;;  %v12583_v36 = vld [vmem:[#allocation3 + $0x6c] sm:$0xf0] }
 0x66a   :  { %8945 = vmatpush.bf16.msrb.mxu3 %v13702_v5  ;;  %v14711_v5 = vld [vmem:[#allocation3 + $0x214] sm:$0xf]  ;;  %v12903_v41 = vld [vmem:[#allocation3 + $0x2ec] sm:$0xf0] }
 0x66b   :  { %8907 = vmatpush.bf16.msrb.mxu0 %v13202_v60  ;;  %v12646_v60 = vor.u32 %v14671_v57, %v12643_v11  ;;  %v12806_v30 = vor.u32 %v14711_v5, %v12803_v51  ;;  %v12746_v11 = vor.u32 %v14696_v37, %v12743_v9  ;;  %v12906_v5 = vor.u32 %v14736_v43, %v12903_v41  ;;  %v12563_v51 = vld [vmem:[#allocation3 + $0x44] sm:$0xf0]  ;;  %v14836_v37 = vld [vmem:[#allocation3 + $0x5fc] sm:$0xf]  ;;  %v13463_v43 = vld [vmem:[#allocation3 + $0x74c] sm:$0xf0] }
 0x66c   :  { %8920 = vmatpush.bf16.msrb.mxu1 %v13362_v3  ;;  %v14666_v3 = vld [vmem:[#allocation3 + $0xac] sm:$0xf]  ;;  %v14916_v41 = vld [vmem:[#allocation3 + $0x87c] sm:$0xf] }
 0x66d   :  { %8933 = vmatpush.bf16.msrb.mxu2 %v13522_v33  ;;  %v12623_v33 = vld [vmem:[#allocation3 + $0xbc] sm:$0xf0] }
 0x66e   :  { %8946 = vmatpush.bf16.msrb.mxu3 %v13682_v8  ;;  %v12943_v8 = vld [vmem:[#allocation3 + $0x33c] sm:$0xf0]  ;;  %v12626_v12 = vor.u32 %v14666_v3, %v12623_v33  ;;  %v14646_v33 = vld [vmem:[#allocation3 + $0xc] sm:$0xf] }
 0x66f   :  { %8908 = vmatpush.bf16.msrb.mxu0 %v13182_v39  ;;  %v8702_v2 = vpop.f32.mrf.mxu0  ;;  %v12946_v26 = vor.u32 %v14746_v46, %v12943_v8  ;;  %v14686_v46 = vld [vmem:[#allocation3 + $0x14c] sm:$0xf]  ;;  %v12703_v8 = vld [vmem:[#allocation3 + $0x15c] sm:$0xf0] }
 0x670   :  { %8921 = vmatpush.bf16.msrb.mxu1 %v13342_v19  ;;  %v8703_v39 = vadd.f32 %v8702_v2, %v8690_v62  ;;  %v8715_v17 = vpop.f32.mrf.mxu1  ;;  %v14741_v19 = vld [vmem:[#allocation3 + $0x304] sm:$0xf]  ;;  %v13043_v62 = vld [vmem:[#allocation3 + $0x404] sm:$0xf0]  ;;  %v12863_v2 = vld [vmem:[#allocation3 + $0x29c] sm:$0xf0] }
 0x671   :  { %8934 = vmatpush.bf16.msrb.mxu2 %v13502_v50  ;;  %v12923_v50 = vld [vmem:[#allocation3 + $0x314] sm:$0xf0] }
 0x672   :  { %8947 = vmatpush.bf16.msrb.mxu3 %v13662_v22  ;;  %8909 = vmatmul.bf16.vlgmr.msrb.gmra.mxu0 %v15476_v53  ;;  %v8716_v22 = vadd.f32 %v8715_v17, %v8703_v39  ;;  %v14881_v39 = vld [vmem:[#allocation3 + $0x764] sm:$0xf] }
 0x673   :  { %8953 = vmatpush.bf16.msra.mxu0 %v12686_v24  ;;  %8922 = vmatmul.bf16.vlgmr.msrb.gmra.mxu1 %v15487_v13  ;;  %v12606_v24 = vor.u32 %v14661_v6, %v12603_v10  ;;  %v14841_v10 = vld [vmem:[#allocation3 + $0x624] sm:$0xf] }
 0x674   :  { %8966 = vmatpush.bf16.msra.mxu1 %v12846_v27  ;;  %8935 = vmatmul.bf16.vlgmr.msrb.gmra.mxu2 %v15490_v49  ;;  %v12766_v27 = vor.u32 %v14701_v40, %v12763_v28  ;;  %v13323_v40 = vld [vmem:[#allocation3 + $0x634] sm:$0xf0] }
 0x675   :  { %8979 = vmatpush.bf16.msra.mxu2 %v13006_v29  ;;  %8948 = vmatmul.bf16.vlgmr.msrb.gmra.mxu3 %v15493_v35  ;;  %v12926_v29 = vor.u32 %v14741_v19, %v12923_v50  ;;  %v13483_v28 = vld [vmem:[#allocation3 + $0x774] sm:$0xf0]  ;;  %v14921_v19 = vld [vmem:[#allocation3 + $0x8a4] sm:$0xf] }
 0x676   :  { %8992 = vmatpush.bf16.msra.mxu3 %v13166_v38  ;;  %v13086_v38 = vor.u32 %v14781_v20, %v13083_v21  ;;  %v13643_v50 = vld [vmem:[#allocation3 + $0x8b4] sm:$0xf0]  ;;  %v12706_v20 = vor.u32 %v14686_v46, %v12703_v8  ;;  %v12866_v21 = vor.u32 %v14726_v15, %v12863_v2  ;;  %v13583_v46 = vld [vmem:[#allocation3 + $0x83c] sm:$0xf0]  ;;  %v14946_v8 = vld [vmem:[#allocation3 + $0x96c] sm:$0xf] }
 0x677   :  { %8954 = vmatpush.bf16.msra.mxu0 %v12666_v47  ;;  %v8728_v1 = vpop.f32.mrf.mxu2  ;;  %v14776_v47 = vld [vmem:[#allocation3 + $0x41c] sm:$0xf]  ;;  %v8704_v57 = vpop.f32.mrf.mxu0  ;;  %v13743_v15 = vld [vmem:[#allocation3 + $0x97c] sm:$0xf0] }
 0x678   :  { %8967 = vmatpush.bf16.msra.mxu1 %v12826_v7  ;;  %v8729_v44 = vadd.f32 %v8728_v1, %v8716_v22  ;;  %v8741_v45 = vpop.f32.mrf.mxu3  ;;  %v13063_v7 = vld [vmem:[#allocation3 + $0x42c] sm:$0xf0]  ;;  %v8717_v55 = vpop.f32.mrf.mxu1  ;;  %v14961_v22 = vld [vmem:[#allocation3 + $0x9e4] sm:$0xf]  ;;  %v14831_v57 = vld [vmem:[#allocation3 + $0x5d4] sm:$0xf] }
 0x679   :  { %8980 = vmatpush.bf16.msra.mxu2 %v12986_v58  ;;  %v12586_v58 = vor.u32 %v14656_v34, %v12583_v36  ;;  %v13066_v56 = vor.u32 %v14776_v47, %v13063_v7  ;;  %v13486_v34 = vor.u32 %v14881_v39, %v13483_v28  ;;  %v13646_v36 = vor.u32 %v14921_v19, %v13643_v50  ;;  %v13303_v1 = vld [vmem:[#allocation3 + $0x60c] sm:$0xf0]  ;;  %v13603_v55 = vld [vmem:[#allocation3 + $0x864] sm:$0xf0]  ;;  %v13563_v28 = vld [vmem:[#allocation3 + $0x814] sm:$0xf0] }
 0x67a   :  { %8993 = vmatpush.bf16.msra.mxu3 %v13146_v48  ;;  %v8742_v14 = vadd.f32 %v8741_v45, %v8729_v44  ;;  %v14651_v48 = vld [vmem:[#allocation3 + $0x34] sm:$0xf]  ;;  %v13623_v44 = vld [vmem:[#allocation3 + $0x88c] sm:$0xf0]  ;;  %v14956_v45 = vld [vmem:[#allocation3 + $0x9bc] sm:$0xf]  ;;  %v13306_v7 = vor.u32 %v14836_v37, %v13303_v1  ;;  %v13746_v39 = vor.u32 %v14946_v8, %v13743_v15 }
 0x67b   :  { %8955 = vmatpush.bf16.msra.mxu0 %v12646_v60  ;;  %v14731_v60 = vld [vmem:[#allocation3 + $0x2b4] sm:$0xf]  ;;  %v12566_v3 = vor.u32 %v14651_v48, %v12563_v51  ;;  %v13783_v47 = vld [vmem:[#allocation3 + $0x9cc] sm:$0xf0]  ;;  %v13443_v51 = vld [vmem:[#allocation3 + $0x724] sm:$0xf0] }
 0x67c   :  { %8968 = vmatpush.bf16.msra.mxu1 %v12806_v30  ;;  %v12883_v30 = vld [vmem:[#allocation3 + $0x2c4] sm:$0xf0]  ;;  %15010 = vtanh.f32 %v8742_v14  ;;  %v13626_v14 = vor.u32 %v14916_v41, %v13623_v44  ;;  %v13786_v48 = vor.u32 %v14956_v45, %v13783_v47  ;;  %v14941_v19 = vld [vmem:[#allocation3 + $0x944] sm:$0xf]  ;;  %v13723_v50 = vld [vmem:[#allocation3 + $0x954] sm:$0xf0] }
 0x67d   :  { %8981 = vmatpush.bf16.msra.mxu2 %v12966_v61  ;;  %v14771_v61 = vld [vmem:[#allocation3 + $0x3f4] sm:$0xf]  ;;  %v12886_v0 = vor.u32 %v14731_v60, %v12883_v30  ;;  %v13383_v37 = vld [vmem:[#allocation3 + $0x6ac] sm:$0xf0]  ;;  %v14896_v1 = vld [vmem:[#allocation3 + $0x7dc] sm:$0xf] }
 0x67e   :  { %8994 = vmatpush.bf16.msra.mxu3 %v13126_v63  ;;  %v12726_v63 = vor.u32 %v14691_v52, %v12723_v59  ;;  %v14911_v52 = vld [vmem:[#allocation3 + $0x854] sm:$0xf]  ;;  %v13763_v59 = vld [vmem:[#allocation3 + $0x9a4] sm:$0xf0]  ;;  %v13703_v41 = vld [vmem:[#allocation3 + $0x92c] sm:$0xf0] }
 0x67f   :  { %8956 = vmatpush.bf16.msra.mxu0 %v12626_v12  ;;  %v8730_v25 = vpop.f32.mrf.mxu2  ;;  %v13046_v12 = vor.u32 %v14771_v61, %v13043_v62  ;;  %v13606_v61 = vor.u32 %v14911_v52, %v13603_v55  ;;  %v14826_v62 = vld [vmem:[#allocation3 + $0x5ac] sm:$0xf]  ;;  %v13523_v52 = vld [vmem:[#allocation3 + $0x7c4] sm:$0xf0]  ;;  %v14931_v55 = vld [vmem:[#allocation3 + $0x8f4] sm:$0xf] }
 0x680   :  { %8969 = vmatpush.bf16.msra.mxu1 %v12786_v4  ;;  %v14766_v4 = vld [vmem:[#allocation3 + $0x3cc] sm:$0xf]  ;;  %v8743_v6 = vpop.f32.mrf.mxu3  ;;  %v13503_v8 = vld [vmem:[#allocation3 + $0x79c] sm:$0xf0] }
 0x681   :  { %8982 = vmatpush.bf16.msra.mxu2 %v12946_v26  ;;  %v13023_v26 = vld [vmem:[#allocation3 + $0x3dc] sm:$0xf0]  ;;  %v13243_v6 = vld [vmem:[#allocation3 + $0x594] sm:$0xf0]  ;;  %v14926_v15 = vld [vmem:[#allocation3 + $0x8cc] sm:$0xf] }
 0x682   :  { %8995 = vmatpush.bf16.msra.mxu3 %v13106_v54  ;;  %v15011_v17 = vpop.eup %15010  ;;  %v12546_v54 = vor.u32 %v14646_v33, %v12543_v16  ;;  %v14866_v33 = vld [vmem:[#allocation3 + $0x6ec] sm:$0xf] }
 0x683   :  { %8957 = vmatpush.bf16.msra.mxu0 %v12606_v24  ;;  %9166 = vst [vmem:[#allocation14] sm:$0xff] %v15011_v17  ;;  %v13803_v24 = vld [vmem:[#allocation3 + $0x9f4] sm:$0xf0] }
 0x684   :  { %8970 = vmatpush.bf16.msra.mxu1 %v12766_v27  ;;  %v13026_v27 = vor.u32 %v14766_v4, %v13023_v26  ;;  %v13806_v9 = vor.u32 %v14961_v22, %v13803_v24  ;;  %v14821_v26 = vld [vmem:[#allocation3 + $0x584] sm:$0xf]  ;;  %v13403_v17 = vld [vmem:[#allocation3 + $0x6d4] sm:$0xf0]  ;;  %v14816_v24 = vld [vmem:[#allocation3 + $0x55c] sm:$0xf] }
 0x685   :  { %8983 = vmatpush.bf16.msra.mxu2 %v12926_v29  ;;  %v13326_v29 = vor.u32 %v14841_v10, %v13323_v40  ;;  %v14861_v10 = vld [vmem:[#allocation3 + $0x6c4] sm:$0xf] }
 0x686   :  { %8996 = vmatpush.bf16.msra.mxu3 %v13086_v38  ;;  %v14876_v38 = vld [vmem:[#allocation3 + $0x73c] sm:$0xf] }
 0x687   :  { %8958 = vmatpush.bf16.msra.mxu0 %v12586_v58  ;;  %v13466_v58 = vor.u32 %v14876_v38, %v13463_v43  ;;  %v13543_v38 = vld [vmem:[#allocation3 + $0x7ec] sm:$0xf0]  ;;  %v14936_v43 = vld [vmem:[#allocation3 + $0x91c] sm:$0xf] }
 0x688   :  { %8971 = vmatpush.bf16.msra.mxu1 %v12746_v11  ;;  %v13283_v11 = vld [vmem:[#allocation3 + $0x5e4] sm:$0xf0] }
 0x689   :  { %8984 = vmatpush.bf16.msra.mxu2 %v12906_v5  ;;  %v14871_v5 = vld [vmem:[#allocation3 + $0x714] sm:$0xf]  ;;  %v13286_v60 = vor.u32 %v14831_v57, %v13283_v11 }
 0x68a   :  { %8997 = vmatpush.bf16.msra.mxu3 %v13066_v56  ;;  %v14951_v56 = vld [vmem:[#allocation3 + $0x994] sm:$0xf]  ;;  %v13446_v30 = vor.u32 %v14871_v5, %v13443_v51  ;;  %v13706_v5 = vor.u32 %v14936_v43, %v13703_v41  ;;  %v12989_v43 = vld [vmem:[#allocation3 + $0x380] sm:$0xf] }
 0x68b   :  { %8959 = vmatpush.bf16.msra.mxu0 %v12566_v3  ;;  %v13263_v3 = vld [vmem:[#allocation3 + $0x5bc] sm:$0xf0]  ;;  %v13766_v16 = vor.u32 %v14951_v56, %v13763_v59  ;;  %v14851_v57 = vld [vmem:[#allocation3 + $0x674] sm:$0xf]  ;;  %v13683_v56 = vld [vmem:[#allocation3 + $0x904] sm:$0xf0] }
 0x68c   :  { %8972 = vmatpush.bf16.msra.mxu1 %v12726_v63  ;;  %v13423_v63 = vld [vmem:[#allocation3 + $0x6fc] sm:$0xf0]  ;;  %v13266_v25 = vor.u32 %v14826_v62, %v13263_v3  ;;  %v14891_v51 = vld [vmem:[#allocation3 + $0x7b4] sm:$0xf]  ;;  %v6968_v59 = vperm.slane %v15523_v42, 1 }
 0x68d   :  { %8985 = vmatpush.bf16.msra.mxu2 %v12886_v0  ;;  %v14906_v0 = vld [vmem:[#allocation3 + $0x82c] sm:$0xf]  ;;  %v13426_v2 = vor.u32 %v14866_v33, %v13423_v63  ;;  %v13526_v3 = vor.u32 %v14891_v51, %v13523_v52  ;;  %v14684_v42 = vld [vmem:[#allocation3 + $0x138] sm:$0xf0]  ;;  %v14759_v41 = vld [vmem:[#allocation3 + $0x390] sm:$0xf0] }
 0x68e   :  { %8998 = vmatpush.bf16.msra.mxu3 %v13046_v12  ;;  %v13586_v4 = vor.u32 %v14906_v0, %v13583_v46  ;;  %v14846_v33 = vld [vmem:[#allocation3 + $0x64c] sm:$0xf]  ;;  %v13686_v46 = vor.u32 %v14931_v55, %v13683_v56  ;;  %v12969_v51 = vld [vmem:[#allocation3 + $0x358] sm:$0xf] }
 0x68f   :  { %8960 = vmatpush.bf16.msra.mxu0 %v12546_v54  ;;  %v15538_v12 = vpop.f32.mrf.mxu0  ;;  %v14901_v54 = vld [vmem:[#allocation3 + $0x804] sm:$0xf]  ;;  %v14886_v63 = vld [vmem:[#allocation3 + $0x78c] sm:$0xf]  ;;  %v13129_v55 = vld [vmem:[#allocation3 + $0x498] sm:$0xf] }
 0x690   :  { %8973 = vmatpush.bf16.msra.mxu1 %v12706_v20  ;;  %v15540_v40 = vpop.f32.mrf.mxu1  ;;  %v13246_v20 = vor.u32 %v14821_v26, %v13243_v6  ;;  %v13566_v22 = vor.u32 %v14901_v54, %v13563_v28  ;;  %v12849_v26 = vld [vmem:[#allocation3 + $0x268] sm:$0xf]  ;;  %v8755_v6 = vadd.f32 %v15538_v12, %v6968_v59  ;;  %v14764_v54 = vld [vmem:[#allocation3 + $0x3b8] sm:$0xf0]  ;;  %v14754_v52 = vld [vmem:[#allocation3 + $0x368] sm:$0xf0] }
 0x691   :  { %8986 = vmatpush.bf16.msra.mxu2 %v12866_v21  ;;  %v13406_v21 = vor.u32 %v14861_v10, %v13403_v17  ;;  %v13009_v17 = vld [vmem:[#allocation3 + $0x3a8] sm:$0xf]  ;;  %v14794_v56 = vld [vmem:[#allocation3 + $0x4a8] sm:$0xf0] }
 0x692   :  { %8999 = vmatpush.bf16.msra.mxu3 %v13026_v27  ;;  %8961 = vmatmul.bf16.vlgmr.msra.gmra.mxu0 %v15416_v31  ;;  %v13223_v27 = vld [vmem:[#allocation3 + $0x56c] sm:$0xf0]  ;;  %v8768_v12 = vadd.f32 %v15540_v40, %v8755_v6  ;;  %v14674_v40 = vld [vmem:[#allocation3 + $0xe8] sm:$0xf0] }
 0x693   :  { %9005 = vmatpush.bf16.msrb.mxu0 %v13326_v29  ;;  %8974 = vmatmul.bf16.vlgmr.msra.gmra.mxu1 %v15430_v23  ;;  %v14856_v29 = vld [vmem:[#allocation3 + $0x69c] sm:$0xf]  ;;  %v13226_v44 = vor.u32 %v14816_v24, %v13223_v27  ;;  %v13010_v27 = vor.u32 %v14764_v54, %v13009_v17  ;;  %v12929_v54 = vld [vmem:[#allocation3 + $0x308] sm:$0xf] }
 0x694   :  { %9018 = vmatpush.bf16.msrb.mxu1 %v13486_v34  ;;  %8987 = vmatmul.bf16.vlgmr.msra.gmra.mxu2 %v15446_v18  ;;  %v13386_v47 = vor.u32 %v14856_v29, %v13383_v37  ;;  %v12669_v29 = vld [vmem:[#allocation3 + $0x100] sm:$0xf]  ;;  %v14704_v17 = vld [vmem:[#allocation3 + $0x1d8] sm:$0xf0] }
 0x695   :  { %9031 = vmatpush.bf16.msrb.mxu2 %v13646_v36  ;;  %9000 = vmatmul.bf16.vlgmr.msra.gmra.mxu3 %v15460_v32  ;;  %v13726_v36 = vor.u32 %v14941_v19, %v13723_v50  ;;  %v13506_v19 = vor.u32 %v14886_v63, %v13503_v8  ;;  %v13169_v50 = vld [vmem:[#allocation3 + $0x4e8] sm:$0xf]  ;;  %v12829_v37 = vld [vmem:[#allocation3 + $0x240] sm:$0xf]  ;;  %v12949_v63 = vld [vmem:[#allocation3 + $0x330] sm:$0xf] }
 0x696   :  { %9044 = vmatpush.bf16.msrb.mxu3 %v13806_v9  ;;  %v14789_v8 = vld [vmem:[#allocation3 + $0x480] sm:$0xf0] }
 0x697   :  { %9006 = vmatpush.bf16.msrb.mxu0 %v13306_v7  ;;  %v15542_v34 = vpop.f32.mrf.mxu2  ;;  %v8756_v45 = vpop.f32.mrf.mxu0  ;;  %v13546_v7 = vor.u32 %v14896_v1, %v13543_v38  ;;  %v14719_v38 = vld [vmem:[#allocation3 + $0x250] sm:$0xf0] }
 0x698   :  { %9019 = vmatpush.bf16.msrb.mxu1 %v13466_v58  ;;  %v15544_v9 = vpop.f32.mrf.mxu3  ;;  %v14811_v58 = vld [vmem:[#allocation3 + $0x534] sm:$0xf]  ;;  %v8769_v11 = vpop.f32.mrf.mxu1 }
 0x699   :  { %9032 = vmatpush.bf16.msrb.mxu2 %v13626_v14  ;;  %v13203_v14 = vld [vmem:[#allocation3 + $0x544] sm:$0xf0]  ;;  %v14799_v45 = vld [vmem:[#allocation3 + $0x4d0] sm:$0xf0]  ;;  %v12809_v11 = vld [vmem:[#allocation3 + $0x218] sm:$0xf] }
 0x69a   :  { %9045 = vmatpush.bf16.msrb.mxu3 %v13786_v48  ;;  %v13363_v48 = vld [vmem:[#allocation3 + $0x684] sm:$0xf0] }
 0x69b   :  { %9007 = vmatpush.bf16.msrb.mxu0 %v13286_v60  ;;  %v13206_v60 = vor.u32 %v14811_v58, %v13203_v14  ;;  %v13366_v62 = vor.u32 %v14851_v57, %v13363_v48  ;;  %v12990_v58 = vor.u32 %v14759_v41, %v12989_v43  ;;  %v8781_v14 = vadd.f32 %v15542_v34, %v8768_v12  ;;  %v12649_v57 = vld [vmem:[#allocation3 + $0xd8] sm:$0xf]  ;;  %v14714_v48 = vld [vmem:[#allocation3 + $0x228] sm:$0xf0]  ;;  %v14739_v43 = vld [vmem:[#allocation3 + $0x2f0] sm:$0xf0] }
 0x69c   :  { %9020 = vmatpush.bf16.msrb.mxu1 %v13446_v30  ;;  %v14806_v30 = vld [vmem:[#allocation3 + $0x50c] sm:$0xf]  ;;  %v12650_v59 = vor.u32 %v14674_v40, %v12649_v57  ;;  %v12810_v34 = vor.u32 %v14714_v48, %v12809_v11  ;;  %v12569_v11 = vld [vmem:[#allocation3 + $0x38] sm:$0xf] }
 0x69d   :  { %9033 = vmatpush.bf16.msrb.mxu2 %v13606_v61  ;;  %v13183_v61 = vld [vmem:[#allocation3 + $0x51c] sm:$0xf0]  ;;  %v12729_v48 = vld [vmem:[#allocation3 + $0x178] sm:$0xf] }
 0x69e   :  { %9046 = vmatpush.bf16.msrb.mxu3 %v13766_v16  ;;  %v13343_v16 = vld [vmem:[#allocation3 + $0x65c] sm:$0xf0]  ;;  %v13186_v10 = vor.u32 %v14806_v30, %v13183_v61  ;;  %v8794_v30 = vadd.f32 %v15544_v9, %v8781_v14  ;;  %v12629_v61 = vld [vmem:[#allocation3 + $0xb0] sm:$0xf]  ;;  %v12769_v9 = vld [vmem:[#allocation3 + $0x1c8] sm:$0xf] }
 0x69f   :  { %9008 = vmatpush.bf16.msrb.mxu0 %v13266_v25  ;;  %v8782_v0 = vpop.f32.mrf.mxu2  ;;  %v13663_v25 = vld [vmem:[#allocation3 + $0x8dc] sm:$0xf0]  ;;  %v13346_v28 = vor.u32 %v14846_v33, %v13343_v16  ;;  %v13130_v33 = vor.u32 %v14794_v56, %v13129_v55  ;;  %v14709_v16 = vld [vmem:[#allocation3 + $0x200] sm:$0xf0]  ;;  %v14694_v55 = vld [vmem:[#allocation3 + $0x188] sm:$0xf0] }
 0x6a0   :  { %9021 = vmatpush.bf16.msrb.mxu1 %v13426_v2  ;;  %v8795_v2 = vpop.f32.mrf.mxu3  ;;  %v14749_v0 = vld [vmem:[#allocation3 + $0x340] sm:$0xf0]  ;;  %v12889_v56 = vld [vmem:[#allocation3 + $0x2b8] sm:$0xf] }
 0x6a1   :  { %9034 = vmatpush.bf16.msrb.mxu2 %v13586_v4  ;;  %v12689_v4 = vld [vmem:[#allocation3 + $0x128] sm:$0xf] }
 0x6a2   :  { %9047 = vmatpush.bf16.msrb.mxu3 %v13746_v39  ;;  %v14724_v39 = vld [vmem:[#allocation3 + $0x278] sm:$0xf0] }
 0x6a3   :  { %9009 = vmatpush.bf16.msrb.mxu0 %v13246_v20  ;;  %v14804_v20 = vld [vmem:[#allocation3 + $0x4f8] sm:$0xf0]  ;;  %v12850_v24 = vor.u32 %v14724_v39, %v12849_v26 }
 0x6a4   :  { %9022 = vmatpush.bf16.msrb.mxu1 %v13406_v21  ;;  %v13666_v21 = vor.u32 %v14926_v15, %v13663_v25  ;;  %v13170_v1 = vor.u32 %v14804_v20, %v13169_v50  ;;  %v14664_v26 = vld [vmem:[#allocation3 + $0x98] sm:$0xf0] }
 0x6a5   :  { %9035 = vmatpush.bf16.msrb.mxu2 %v13566_v22  ;;  %v12690_v22 = vor.u32 %v14684_v42, %v12689_v4  ;;  %v12950_v4 = vor.u32 %v14749_v0, %v12949_v63  ;;  %v12609_v42 = vld [vmem:[#allocation3 + $0x88] sm:$0xf]  ;;  %v14784_v50 = vld [vmem:[#allocation3 + $0x458] sm:$0xf0]  ;;  %v14689_v63 = vld [vmem:[#allocation3 + $0x160] sm:$0xf0] }
 0x6a6   :  { %9048 = vmatpush.bf16.msrb.mxu3 %v13726_v36  ;;  %v14679_v36 = vld [vmem:[#allocation3 + $0x110] sm:$0xf0]  ;;  %v12869_v0 = vld [vmem:[#allocation3 + $0x290] sm:$0xf] }
 0x6a7   :  { %9010 = vmatpush.bf16.msrb.mxu0 %v13226_v44  ;;  %v13149_v44 = vld [vmem:[#allocation3 + $0x4c0] sm:$0xf] }
 0x6a8   :  { %9023 = vmatpush.bf16.msrb.mxu1 %v13386_v47  ;;  %v12670_v47 = vor.u32 %v14679_v36, %v12669_v29  ;;  %v14659_v29 = vld [vmem:[#allocation3 + $0x70] sm:$0xf0]  ;;  %v12749_v36 = vld [vmem:[#allocation3 + $0x1a0] sm:$0xf] }
 0x6a9   :  { %9036 = vmatpush.bf16.msrb.mxu2 %v13546_v7  ;;  %v12830_v7 = vor.u32 %v14719_v38, %v12829_v37  ;;  %v12909_v38 = vld [vmem:[#allocation3 + $0x2e0] sm:$0xf] }
 0x6aa   :  { %9049 = vmatpush.bf16.msrb.mxu3 %v13706_v5  ;;  %v13150_v5 = vor.u32 %v14799_v45, %v13149_v44  ;;  %v13069_v45 = vld [vmem:[#allocation3 + $0x420] sm:$0xf]  ;;  %v12910_v40 = vor.u32 %v14739_v43, %v12909_v38  ;;  %v14919_v43 = vld [vmem:[#allocation3 + $0x890] sm:$0xf0] }
 0x6ab   :  { %9011 = vmatpush.bf16.msrb.mxu0 %v13206_v60  ;;  %v12970_v60 = vor.u32 %v14754_v52, %v12969_v51  ;;  %v13629_v38 = vld [vmem:[#allocation3 + $0x880] sm:$0xf] }
 0x6ac   :  { %9024 = vmatpush.bf16.msrb.mxu1 %v13366_v62  ;;  %v14669_v62 = vld [vmem:[#allocation3 + $0xc0] sm:$0xf0] }
 0x6ad   :  { %9037 = vmatpush.bf16.msrb.mxu2 %v13526_v3  ;;  %v12789_v3 = vld [vmem:[#allocation3 + $0x1f0] sm:$0xf]  ;;  %v12630_v15 = vor.u32 %v14669_v62, %v12629_v61  ;;  %v14649_v62 = vld [vmem:[#allocation3 + $0x20] sm:$0xf0] }
 0x6ae   :  { %9050 = vmatpush.bf16.msrb.mxu3 %v13686_v46  ;;  %v13109_v46 = vld [vmem:[#allocation3 + $0x470] sm:$0xf]  ;;  %v12790_v2 = vor.u32 %v14709_v16, %v12789_v3  ;;  %v12730_v3 = vor.u32 %v14694_v55, %v12729_v48  ;;  %v14914_v48 = vld [vmem:[#allocation3 + $0x868] sm:$0xf0] }
 0x6af   :  { %9012 = vmatpush.bf16.msrb.mxu0 %v13186_v10  ;;  %v8806_v25 = vpop.f32.mrf.mxu0  ;;  %v13110_v39 = vor.u32 %v14789_v8, %v13109_v46  ;;  %v12549_v61 = vld [vmem:[#allocation3 + $0x10] sm:$0xf] }
 0x6b0   :  { %9025 = vmatpush.bf16.msrb.mxu1 %v13346_v28  ;;  %v8807_v6 = vadd.f32 %v8806_v25, %v8794_v30  ;;  %v8819_v10 = vpop.f32.mrf.mxu1  ;;  %v14744_v28 = vld [vmem:[#allocation3 + $0x318] sm:$0xf0]  ;;  %v12709_v16 = vld [vmem:[#allocation3 + $0x150] sm:$0xf] }
 0x6b1   :  { %9038 = vmatpush.bf16.msrb.mxu2 %v13506_v19  ;;  %v13089_v19 = vld [vmem:[#allocation3 + $0x448] sm:$0xf]  ;;  %v13029_v25 = vld [vmem:[#allocation3 + $0x3d0] sm:$0xf] }
 0x6b2   :  { %9051 = vmatpush.bf16.msrb.mxu3 %v13666_v21  ;;  %9013 = vmatmul.bf16.vlgmr.msrb.gmra.mxu0 %v15476_v53  ;;  %v8820_v20 = vadd.f32 %v8819_v10, %v8807_v6  ;;  %v12610_v21 = vor.u32 %v14664_v26, %v12609_v42  ;;  %v13090_v12 = vor.u32 %v14784_v50, %v13089_v19  ;;  %v13329_v42 = vld [vmem:[#allocation3 + $0x628] sm:$0xf]  ;;  %v14844_v26 = vld [vmem:[#allocation3 + $0x638] sm:$0xf0] }
 0x6b3   :  { %9057 = vmatpush.bf16.msra.mxu0 %v12690_v22  ;;  %9026 = vmatmul.bf16.vlgmr.msrb.gmra.mxu1 %v15487_v13  ;;  %v12770_v22 = vor.u32 %v14704_v17, %v12769_v9  ;;  %v13489_v9 = vld [vmem:[#allocation3 + $0x768] sm:$0xf]  ;;  %v12550_v10 = vor.u32 %v14649_v62, %v12549_v61  ;;  %v14869_v61 = vld [vmem:[#allocation3 + $0x700] sm:$0xf0]  ;;  %v13589_v62 = vld [vmem:[#allocation3 + $0x830] sm:$0xf] }
 0x6b4   :  { %9070 = vmatpush.bf16.msra.mxu1 %v12850_v24  ;;  %9039 = vmatmul.bf16.vlgmr.msrb.gmra.mxu2 %v15490_v49  ;;  %v12930_v24 = vor.u32 %v14744_v28, %v12929_v54  ;;  %v13649_v17 = vld [vmem:[#allocation3 + $0x8a8] sm:$0xf]  ;;  %v14924_v54 = vld [vmem:[#allocation3 + $0x8b8] sm:$0xf0]  ;;  %v12710_v28 = vor.u32 %v14689_v63, %v12709_v16 }
 0x6b5   :  { %9083 = vmatpush.bf16.msra.mxu2 %v13010_v27  ;;  %9052 = vmatmul.bf16.vlgmr.msrb.gmra.mxu3 %v15493_v35  ;;  %v12589_v27 = vld [vmem:[#allocation3 + $0x60] sm:$0xf]  ;;  %v13809_v50 = vld [vmem:[#allocation3 + $0x9e8] sm:$0xf] }
 0x6b6   :  { %9096 = vmatpush.bf16.msra.mxu3 %v13170_v1  ;;  %v14699_v1 = vld [vmem:[#allocation3 + $0x1b0] sm:$0xf0] }
 0x6b7   :  { %9058 = vmatpush.bf16.msra.mxu0 %v12670_v47  ;;  %v8832_v37 = vpop.f32.mrf.mxu2  ;;  %v14779_v47 = vld [vmem:[#allocation3 + $0x430] sm:$0xf0]  ;;  %v8808_v14 = vpop.f32.mrf.mxu0  ;;  %v12750_v57 = vor.u32 %v14699_v1, %v12749_v36 }
 0x6b8   :  { %9071 = vmatpush.bf16.msra.mxu1 %v12830_v7  ;;  %v8833_v41 = vadd.f32 %v8832_v37, %v8820_v20  ;;  %v8845_v44 = vpop.f32.mrf.mxu3  ;;  %v12590_v7 = vor.u32 %v14659_v29, %v12589_v27  ;;  %v8821_v51 = vpop.f32.mrf.mxu1  ;;  %v13070_v52 = vor.u32 %v14779_v47, %v13069_v45  ;;  %v14964_v20 = vld [vmem:[#allocation3 + $0x9f8] sm:$0xf0]  ;;  %v13650_v27 = vor.u32 %v14924_v54, %v13649_v17  ;;  %v13309_v29 = vld [vmem:[#allocation3 + $0x600] sm:$0xf]  ;;  %v14839_v36 = vld [vmem:[#allocation3 + $0x610] sm:$0xf0] }
 0x6b9   :  { %9084 = vmatpush.bf16.msra.mxu2 %v12990_v58  ;;  %v13469_v37 = vld [vmem:[#allocation3 + $0x740] sm:$0xf]  ;;  %v14879_v1 = vld [vmem:[#allocation3 + $0x750] sm:$0xf0]  ;;  %v13310_v45 = vor.u32 %v14839_v36, %v13309_v29  ;;  %v14834_v14 = vld [vmem:[#allocation3 + $0x5e8] sm:$0xf0] }
 0x6ba   :  { %9097 = vmatpush.bf16.msra.mxu3 %v13150_v5  ;;  %v8846_v58 = vadd.f32 %v8845_v44, %v8833_v41  ;;  %v14654_v5 = vld [vmem:[#allocation3 + $0x48] sm:$0xf0]  ;;  %v13789_v41 = vld [vmem:[#allocation3 + $0x9c0] sm:$0xf]  ;;  %v14959_v44 = vld [vmem:[#allocation3 + $0x9d0] sm:$0xf0]  ;;  %v13470_v47 = vor.u32 %v14879_v1, %v13469_v37 }
 0x6bb   :  { %9059 = vmatpush.bf16.msra.mxu0 %v12650_v59  ;;  %v14734_v59 = vld [vmem:[#allocation3 + $0x2c8] sm:$0xf0]  ;;  %v12570_v30 = vor.u32 %v14654_v5, %v12569_v11  ;;  %v13609_v5 = vld [vmem:[#allocation3 + $0x858] sm:$0xf]  ;;  %v13229_v17 = vld [vmem:[#allocation3 + $0x560] sm:$0xf] }
 0x6bc   :  { %9072 = vmatpush.bf16.msra.mxu1 %v12810_v34  ;;  %15012 = vtanh.f32 %v8846_v58  ;;  %v13049_v34 = vld [vmem:[#allocation3 + $0x3f8] sm:$0xf]  ;;  %v14874_v11 = vld [vmem:[#allocation3 + $0x728] sm:$0xf0]  ;;  %v14819_v54 = vld [vmem:[#allocation3 + $0x570] sm:$0xf0] }
 0x6bd   :  { %9085 = vmatpush.bf16.msra.mxu2 %v12970_v60  ;;  %v14774_v60 = vld [vmem:[#allocation3 + $0x408] sm:$0xf0]  ;;  %v13289_v58 = vld [vmem:[#allocation3 + $0x5d8] sm:$0xf]  ;;  %v14939_v29 = vld [vmem:[#allocation3 + $0x930] sm:$0xf0]  ;;  %v13230_v36 = vor.u32 %v14819_v54, %v13229_v17 }
 0x6be   :  { %9098 = vmatpush.bf16.msra.mxu3 %v13130_v33  ;;  %v12890_v33 = vor.u32 %v14734_v59, %v12889_v56  ;;  %v13050_v8 = vor.u32 %v14774_v60, %v13049_v34  ;;  %v13769_v51 = vld [vmem:[#allocation3 + $0x998] sm:$0xf]  ;;  %v13290_v55 = vor.u32 %v14834_v14, %v13289_v58  ;;  %v13610_v59 = vor.u32 %v14914_v48, %v13609_v5  ;;  %v13269_v34 = vld [vmem:[#allocation3 + $0x5b0] sm:$0xf]  ;;  %v14829_v60 = vld [vmem:[#allocation3 + $0x5c0] sm:$0xf0] }
 0x6bf   :  { %9060 = vmatpush.bf16.msra.mxu0 %v12630_v15  ;;  %v8834_v46 = vpop.f32.mrf.mxu2  ;;  %v14729_v15 = vld [vmem:[#allocation3 + $0x2a0] sm:$0xf0]  ;;  %v14894_v58 = vld [vmem:[#allocation3 + $0x7c8] sm:$0xf0]  ;;  %v13689_v14 = vld [vmem:[#allocation3 + $0x8f8] sm:$0xf] }
 0x6c0   :  { %9073 = vmatpush.bf16.msra.mxu1 %v12790_v2  ;;  %v14769_v2 = vld [vmem:[#allocation3 + $0x3e0] sm:$0xf0]  ;;  %v12870_v19 = vor.u32 %v14729_v15, %v12869_v0  ;;  %v13249_v0 = vld [vmem:[#allocation3 + $0x588] sm:$0xf]  ;;  %v14824_v46 = vld [vmem:[#allocation3 + $0x598] sm:$0xf0] }
 0x6c1   :  { %9086 = vmatpush.bf16.msra.mxu2 %v12950_v4  ;;  %v8847_v4 = vpop.f32.mrf.mxu3 }
 0x6c2   :  { %9099 = vmatpush.bf16.msra.mxu3 %v13110_v39  ;;  %v15013_v6 = vpop.eup %15012  ;;  %v14884_v39 = vld [vmem:[#allocation3 + $0x778] sm:$0xf0]  ;;  %v13569_v4 = vld [vmem:[#allocation3 + $0x808] sm:$0xf] }
 0x6c3   :  { %9061 = vmatpush.bf16.msra.mxu0 %v12610_v21  ;;  %9167 = vst [vmem:[#allocation14 + $0x8] sm:$0xff] %v15013_v6  ;;  %v13030_v21 = vor.u32 %v14769_v2, %v13029_v25  ;;  %v14864_v2 = vld [vmem:[#allocation3 + $0x6d8] sm:$0xf0]  ;;  %v13250_v6 = vor.u32 %v14824_v46, %v13249_v0 }
 0x6c4   :  { %9074 = vmatpush.bf16.msra.mxu1 %v12770_v22  ;;  %v13330_v22 = vor.u32 %v14844_v26, %v13329_v42  ;;  %v14904_v42 = vld [vmem:[#allocation3 + $0x818] sm:$0xf0]  ;;  %v13729_v26 = vld [vmem:[#allocation3 + $0x948] sm:$0xf] }
 0x6c5   :  { %9087 = vmatpush.bf16.msra.mxu2 %v12930_v24  ;;  %v13490_v24 = vor.u32 %v14884_v39, %v13489_v9  ;;  %v14944_v9 = vld [vmem:[#allocation3 + $0x958] sm:$0xf0]  ;;  %v13570_v39 = vor.u32 %v14904_v42, %v13569_v4 }
 0x6c6   :  { %9100 = vmatpush.bf16.msra.mxu3 %v13090_v12  ;;  %v13810_v12 = vor.u32 %v14964_v20, %v13809_v50  ;;  %v13730_v50 = vor.u32 %v14944_v9, %v13729_v26  ;;  %v14859_v20 = vld [vmem:[#allocation3 + $0x6b0] sm:$0xf0] }
 0x6c7   :  { %9062 = vmatpush.bf16.msra.mxu0 %v12590_v7  ;;  %v13630_v7 = vor.u32 %v14919_v43, %v13629_v38  ;;  %v13209_v38 = vld [vmem:[#allocation3 + $0x538] sm:$0xf]  ;;  %v14814_v43 = vld [vmem:[#allocation3 + $0x548] sm:$0xf0] }
 0x6c8   :  { %9075 = vmatpush.bf16.msra.mxu1 %v12750_v57  ;;  %v13449_v57 = vld [vmem:[#allocation3 + $0x718] sm:$0xf]  ;;  %v13210_v5 = vor.u32 %v14814_v43, %v13209_v38 }
 0x6c9   :  { %9088 = vmatpush.bf16.msra.mxu2 %v12910_v40  ;;  %v13790_v40 = vor.u32 %v14959_v44, %v13789_v41  ;;  %v13450_v56 = vor.u32 %v14874_v11, %v13449_v57  ;;  %v13369_v41 = vld [vmem:[#allocation3 + $0x678] sm:$0xf]  ;;  %v14934_v57 = vld [vmem:[#allocation3 + $0x908] sm:$0xf0] }
 0x6ca   :  { %9101 = vmatpush.bf16.msra.mxu3 %v13070_v52  ;;  %v14954_v52 = vld [vmem:[#allocation3 + $0x9a8] sm:$0xf0] }
 0x6cb   :  { %9063 = vmatpush.bf16.msra.mxu0 %v12570_v30  ;;  %v13770_v30 = vor.u32 %v14954_v52, %v13769_v51  ;;  %v13189_v52 = vld [vmem:[#allocation3 + $0x510] sm:$0xf] }
 0x6cc   :  { %9076 = vmatpush.bf16.msra.mxu1 %v12730_v3  ;;  %v14909_v3 = vld [vmem:[#allocation3 + $0x840] sm:$0xf0] }
 0x6cd   :  { %9089 = vmatpush.bf16.msra.mxu2 %v12890_v33  ;;  %v13749_v33 = vld [vmem:[#allocation3 + $0x970] sm:$0xf]  ;;  %v13590_v63 = vor.u32 %v14909_v3, %v13589_v62  ;;  %v14929_v3 = vld [vmem:[#allocation3 + $0x8e0] sm:$0xf0] }
 0x6ce   :  { %9102 = vmatpush.bf16.msra.mxu3 %v13050_v8  ;;  %v13409_v8 = vld [vmem:[#allocation3 + $0x6c8] sm:$0xf]  ;;  %v13669_v62 = vld [vmem:[#allocation3 + $0x8d0] sm:$0xf] }
 0x6cf   :  { %9064 = vmatpush.bf16.msra.mxu0 %v12550_v10  ;;  %v15559_v16 = vpop.f32.mrf.mxu0  ;;  %v13410_v10 = vor.u32 %v14864_v2, %v13409_v8 }
 0x6d0   :  { %9077 = vmatpush.bf16.msra.mxu1 %v12710_v28  ;;  %v15561_v15 = vpop.f32.mrf.mxu1  ;;  %v13389_v28 = vld [vmem:[#allocation3 + $0x6a0] sm:$0xf] }
 0x6d1   :  { %9090 = vmatpush.bf16.msra.mxu2 %v12870_v19 }
 0x6d2   :  { %9103 = vmatpush.bf16.msra.mxu3 %v13030_v21  ;;  %9065 = vmatmul.bf16.vlgmr.msra.gmra.mxu0 %v15416_v31  ;;  %v14949_v31 = vld [vmem:[#allocation3 + $0x980] sm:$0xf0]  ;;  %v13549_v21 = vld [vmem:[#allocation3 + $0x7e0] sm:$0xf] }
 0x6d3   :  { %9109 = vmatpush.bf16.msrb.mxu0 %v13330_v22  ;;  %9078 = vmatmul.bf16.vlgmr.msra.gmra.mxu1 %v15430_v23  ;;  %v13750_v25 = vor.u32 %v14949_v31, %v13749_v33  ;;  %v14899_v22 = vld [vmem:[#allocation3 + $0x7f0] sm:$0xf0] }
 0x6d4   :  { %9122 = vmatpush.bf16.msrb.mxu1 %v13490_v24  ;;  %9091 = vmatmul.bf16.vlgmr.msra.gmra.mxu2 %v15446_v18  ;;  %v13429_v18 = vld [vmem:[#allocation3 + $0x6f0] sm:$0xf]  ;;  %v13550_v1 = vor.u32 %v14899_v22, %v13549_v21 }
 0x6d5   :  { %9135 = vmatpush.bf16.msrb.mxu2 %v13650_v27  ;;  %9104 = vmatmul.bf16.vlgmr.msra.gmra.mxu3 %v15460_v32  ;;  %v13270_v32 = vor.u32 %v14829_v60, %v13269_v34  ;;  %v13430_v23 = vor.u32 %v14869_v61, %v13429_v18  ;;  %v13709_v27 = vld [vmem:[#allocation3 + $0x920] sm:$0xf]  ;;  %v13690_v34 = vor.u32 %v14934_v57, %v13689_v14  ;;  %v14849_v60 = vld [vmem:[#allocation3 + $0x660] sm:$0xf0]  ;;  %v13509_v18 = vld [vmem:[#allocation3 + $0x790] sm:$0xf] }
 0x6d6   :  { %9148 = vmatpush.bf16.msrb.mxu3 %v13810_v12  ;;  %v13390_v12 = vor.u32 %v14859_v20, %v13389_v28 }
 0x6d7   :  { %9110 = vmatpush.bf16.msrb.mxu0 %v13310_v45  ;;  %v8884_v19 = vpop.f32.mrf.mxu2  ;;  %v8860_v37 = vpop.f32.mrf.mxu0  ;;  %v13710_v45 = vor.u32 %v14939_v29, %v13709_v27 }
 0x6d8   :  { %9123 = vmatpush.bf16.msrb.mxu1 %v13470_v47  ;;  %v8897_v24 = vpop.f32.mrf.mxu3  ;;  %v8873_v44 = vpop.f32.mrf.mxu1  ;;  %v14854_v47 = vld [vmem:[#allocation3 + $0x688] sm:$0xf0] }
 0x6d9   :  { %9136 = vmatpush.bf16.msrb.mxu2 %v13630_v7  ;;  %v13529_v7 = vld [vmem:[#allocation3 + $0x7b8] sm:$0xf]  ;;  %v13370_v48 = vor.u32 %v14854_v47, %v13369_v41 }
 0x6da   :  { %9149 = vmatpush.bf16.msrb.mxu3 %v13790_v40  ;;  %v15563_v40 = vld [vmem:[#allocation13] sm:$0x1f]  ;;  %v13530_v51 = vor.u32 %v14894_v58, %v13529_v7 }
 0x6db   :  { %9111 = vmatpush.bf16.msrb.mxu0 %v13290_v55  ;;  %v6969_v11 = vperm.slane %v15563_v40, 2  ;;  %v14809_v55 = vld [vmem:[#allocation3 + $0x520] sm:$0xf0] }
 0x6dc   :  { %9124 = vmatpush.bf16.msrb.mxu1 %v13450_v56  ;;  %v13349_v56 = vld [vmem:[#allocation3 + $0x650] sm:$0xf]  ;;  %v13190_v31 = vor.u32 %v14809_v55, %v13189_v52  ;;  %v6971_v55 = vperm.slane %v15563_v40, 4 }
 0x6dd   :  { %9137 = vmatpush.bf16.msrb.mxu2 %v13610_v59  ;;  %v8859_v33 = vadd.f32 %v15559_v16, %v6969_v11 }
 0x6de   :  { %9150 = vmatpush.bf16.msrb.mxu3 %v13770_v30  ;;  %v14889_v30 = vld [vmem:[#allocation3 + $0x7a0] sm:$0xf0] }
 0x6df   :  { %9112 = vmatpush.bf16.msrb.mxu0 %v13270_v32  ;;  %v8886_v59 = vpop.f32.mrf.mxu2  ;;  %v13350_v32 = vor.u32 %v14849_v60, %v13349_v56  ;;  %v8872_v0 = vadd.f32 %v15561_v15, %v8859_v33 }
 0x6e0   :  { %9125 = vmatpush.bf16.msrb.mxu1 %v13430_v23  ;;  %v8899_v61 = vpop.f32.mrf.mxu3  ;;  %v13510_v23 = vor.u32 %v14889_v30, %v13509_v18 }
 0x6e1   :  { %9138 = vmatpush.bf16.msrb.mxu2 %v13590_v63  ;;  %v13670_v63 = vor.u32 %v14929_v3, %v13669_v62  ;;  %v8885_v46 = vadd.f32 %v8884_v19, %v8872_v0 }
 0x6e2   :  { %9151 = vmatpush.bf16.msrb.mxu3 %v13750_v25 }
 0x6e3   :  { %9113 = vmatpush.bf16.msrb.mxu0 %v13250_v6  ;;  %v8898_v16 = vadd.f32 %v8897_v24, %v8885_v46 }
 0x6e4   :  { %9126 = vmatpush.bf16.msrb.mxu1 %v13410_v10 }
 0x6e5   :  { %9139 = vmatpush.bf16.msrb.mxu2 %v13570_v39 }
 0x6e6   :  { %9152 = vmatpush.bf16.msrb.mxu3 %v13730_v50  ;;  %v6970_v50 = vperm.slane %v15563_v40, 3 }
 0x6e7   :  { %9114 = vmatpush.bf16.msrb.mxu0 %v13230_v36 }
 0x6e8   :  { %9127 = vmatpush.bf16.msrb.mxu1 %v13390_v12 }
 0x6e9   :  { %9140 = vmatpush.bf16.msrb.mxu2 %v13550_v1 }
 0x6ea   :  { %9153 = vmatpush.bf16.msrb.mxu3 %v13710_v45 }
 0x6eb   :  { %9115 = vmatpush.bf16.msrb.mxu0 %v13210_v5 }
 0x6ec   :  { %9128 = vmatpush.bf16.msrb.mxu1 %v13370_v48 }
 0x6ed   :  { %9141 = vmatpush.bf16.msrb.mxu2 %v13530_v51 }
 0x6ee   :  { %9154 = vmatpush.bf16.msrb.mxu3 %v13690_v34 }
 0x6ef   :  { %9116 = vmatpush.bf16.msrb.mxu0 %v13190_v31  ;;  %v8910_v8 = vpop.f32.mrf.mxu0 }
 0x6f0   :  { %9129 = vmatpush.bf16.msrb.mxu1 %v13350_v32  ;;  %v8911_v25 = vadd.f32 %v8910_v8, %v8898_v16  ;;  %v8923_v2 = vpop.f32.mrf.mxu1 }
 0x6f1   :  { %9142 = vmatpush.bf16.msrb.mxu2 %v13510_v23 }
 0x6f2   :  { %9155 = vmatpush.bf16.msrb.mxu3 %v13670_v63  ;;  %9117 = vmatmul.bf16.vlgmr.msrb.gmra.mxu0 %v15476_v53  ;;  %v8924_v4 = vadd.f32 %v8923_v2, %v8911_v25 }
 0x6f3   :  { %9130 = vmatmul.bf16.vlgmr.msrb.gmra.mxu1 %v15487_v13 }
 0x6f4   :  { %9143 = vmatmul.bf16.vlgmr.msrb.gmra.mxu2 %v15490_v49 }
 0x6f5   :  { %9156 = vmatmul.bf16.vlgmr.msrb.gmra.mxu3 %v15493_v35 }
 0x6f7   :  { %v8936_v42 = vpop.f32.mrf.mxu2  ;;  %v8912_v6 = vpop.f32.mrf.mxu0 }
 0x6f8   :  { %v8937_v15 = vadd.f32 %v8936_v42, %v8924_v4  ;;  %v8949_v26 = vpop.f32.mrf.mxu3  ;;  %v8925_v10 = vpop.f32.mrf.mxu1 }
 0x6fa   :  { %v8950_v9 = vadd.f32 %v8949_v26, %v8937_v15 }
 0x6fc   :  { %15014 = vtanh.f32 %v8950_v9 }
 0x6ff   :  { %v8938_v53 = vpop.f32.mrf.mxu2 }
 0x700   :  { %v8951_v39 = vpop.f32.mrf.mxu3 }
 0x702   :  { %v15015_v17 = vpop.eup %15014 }
 0x703   :  { %9168 = vst [vmem:[#allocation14 + $0x10] sm:$0xff] %v15015_v17 }
 0x70f   :  { %v8962_v13 = vpop.f32.mrf.mxu0 }
 0x710   :  { %v8975_v49 = vpop.f32.mrf.mxu1  ;;  %v8963_v22 = vadd.f32 %v8962_v13, %v6970_v50 }
 0x712   :  { %v8976_v24 = vadd.f32 %v8975_v49, %v8963_v22 }
 0x717   :  { %v8988_v54 = vpop.f32.mrf.mxu2  ;;  %v8964_v28 = vpop.f32.mrf.mxu0 }
 0x718   :  { %v9001_v35 = vpop.f32.mrf.mxu3  ;;  %v8977_v19 = vpop.f32.mrf.mxu1  ;;  %v8989_v27 = vadd.f32 %v8988_v54, %v8976_v24 }
 0x71a   :  { %v9002_v29 = vadd.f32 %v9001_v35, %v8989_v27 }
 0x71f   :  { %v8990_v20 = vpop.f32.mrf.mxu2 }
 0x720   :  { %v9003_v21 = vpop.f32.mrf.mxu3 }
 0x72f   :  { %v9014_v36 = vpop.f32.mrf.mxu0 }
 0x730   :  { %v9015_v37 = vadd.f32 %v9014_v36, %v9002_v29  ;;  %v9027_v12 = vpop.f32.mrf.mxu1 }
 0x732   :  { %v9028_v1 = vadd.f32 %v9027_v12, %v9015_v37 }
 0x737   :  { %v9040_v38 = vpop.f32.mrf.mxu2  ;;  %v9016_v45 = vpop.f32.mrf.mxu0 }
 0x738   :  { %v9041_v43 = vadd.f32 %v9040_v38, %v9028_v1  ;;  %v9053_v41 = vpop.f32.mrf.mxu3  ;;  %v9029_v47 = vpop.f32.mrf.mxu1 }
 0x73a   :  { %v9054_v44 = vadd.f32 %v9053_v41, %v9041_v43 }
 0x73c   :  { %15016 = vtanh.f32 %v9054_v44 }
 0x73f   :  { %v9042_v7 = vpop.f32.mrf.mxu2 }
 0x740   :  { %v9055_v58 = vpop.f32.mrf.mxu3 }
 0x742   :  { %v15017_v14 = vpop.eup %15016 }
 0x743   :  { %9169 = vst [vmem:[#allocation14 + $0x18] sm:$0xff] %v15017_v14 }
 0x74f   :  { %v9066_v57 = vpop.f32.mrf.mxu0 }
 0x750   :  { %v9079_v11 = vpop.f32.mrf.mxu1  ;;  %v9067_v34 = vadd.f32 %v9066_v57, %v6971_v55 }
 0x752   :  { %v9080_v60 = vadd.f32 %v9079_v11, %v9067_v34 }
 0x757   :  { %v9092_v5 = vpop.f32.mrf.mxu2  ;;  %v9068_v51 = vpop.f32.mrf.mxu0 }
 0x758   :  { %v9105_v48 = vpop.f32.mrf.mxu3  ;;  %v9081_v52 = vpop.f32.mrf.mxu1  ;;  %v9093_v18 = vadd.f32 %v9092_v5, %v9080_v60 }
 0x75a   :  { %v9106_v30 = vadd.f32 %v9105_v48, %v9093_v18 }
 0x75f   :  { %v9094_v56 = vpop.f32.mrf.mxu2 }
 0x760   :  { %v9107_v59 = vpop.f32.mrf.mxu3 }
 0x76f   :  { %v9118_v61 = vpop.f32.mrf.mxu0 }
 0x770   :  { %v9131_v62 = vpop.f32.mrf.mxu1  ;;  %v9119_v3 = vadd.f32 %v9118_v61, %v9106_v30 }
 0x772   :  { %v9132_v33 = vadd.f32 %v9131_v62, %v9119_v3 }
 0x777   :  { %v9144_v31 = vpop.f32.mrf.mxu2  ;;  %v9120_v63 = vpop.f32.mrf.mxu0 }
 0x778   :  { %v9145_v32 = vadd.f32 %v9144_v31, %v9132_v33  ;;  %v9157_v23 = vpop.f32.mrf.mxu3  ;;  %v9133_v0 = vpop.f32.mrf.mxu1 }
 0x77a   :  { %v9158_v46 = vadd.f32 %v9157_v23, %v9145_v32 }
 0x77c   :  { %15018 = vtanh.f32 %v9158_v46 }
 0x77f   :  { %v9146_v40 = vpop.f32.mrf.mxu2 }
 0x780   :  { %v9159_v16 = vpop.f32.mrf.mxu3 }
 0x782   :  { %v15019_v8 = vpop.eup %15018 }
 0x783   :  { %9170 = vst [vmem:[#allocation14 + $0x20] sm:$0xff] %v15019_v8 }
 0x784   :  { %9181 = dma.vmem_to_hbm [thread:$0]  %s9177_s5, 640, %s9179_s12, [#allocation7]  }
 0x785   :  { %15223 = dma.done.wait [#allocation7], 640  }
 0x786   :  { %15224 = vsyncadd [#allocation7], 4294966656 }
 0x787   :  { %9186 = vsyncpa [#allocation6], 1 }
 0x788   :  { %9187 = vsyncpa [#allocation9], 1 }
 0x789   :  { %9188 = vsyncpa [#allocation12], 1 }
 0x78a   :  { %9189 = vsyncpa [#allocation7], 1 }
 0x78b   :  { %9190 = vsyncmov [#allocation4] }
 0x78e   :  { %s9191_s13 = vpop.sfrf %9190 }
 0x78f   :  { %p13811_p0 = scmp.ne.s32.totalorder %s9191_s13, 0 }
 0x791   :  { %9195 = shalt.err (%p13811_p0)  }
 0x792   :  { %9197 = vsyncmov [#allocation4 + $0x1] }
 0x795   :  { %s9198_s14 = vpop.sfrf %9197 }
 0x796   :  { %p13812_p1 = scmp.ne.s32.totalorder %s9198_s14, 0 }
 0x798   :  { %9202 = shalt.err (%p13812_p1)  }

</bundles_post_ra>
